<compile_context>
chip_gen: v7x
topology: tpu7x:2x2x1
jax: 0.10.0
libtpu: 0.0.40
codegen_flags: <defaults>
</compile_context>

<pallas_src>
import functools

import jax
import jax.numpy as jnp
from jax.experimental import pallas as pl
from jax.experimental.pallas import tpu as pltpu


_VMEM_LIMIT = 32 * 1024 * 1024  # safe on v5e/v6e/v7x; per-step working set is ~2 MiB.


def _compiler_params():
    return pltpu.CompilerParams(dimension_semantics=("parallel",),
                                vmem_limit_bytes=_VMEM_LIMIT)


def _full_spec(shape):
    nd = len(shape)
    return pl.BlockSpec(shape, lambda *_: (0,) * nd)


# ----------------------------------------------------------------------------
# In-kernel helpers
# ----------------------------------------------------------------------------
def _write_stats(stats_ref, v):
    # v: (rows, C) f32 pre-activations of this grid step -> per-step [sum, sumsq].
    s = jnp.sum(v, axis=0, keepdims=True)
    ss = jnp.sum(v * v, axis=0, keepdims=True)
    stats_ref[0] = jnp.concatenate([s, ss], axis=0)


def _zero_halo(pad_ref, H, W):
    # Zero only the 1-pixel halo frame; the interior is fully overwritten before use.
    cin = pad_ref.shape[-1]
    zrow = jnp.zeros((1, W + 2, cin), pad_ref.dtype)
    zcol = jnp.zeros((H + 2, 1, cin), pad_ref.dtype)
    pad_ref[0:1, :, :] = zrow
    pad_ref[H + 1:H + 2, :, :] = zrow
    pad_ref[:, 0:1, :] = zcol
    pad_ref[:, W + 1:W + 2, :] = zcol


def _conv3x3(pad_ref, act, w_ref, H, W):
    # act: (H*W, Cin) f32 activations of one image.  Write the bf16 interior of the
    # halo-padded scratch, then accumulate nine K=Cin MXU matmuls (tap order matches the
    # weight row order kh*3+kw), accumulating in f32.  No im2col materialization.
    HW = H * W
    cin = pad_ref.shape[-1]
    pad_ref[1:H + 1, 1:W + 1, :] = act.astype(pad_ref.dtype).reshape(H, W, cin)
    acc = None
    for kh in range(3):
        for kw in range(3):
            tap = pad_ref[kh:kh + H, kw:kw + W, :].reshape(HW, cin)
            part = jnp.dot(tap, w_ref[kh * 3 + kw], preferred_element_type=jnp.float32)
            acc = part if acc is None else acc + part
    return acc


# ----------------------------------------------------------------------------
# Stage kernels
# ----------------------------------------------------------------------------
def _head_kernel(x_ref, w_ref, hpre_ref, stats_ref):
    # Fused branch-head 1x1 convs: (HW, 320) @ (320, 128) -> lane-dense (HW, 128)
    # pre-activations: lanes 0:32 branch0, 32:64 branch1-in, 64:96 branch2-in, 96:128 pad.
    h = jnp.dot(x_ref[0].astype(jnp.bfloat16), w_ref[...],
                preferred_element_type=jnp.float32)
    hpre_ref[0] = h
    _write_stats(stats_ref, h)


def _branch_convs_kernel(hpre_ref, hs_ref, hb_ref, w1_ref, w2_ref,
                         t1_ref, t2_ref, st1_ref, st2_ref, pad_ref, *, H, W):
    # Folded BN + ReLU of the head output, then the two 32-channel-input 3x3 convs of
    # branch1 (32->32) and branch2a (32->48), sharing one bf16 halo-padded scratch.
    h = jnp.maximum(hpre_ref[0] * hs_ref[...] + hb_ref[...], 0.0)
    _zero_halo(pad_ref, H, W)
    t1 = _conv3x3(pad_ref, h[:, 32:64], w1_ref, H, W)        # (HW, 32)
    t1_ref[0] = t1
    _write_stats(st1_ref, t1)
    t2 = _conv3x3(pad_ref, h[:, 64:96], w2_ref, H, W)        # (HW, 48)
    t2_ref[0] = t2
    _write_stats(st2_ref, t2)


def _branch2b_kernel(t2a_ref, s_ref, b_ref, w_ref, out_ref, st_ref, pad_ref, *, H, W):
    # Folded BN + ReLU of branch2a, then the 48->64 3x3 conv.
    a = jnp.maximum(t2a_ref[0] * s_ref[...] + b_ref[...], 0.0)
    _zero_halo(pad_ref, H, W)
    t = _conv3x3(pad_ref, a, w_ref, H, W)                    # (HW, 64)
    out_ref[0] = t
    _write_stats(st_ref, t)


def _proj_kernel(x_ref, hpre_ref, t1_ref, t2_ref,
                 hs_ref, hb_ref, s1_ref, b1_ref, s2_ref, b2_ref,
                 wf0_ref, wf1_ref, wf2_ref, bfin_ref, o_ref, *, res_scale):
    # concat(32+32+64) + final 1x1 conv done as three accumulating matmuls
    # (wf0 has zero rows outside lanes 0:32), then bias + residual + ReLU.
    h_act = jnp.maximum(hpre_ref[0] * hs_ref[...] + hb_ref[...], 0.0).astype(jnp.bfloat16)
    x1 = jnp.maximum(t1_ref[0] * s1_ref[...] + b1_ref[...], 0.0).astype(jnp.bfloat16)
    x2 = jnp.maximum(t2_ref[0] * s2_ref[...] + b2_ref[...], 0.0).astype(jnp.bfloat16)
    proj = jnp.dot(h_act, wf0_ref[...], preferred_element_type=jnp.float32)
    proj = proj + jnp.dot(x1, wf1_ref[...], preferred_element_type=jnp.float32)
    proj = proj + jnp.dot(x2, wf2_ref[...], preferred_element_type=jnp.float32)
    proj = proj + bfin_ref[...]
    o_ref[0] = jnp.maximum(x_ref[0] + res_scale * proj, 0.0).astype(o_ref.dtype)


# ----------------------------------------------------------------------------
# Wrapper
# ----------------------------------------------------------------------------
def _fold_bn(partial_stats, gamma, beta, m, eps):
    # partial_stats: (T, 2, C) per-grid-step [sum, sumsq]; fold batch stats + affine
    # into a per-channel (scale, shift) pair: bn(x) = x*scale + shift.
    s = jnp.sum(partial_stats[:, 0, :], axis=0)
    ss = jnp.sum(partial_stats[:, 1, :], axis=0)
    mean = s / m
    var = jnp.maximum(ss / m - mean * mean, 0.0)
    scale = gamma * jax.lax.rsqrt(var + eps)
    shift = beta - mean * scale
    return scale.reshape(1, -1).astype(jnp.float32), shift.reshape(1, -1).astype(jnp.float32)


def inception_resnet_a(x_nhwc, params, *, scale=1.0, eps=1e-5):
    """Inception-ResNet-A forward.  x_nhwc: (N, H, W, 320) -> (N, H, W, 320)."""
    N, H, W, C = x_nhwc.shape
    assert C == 320, "residual add requires 320 input channels (as in the PyTorch module)"
    HW = H * W
    M = N * HW
    f32 = jnp.float32
    x_img = x_nhwc.reshape(N, HW, C).astype(f32)   # per-image flattened rows (free reshape)
    cp = _compiler_params()

    # ---- stage 1: fused branch-head 1x1 convs + per-image BN partial stats ------------
    h_pre, stats_h = pl.pallas_call(
        _head_kernel,
        grid=(N,),
        in_specs=[pl.BlockSpec((1, HW, C), lambda n: (n, 0, 0)),
                  _full_spec((C, 128))],
        out_specs=(pl.BlockSpec((1, HW, 128), lambda n: (n, 0, 0)),
                   pl.BlockSpec((1, 2, 128), lambda n: (n, 0, 0))),
        out_shape=(jax.ShapeDtypeStruct((N, HW, 128), f32),
                   jax.ShapeDtypeStruct((N, 2, 128), f32)),
        compiler_params=cp,
        cost_estimate=pl.CostEstimate(
            flops=2 * M * C * 128, transcendentals=0,
            bytes_accessed=M * C * 4 + C * 128 * 2 + M * 128 * 4),
    )(x_img, params["w_head"])
    hs, hb = _fold_bn(stats_h, params["g_head"], params["b_head"], M, eps)

    # ---- stage 2: branch1 / branch2a 3x3 convs (32->32, 32->48) -----------------------
    t1_pre, t2a_pre, st1, st2a = pl.pallas_call(
        functools.partial(_branch_convs_kernel, H=H, W=W),
        grid=(N,),
        in_specs=[pl.BlockSpec((1, HW, 128), lambda n: (n, 0, 0)),
                  _full_spec((1, 128)), _full_spec((1, 128)),
                  _full_spec((9, 32, 32)), _full_spec((9, 32, 48))],
        out_specs=(pl.BlockSpec((1, HW, 32), lambda n: (n, 0, 0)),
                   pl.BlockSpec((1, HW, 48), lambda n: (n, 0, 0)),
                   pl.BlockSpec((1, 2, 32), lambda n: (n, 0, 0)),
                   pl.BlockSpec((1, 2, 48), lambda n: (n, 0, 0))),
        out_shape=(jax.ShapeDtypeStruct((N, HW, 32), f32),
                   jax.ShapeDtypeStruct((N, HW, 48), f32),
                   jax.ShapeDtypeStruct((N, 2, 32), f32),
                   jax.ShapeDtypeStruct((N, 2, 48), f32)),
        scratch_shapes=[pltpu.VMEM((H + 2, W + 2, 32), jnp.bfloat16)],
        compiler_params=cp,
        cost_estimate=pl.CostEstimate(
            flops=2 * M * 9 * 32 * (32 + 48), transcendentals=0,
            bytes_accessed=M * 128 * 4 + M * (32 + 48) * 4),
    )(h_pre, hs, hb, params["w_b1"], params["w_b2a"])
    s1, b1 = _fold_bn(st1, params["g_b1"], params["b_b1"], M, eps)
    s2a, b2a = _fold_bn(st2a, params["g_b2a"], params["b_b2a"], M, eps)

    # ---- stage 3: branch2b 3x3 conv (48->64) ------------------------------------------
    t2b_pre, st2b = pl.pallas_call(
        functools.partial(_branch2b_kernel, H=H, W=W),
        grid=(N,),
        in_specs=[pl.BlockSpec((1, HW, 48), lambda n: (n, 0, 0)),
                  _full_spec((1, 48)), _full_spec((1, 48)),
                  _full_spec((9, 48, 64))],
        out_specs=(pl.BlockSpec((1, HW, 64), lambda n: (n, 0, 0)),
                   pl.BlockSpec((1, 2, 64), lambda n: (n, 0, 0))),
        out_shape=(jax.ShapeDtypeStruct((N, HW, 64), f32),
                   jax.ShapeDtypeStruct((N, 2, 64), f32)),
        scratch_shapes=[pltpu.VMEM((H + 2, W + 2, 48), jnp.bfloat16)],
        compiler_params=cp,
        cost_estimate=pl.CostEstimate(
            flops=2 * M * 9 * 48 * 64, transcendentals=0,
            bytes_accessed=M * 48 * 4 + M * 64 * 4),
    )(t2a_pre, s2a, b2a, params["w_b2b"])
    s2b, b2b = _fold_bn(st2b, params["g_b2b"], params["b_b2b"], M, eps)

    # ---- stage 4: BN+ReLU of branch outputs, final 1x1 conv, residual, ReLU -----------
    out_img = pl.pallas_call(
        functools.partial(_proj_kernel, res_scale=float(scale)),
        grid=(N,),
        in_specs=[pl.BlockSpec((1, HW, C), lambda n: (n, 0, 0)),
                  pl.BlockSpec((1, HW, 128), lambda n: (n, 0, 0)),
                  pl.BlockSpec((1, HW, 32), lambda n: (n, 0, 0)),
                  pl.BlockSpec((1, HW, 64), lambda n: (n, 0, 0)),
                  _full_spec((1, 128)), _full_spec((1, 128)),
                  _full_spec((1, 32)), _full_spec((1, 32)),
                  _full_spec((1, 64)), _full_spec((1, 64)),
                  _full_spec((128, C)), _full_spec((32, C)), _full_spec((64, C)),
                  _full_spec((1, C))],
        out_specs=pl.BlockSpec((1, HW, C), lambda n: (n, 0, 0)),
        out_shape=jax.ShapeDtypeStruct((N, HW, C), x_nhwc.dtype),
        compiler_params=cp,
        cost_estimate=pl.CostEstimate(
            flops=2 * M * (128 + 32 + 64) * C, transcendentals=0,
            bytes_accessed=M * (2 * C + 128 + 32 + 64) * 4),
    )(x_img, h_pre, t1_pre, t2b_pre, hs, hb, s1, b1, s2b, b2b,
      params["w_fin0"], params["w_fin1"], params["w_fin2"], params["b_fin"])

    return out_img.reshape(N, H, W, C)


def inception_resnet_a_nchw(x_nchw, params, *, scale=1.0):
    # Drop-in adapter matching the PyTorch module's NCHW interface.
    x = jnp.transpose(x_nchw, (0, 2, 3, 1))
    y = inception_resnet_a(x, params, scale=scale)
    return jnp.transpose(y, (0, 3, 1, 2))


# ----------------------------------------------------------------------------
# Parameter construction (deterministic, synthetic) + packing for the kernels
# ----------------------------------------------------------------------------
def init_params(key, in_size, mxu_dtype=jnp.bfloat16):
    assert in_size == 320, "residual add requires in_size == 320 (as in the PyTorch module)"
    ks = jax.random.split(key, 8)

    def conv_bn(k, kh, kw, cin, cout):
        kw_, kg_, kb_ = jax.random.split(k, 3)
        w = jax.random.normal(kw_, (kh, kw, cin, cout), jnp.float32) / jnp.sqrt(kh * kw * cin)
        g = 1.0 + 0.1 * jax.random.normal(kg_, (cout,), jnp.float32)
        b = 0.1 * jax.random.normal(kb_, (cout,), jnp.float32)
        return w, g, b

    b0 = conv_bn(ks[0], 1, 1, in_size, 32)
    b1_0 = conv_bn(ks[1], 1, 1, in_size, 32)
    b1_1 = conv_bn(ks[2], 3, 3, 32, 32)
    b2_0 = conv_bn(ks[3], 1, 1, in_size, 32)
    b2_1 = conv_bn(ks[4], 3, 3, 32, 48)
    b2_2 = conv_bn(ks[5], 3, 3, 48, 64)
    w_fin = jax.random.normal(ks[6], (128, 320), jnp.float32) / jnp.sqrt(128.0)
    b_fin = 0.1 * jax.random.normal(ks[7], (320,), jnp.float32)

    ref_params = {
        "b0": [(b0, 0)],
        "b1": [(b1_0, 0), (b1_1, 1)],
        "b2": [(b2_0, 0), (b2_1, 1), (b2_2, 1)],
        "final_w": w_fin, "final_b": b_fin,
    }

    def c1x1(w):   # (1,1,cin,cout) -> (cin, cout)
        return w.reshape(w.shape[2], w.shape[3])

    def taps(w):   # (3,3,cin,cout) -> (9, cin, cout); row order == kernel tap order kh*3+kw
        return w.reshape(9, w.shape[2], w.shape[3])

    # Fused, lane-dense (320 -> 128) branch heads: [b0 | b1_in | b2_in | zero pad].
    w_head = jnp.concatenate(
        [c1x1(b0[0]), c1x1(b1_0[0]), c1x1(b2_0[0]),
         jnp.zeros((in_size, 32), jnp.float32)], axis=1)
    g_head = jnp.concatenate([b0[1], b1_0[1], b2_0[1], jnp.ones((32,), jnp.float32)])
    b_head = jnp.concatenate([b0[2], b1_0[2], b2_0[2], jnp.zeros((32,), jnp.float32)])

    # Final 1x1 conv split by concat source; the branch-0 part is zero-padded to K=128 so
    # the projection kernel can feed the whole lane-dense head activation (no lane slice).
    w_fin0 = jnp.zeros((128, 320), jnp.float32).at[0:32, :].set(w_fin[0:32])
    w_fin1 = w_fin[32:64]
    w_fin2 = w_fin[64:128]

    kernel_params = {
        "w_head": w_head.astype(mxu_dtype),                  # (320, 128)
        "g_head": g_head, "b_head": b_head,                  # (128,)
        "w_b1": taps(b1_1[0]).astype(mxu_dtype),             # (9, 32, 32)
        "g_b1": b1_1[1], "b_b1": b1_1[2],
        "w_b2a": taps(b2_1[0]).astype(mxu_dtype),            # (9, 32, 48)
        "g_b2a": b2_1[1], "b_b2a": b2_1[2],
        "w_b2b": taps(b2_2[0]).astype(mxu_dtype),            # (9, 48, 64)
        "g_b2b": b2_2[1], "b_b2b": b2_2[2],
        "w_fin0": w_fin0.astype(mxu_dtype),                  # (128, 320)
        "w_fin1": w_fin1.astype(mxu_dtype),                  # (32, 320)
        "w_fin2": w_fin2.astype(mxu_dtype),                  # (64, 320)
        "b_fin": b_fin.reshape(1, 320),
    }
    return kernel_params, ref_params


# ----------------------------------------------------------------------------
# Pure-JAX f32 reference (unfused, same math) for a sanity check
# ----------------------------------------------------------------------------
def _ref_conv_bn_relu(x, w, gamma, beta, padding, eps=1e-5):
    N, H, W, _ = x.shape
    KH, KW, _, Cout = w.shape
    xp = jnp.pad(x, ((0, 0), (padding, padding), (padding, padding), (0, 0)))
    acc = jnp.zeros((N, H, W, Cout), jnp.float32)
    for kh in range(KH):
        for kw in range(KW):
            acc = acc + jnp.einsum("nhwc,co->nhwo", xp[:, kh:kh + H, kw:kw + W, :], w[kh, kw])
    mean = jnp.mean(acc, axis=(0, 1, 2), keepdims=True)
    var = jnp.mean((acc - mean) ** 2, axis=(0, 1, 2), keepdims=True)
    y = (acc - mean) * jax.lax.rsqrt(var + eps) * gamma + beta
    return jnp.maximum(y, 0.0)


def _ref_forward(x, ref_params, scale=1.0):
    def run(h, layers):
        for (w, g, b), pad in layers:
            h = _ref_conv_bn_relu(h, w, g, b, pad)
        return h
    x0 = run(x, ref_params["b0"])
    x1 = run(x, ref_params["b1"])
    x2 = run(x, ref_params["b2"])
    cat = jnp.concatenate([x0, x1, x2], axis=-1)
    proj = jnp.einsum("nhwc,co->nhwo", cat, ref_params["final_w"]) + ref_params["final_b"]
    return jnp.maximum(x + scale * proj, 0.0)


if __name__ == "__main__":
    # NHWC (2, 8, 8, 320) corresponds to the module's NCHW (2, 320, 8, 8); in_size must
    # be 320 so the residual add is shape-valid, exactly as in the PyTorch module.
    N, H, W, C = 2, 8, 8, 320
    key = jax.random.PRNGKey(0)
    kx, kp = jax.random.split(key)
    x = jax.random.normal(kx, (N, H, W, C), jnp.float32)
    kernel_params, ref_params = init_params(kp, C)

    fwd = jax.jit(lambda xx, pp: inception_resnet_a(xx, pp, scale=1.0))
    out = jax.block_until_ready(fwd(x, kernel_params))
    ref = jax.block_until_ready(_ref_forward(x, ref_params, scale=1.0))

    assert out.shape == (N, H, W, C), out.shape
    assert bool(jnp.all(jnp.isfinite(out)))
    max_err = float(jnp.max(jnp.abs(out - ref)))
    assert bool(jnp.allclose(out, ref, atol=5e-2, rtol=5e-2)), f"mismatch vs reference: {max_err}"

    print("KERNEL_OK")
</pallas_src>

<mosaic_0001>
module attributes {stable_mosaic.version = 11 : i64} {
  func.func @_head_kernel(%arg0: i32, %arg1: memref<1x64x320xf32, #tpu.memory_space<vmem>>, %arg2: memref<320x128xbf16, #tpu.memory_space<vmem>>, %arg3: memref<1x64x128xf32, #tpu.memory_space<vmem>>, %arg4: memref<1x2x128xf32, #tpu.memory_space<vmem>>) attributes {dimension_semantics = [#tpu.dimension_semantics<parallel>], iteration_bounds = array<i64: 2>, scalar_prefetch = 0 : i64, scratch_operands = 0 : i64, tpu.core_type = #tpu.core_type<tc>, window_params = [{transform_indices = @transform_0, window_bounds = array<i64: 1, 64, 320>}, {pipeline_mode = #tpu.pipeline_mode<synchronous>, transform_indices = @transform_1, window_bounds = array<i64: 320, 128>}, {transform_indices = @transform_2, window_bounds = array<i64: 1, 64, 128>}, {transform_indices = @transform_3, window_bounds = array<i64: 1, 2, 128>}]} {
    %c0 = arith.constant 0 : index
    %c0_0 = arith.constant 0 : index
    %c0_1 = arith.constant 0 : index
    %0 = vector.load %arg1[%c0, %c0_0, %c0_1] : memref<1x64x320xf32, #tpu.memory_space<vmem>>, vector<1x64x320xf32>
    %1 = vector.shape_cast %0 : vector<1x64x320xf32> to vector<64x320xf32>
    %2 = arith.truncf %1 : vector<64x320xf32> to vector<64x320xbf16>
    %c0_2 = arith.constant 0 : index
    %c0_3 = arith.constant 0 : index
    %3 = vector.load %arg2[%c0_2, %c0_3] : memref<320x128xbf16, #tpu.memory_space<vmem>>, vector<320x128xbf16>
    %cst = arith.constant dense<0.000000e+00> : vector<64x128xf32>
    %4 = tpu.matmul %2, %3, %cst {dimension_numbers = #tpu.dot_dimension_numbers<[1], [0], [0], [1], [0, 0, 1, 1], [], []>} : vector<64x320xbf16>, vector<320x128xbf16>, vector<64x128xf32> -> vector<64x128xf32>
    %c0_4 = arith.constant 0 : index
    %c0_5 = arith.constant 0 : index
    %c0_6 = arith.constant 0 : index
    %5 = vector.load %arg3[%c0_4, %c0_5, %c0_6] : memref<1x64x128xf32, #tpu.memory_space<vmem>>, vector<1x64x128xf32>
    %6 = vector.shape_cast %5 : vector<1x64x128xf32> to vector<64x128xf32>
    %7 = vector.shape_cast %4 : vector<64x128xf32> to vector<1x64x128xf32>
    tpu.vector_store %arg3[%c0_4, %c0_5, %c0_6], %7 {strides = array<i32>} : memref<1x64x128xf32, #tpu.memory_space<vmem>>, vector<1x64x128xf32>,
    %cst_7 = arith.constant dense<0.000000e+00> : vector<128xf32>
    %8 = vector.multi_reduction <add>, %4, %cst_7 [0] : vector<64x128xf32> to vector<128xf32>
    %9 = vector.shape_cast %8 : vector<128xf32> to vector<1x128xf32>
    %10 = arith.mulf %4, %4 : vector<64x128xf32>
    %cst_8 = arith.constant dense<0.000000e+00> : vector<128xf32>
    %11 = vector.multi_reduction <add>, %10, %cst_8 [0] : vector<64x128xf32> to vector<128xf32>
    %12 = vector.shape_cast %11 : vector<128xf32> to vector<1x128xf32>
    %13 = tpu.concatenate %9, %12 in 0 : vector<1x128xf32>, vector<1x128xf32> -> vector<2x128xf32>
    %c0_9 = arith.constant 0 : index
    %c0_10 = arith.constant 0 : index
    %c0_11 = arith.constant 0 : index
    %14 = vector.load %arg4[%c0_9, %c0_10, %c0_11] : memref<1x2x128xf32, #tpu.memory_space<vmem>>, vector<1x2x128xf32>
    %15 = vector.shape_cast %14 : vector<1x2x128xf32> to vector<2x128xf32>
    %16 = vector.shape_cast %13 : vector<2x128xf32> to vector<1x2x128xf32>
    tpu.vector_store %arg4[%c0_9, %c0_10, %c0_11], %16 {strides = array<i32>} : memref<1x2x128xf32, #tpu.memory_space<vmem>>, vector<1x2x128xf32>,
    return
  }
  func.func @transform_0(%arg0: i32) -> (i32, i32, i32) {
    %c0_i32 = arith.constant 0 : i32
    %c0_i32_0 = arith.constant 0 : i32
    %c0_i32_1 = arith.constant 0 : i32
    return %arg0, %c0_i32, %c0_i32_0 : i32, i32, i32
  }
  func.func @transform_1(%arg0: i32) -> (i32, i32) {
    %c0_i32 = arith.constant 0 : i32
    %c0_i32_0 = arith.constant 0 : i32
    %c0_i32_1 = arith.constant 0 : i32
    return %c0_i32, %c0_i32_0 : i32, i32
  }
  func.func @transform_2(%arg0: i32) -> (i32, i32, i32) {
    %c0_i32 = arith.constant 0 : i32
    %c0_i32_0 = arith.constant 0 : i32
    %c0_i32_1 = arith.constant 0 : i32
    return %arg0, %c0_i32, %c0_i32_0 : i32, i32, i32
  }
  func.func @transform_3(%arg0: i32) -> (i32, i32, i32) {
    %c0_i32 = arith.constant 0 : i32
    %c0_i32_0 = arith.constant 0 : i32
    %c0_i32_1 = arith.constant 0 : i32
    return %arg0, %c0_i32, %c0_i32_0 : i32, i32, i32
  }
}

module attributes {stable_mosaic.version = 11 : i64} {
  func.func @_branch_convs_kernel(%arg0: i32, %arg1: memref<1x64x128xf32, #tpu.memory_space<vmem>>, %arg2: memref<1x128xf32, #tpu.memory_space<vmem>>, %arg3: memref<1x128xf32, #tpu.memory_space<vmem>>, %arg4: memref<9x32x32xbf16, #tpu.memory_space<vmem>>, %arg5: memref<9x32x48xbf16, #tpu.memory_space<vmem>>, %arg6: memref<1x64x32xf32, #tpu.memory_space<vmem>>, %arg7: memref<1x64x48xf32, #tpu.memory_space<vmem>>, %arg8: memref<1x2x32xf32, #tpu.memory_space<vmem>>, %arg9: memref<1x2x48xf32, #tpu.memory_space<vmem>>, %arg10: memref<10x10x32xbf16, #tpu.memory_space<vmem>>) attributes {dimension_semantics = [#tpu.dimension_semantics<parallel>], iteration_bounds = array<i64: 2>, scalar_prefetch = 0 : i64, scratch_operands = 1 : i64, tpu.core_type = #tpu.core_type<tc>, window_params = [{transform_indices = @transform_0, window_bounds = array<i64: 1, 64, 128>}, {pipeline_mode = #tpu.pipeline_mode<synchronous>, transform_indices = @transform_1, window_bounds = array<i64: 1, 128>}, {pipeline_mode = #tpu.pipeline_mode<synchronous>, transform_indices = @transform_2, window_bounds = array<i64: 1, 128>}, {pipeline_mode = #tpu.pipeline_mode<synchronous>, transform_indices = @transform_3, window_bounds = array<i64: 9, 32, 32>}, {pipeline_mode = #tpu.pipeline_mode<synchronous>, transform_indices = @transform_4, window_bounds = array<i64: 9, 32, 48>}, {transform_indices = @transform_5, window_bounds = array<i64: 1, 64, 32>}, {transform_indices = @transform_6, window_bounds = array<i64: 1, 64, 48>}, {transform_indices = @transform_7, window_bounds = array<i64: 1, 2, 32>}, {transform_indices = @transform_8, window_bounds = array<i64: 1, 2, 48>}]} {
    %c0 = arith.constant 0 : index
    %c0_0 = arith.constant 0 : index
    %c0_1 = arith.constant 0 : index
    %0 = vector.load %arg1[%c0, %c0_0, %c0_1] : memref<1x64x128xf32, #tpu.memory_space<vmem>>, vector<1x64x128xf32>
    %1 = vector.shape_cast %0 : vector<1x64x128xf32> to vector<64x128xf32>
    %c0_2 = arith.constant 0 : index
    %c0_3 = arith.constant 0 : index
    %2 = vector.load %arg2[%c0_2, %c0_3] : memref<1x128xf32, #tpu.memory_space<vmem>>, vector<1x128xf32>
    %3 = vector.broadcast %2 : vector<1x128xf32> to vector<64x128xf32>
    %4 = arith.mulf %1, %3 : vector<64x128xf32>
    %c0_4 = arith.constant 0 : index
    %c0_5 = arith.constant 0 : index
    %5 = vector.load %arg3[%c0_4, %c0_5] : memref<1x128xf32, #tpu.memory_space<vmem>>, vector<1x128xf32>
    %6 = vector.broadcast %5 : vector<1x128xf32> to vector<64x128xf32>
    %7 = arith.addf %4, %6 : vector<64x128xf32>
    %cst = arith.constant 0.000000e+00 : f32
    %8 = vector.broadcast %cst : f32 to vector<64x128xf32>
    %9 = arith.maximumf %7, %8 : vector<64x128xf32>
    %cst_6 = arith.constant 0.000000e+00 : bf16
    %10 = vector.broadcast %cst_6 : bf16 to vector<1x10x32xbf16>
    %cst_7 = arith.constant 0.000000e+00 : bf16
    %11 = vector.broadcast %cst_7 : bf16 to vector<10x1x32xbf16>
    %c0_8 = arith.constant 0 : index
    %c0_9 = arith.constant 0 : index
    %c0_10 = arith.constant 0 : index
    %12 = vector.load %arg10[%c0_8, %c0_9, %c0_10] : memref<10x10x32xbf16, #tpu.memory_space<vmem>>, vector<1x10x32xbf16>
    tpu.vector_store %arg10[%c0_8, %c0_9, %c0_10], %10 {strides = array<i32>} : memref<10x10x32xbf16, #tpu.memory_space<vmem>>, vector<1x10x32xbf16>,
    %c9 = arith.constant 9 : index
    %c0_11 = arith.constant 0 : index
    %c0_12 = arith.constant 0 : index
    %13 = vector.load %arg10[%c9, %c0_11, %c0_12] : memref<10x10x32xbf16, #tpu.memory_space<vmem>>, vector<1x10x32xbf16>
    tpu.vector_store %arg10[%c9, %c0_11, %c0_12], %10 {strides = array<i32>} : memref<10x10x32xbf16, #tpu.memory_space<vmem>>, vector<1x10x32xbf16>,
    %c0_13 = arith.constant 0 : index
    %c0_14 = arith.constant 0 : index
    %c0_15 = arith.constant 0 : index
    %14 = vector.load %arg10[%c0_13, %c0_14, %c0_15] : memref<10x10x32xbf16, #tpu.memory_space<vmem>>, vector<10x1x32xbf16>
    tpu.vector_store %arg10[%c0_13, %c0_14, %c0_15], %11 {strides = array<i32>} : memref<10x10x32xbf16, #tpu.memory_space<vmem>>, vector<10x1x32xbf16>,
    %c0_16 = arith.constant 0 : index
    %c9_17 = arith.constant 9 : index
    %c0_18 = arith.constant 0 : index
    %15 = vector.load %arg10[%c0_16, %c9_17, %c0_18] : memref<10x10x32xbf16, #tpu.memory_space<vmem>>, vector<10x1x32xbf16>
    tpu.vector_store %arg10[%c0_16, %c9_17, %c0_18], %11 {strides = array<i32>} : memref<10x10x32xbf16, #tpu.memory_space<vmem>>, vector<10x1x32xbf16>,
    %16 = vector.extract_strided_slice %9 {offsets = [0, 32], sizes = [64, 32], strides = [1, 1]} : vector<64x128xf32> to vector<64x32xf32>
    %17 = arith.truncf %16 : vector<64x32xf32> to vector<64x32xbf16>
    %18 = vector.shape_cast %17 : vector<64x32xbf16> to vector<8x8x32xbf16>
    %c1 = arith.constant 1 : index
    %c1_19 = arith.constant 1 : index
    %c0_20 = arith.constant 0 : index
    %19 = vector.load %arg10[%c1, %c1_19, %c0_20] : memref<10x10x32xbf16, #tpu.memory_space<vmem>>, vector<8x8x32xbf16>
    tpu.vector_store %arg10[%c1, %c1_19, %c0_20], %18 {strides = array<i32>} : memref<10x10x32xbf16, #tpu.memory_space<vmem>>, vector<8x8x32xbf16>,
    %c0_21 = arith.constant 0 : index
    %c0_22 = arith.constant 0 : index
    %c0_23 = arith.constant 0 : index
    %20 = vector.load %arg10[%c0_21, %c0_22, %c0_23] : memref<10x10x32xbf16, #tpu.memory_space<vmem>>, vector<8x8x32xbf16>
    %21 = vector.shape_cast %20 : vector<8x8x32xbf16> to vector<64x32xbf16>
    %c0_24 = arith.constant 0 : index
    %c0_25 = arith.constant 0 : index
    %c0_26 = arith.constant 0 : index
    %22 = vector.load %arg4[%c0_24, %c0_25, %c0_26] : memref<9x32x32xbf16, #tpu.memory_space<vmem>>, vector<1x32x32xbf16>
    %23 = vector.shape_cast %22 : vector<1x32x32xbf16> to vector<32x32xbf16>
    %cst_27 = arith.constant dense<0.000000e+00> : vector<64x32xf32>
    %24 = tpu.matmul %21, %23, %cst_27 {dimension_numbers = #tpu.dot_dimension_numbers<[1], [0], [0], [1], [0, 0, 1, 1], [], []>} : vector<64x32xbf16>, vector<32x32xbf16>, vector<64x32xf32> -> vector<64x32xf32>
    %c0_28 = arith.constant 0 : index
    %c1_29 = arith.constant 1 : index
    %c0_30 = arith.constant 0 : index
    %25 = vector.load %arg10[%c0_28, %c1_29, %c0_30] : memref<10x10x32xbf16, #tpu.memory_space<vmem>>, vector<8x8x32xbf16>
    %26 = vector.shape_cast %25 : vector<8x8x32xbf16> to vector<64x32xbf16>
    %c1_31 = arith.constant 1 : index
    %c0_32 = arith.constant 0 : index
    %c0_33 = arith.constant 0 : index
    %27 = vector.load %arg4[%c1_31, %c0_32, %c0_33] : memref<9x32x32xbf16, #tpu.memory_space<vmem>>, vector<1x32x32xbf16>
    %28 = vector.shape_cast %27 : vector<1x32x32xbf16> to vector<32x32xbf16>
    %cst_34 = arith.constant dense<0.000000e+00> : vector<64x32xf32>
    %29 = tpu.matmul %26, %28, %cst_34 {dimension_numbers = #tpu.dot_dimension_numbers<[1], [0], [0], [1], [0, 0, 1, 1], [], []>} : vector<64x32xbf16>, vector<32x32xbf16>, vector<64x32xf32> -> vector<64x32xf32>
    %30 = arith.addf %24, %29 : vector<64x32xf32>
    %c0_35 = arith.constant 0 : index
    %c2 = arith.constant 2 : index
    %c0_36 = arith.constant 0 : index
    %31 = vector.load %arg10[%c0_35, %c2, %c0_36] : memref<10x10x32xbf16, #tpu.memory_space<vmem>>, vector<8x8x32xbf16>
    %32 = vector.shape_cast %31 : vector<8x8x32xbf16> to vector<64x32xbf16>
    %c2_37 = arith.constant 2 : index
    %c0_38 = arith.constant 0 : index
    %c0_39 = arith.constant 0 : index
    %33 = vector.load %arg4[%c2_37, %c0_38, %c0_39] : memref<9x32x32xbf16, #tpu.memory_space<vmem>>, vector<1x32x32xbf16>
    %34 = vector.shape_cast %33 : vector<1x32x32xbf16> to vector<32x32xbf16>
    %cst_40 = arith.constant dense<0.000000e+00> : vector<64x32xf32>
    %35 = tpu.matmul %32, %34, %cst_40 {dimension_numbers = #tpu.dot_dimension_numbers<[1], [0], [0], [1], [0, 0, 1, 1], [], []>} : vector<64x32xbf16>, vector<32x32xbf16>, vector<64x32xf32> -> vector<64x32xf32>
    %36 = arith.addf %30, %35 : vector<64x32xf32>
    %c1_41 = arith.constant 1 : index
    %c0_42 = arith.constant 0 : index
    %c0_43 = arith.constant 0 : index
    %37 = vector.load %arg10[%c1_41, %c0_42, %c0_43] : memref<10x10x32xbf16, #tpu.memory_space<vmem>>, vector<8x8x32xbf16>
    %38 = vector.shape_cast %37 : vector<8x8x32xbf16> to vector<64x32xbf16>
    %c3 = arith.constant 3 : index
    %c0_44 = arith.constant 0 : index
    %c0_45 = arith.constant 0 : index
    %39 = vector.load %arg4[%c3, %c0_44, %c0_45] : memref<9x32x32xbf16, #tpu.memory_space<vmem>>, vector<1x32x32xbf16>
    %40 = vector.shape_cast %39 : vector<1x32x32xbf16> to vector<32x32xbf16>
    %cst_46 = arith.constant dense<0.000000e+00> : vector<64x32xf32>
    %41 = tpu.matmul %38, %40, %cst_46 {dimension_numbers = #tpu.dot_dimension_numbers<[1], [0], [0], [1], [0, 0, 1, 1], [], []>} : vector<64x32xbf16>, vector<32x32xbf16>, vector<64x32xf32> -> vector<64x32xf32>
    %42 = arith.addf %36, %41 : vector<64x32xf32>
    %c1_47 = arith.constant 1 : index
    %c1_48 = arith.constant 1 : index
    %c0_49 = arith.constant 0 : index
    %43 = vector.load %arg10[%c1_47, %c1_48, %c0_49] : memref<10x10x32xbf16, #tpu.memory_space<vmem>>, vector<8x8x32xbf16>
    %44 = vector.shape_cast %43 : vector<8x8x32xbf16> to vector<64x32xbf16>
    %c4 = arith.constant 4 : index
    %c0_50 = arith.constant 0 : index
    %c0_51 = arith.constant 0 : index
    %45 = vector.load %arg4[%c4, %c0_50, %c0_51] : memref<9x32x32xbf16, #tpu.memory_space<vmem>>, vector<1x32x32xbf16>
    %46 = vector.shape_cast %45 : vector<1x32x32xbf16> to vector<32x32xbf16>
    %cst_52 = arith.constant dense<0.000000e+00> : vector<64x32xf32>
    %47 = tpu.matmul %44, %46, %cst_52 {dimension_numbers = #tpu.dot_dimension_numbers<[1], [0], [0], [1], [0, 0, 1, 1], [], []>} : vector<64x32xbf16>, vector<32x32xbf16>, vector<64x32xf32> -> vector<64x32xf32>
    %48 = arith.addf %42, %47 : vector<64x32xf32>
    %c1_53 = arith.constant 1 : index
    %c2_54 = arith.constant 2 : index
    %c0_55 = arith.constant 0 : index
    %49 = vector.load %arg10[%c1_53, %c2_54, %c0_55] : memref<10x10x32xbf16, #tpu.memory_space<vmem>>, vector<8x8x32xbf16>
    %50 = vector.shape_cast %49 : vector<8x8x32xbf16> to vector<64x32xbf16>
    %c5 = arith.constant 5 : index
    %c0_56 = arith.constant 0 : index
    %c0_57 = arith.constant 0 : index
    %51 = vector.load %arg4[%c5, %c0_56, %c0_57] : memref<9x32x32xbf16, #tpu.memory_space<vmem>>, vector<1x32x32xbf16>
    %52 = vector.shape_cast %51 : vector<1x32x32xbf16> to vector<32x32xbf16>
    %cst_58 = arith.constant dense<0.000000e+00> : vector<64x32xf32>
    %53 = tpu.matmul %50, %52, %cst_58 {dimension_numbers = #tpu.dot_dimension_numbers<[1], [0], [0], [1], [0, 0, 1, 1], [], []>} : vector<64x32xbf16>, vector<32x32xbf16>, vector<64x32xf32> -> vector<64x32xf32>
    %54 = arith.addf %48, %53 : vector<64x32xf32>
    %c2_59 = arith.constant 2 : index
    %c0_60 = arith.constant 0 : index
    %c0_61 = arith.constant 0 : index
    %55 = vector.load %arg10[%c2_59, %c0_60, %c0_61] : memref<10x10x32xbf16, #tpu.memory_space<vmem>>, vector<8x8x32xbf16>
    %56 = vector.shape_cast %55 : vector<8x8x32xbf16> to vector<64x32xbf16>
    %c6 = arith.constant 6 : index
    %c0_62 = arith.constant 0 : index
    %c0_63 = arith.constant 0 : index
    %57 = vector.load %arg4[%c6, %c0_62, %c0_63] : memref<9x32x32xbf16, #tpu.memory_space<vmem>>, vector<1x32x32xbf16>
    %58 = vector.shape_cast %57 : vector<1x32x32xbf16> to vector<32x32xbf16>
    %cst_64 = arith.constant dense<0.000000e+00> : vector<64x32xf32>
    %59 = tpu.matmul %56, %58, %cst_64 {dimension_numbers = #tpu.dot_dimension_numbers<[1], [0], [0], [1], [0, 0, 1, 1], [], []>} : vector<64x32xbf16>, vector<32x32xbf16>, vector<64x32xf32> -> vector<64x32xf32>
    %60 = arith.addf %54, %59 : vector<64x32xf32>
    %c2_65 = arith.constant 2 : index
    %c1_66 = arith.constant 1 : index
    %c0_67 = arith.constant 0 : index
    %61 = vector.load %arg10[%c2_65, %c1_66, %c0_67] : memref<10x10x32xbf16, #tpu.memory_space<vmem>>, vector<8x8x32xbf16>
    %62 = vector.shape_cast %61 : vector<8x8x32xbf16> to vector<64x32xbf16>
    %c7 = arith.constant 7 : index
    %c0_68 = arith.constant 0 : index
    %c0_69 = arith.constant 0 : index
    %63 = vector.load %arg4[%c7, %c0_68, %c0_69] : memref<9x32x32xbf16, #tpu.memory_space<vmem>>, vector<1x32x32xbf16>
    %64 = vector.shape_cast %63 : vector<1x32x32xbf16> to vector<32x32xbf16>
    %cst_70 = arith.constant dense<0.000000e+00> : vector<64x32xf32>
    %65 = tpu.matmul %62, %64, %cst_70 {dimension_numbers = #tpu.dot_dimension_numbers<[1], [0], [0], [1], [0, 0, 1, 1], [], []>} : vector<64x32xbf16>, vector<32x32xbf16>, vector<64x32xf32> -> vector<64x32xf32>
    %66 = arith.addf %60, %65 : vector<64x32xf32>
    %c2_71 = arith.constant 2 : index
    %c2_72 = arith.constant 2 : index
    %c0_73 = arith.constant 0 : index
    %67 = vector.load %arg10[%c2_71, %c2_72, %c0_73] : memref<10x10x32xbf16, #tpu.memory_space<vmem>>, vector<8x8x32xbf16>
    %68 = vector.shape_cast %67 : vector<8x8x32xbf16> to vector<64x32xbf16>
    %c8 = arith.constant 8 : index
    %c0_74 = arith.constant 0 : index
    %c0_75 = arith.constant 0 : index
    %69 = vector.load %arg4[%c8, %c0_74, %c0_75] : memref<9x32x32xbf16, #tpu.memory_space<vmem>>, vector<1x32x32xbf16>
    %70 = vector.shape_cast %69 : vector<1x32x32xbf16> to vector<32x32xbf16>
    %cst_76 = arith.constant dense<0.000000e+00> : vector<64x32xf32>
    %71 = tpu.matmul %68, %70, %cst_76 {dimension_numbers = #tpu.dot_dimension_numbers<[1], [0], [0], [1], [0, 0, 1, 1], [], []>} : vector<64x32xbf16>, vector<32x32xbf16>, vector<64x32xf32> -> vector<64x32xf32>
    %72 = arith.addf %66, %71 : vector<64x32xf32>
    %c0_77 = arith.constant 0 : index
    %c0_78 = arith.constant 0 : index
    %c0_79 = arith.constant 0 : index
    %73 = vector.load %arg6[%c0_77, %c0_78, %c0_79] : memref<1x64x32xf32, #tpu.memory_space<vmem>>, vector<1x64x32xf32>
    %74 = vector.shape_cast %73 : vector<1x64x32xf32> to vector<64x32xf32>
    %75 = vector.shape_cast %72 : vector<64x32xf32> to vector<1x64x32xf32>
    tpu.vector_store %arg6[%c0_77, %c0_78, %c0_79], %75 {strides = array<i32>} : memref<1x64x32xf32, #tpu.memory_space<vmem>>, vector<1x64x32xf32>,
    %cst_80 = arith.constant dense<0.000000e+00> : vector<32xf32>
    %76 = vector.multi_reduction <add>, %72, %cst_80 [0] : vector<64x32xf32> to vector<32xf32>
    %77 = vector.shape_cast %76 : vector<32xf32> to vector<1x32xf32>
    %78 = arith.mulf %72, %72 : vector<64x32xf32>
    %cst_81 = arith.constant dense<0.000000e+00> : vector<32xf32>
    %79 = vector.multi_reduction <add>, %78, %cst_81 [0] : vector<64x32xf32> to vector<32xf32>
    %80 = vector.shape_cast %79 : vector<32xf32> to vector<1x32xf32>
    %81 = tpu.concatenate %77, %80 in 0 : vector<1x32xf32>, vector<1x32xf32> -> vector<2x32xf32>
    %c0_82 = arith.constant 0 : index
    %c0_83 = arith.constant 0 : index
    %c0_84 = arith.constant 0 : index
    %82 = vector.load %arg8[%c0_82, %c0_83, %c0_84] : memref<1x2x32xf32, #tpu.memory_space<vmem>>, vector<1x2x32xf32>
    %83 = vector.shape_cast %82 : vector<1x2x32xf32> to vector<2x32xf32>
    %84 = vector.shape_cast %81 : vector<2x32xf32> to vector<1x2x32xf32>
    tpu.vector_store %arg8[%c0_82, %c0_83, %c0_84], %84 {strides = array<i32>} : memref<1x2x32xf32, #tpu.memory_space<vmem>>, vector<1x2x32xf32>,
    %85 = vector.extract_strided_slice %9 {offsets = [0, 64], sizes = [64, 32], strides = [1, 1]} : vector<64x128xf32> to vector<64x32xf32>
    %86 = arith.truncf %85 : vector<64x32xf32> to vector<64x32xbf16>
    %87 = vector.shape_cast %86 : vector<64x32xbf16> to vector<8x8x32xbf16>
    %c1_85 = arith.constant 1 : index
    %c1_86 = arith.constant 1 : index
    %c0_87 = arith.constant 0 : index
    %88 = vector.load %arg10[%c1_85, %c1_86, %c0_87] : memref<10x10x32xbf16, #tpu.memory_space<vmem>>, vector<8x8x32xbf16>
    tpu.vector_store %arg10[%c1_85, %c1_86, %c0_87], %87 {strides = array<i32>} : memref<10x10x32xbf16, #tpu.memory_space<vmem>>, vector<8x8x32xbf16>,
    %c0_88 = arith.constant 0 : index
    %c0_89 = arith.constant 0 : index
    %c0_90 = arith.constant 0 : index
    %89 = vector.load %arg10[%c0_88, %c0_89, %c0_90] : memref<10x10x32xbf16, #tpu.memory_space<vmem>>, vector<8x8x32xbf16>
    %90 = vector.shape_cast %89 : vector<8x8x32xbf16> to vector<64x32xbf16>
    %c0_91 = arith.constant 0 : index
    %c0_92 = arith.constant 0 : index
    %c0_93 = arith.constant 0 : index
    %91 = vector.load %arg5[%c0_91, %c0_92, %c0_93] : memref<9x32x48xbf16, #tpu.memory_space<vmem>>, vector<1x32x48xbf16>
    %92 = vector.shape_cast %91 : vector<1x32x48xbf16> to vector<32x48xbf16>
    %cst_94 = arith.constant dense<0.000000e+00> : vector<64x48xf32>
    %93 = tpu.matmul %90, %92, %cst_94 {dimension_numbers = #tpu.dot_dimension_numbers<[1], [0], [0], [1], [0, 0, 1, 1], [], []>} : vector<64x32xbf16>, vector<32x48xbf16>, vector<64x48xf32> -> vector<64x48xf32>
    %c0_95 = arith.constant 0 : index
    %c1_96 = arith.constant 1 : index
    %c0_97 = arith.constant 0 : index
    %94 = vector.load %arg10[%c0_95, %c1_96, %c0_97] : memref<10x10x32xbf16, #tpu.memory_space<vmem>>, vector<8x8x32xbf16>
    %95 = vector.shape_cast %94 : vector<8x8x32xbf16> to vector<64x32xbf16>
    %c1_98 = arith.constant 1 : index
    %c0_99 = arith.constant 0 : index
    %c0_100 = arith.constant 0 : index
    %96 = vector.load %arg5[%c1_98, %c0_99, %c0_100] : memref<9x32x48xbf16, #tpu.memory_space<vmem>>, vector<1x32x48xbf16>
    %97 = vector.shape_cast %96 : vector<1x32x48xbf16> to vector<32x48xbf16>
    %cst_101 = arith.constant dense<0.000000e+00> : vector<64x48xf32>
    %98 = tpu.matmul %95, %97, %cst_101 {dimension_numbers = #tpu.dot_dimension_numbers<[1], [0], [0], [1], [0, 0, 1, 1], [], []>} : vector<64x32xbf16>, vector<32x48xbf16>, vector<64x48xf32> -> vector<64x48xf32>
    %99 = arith.addf %93, %98 : vector<64x48xf32>
    %c0_102 = arith.constant 0 : index
    %c2_103 = arith.constant 2 : index
    %c0_104 = arith.constant 0 : index
    %100 = vector.load %arg10[%c0_102, %c2_103, %c0_104] : memref<10x10x32xbf16, #tpu.memory_space<vmem>>, vector<8x8x32xbf16>
    %101 = vector.shape_cast %100 : vector<8x8x32xbf16> to vector<64x32xbf16>
    %c2_105 = arith.constant 2 : index
    %c0_106 = arith.constant 0 : index
    %c0_107 = arith.constant 0 : index
    %102 = vector.load %arg5[%c2_105, %c0_106, %c0_107] : memref<9x32x48xbf16, #tpu.memory_space<vmem>>, vector<1x32x48xbf16>
    %103 = vector.shape_cast %102 : vector<1x32x48xbf16> to vector<32x48xbf16>
    %cst_108 = arith.constant dense<0.000000e+00> : vector<64x48xf32>
    %104 = tpu.matmul %101, %103, %cst_108 {dimension_numbers = #tpu.dot_dimension_numbers<[1], [0], [0], [1], [0, 0, 1, 1], [], []>} : vector<64x32xbf16>, vector<32x48xbf16>, vector<64x48xf32> -> vector<64x48xf32>
    %105 = arith.addf %99, %104 : vector<64x48xf32>
    %c1_109 = arith.constant 1 : index
    %c0_110 = arith.constant 0 : index
    %c0_111 = arith.constant 0 : index
    %106 = vector.load %arg10[%c1_109, %c0_110, %c0_111] : memref<10x10x32xbf16, #tpu.memory_space<vmem>>, vector<8x8x32xbf16>
    %107 = vector.shape_cast %106 : vector<8x8x32xbf16> to vector<64x32xbf16>
    %c3_112 = arith.constant 3 : index
    %c0_113 = arith.constant 0 : index
    %c0_114 = arith.constant 0 : index
    %108 = vector.load %arg5[%c3_112, %c0_113, %c0_114] : memref<9x32x48xbf16, #tpu.memory_space<vmem>>, vector<1x32x48xbf16>
    %109 = vector.shape_cast %108 : vector<1x32x48xbf16> to vector<32x48xbf16>
    %cst_115 = arith.constant dense<0.000000e+00> : vector<64x48xf32>
    %110 = tpu.matmul %107, %109, %cst_115 {dimension_numbers = #tpu.dot_dimension_numbers<[1], [0], [0], [1], [0, 0, 1, 1], [], []>} : vector<64x32xbf16>, vector<32x48xbf16>, vector<64x48xf32> -> vector<64x48xf32>
    %111 = arith.addf %105, %110 : vector<64x48xf32>
    %c1_116 = arith.constant 1 : index
    %c1_117 = arith.constant 1 : index
    %c0_118 = arith.constant 0 : index
    %112 = vector.load %arg10[%c1_116, %c1_117, %c0_118] : memref<10x10x32xbf16, #tpu.memory_space<vmem>>, vector<8x8x32xbf16>
    %113 = vector.shape_cast %112 : vector<8x8x32xbf16> to vector<64x32xbf16>
    %c4_119 = arith.constant 4 : index
    %c0_120 = arith.constant 0 : index
    %c0_121 = arith.constant 0 : index
    %114 = vector.load %arg5[%c4_119, %c0_120, %c0_121] : memref<9x32x48xbf16, #tpu.memory_space<vmem>>, vector<1x32x48xbf16>
    %115 = vector.shape_cast %114 : vector<1x32x48xbf16> to vector<32x48xbf16>
    %cst_122 = arith.constant dense<0.000000e+00> : vector<64x48xf32>
    %116 = tpu.matmul %113, %115, %cst_122 {dimension_numbers = #tpu.dot_dimension_numbers<[1], [0], [0], [1], [0, 0, 1, 1], [], []>} : vector<64x32xbf16>, vector<32x48xbf16>, vector<64x48xf32> -> vector<64x48xf32>
    %117 = arith.addf %111, %116 : vector<64x48xf32>
    %c1_123 = arith.constant 1 : index
    %c2_124 = arith.constant 2 : index
    %c0_125 = arith.constant 0 : index
    %118 = vector.load %arg10[%c1_123, %c2_124, %c0_125] : memref<10x10x32xbf16, #tpu.memory_space<vmem>>, vector<8x8x32xbf16>
    %119 = vector.shape_cast %118 : vector<8x8x32xbf16> to vector<64x32xbf16>
    %c5_126 = arith.constant 5 : index
    %c0_127 = arith.constant 0 : index
    %c0_128 = arith.constant 0 : index
    %120 = vector.load %arg5[%c5_126, %c0_127, %c0_128] : memref<9x32x48xbf16, #tpu.memory_space<vmem>>, vector<1x32x48xbf16>
    %121 = vector.shape_cast %120 : vector<1x32x48xbf16> to vector<32x48xbf16>
    %cst_129 = arith.constant dense<0.000000e+00> : vector<64x48xf32>
    %122 = tpu.matmul %119, %121, %cst_129 {dimension_numbers = #tpu.dot_dimension_numbers<[1], [0], [0], [1], [0, 0, 1, 1], [], []>} : vector<64x32xbf16>, vector<32x48xbf16>, vector<64x48xf32> -> vector<64x48xf32>
    %123 = arith.addf %117, %122 : vector<64x48xf32>
    %c2_130 = arith.constant 2 : index
    %c0_131 = arith.constant 0 : index
    %c0_132 = arith.constant 0 : index
    %124 = vector.load %arg10[%c2_130, %c0_131, %c0_132] : memref<10x10x32xbf16, #tpu.memory_space<vmem>>, vector<8x8x32xbf16>
    %125 = vector.shape_cast %124 : vector<8x8x32xbf16> to vector<64x32xbf16>
    %c6_133 = arith.constant 6 : index
    %c0_134 = arith.constant 0 : index
    %c0_135 = arith.constant 0 : index
    %126 = vector.load %arg5[%c6_133, %c0_134, %c0_135] : memref<9x32x48xbf16, #tpu.memory_space<vmem>>, vector<1x32x48xbf16>
    %127 = vector.shape_cast %126 : vector<1x32x48xbf16> to vector<32x48xbf16>
    %cst_136 = arith.constant dense<0.000000e+00> : vector<64x48xf32>
    %128 = tpu.matmul %125, %127, %cst_136 {dimension_numbers = #tpu.dot_dimension_numbers<[1], [0], [0], [1], [0, 0, 1, 1], [], []>} : vector<64x32xbf16>, vector<32x48xbf16>, vector<64x48xf32> -> vector<64x48xf32>
    %129 = arith.addf %123, %128 : vector<64x48xf32>
    %c2_137 = arith.constant 2 : index
    %c1_138 = arith.constant 1 : index
    %c0_139 = arith.constant 0 : index
    %130 = vector.load %arg10[%c2_137, %c1_138, %c0_139] : memref<10x10x32xbf16, #tpu.memory_space<vmem>>, vector<8x8x32xbf16>
    %131 = vector.shape_cast %130 : vector<8x8x32xbf16> to vector<64x32xbf16>
    %c7_140 = arith.constant 7 : index
    %c0_141 = arith.constant 0 : index
    %c0_142 = arith.constant 0 : index
    %132 = vector.load %arg5[%c7_140, %c0_141, %c0_142] : memref<9x32x48xbf16, #tpu.memory_space<vmem>>, vector<1x32x48xbf16>
    %133 = vector.shape_cast %132 : vector<1x32x48xbf16> to vector<32x48xbf16>
    %cst_143 = arith.constant dense<0.000000e+00> : vector<64x48xf32>
    %134 = tpu.matmul %131, %133, %cst_143 {dimension_numbers = #tpu.dot_dimension_numbers<[1], [0], [0], [1], [0, 0, 1, 1], [], []>} : vector<64x32xbf16>, vector<32x48xbf16>, vector<64x48xf32> -> vector<64x48xf32>
    %135 = arith.addf %129, %134 : vector<64x48xf32>
    %c2_144 = arith.constant 2 : index
    %c2_145 = arith.constant 2 : index
    %c0_146 = arith.constant 0 : index
    %136 = vector.load %arg10[%c2_144, %c2_145, %c0_146] : memref<10x10x32xbf16, #tpu.memory_space<vmem>>, vector<8x8x32xbf16>
    %137 = vector.shape_cast %136 : vector<8x8x32xbf16> to vector<64x32xbf16>
    %c8_147 = arith.constant 8 : index
    %c0_148 = arith.constant 0 : index
    %c0_149 = arith.constant 0 : index
    %138 = vector.load %arg5[%c8_147, %c0_148, %c0_149] : memref<9x32x48xbf16, #tpu.memory_space<vmem>>, vector<1x32x48xbf16>
    %139 = vector.shape_cast %138 : vector<1x32x48xbf16> to vector<32x48xbf16>
    %cst_150 = arith.constant dense<0.000000e+00> : vector<64x48xf32>
    %140 = tpu.matmul %137, %139, %cst_150 {dimension_numbers = #tpu.dot_dimension_numbers<[1], [0], [0], [1], [0, 0, 1, 1], [], []>} : vector<64x32xbf16>, vector<32x48xbf16>, vector<64x48xf32> -> vector<64x48xf32>
    %141 = arith.addf %135, %140 : vector<64x48xf32>
    %c0_151 = arith.constant 0 : index
    %c0_152 = arith.constant 0 : index
    %c0_153 = arith.constant 0 : index
    %142 = vector.load %arg7[%c0_151, %c0_152, %c0_153] : memref<1x64x48xf32, #tpu.memory_space<vmem>>, vector<1x64x48xf32>
    %143 = vector.shape_cast %142 : vector<1x64x48xf32> to vector<64x48xf32>
    %144 = vector.shape_cast %141 : vector<64x48xf32> to vector<1x64x48xf32>
    tpu.vector_store %arg7[%c0_151, %c0_152, %c0_153], %144 {strides = array<i32>} : memref<1x64x48xf32, #tpu.memory_space<vmem>>, vector<1x64x48xf32>,
    %cst_154 = arith.constant dense<0.000000e+00> : vector<48xf32>
    %145 = vector.multi_reduction <add>, %141, %cst_154 [0] : vector<64x48xf32> to vector<48xf32>
    %146 = vector.shape_cast %145 : vector<48xf32> to vector<1x48xf32>
    %147 = arith.mulf %141, %141 : vector<64x48xf32>
    %cst_155 = arith.constant dense<0.000000e+00> : vector<48xf32>
    %148 = vector.multi_reduction <add>, %147, %cst_155 [0] : vector<64x48xf32> to vector<48xf32>
    %149 = vector.shape_cast %148 : vector<48xf32> to vector<1x48xf32>
    %150 = tpu.concatenate %146, %149 in 0 : vector<1x48xf32>, vector<1x48xf32> -> vector<2x48xf32>
    %c0_156 = arith.constant 0 : index
    %c0_157 = arith.constant 0 : index
    %c0_158 = arith.constant 0 : index
    %151 = vector.load %arg9[%c0_156, %c0_157, %c0_158] : memref<1x2x48xf32, #tpu.memory_space<vmem>>, vector<1x2x48xf32>
    %152 = vector.shape_cast %151 : vector<1x2x48xf32> to vector<2x48xf32>
    %153 = vector.shape_cast %150 : vector<2x48xf32> to vector<1x2x48xf32>
    tpu.vector_store %arg9[%c0_156, %c0_157, %c0_158], %153 {strides = array<i32>} : memref<1x2x48xf32, #tpu.memory_space<vmem>>, vector<1x2x48xf32>,
    return
  }
  func.func @transform_0(%arg0: i32) -> (i32, i32, i32) {
    %c0_i32 = arith.constant 0 : i32
    %c0_i32_0 = arith.constant 0 : i32
    %c0_i32_1 = arith.constant 0 : i32
    return %arg0, %c0_i32, %c0_i32_0 : i32, i32, i32
  }
  func.func @transform_1(%arg0: i32) -> (i32, i32) {
    %c0_i32 = arith.constant 0 : i32
    %c0_i32_0 = arith.constant 0 : i32
    %c0_i32_1 = arith.constant 0 : i32
    return %c0_i32, %c0_i32_0 : i32, i32
  }
  func.func @transform_2(%arg0: i32) -> (i32, i32) {
    %c0_i32 = arith.constant 0 : i32
    %c0_i32_0 = arith.constant 0 : i32
    %c0_i32_1 = arith.constant 0 : i32
    return %c0_i32, %c0_i32_0 : i32, i32
  }
  func.func @transform_3(%arg0: i32) -> (i32, i32, i32) {
    %c0_i32 = arith.constant 0 : i32
    %c0_i32_0 = arith.constant 0 : i32
    %c0_i32_1 = arith.constant 0 : i32
    %c0_i32_2 = arith.constant 0 : i32
    return %c0_i32, %c0_i32_0, %c0_i32_1 : i32, i32, i32
  }
  func.func @transform_4(%arg0: i32) -> (i32, i32, i32) {
    %c0_i32 = arith.constant 0 : i32
    %c0_i32_0 = arith.constant 0 : i32
    %c0_i32_1 = arith.constant 0 : i32
    %c0_i32_2 = arith.constant 0 : i32
    return %c0_i32, %c0_i32_0, %c0_i32_1 : i32, i32, i32
  }
  func.func @transform_5(%arg0: i32) -> (i32, i32, i32) {
    %c0_i32 = arith.constant 0 : i32
    %c0_i32_0 = arith.constant 0 : i32
    %c0_i32_1 = arith.constant 0 : i32
    return %arg0, %c0_i32, %c0_i32_0 : i32, i32, i32
  }
  func.func @transform_6(%arg0: i32) -> (i32, i32, i32) {
    %c0_i32 = arith.constant 0 : i32
    %c0_i32_0 = arith.constant 0 : i32
    %c0_i32_1 = arith.constant 0 : i32
    return %arg0, %c0_i32, %c0_i32_0 : i32, i32, i32
  }
  func.func @transform_7(%arg0: i32) -> (i32, i32, i32) {
    %c0_i32 = arith.constant 0 : i32
    %c0_i32_0 = arith.constant 0 : i32
    %c0_i32_1 = arith.constant 0 : i32
    return %arg0, %c0_i32, %c0_i32_0 : i32, i32, i32
  }
  func.func @transform_8(%arg0: i32) -> (i32, i32, i32) {
    %c0_i32 = arith.constant 0 : i32
    %c0_i32_0 = arith.constant 0 : i32
    %c0_i32_1 = arith.constant 0 : i32
    return %arg0, %c0_i32, %c0_i32_0 : i32, i32, i32
  }
}

module attributes {stable_mosaic.version = 11 : i64} {
  func.func @_branch2b_kernel(%arg0: i32, %arg1: memref<1x64x48xf32, #tpu.memory_space<vmem>>, %arg2: memref<1x48xf32, #tpu.memory_space<vmem>>, %arg3: memref<1x48xf32, #tpu.memory_space<vmem>>, %arg4: memref<9x48x64xbf16, #tpu.memory_space<vmem>>, %arg5: memref<1x64x64xf32, #tpu.memory_space<vmem>>, %arg6: memref<1x2x64xf32, #tpu.memory_space<vmem>>, %arg7: memref<10x10x48xbf16, #tpu.memory_space<vmem>>) attributes {dimension_semantics = [#tpu.dimension_semantics<parallel>], iteration_bounds = array<i64: 2>, scalar_prefetch = 0 : i64, scratch_operands = 1 : i64, tpu.core_type = #tpu.core_type<tc>, window_params = [{transform_indices = @transform_0, window_bounds = array<i64: 1, 64, 48>}, {pipeline_mode = #tpu.pipeline_mode<synchronous>, transform_indices = @transform_1, window_bounds = array<i64: 1, 48>}, {pipeline_mode = #tpu.pipeline_mode<synchronous>, transform_indices = @transform_2, window_bounds = array<i64: 1, 48>}, {pipeline_mode = #tpu.pipeline_mode<synchronous>, transform_indices = @transform_3, window_bounds = array<i64: 9, 48, 64>}, {transform_indices = @transform_4, window_bounds = array<i64: 1, 64, 64>}, {transform_indices = @transform_5, window_bounds = array<i64: 1, 2, 64>}]} {
    %c0 = arith.constant 0 : index
    %c0_0 = arith.constant 0 : index
    %c0_1 = arith.constant 0 : index
    %0 = vector.load %arg1[%c0, %c0_0, %c0_1] : memref<1x64x48xf32, #tpu.memory_space<vmem>>, vector<1x64x48xf32>
    %1 = vector.shape_cast %0 : vector<1x64x48xf32> to vector<64x48xf32>
    %c0_2 = arith.constant 0 : index
    %c0_3 = arith.constant 0 : index
    %2 = vector.load %arg2[%c0_2, %c0_3] : memref<1x48xf32, #tpu.memory_space<vmem>>, vector<1x48xf32>
    %3 = vector.broadcast %2 : vector<1x48xf32> to vector<64x48xf32>
    %4 = arith.mulf %1, %3 : vector<64x48xf32>
    %c0_4 = arith.constant 0 : index
    %c0_5 = arith.constant 0 : index
    %5 = vector.load %arg3[%c0_4, %c0_5] : memref<1x48xf32, #tpu.memory_space<vmem>>, vector<1x48xf32>
    %6 = vector.broadcast %5 : vector<1x48xf32> to vector<64x48xf32>
    %7 = arith.addf %4, %6 : vector<64x48xf32>
    %cst = arith.constant 0.000000e+00 : f32
    %8 = vector.broadcast %cst : f32 to vector<64x48xf32>
    %9 = arith.maximumf %7, %8 : vector<64x48xf32>
    %cst_6 = arith.constant 0.000000e+00 : bf16
    %10 = vector.broadcast %cst_6 : bf16 to vector<1x10x48xbf16>
    %cst_7 = arith.constant 0.000000e+00 : bf16
    %11 = vector.broadcast %cst_7 : bf16 to vector<10x1x48xbf16>
    %c0_8 = arith.constant 0 : index
    %c0_9 = arith.constant 0 : index
    %c0_10 = arith.constant 0 : index
    %12 = vector.load %arg7[%c0_8, %c0_9, %c0_10] : memref<10x10x48xbf16, #tpu.memory_space<vmem>>, vector<1x10x48xbf16>
    tpu.vector_store %arg7[%c0_8, %c0_9, %c0_10], %10 {strides = array<i32>} : memref<10x10x48xbf16, #tpu.memory_space<vmem>>, vector<1x10x48xbf16>,
    %c9 = arith.constant 9 : index
    %c0_11 = arith.constant 0 : index
    %c0_12 = arith.constant 0 : index
    %13 = vector.load %arg7[%c9, %c0_11, %c0_12] : memref<10x10x48xbf16, #tpu.memory_space<vmem>>, vector<1x10x48xbf16>
    tpu.vector_store %arg7[%c9, %c0_11, %c0_12], %10 {strides = array<i32>} : memref<10x10x48xbf16, #tpu.memory_space<vmem>>, vector<1x10x48xbf16>,
    %c0_13 = arith.constant 0 : index
    %c0_14 = arith.constant 0 : index
    %c0_15 = arith.constant 0 : index
    %14 = vector.load %arg7[%c0_13, %c0_14, %c0_15] : memref<10x10x48xbf16, #tpu.memory_space<vmem>>, vector<10x1x48xbf16>
    tpu.vector_store %arg7[%c0_13, %c0_14, %c0_15], %11 {strides = array<i32>} : memref<10x10x48xbf16, #tpu.memory_space<vmem>>, vector<10x1x48xbf16>,
    %c0_16 = arith.constant 0 : index
    %c9_17 = arith.constant 9 : index
    %c0_18 = arith.constant 0 : index
    %15 = vector.load %arg7[%c0_16, %c9_17, %c0_18] : memref<10x10x48xbf16, #tpu.memory_space<vmem>>, vector<10x1x48xbf16>
    tpu.vector_store %arg7[%c0_16, %c9_17, %c0_18], %11 {strides = array<i32>} : memref<10x10x48xbf16, #tpu.memory_space<vmem>>, vector<10x1x48xbf16>,
    %16 = arith.truncf %9 : vector<64x48xf32> to vector<64x48xbf16>
    %17 = vector.shape_cast %16 : vector<64x48xbf16> to vector<8x8x48xbf16>
    %c1 = arith.constant 1 : index
    %c1_19 = arith.constant 1 : index
    %c0_20 = arith.constant 0 : index
    %18 = vector.load %arg7[%c1, %c1_19, %c0_20] : memref<10x10x48xbf16, #tpu.memory_space<vmem>>, vector<8x8x48xbf16>
    tpu.vector_store %arg7[%c1, %c1_19, %c0_20], %17 {strides = array<i32>} : memref<10x10x48xbf16, #tpu.memory_space<vmem>>, vector<8x8x48xbf16>,
    %c0_21 = arith.constant 0 : index
    %c0_22 = arith.constant 0 : index
    %c0_23 = arith.constant 0 : index
    %19 = vector.load %arg7[%c0_21, %c0_22, %c0_23] : memref<10x10x48xbf16, #tpu.memory_space<vmem>>, vector<8x8x48xbf16>
    %20 = vector.shape_cast %19 : vector<8x8x48xbf16> to vector<64x48xbf16>
    %c0_24 = arith.constant 0 : index
    %c0_25 = arith.constant 0 : index
    %c0_26 = arith.constant 0 : index
    %21 = vector.load %arg4[%c0_24, %c0_25, %c0_26] : memref<9x48x64xbf16, #tpu.memory_space<vmem>>, vector<1x48x64xbf16>
    %22 = vector.shape_cast %21 : vector<1x48x64xbf16> to vector<48x64xbf16>
    %cst_27 = arith.constant dense<0.000000e+00> : vector<64x64xf32>
    %23 = tpu.matmul %20, %22, %cst_27 {dimension_numbers = #tpu.dot_dimension_numbers<[1], [0], [0], [1], [0, 0, 1, 1], [], []>} : vector<64x48xbf16>, vector<48x64xbf16>, vector<64x64xf32> -> vector<64x64xf32>
    %c0_28 = arith.constant 0 : index
    %c1_29 = arith.constant 1 : index
    %c0_30 = arith.constant 0 : index
    %24 = vector.load %arg7[%c0_28, %c1_29, %c0_30] : memref<10x10x48xbf16, #tpu.memory_space<vmem>>, vector<8x8x48xbf16>
    %25 = vector.shape_cast %24 : vector<8x8x48xbf16> to vector<64x48xbf16>
    %c1_31 = arith.constant 1 : index
    %c0_32 = arith.constant 0 : index
    %c0_33 = arith.constant 0 : index
    %26 = vector.load %arg4[%c1_31, %c0_32, %c0_33] : memref<9x48x64xbf16, #tpu.memory_space<vmem>>, vector<1x48x64xbf16>
    %27 = vector.shape_cast %26 : vector<1x48x64xbf16> to vector<48x64xbf16>
    %cst_34 = arith.constant dense<0.000000e+00> : vector<64x64xf32>
    %28 = tpu.matmul %25, %27, %cst_34 {dimension_numbers = #tpu.dot_dimension_numbers<[1], [0], [0], [1], [0, 0, 1, 1], [], []>} : vector<64x48xbf16>, vector<48x64xbf16>, vector<64x64xf32> -> vector<64x64xf32>
    %29 = arith.addf %23, %28 : vector<64x64xf32>
    %c0_35 = arith.constant 0 : index
    %c2 = arith.constant 2 : index
    %c0_36 = arith.constant 0 : index
    %30 = vector.load %arg7[%c0_35, %c2, %c0_36] : memref<10x10x48xbf16, #tpu.memory_space<vmem>>, vector<8x8x48xbf16>
    %31 = vector.shape_cast %30 : vector<8x8x48xbf16> to vector<64x48xbf16>
    %c2_37 = arith.constant 2 : index
    %c0_38 = arith.constant 0 : index
    %c0_39 = arith.constant 0 : index
    %32 = vector.load %arg4[%c2_37, %c0_38, %c0_39] : memref<9x48x64xbf16, #tpu.memory_space<vmem>>, vector<1x48x64xbf16>
    %33 = vector.shape_cast %32 : vector<1x48x64xbf16> to vector<48x64xbf16>
    %cst_40 = arith.constant dense<0.000000e+00> : vector<64x64xf32>
    %34 = tpu.matmul %31, %33, %cst_40 {dimension_numbers = #tpu.dot_dimension_numbers<[1], [0], [0], [1], [0, 0, 1, 1], [], []>} : vector<64x48xbf16>, vector<48x64xbf16>, vector<64x64xf32> -> vector<64x64xf32>
    %35 = arith.addf %29, %34 : vector<64x64xf32>
    %c1_41 = arith.constant 1 : index
    %c0_42 = arith.constant 0 : index
    %c0_43 = arith.constant 0 : index
    %36 = vector.load %arg7[%c1_41, %c0_42, %c0_43] : memref<10x10x48xbf16, #tpu.memory_space<vmem>>, vector<8x8x48xbf16>
    %37 = vector.shape_cast %36 : vector<8x8x48xbf16> to vector<64x48xbf16>
    %c3 = arith.constant 3 : index
    %c0_44 = arith.constant 0 : index
    %c0_45 = arith.constant 0 : index
    %38 = vector.load %arg4[%c3, %c0_44, %c0_45] : memref<9x48x64xbf16, #tpu.memory_space<vmem>>, vector<1x48x64xbf16>
    %39 = vector.shape_cast %38 : vector<1x48x64xbf16> to vector<48x64xbf16>
    %cst_46 = arith.constant dense<0.000000e+00> : vector<64x64xf32>
    %40 = tpu.matmul %37, %39, %cst_46 {dimension_numbers = #tpu.dot_dimension_numbers<[1], [0], [0], [1], [0, 0, 1, 1], [], []>} : vector<64x48xbf16>, vector<48x64xbf16>, vector<64x64xf32> -> vector<64x64xf32>
    %41 = arith.addf %35, %40 : vector<64x64xf32>
    %c1_47 = arith.constant 1 : index
    %c1_48 = arith.constant 1 : index
    %c0_49 = arith.constant 0 : index
    %42 = vector.load %arg7[%c1_47, %c1_48, %c0_49] : memref<10x10x48xbf16, #tpu.memory_space<vmem>>, vector<8x8x48xbf16>
    %43 = vector.shape_cast %42 : vector<8x8x48xbf16> to vector<64x48xbf16>
    %c4 = arith.constant 4 : index
    %c0_50 = arith.constant 0 : index
    %c0_51 = arith.constant 0 : index
    %44 = vector.load %arg4[%c4, %c0_50, %c0_51] : memref<9x48x64xbf16, #tpu.memory_space<vmem>>, vector<1x48x64xbf16>
    %45 = vector.shape_cast %44 : vector<1x48x64xbf16> to vector<48x64xbf16>
    %cst_52 = arith.constant dense<0.000000e+00> : vector<64x64xf32>
    %46 = tpu.matmul %43, %45, %cst_52 {dimension_numbers = #tpu.dot_dimension_numbers<[1], [0], [0], [1], [0, 0, 1, 1], [], []>} : vector<64x48xbf16>, vector<48x64xbf16>, vector<64x64xf32> -> vector<64x64xf32>
    %47 = arith.addf %41, %46 : vector<64x64xf32>
    %c1_53 = arith.constant 1 : index
    %c2_54 = arith.constant 2 : index
    %c0_55 = arith.constant 0 : index
    %48 = vector.load %arg7[%c1_53, %c2_54, %c0_55] : memref<10x10x48xbf16, #tpu.memory_space<vmem>>, vector<8x8x48xbf16>
    %49 = vector.shape_cast %48 : vector<8x8x48xbf16> to vector<64x48xbf16>
    %c5 = arith.constant 5 : index
    %c0_56 = arith.constant 0 : index
    %c0_57 = arith.constant 0 : index
    %50 = vector.load %arg4[%c5, %c0_56, %c0_57] : memref<9x48x64xbf16, #tpu.memory_space<vmem>>, vector<1x48x64xbf16>
    %51 = vector.shape_cast %50 : vector<1x48x64xbf16> to vector<48x64xbf16>
    %cst_58 = arith.constant dense<0.000000e+00> : vector<64x64xf32>
    %52 = tpu.matmul %49, %51, %cst_58 {dimension_numbers = #tpu.dot_dimension_numbers<[1], [0], [0], [1], [0, 0, 1, 1], [], []>} : vector<64x48xbf16>, vector<48x64xbf16>, vector<64x64xf32> -> vector<64x64xf32>
    %53 = arith.addf %47, %52 : vector<64x64xf32>
    %c2_59 = arith.constant 2 : index
    %c0_60 = arith.constant 0 : index
    %c0_61 = arith.constant 0 : index
    %54 = vector.load %arg7[%c2_59, %c0_60, %c0_61] : memref<10x10x48xbf16, #tpu.memory_space<vmem>>, vector<8x8x48xbf16>
    %55 = vector.shape_cast %54 : vector<8x8x48xbf16> to vector<64x48xbf16>
    %c6 = arith.constant 6 : index
    %c0_62 = arith.constant 0 : index
    %c0_63 = arith.constant 0 : index
    %56 = vector.load %arg4[%c6, %c0_62, %c0_63] : memref<9x48x64xbf16, #tpu.memory_space<vmem>>, vector<1x48x64xbf16>
    %57 = vector.shape_cast %56 : vector<1x48x64xbf16> to vector<48x64xbf16>
    %cst_64 = arith.constant dense<0.000000e+00> : vector<64x64xf32>
    %58 = tpu.matmul %55, %57, %cst_64 {dimension_numbers = #tpu.dot_dimension_numbers<[1], [0], [0], [1], [0, 0, 1, 1], [], []>} : vector<64x48xbf16>, vector<48x64xbf16>, vector<64x64xf32> -> vector<64x64xf32>
    %59 = arith.addf %53, %58 : vector<64x64xf32>
    %c2_65 = arith.constant 2 : index
    %c1_66 = arith.constant 1 : index
    %c0_67 = arith.constant 0 : index
    %60 = vector.load %arg7[%c2_65, %c1_66, %c0_67] : memref<10x10x48xbf16, #tpu.memory_space<vmem>>, vector<8x8x48xbf16>
    %61 = vector.shape_cast %60 : vector<8x8x48xbf16> to vector<64x48xbf16>
    %c7 = arith.constant 7 : index
    %c0_68 = arith.constant 0 : index
    %c0_69 = arith.constant 0 : index
    %62 = vector.load %arg4[%c7, %c0_68, %c0_69] : memref<9x48x64xbf16, #tpu.memory_space<vmem>>, vector<1x48x64xbf16>
    %63 = vector.shape_cast %62 : vector<1x48x64xbf16> to vector<48x64xbf16>
    %cst_70 = arith.constant dense<0.000000e+00> : vector<64x64xf32>
    %64 = tpu.matmul %61, %63, %cst_70 {dimension_numbers = #tpu.dot_dimension_numbers<[1], [0], [0], [1], [0, 0, 1, 1], [], []>} : vector<64x48xbf16>, vector<48x64xbf16>, vector<64x64xf32> -> vector<64x64xf32>
    %65 = arith.addf %59, %64 : vector<64x64xf32>
    %c2_71 = arith.constant 2 : index
    %c2_72 = arith.constant 2 : index
    %c0_73 = arith.constant 0 : index
    %66 = vector.load %arg7[%c2_71, %c2_72, %c0_73] : memref<10x10x48xbf16, #tpu.memory_space<vmem>>, vector<8x8x48xbf16>
    %67 = vector.shape_cast %66 : vector<8x8x48xbf16> to vector<64x48xbf16>
    %c8 = arith.constant 8 : index
    %c0_74 = arith.constant 0 : index
    %c0_75 = arith.constant 0 : index
    %68 = vector.load %arg4[%c8, %c0_74, %c0_75] : memref<9x48x64xbf16, #tpu.memory_space<vmem>>, vector<1x48x64xbf16>
    %69 = vector.shape_cast %68 : vector<1x48x64xbf16> to vector<48x64xbf16>
    %cst_76 = arith.constant dense<0.000000e+00> : vector<64x64xf32>
    %70 = tpu.matmul %67, %69, %cst_76 {dimension_numbers = #tpu.dot_dimension_numbers<[1], [0], [0], [1], [0, 0, 1, 1], [], []>} : vector<64x48xbf16>, vector<48x64xbf16>, vector<64x64xf32> -> vector<64x64xf32>
    %71 = arith.addf %65, %70 : vector<64x64xf32>
    %c0_77 = arith.constant 0 : index
    %c0_78 = arith.constant 0 : index
    %c0_79 = arith.constant 0 : index
    %72 = vector.load %arg5[%c0_77, %c0_78, %c0_79] : memref<1x64x64xf32, #tpu.memory_space<vmem>>, vector<1x64x64xf32>
    %73 = vector.shape_cast %72 : vector<1x64x64xf32> to vector<64x64xf32>
    %74 = vector.shape_cast %71 : vector<64x64xf32> to vector<1x64x64xf32>
    tpu.vector_store %arg5[%c0_77, %c0_78, %c0_79], %74 {strides = array<i32>} : memref<1x64x64xf32, #tpu.memory_space<vmem>>, vector<1x64x64xf32>,
    %cst_80 = arith.constant dense<0.000000e+00> : vector<64xf32>
    %75 = vector.multi_reduction <add>, %71, %cst_80 [0] : vector<64x64xf32> to vector<64xf32>
    %76 = vector.shape_cast %75 : vector<64xf32> to vector<1x64xf32>
    %77 = arith.mulf %71, %71 : vector<64x64xf32>
    %cst_81 = arith.constant dense<0.000000e+00> : vector<64xf32>
    %78 = vector.multi_reduction <add>, %77, %cst_81 [0] : vector<64x64xf32> to vector<64xf32>
    %79 = vector.shape_cast %78 : vector<64xf32> to vector<1x64xf32>
    %80 = tpu.concatenate %76, %79 in 0 : vector<1x64xf32>, vector<1x64xf32> -> vector<2x64xf32>
    %c0_82 = arith.constant 0 : index
    %c0_83 = arith.constant 0 : index
    %c0_84 = arith.constant 0 : index
    %81 = vector.load %arg6[%c0_82, %c0_83, %c0_84] : memref<1x2x64xf32, #tpu.memory_space<vmem>>, vector<1x2x64xf32>
    %82 = vector.shape_cast %81 : vector<1x2x64xf32> to vector<2x64xf32>
    %83 = vector.shape_cast %80 : vector<2x64xf32> to vector<1x2x64xf32>
    tpu.vector_store %arg6[%c0_82, %c0_83, %c0_84], %83 {strides = array<i32>} : memref<1x2x64xf32, #tpu.memory_space<vmem>>, vector<1x2x64xf32>,
    return
  }
  func.func @transform_0(%arg0: i32) -> (i32, i32, i32) {
    %c0_i32 = arith.constant 0 : i32
    %c0_i32_0 = arith.constant 0 : i32
    %c0_i32_1 = arith.constant 0 : i32
    return %arg0, %c0_i32, %c0_i32_0 : i32, i32, i32
  }
  func.func @transform_1(%arg0: i32) -> (i32, i32) {
    %c0_i32 = arith.constant 0 : i32
    %c0_i32_0 = arith.constant 0 : i32
    %c0_i32_1 = arith.constant 0 : i32
    return %c0_i32, %c0_i32_0 : i32, i32
  }
  func.func @transform_2(%arg0: i32) -> (i32, i32) {
    %c0_i32 = arith.constant 0 : i32
    %c0_i32_0 = arith.constant 0 : i32
    %c0_i32_1 = arith.constant 0 : i32
    return %c0_i32, %c0_i32_0 : i32, i32
  }
  func.func @transform_3(%arg0: i32) -> (i32, i32, i32) {
    %c0_i32 = arith.constant 0 : i32
    %c0_i32_0 = arith.constant 0 : i32
    %c0_i32_1 = arith.constant 0 : i32
    %c0_i32_2 = arith.constant 0 : i32
    return %c0_i32, %c0_i32_0, %c0_i32_1 : i32, i32, i32
  }
  func.func @transform_4(%arg0: i32) -> (i32, i32, i32) {
    %c0_i32 = arith.constant 0 : i32
    %c0_i32_0 = arith.constant 0 : i32
    %c0_i32_1 = arith.constant 0 : i32
    return %arg0, %c0_i32, %c0_i32_0 : i32, i32, i32
  }
  func.func @transform_5(%arg0: i32) -> (i32, i32, i32) {
    %c0_i32 = arith.constant 0 : i32
    %c0_i32_0 = arith.constant 0 : i32
    %c0_i32_1 = arith.constant 0 : i32
    return %arg0, %c0_i32, %c0_i32_0 : i32, i32, i32
  }
}

module attributes {stable_mosaic.version = 11 : i64} {
  func.func @_proj_kernel(%arg0: i32, %arg1: memref<1x64x320xf32, #tpu.memory_space<vmem>>, %arg2: memref<1x64x128xf32, #tpu.memory_space<vmem>>, %arg3: memref<1x64x32xf32, #tpu.memory_space<vmem>>, %arg4: memref<1x64x64xf32, #tpu.memory_space<vmem>>, %arg5: memref<1x128xf32, #tpu.memory_space<vmem>>, %arg6: memref<1x128xf32, #tpu.memory_space<vmem>>, %arg7: memref<1x32xf32, #tpu.memory_space<vmem>>, %arg8: memref<1x32xf32, #tpu.memory_space<vmem>>, %arg9: memref<1x64xf32, #tpu.memory_space<vmem>>, %arg10: memref<1x64xf32, #tpu.memory_space<vmem>>, %arg11: memref<128x320xbf16, #tpu.memory_space<vmem>>, %arg12: memref<32x320xbf16, #tpu.memory_space<vmem>>, %arg13: memref<64x320xbf16, #tpu.memory_space<vmem>>, %arg14: memref<1x320xf32, #tpu.memory_space<vmem>>, %arg15: memref<1x64x320xf32, #tpu.memory_space<vmem>>) attributes {dimension_semantics = [#tpu.dimension_semantics<parallel>], iteration_bounds = array<i64: 2>, scalar_prefetch = 0 : i64, scratch_operands = 0 : i64, tpu.core_type = #tpu.core_type<tc>, window_params = [{transform_indices = @transform_0, window_bounds = array<i64: 1, 64, 320>}, {transform_indices = @transform_1, window_bounds = array<i64: 1, 64, 128>}, {transform_indices = @transform_2, window_bounds = array<i64: 1, 64, 32>}, {transform_indices = @transform_3, window_bounds = array<i64: 1, 64, 64>}, {pipeline_mode = #tpu.pipeline_mode<synchronous>, transform_indices = @transform_4, window_bounds = array<i64: 1, 128>}, {pipeline_mode = #tpu.pipeline_mode<synchronous>, transform_indices = @transform_5, window_bounds = array<i64: 1, 128>}, {pipeline_mode = #tpu.pipeline_mode<synchronous>, transform_indices = @transform_6, window_bounds = array<i64: 1, 32>}, {pipeline_mode = #tpu.pipeline_mode<synchronous>, transform_indices = @transform_7, window_bounds = array<i64: 1, 32>}, {pipeline_mode = #tpu.pipeline_mode<synchronous>, transform_indices = @transform_8, window_bounds = array<i64: 1, 64>}, {pipeline_mode = #tpu.pipeline_mode<synchronous>, transform_indices = @transform_9, window_bounds = array<i64: 1, 64>}, {pipeline_mode = #tpu.pipeline_mode<synchronous>, transform_indices = @transform_10, window_bounds = array<i64: 128, 320>}, {pipeline_mode = #tpu.pipeline_mode<synchronous>, transform_indices = @transform_11, window_bounds = array<i64: 32, 320>}, {pipeline_mode = #tpu.pipeline_mode<synchronous>, transform_indices = @transform_12, window_bounds = array<i64: 64, 320>}, {pipeline_mode = #tpu.pipeline_mode<synchronous>, transform_indices = @transform_13, window_bounds = array<i64: 1, 320>}, {transform_indices = @transform_14, window_bounds = array<i64: 1, 64, 320>}]} {
    %c0 = arith.constant 0 : index
    %c0_0 = arith.constant 0 : index
    %c0_1 = arith.constant 0 : index
    %0 = vector.load %arg2[%c0, %c0_0, %c0_1] : memref<1x64x128xf32, #tpu.memory_space<vmem>>, vector<1x64x128xf32>
    %1 = vector.shape_cast %0 : vector<1x64x128xf32> to vector<64x128xf32>
    %c0_2 = arith.constant 0 : index
    %c0_3 = arith.constant 0 : index
    %2 = vector.load %arg5[%c0_2, %c0_3] : memref<1x128xf32, #tpu.memory_space<vmem>>, vector<1x128xf32>
    %3 = vector.broadcast %2 : vector<1x128xf32> to vector<64x128xf32>
    %4 = arith.mulf %1, %3 : vector<64x128xf32>
    %c0_4 = arith.constant 0 : index
    %c0_5 = arith.constant 0 : index
    %5 = vector.load %arg6[%c0_4, %c0_5] : memref<1x128xf32, #tpu.memory_space<vmem>>, vector<1x128xf32>
    %6 = vector.broadcast %5 : vector<1x128xf32> to vector<64x128xf32>
    %7 = arith.addf %4, %6 : vector<64x128xf32>
    %cst = arith.constant 0.000000e+00 : f32
    %8 = vector.broadcast %cst : f32 to vector<64x128xf32>
    %9 = arith.maximumf %7, %8 : vector<64x128xf32>
    %10 = arith.truncf %9 : vector<64x128xf32> to vector<64x128xbf16>
    %c0_6 = arith.constant 0 : index
    %c0_7 = arith.constant 0 : index
    %c0_8 = arith.constant 0 : index
    %11 = vector.load %arg3[%c0_6, %c0_7, %c0_8] : memref<1x64x32xf32, #tpu.memory_space<vmem>>, vector<1x64x32xf32>
    %12 = vector.shape_cast %11 : vector<1x64x32xf32> to vector<64x32xf32>
    %c0_9 = arith.constant 0 : index
    %c0_10 = arith.constant 0 : index
    %13 = vector.load %arg7[%c0_9, %c0_10] : memref<1x32xf32, #tpu.memory_space<vmem>>, vector<1x32xf32>
    %14 = vector.broadcast %13 : vector<1x32xf32> to vector<64x32xf32>
    %15 = arith.mulf %12, %14 : vector<64x32xf32>
    %c0_11 = arith.constant 0 : index
    %c0_12 = arith.constant 0 : index
    %16 = vector.load %arg8[%c0_11, %c0_12] : memref<1x32xf32, #tpu.memory_space<vmem>>, vector<1x32xf32>
    %17 = vector.broadcast %16 : vector<1x32xf32> to vector<64x32xf32>
    %18 = arith.addf %15, %17 : vector<64x32xf32>
    %cst_13 = arith.constant 0.000000e+00 : f32
    %19 = vector.broadcast %cst_13 : f32 to vector<64x32xf32>
    %20 = arith.maximumf %18, %19 : vector<64x32xf32>
    %21 = arith.truncf %20 : vector<64x32xf32> to vector<64x32xbf16>
    %c0_14 = arith.constant 0 : index
    %c0_15 = arith.constant 0 : index
    %c0_16 = arith.constant 0 : index
    %22 = vector.load %arg4[%c0_14, %c0_15, %c0_16] : memref<1x64x64xf32, #tpu.memory_space<vmem>>, vector<1x64x64xf32>
    %23 = vector.shape_cast %22 : vector<1x64x64xf32> to vector<64x64xf32>
    %c0_17 = arith.constant 0 : index
    %c0_18 = arith.constant 0 : index
    %24 = vector.load %arg9[%c0_17, %c0_18] : memref<1x64xf32, #tpu.memory_space<vmem>>, vector<1x64xf32>
    %25 = vector.broadcast %24 : vector<1x64xf32> to vector<64x64xf32>
    %26 = arith.mulf %23, %25 : vector<64x64xf32>
    %c0_19 = arith.constant 0 : index
    %c0_20 = arith.constant 0 : index
    %27 = vector.load %arg10[%c0_19, %c0_20] : memref<1x64xf32, #tpu.memory_space<vmem>>, vector<1x64xf32>
    %28 = vector.broadcast %27 : vector<1x64xf32> to vector<64x64xf32>
    %29 = arith.addf %26, %28 : vector<64x64xf32>
    %cst_21 = arith.constant 0.000000e+00 : f32
    %30 = vector.broadcast %cst_21 : f32 to vector<64x64xf32>
    %31 = arith.maximumf %29, %30 : vector<64x64xf32>
    %32 = arith.truncf %31 : vector<64x64xf32> to vector<64x64xbf16>
    %c0_22 = arith.constant 0 : index
    %c0_23 = arith.constant 0 : index
    %33 = vector.load %arg11[%c0_22, %c0_23] : memref<128x320xbf16, #tpu.memory_space<vmem>>, vector<128x320xbf16>
    %cst_24 = arith.constant dense<0.000000e+00> : vector<64x320xf32>
    %34 = tpu.matmul %10, %33, %cst_24 {dimension_numbers = #tpu.dot_dimension_numbers<[1], [0], [0], [1], [0, 0, 1, 1], [], []>} : vector<64x128xbf16>, vector<128x320xbf16>, vector<64x320xf32> -> vector<64x320xf32>
    %c0_25 = arith.constant 0 : index
    %c0_26 = arith.constant 0 : index
    %35 = vector.load %arg12[%c0_25, %c0_26] : memref<32x320xbf16, #tpu.memory_space<vmem>>, vector<32x320xbf16>
    %cst_27 = arith.constant dense<0.000000e+00> : vector<64x320xf32>
    %36 = tpu.matmul %21, %35, %cst_27 {dimension_numbers = #tpu.dot_dimension_numbers<[1], [0], [0], [1], [0, 0, 1, 1], [], []>} : vector<64x32xbf16>, vector<32x320xbf16>, vector<64x320xf32> -> vector<64x320xf32>
    %37 = arith.addf %34, %36 : vector<64x320xf32>
    %c0_28 = arith.constant 0 : index
    %c0_29 = arith.constant 0 : index
    %38 = vector.load %arg13[%c0_28, %c0_29] : memref<64x320xbf16, #tpu.memory_space<vmem>>, vector<64x320xbf16>
    %cst_30 = arith.constant dense<0.000000e+00> : vector<64x320xf32>
    %39 = tpu.matmul %32, %38, %cst_30 {dimension_numbers = #tpu.dot_dimension_numbers<[1], [0], [0], [1], [0, 0, 1, 1], [], []>} : vector<64x64xbf16>, vector<64x320xbf16>, vector<64x320xf32> -> vector<64x320xf32>
    %40 = arith.addf %37, %39 : vector<64x320xf32>
    %c0_31 = arith.constant 0 : index
    %c0_32 = arith.constant 0 : index
    %41 = vector.load %arg14[%c0_31, %c0_32] : memref<1x320xf32, #tpu.memory_space<vmem>>, vector<1x320xf32>
    %42 = vector.broadcast %41 : vector<1x320xf32> to vector<64x320xf32>
    %43 = arith.addf %40, %42 : vector<64x320xf32>
    %c0_33 = arith.constant 0 : index
    %c0_34 = arith.constant 0 : index
    %c0_35 = arith.constant 0 : index
    %44 = vector.load %arg1[%c0_33, %c0_34, %c0_35] : memref<1x64x320xf32, #tpu.memory_space<vmem>>, vector<1x64x320xf32>
    %45 = vector.shape_cast %44 : vector<1x64x320xf32> to vector<64x320xf32>
    %cst_36 = arith.constant 1.000000e+00 : f32
    %46 = vector.broadcast %cst_36 : f32 to vector<64x320xf32>
    %47 = arith.mulf %46, %43 : vector<64x320xf32>
    %48 = arith.addf %45, %47 : vector<64x320xf32>
    %cst_37 = arith.constant 0.000000e+00 : f32
    %49 = vector.broadcast %cst_37 : f32 to vector<64x320xf32>
    %50 = arith.maximumf %48, %49 : vector<64x320xf32>
    %c0_38 = arith.constant 0 : index
    %c0_39 = arith.constant 0 : index
    %c0_40 = arith.constant 0 : index
    %51 = vector.load %arg15[%c0_38, %c0_39, %c0_40] : memref<1x64x320xf32, #tpu.memory_space<vmem>>, vector<1x64x320xf32>
    %52 = vector.shape_cast %51 : vector<1x64x320xf32> to vector<64x320xf32>
    %53 = vector.shape_cast %50 : vector<64x320xf32> to vector<1x64x320xf32>
    tpu.vector_store %arg15[%c0_38, %c0_39, %c0_40], %53 {strides = array<i32>} : memref<1x64x320xf32, #tpu.memory_space<vmem>>, vector<1x64x320xf32>,
    return
  }
  func.func @transform_0(%arg0: i32) -> (i32, i32, i32) {
    %c0_i32 = arith.constant 0 : i32
    %c0_i32_0 = arith.constant 0 : i32
    %c0_i32_1 = arith.constant 0 : i32
    return %arg0, %c0_i32, %c0_i32_0 : i32, i32, i32
  }
  func.func @transform_1(%arg0: i32) -> (i32, i32, i32) {
    %c0_i32 = arith.constant 0 : i32
    %c0_i32_0 = arith.constant 0 : i32
    %c0_i32_1 = arith.constant 0 : i32
    return %arg0, %c0_i32, %c0_i32_0 : i32, i32, i32
  }
  func.func @transform_2(%arg0: i32) -> (i32, i32, i32) {
    %c0_i32 = arith.constant 0 : i32
    %c0_i32_0 = arith.constant 0 : i32
    %c0_i32_1 = arith.constant 0 : i32
    return %arg0, %c0_i32, %c0_i32_0 : i32, i32, i32
  }
  func.func @transform_3(%arg0: i32) -> (i32, i32, i32) {
    %c0_i32 = arith.constant 0 : i32
    %c0_i32_0 = arith.constant 0 : i32
    %c0_i32_1 = arith.constant 0 : i32
    return %arg0, %c0_i32, %c0_i32_0 : i32, i32, i32
  }
  func.func @transform_4(%arg0: i32) -> (i32, i32) {
    %c0_i32 = arith.constant 0 : i32
    %c0_i32_0 = arith.constant 0 : i32
    %c0_i32_1 = arith.constant 0 : i32
    return %c0_i32, %c0_i32_0 : i32, i32
  }
  func.func @transform_5(%arg0: i32) -> (i32, i32) {
    %c0_i32 = arith.constant 0 : i32
    %c0_i32_0 = arith.constant 0 : i32
    %c0_i32_1 = arith.constant 0 : i32
    return %c0_i32, %c0_i32_0 : i32, i32
  }
  func.func @transform_6(%arg0: i32) -> (i32, i32) {
    %c0_i32 = arith.constant 0 : i32
    %c0_i32_0 = arith.constant 0 : i32
    %c0_i32_1 = arith.constant 0 : i32
    return %c0_i32, %c0_i32_0 : i32, i32
  }
  func.func @transform_7(%arg0: i32) -> (i32, i32) {
    %c0_i32 = arith.constant 0 : i32
    %c0_i32_0 = arith.constant 0 : i32
    %c0_i32_1 = arith.constant 0 : i32
    return %c0_i32, %c0_i32_0 : i32, i32
  }
  func.func @transform_8(%arg0: i32) -> (i32, i32) {
    %c0_i32 = arith.constant 0 : i32
    %c0_i32_0 = arith.constant 0 : i32
    %c0_i32_1 = arith.constant 0 : i32
    return %c0_i32, %c0_i32_0 : i32, i32
  }
  func.func @transform_9(%arg0: i32) -> (i32, i32) {
    %c0_i32 = arith.constant 0 : i32
    %c0_i32_0 = arith.constant 0 : i32
    %c0_i32_1 = arith.constant 0 : i32
    return %c0_i32, %c0_i32_0 : i32, i32
  }
  func.func @transform_10(%arg0: i32) -> (i32, i32) {
    %c0_i32 = arith.constant 0 : i32
    %c0_i32_0 = arith.constant 0 : i32
    %c0_i32_1 = arith.constant 0 : i32
    return %c0_i32, %c0_i32_0 : i32, i32
  }
  func.func @transform_11(%arg0: i32) -> (i32, i32) {
    %c0_i32 = arith.constant 0 : i32
    %c0_i32_0 = arith.constant 0 : i32
    %c0_i32_1 = arith.constant 0 : i32
    return %c0_i32, %c0_i32_0 : i32, i32
  }
  func.func @transform_12(%arg0: i32) -> (i32, i32) {
    %c0_i32 = arith.constant 0 : i32
    %c0_i32_0 = arith.constant 0 : i32
    %c0_i32_1 = arith.constant 0 : i32
    return %c0_i32, %c0_i32_0 : i32, i32
  }
  func.func @transform_13(%arg0: i32) -> (i32, i32) {
    %c0_i32 = arith.constant 0 : i32
    %c0_i32_0 = arith.constant 0 : i32
    %c0_i32_1 = arith.constant 0 : i32
    return %c0_i32, %c0_i32_0 : i32, i32
  }
  func.func @transform_14(%arg0: i32) -> (i32, i32, i32) {
    %c0_i32 = arith.constant 0 : i32
    %c0_i32_0 = arith.constant 0 : i32
    %c0_i32_1 = arith.constant 0 : i32
    return %arg0, %c0_i32, %c0_i32_0 : i32, i32, i32
  }
}

</mosaic_0001>

<bundles_post_ra>
// kernel: _lambda_.4
= control target key start
LH: loop header
LB: loop body
LE: loop exit
PB: predicated region body
PF: predicated region fallthrough
CT: control target
= control target key end

     0   :  { %9 = vsyncpa [#allocation3], 0  ;;  %s1201_s0 = inlined_call_operand.hbm [shape: f32[2,64,320], index: 0, kind: input, shape index: {}]   ;;  %s1202_s1 = inlined_call_operand.hbm [shape: bf16[320,128], index: 1, kind: input, shape index: {}]   ;;  %s1203_s2 = inlined_call_operand.vmem [shape: f32[2,64,128], index: 2, kind: output, shape index: {0}]   ;;  %s1204_s3 = inlined_call_operand.vmem [shape: f32[2,2,128], index: 3, kind: output, shape index: {1}]  }
   0x1   :  { %11 = vsyncpa [#allocation3 + $0x1], 0 }
   0x2   :  { %12 = vsyncpa [#allocation5], 0  ;;  %s1012_s12 = smov 0   ;;  %s1014_s13 = smov 0  }
   0x3   :  { %s1016_s14 = smov 0   ;;  %s1018_s15 = smov 0  }
   0x4 LB: > { %s1031_s16 = sadd.s32 4294967295, %s984_s15   ;;  %p38_p0 = scmp.ne.s32.totalorder %s976_s13, %s972_s12  ;;  %s984_s15 = sphi %s1018_s15, %s1219_s15   ;;  %s980_s14 = sphi %s1016_s14, %s1218_s14   ;;  %s976_s13 = sphi %s1014_s13, %s1217_s13   ;;  %s972_s12 = sphi %s1012_s12, %s1216_s12  }
   0x5   : > { %p1205_p1 = scmp.eq.s32.totalorder %s1031_s16, 0  ;;  %p711_p2 = scmp.ge.s32.totalorder %s984_s15, 1 }
   0x6   : > { %p122_p3 = scmp.lt.s32.totalorder %s984_s15, 3  ;;  %s986_s19 = smov [#allocation4]  }
   0x7   : > { %p1039_p4 = por %p1205_p1, %p38_p0  ;;  %s134_s20 = sshll.u32 %s986_s19, 4  ;;  %s135_s20 = int_to_ptr.vmem [resolvable:$true] %s134_s20 }
   0x8   : > { %p1043_p5 = pnand %p711_p2, %p122_p3  ;;  %s1056_s22 = sadd.s32 1, %s984_s15  }
   0x9   : > { %s1208_s17 = scalar_select %p1039_p4, 1, 0 }
   0xa   : > { %s1209_s18 = scalar_select %p1043_p5, 1, 0 }
   0xb   : > { %p820_p6 = pneg %p1043_p5  ;;  %s25_s23 = sadd.s32 1, %s980_s14 }
   0xc   : > { %s22_s24 = ssub.s32 %s984_s15, %s1056_s22  ;;  %s888_s27 = scalar_lea.hbm %s1202_s1, 2560 }
   0xd   : > { %p1051_p7 = pnand %p820_p6, %p1205_p1  ;;  %p889_p8 = scmp.ne.s32.totalorder %s1202_s1, %s888_s27 }
   0xe   : > { %p895_p12 = scmp.lt.u32.totalorder %s888_s27, %s1202_s1 }
   0xf   : > { %p890_p9 = pneg %p1051_p7 }
  0x11   : > { %p891_p10 = pnand %p890_p9, %p889_p8 }
  0x13   : > { %p892_p11 = pneg %p891_p10 }
  0x15   : > { %p897_p13 = pnand %p895_p12, %p892_p11 }
  0x17   : > { %900 = shalt.err (!%p897_p13)
}
  0x18   : > { %s901_s5 = scalar_lea.vmem %s135_s20, 2560  ;;  %p909_p6 = scmp.lt.s32.totalorder %s135_s20, %s135_s20 }
  0x19   : > { %p902_p0 = scmp.ne.s32.totalorder %s135_s20, %s901_s5  ;;  %p910_p1 = scmp.lt.s32.totalorder %s901_s5, %s901_s5 }
  0x1b   : > { %p904_p2 = pnand %p902_p0, %p890_p9  ;;  %p911_p4 = por %p910_p1, %p909_p6 }
  0x1d   : > { %p905_p3 = pneg %p904_p2 }
  0x1f   : > { %p912_p5 = pnand %p911_p4, %p905_p3 }
  0x21   : > { %915 = shalt.err (!%p912_p5)
}
  0x22   : > { %s987_s6 = smov 64   ;;  %s988_s7 = smov 4  }
  0x23   : > { %823 = dma.hbm_to_vmem [thread:$0]  (!%p1051_p7), %s1202_s1, 2560, %s135_s20, [#allocation5], %s987_s6, %s987_s6, %s988_s7  }
  0x24   : > { %p23_p8 = scmp.eq.s32.totalorder %s22_s24, 0  ;;  %p32_p9 = scmp.ne.s32.totalorder %s980_s14, %s976_s13 }
  0x25   : > { %p33_p1 = scmp.eq.s32.totalorder %s984_s15, 0  ;;  %p829_p4 = scmp.lt.s32.totalorder %s984_s15, 2 }
  0x26   : > { %s1082_s10 = scalar_select %p23_p8, %s980_s14, %s25_s23  }
  0x27   : > { %p34_p5 = por %p33_p1, %p32_p9  ;;  %s148_s11 = sand.u32 1, %s980_s14  }
  0x28   : > { %s811_s12 = smul.u32 192, %s148_s11  ;;  %s921_s30 = scalar_lea.hbm %s1201_s0, 6144 }
  0x29   : > { %s812_s19 = smul.u32 3072, %s984_s15  ;;  %p1086_p10 = pnand %p829_p4, %p34_p5 }
  0x2a   : > { %s152_s23 = scalar_lea.vmem [#allocation2], %s811_s12  ;;  %s1097_s15 = scalar_lea.sflag [#allocation3], %s148_s11 }
  0x2b   : > { %s1093_s20 = scalar_lea.hbm %s1201_s0, %s812_s19  ;;  %s159_s24 = sshll.u32 %s152_s23, 4  ;;  %s1095_s24 = int_to_ptr.vmem [resolvable:$true] %s159_s24 }
  0x2c   : > { %s916_s27 = scalar_lea.hbm %s1093_s20, 3072  ;;  %p918_p11 = pneg %p1086_p10 }
  0x2d   : > { %p917_p7 = scmp.ne.s32.totalorder %s1093_s20, %s916_s27  ;;  %p922_p0 = scmp.lt.u32.totalorder %s1093_s20, %s1201_s0 }
  0x2e   : > { %p923_p2 = scmp.lt.u32.totalorder %s921_s30, %s916_s27  ;;  %p925_p6 = scmp.lt.u32.totalorder %s916_s27, %s1093_s20 }
  0x2f   : > { %p919_p12 = pnand %p918_p11, %p917_p7 }
  0x30   : > { %p924_p3 = por %p923_p2, %p922_p0 }
  0x31   : > { %p920_p13 = pneg %p919_p12 }
  0x32   : > { %p926_p8 = por %p925_p6, %p924_p3 }
  0x34   : > { %p927_p9 = pnand %p926_p8, %p920_p13 }
  0x36   : > { %930 = shalt.err (!%p927_p9)
}
  0x37   : > { %s931_s6 = scalar_lea.vmem %s1095_s24, 3072  ;;  %s989_s7 = smov [#allocation2]  }
  0x38   : > { %p932_p1 = scmp.ne.s32.totalorder %s1095_s24, %s931_s6  ;;  %s936_s8 = sshll.u32 %s989_s7, 4  ;;  %s937_s8 = int_to_ptr.vmem [resolvable:$false] %s936_s8 }
  0x39   : > { %s938_s9 = scalar_lea.vmem %s937_s8, 6144  ;;  %p939_p7 = scmp.lt.s32.totalorder %s1095_s24, %s937_s8 }
  0x3a   : > { %p934_p4 = pnand %p932_p1, %p918_p11  ;;  %p940_p12 = scmp.lt.s32.totalorder %s938_s9, %s931_s6 }
  0x3c   : > { %p935_p5 = pneg %p934_p4  ;;  %p941_p0 = por %p940_p12, %p939_p7 }
  0x3e   : > { %p942_p2 = pnand %p941_p0, %p935_p5 }
  0x40   : > { %945 = shalt.err (!%p942_p2)
}
  0x41   : > { %s990_s11 = smov 384   ;;  %s991_s12 = smov 24  }
  0x42   : > { %827 = dma.hbm_to_vmem [thread:$0]  (!%p1086_p10), %s1093_s20, 3072, %s1095_s24, %s1097_s15, %s990_s11, %s990_s11, %s991_s12  }
  0x43   : > { %p1212_p11 = scmp.ne.s32.totalorder %s1209_s18, 0 }
  0x44   : > { %s173_s19 = sand.u32 (!%p1212_p11), 1, %s976_s13   ;;  %p1213_p13 = scmp.ne.s32.totalorder (!%p1212_p11), %s1208_s17, 0 }
  0x45   : > { %171 = sbr.rel (%p1212_p11) target bundleno = 374 (0x176), region = 28  ;;  %s174_s21 = scalar_lea.sflag (!%p1212_p11), [#allocation3], %s173_s19 }
  0x46   : > { %s813_s26 = smul.u32 (!%p1212_p11), 192, %s173_s19 }
  0x48   : > { %s1128_s23 = scalar_lea.vmem (!%p1212_p11), [#allocation2], %s813_s26 }
  0x4c   : > { %963 = dma.done.wait (%p1213_p13), %s174_s21, 3072  }
  0x4d   : > { %965 = vsyncadd (%p1213_p13), %s174_s21, 4294964224  ;;  %p1214_p3 = scmp.eq.s32.totalorder %s1031_s16, 0 }
  0x4f   : > { %967 = dma.done.wait (%p1214_p3), [#allocation5], 2560   ;;  %p1215_p10 = pmov %p1214_p3 }
  0x50   : > { %v868_v0 = vld [vmem:[#allocation4 + $0x40] sm:$0xff]   ;;  %v870_v2 = vld [vmem:[#allocation4 + $0x48] sm:$0xff]   ;;  %v872_v4 = vld [vmem:[#allocation4 + $0x50] sm:$0xff]   ;;  %vm414_vm0 = vcmask 523264   ;;  %p208_p6 = scmp.lt.s32.totalorder %s1031_s16, 1  ;;  %vm599_vm1 = vcmask 1040384  }
  0x51   : > { %969 = vsyncadd (%p1215_p10), [#allocation5], 4294964736  ;;  %v869_v1 = vld [vmem:[#allocation4] sm:$0xff]   ;;  %747 = vmatprep.subr.bf16.mxu0 %v868_v0  ;;  %v871_v3 = vld [vmem:[#allocation4 + $0x8] sm:$0xff]  }
  0x52   : > { %748 = vmatpush3.bf16.msra.mxu0 %v869_v1  ;;  %v873_v5 = vld [vmem:[#allocation4 + $0x10] sm:$0xff]   ;;  %v874_v6 = vld [vmem:[#allocation4 + $0x58] sm:$0xff]   ;;  %v878_v7 = vld [vmem:[#allocation4 + $0x80] sm:$0xff]   ;;  %s1221_s16 = smov (!%p208_p6, %s1031_s16), 1 }
  0x53   : > { %749 = vmatprep.subr.bf16.mxu0 %v870_v2  ;;  %v875_v8 = vld [vmem:[#allocation4 + $0x18] sm:$0xff]   ;;  %v876_v9 = vld [vmem:[#allocation4 + $0x60] sm:$0xff]   ;;  %795 = vmatprep.subr.bf16.mxu1 %v878_v7  ;;  %v881_v10 = vld [vmem:[#allocation4 + $0x88] sm:$0xff]   ;;  %s746_s17 = sshll.u32 %s1221_s16, 6  ;;  %s719_s24 = sshll.u32 %s1221_s16, 1 }
  0x54   : > { %796 = vmatpush3.bf16.msra.mxu1 %v878_v7  ;;  %v877_v11 = vld [vmem:[#allocation4 + $0x20] sm:$0xff]   ;;  %v879_v12 = vld [vmem:[#allocation4 + $0x68] sm:$0xff]   ;;  %v884_v13 = vld [vmem:[#allocation4 + $0x90] sm:$0xff]   ;;  %s1174_s20 = scalar_lea.vmem %s1203_s2, %s746_s17  ;;  %s216_s28 = scalar_lea.vmem %s1204_s3, %s719_s24 }
  0x55   : > { %797 = vmatprep.subr.bf16.mxu1 %v881_v10  ;;  %v880_v14 = vld [vmem:[#allocation4 + $0x28] sm:$0xff]   ;;  %v887_v15 = vld [vmem:[#allocation4 + $0x98] sm:$0xff]   ;;  %v882_v16 = vld [vmem:[#allocation4 + $0x70] sm:$0xff]  }
  0x56   : > { %750 = vmatpush3.bf16.msra.mxu0 %v871_v3  ;;  %v219_v17 = vld [vmem:[%s1128_s23 + $0x8] sm:$0xff]  ;;  %v222_v18 = vld [vmem:[%s1128_s23 + $0x20] sm:$0xff]  ;;  %v220_v20 = vld [vmem:[%s1128_s23 + $0x10] sm:$0xff] }
  0x57   : > { %751 = vmatprep.subr.bf16.mxu0 %v872_v4  ;;  %v243_v19 = vpack.c.bf16 %v222_v18, %v219_v17  ;;  %v223_v21 = vld [vmem:[%s1128_s23 + $0x28] sm:$0xff]  ;;  %v226_v23 = vld [vmem:[%s1128_s23 + $0x40] sm:$0xff]  ;;  %v229_v24 = vld [vmem:[%s1128_s23 + $0x58] sm:$0xff] }
  0x58   : > { %798 = vmatpush3.bf16.msra.mxu1 %v881_v10  ;;  %v244_v22 = vpack.c.bf16 %v223_v21, %v220_v20  ;;  %v883_v25 = vld [vmem:[#allocation4 + $0x30] sm:$0xff]   ;;  %v885_v26 = vld [vmem:[#allocation4 + $0x78] sm:$0xff]   ;;  %v247_v27 = vpack.c.bf16 %v229_v24, %v226_v23  ;;  %v235_v29 = vld [vmem:[%s1128_s23 + $0x88] sm:$0xff] }
  0x59   : > { %799 = vmatprep.subr.bf16.mxu1 %v884_v13  ;;  %459 = vmatprep.mubr.bf16.mxu0 %v243_v19  ;;  %v232_v28 = vld [vmem:[%s1128_s23 + $0x70] sm:$0xff]  ;;  %v886_v31 = vld [vmem:[#allocation4 + $0x38] sm:$0xff]   ;;  %v218_v32 = vld [vmem:[%s1128_s23] sm:$0xff] }
  0x5a   : > { %752 = vmatpush3.bf16.msra.mxu0 %v873_v5  ;;  %803 = vmatprep.mubr.msk.bf16.mxu1 %vm414_vm0, %v244_v22  ;;  %v250_v30 = vpack.c.bf16 %v235_v29, %v232_v28  ;;  %v221_v33 = vld [vmem:[%s1128_s23 + $0x18] sm:$0xff]  ;;  %v228_v35 = vld [vmem:[%s1128_s23 + $0x50] sm:$0xff]  ;;  %v238_v36 = vld [vmem:[%s1128_s23 + $0xa0] sm:$0xff] }
  0x5b   : > { %753 = vmatprep.subr.bf16.mxu0 %v874_v6  ;;  %v225_v34 = vld [vmem:[%s1128_s23 + $0x38] sm:$0xff]  ;;  %v242_v38 = vpack.c.bf16 %v221_v33, %v218_v32  ;;  %v224_v41 = vld [vmem:[%s1128_s23 + $0x30] sm:$0xff]  ;;  %v227_v42 = vld [vmem:[%s1128_s23 + $0x48] sm:$0xff] }
  0x5c   : > { %800 = vmatpush3.bf16.msra.mxu1 %v884_v13  ;;  %v241_v37 = vld [vmem:[%s1128_s23 + $0xb8] sm:$0xff]  ;;  %v246_v39 = vpack.c.bf16 %v228_v35, %v225_v34  ;;  %v231_v43 = vld [vmem:[%s1128_s23 + $0x68] sm:$0xff]  ;;  %v234_v44 = vld [vmem:[%s1128_s23 + $0x80] sm:$0xff]  ;;  %v245_v45 = vpack.c.bf16 %v227_v42, %v224_v41 }
  0x5d   : > { %801 = vmatprep.subr.bf16.mxu1 %v887_v15  ;;  %v253_v40 = vpack.c.bf16 %v241_v37, %v238_v36  ;;  %v249_v46 = vpack.c.bf16 %v234_v44, %v231_v43  ;;  %v230_v47 = vld [vmem:[%s1128_s23 + $0x60] sm:$0xff]  ;;  %v233_v48 = vld [vmem:[%s1128_s23 + $0x78] sm:$0xff]  ;;  %v240_v50 = vld [vmem:[%s1128_s23 + $0xb0] sm:$0xff] }
  0x5e   : > { %754 = vmatpush3.bf16.msra.mxu0 %v875_v8  ;;  %v237_v49 = vld [vmem:[%s1128_s23 + $0x98] sm:$0xff]  ;;  %v248_v51 = vpack.c.bf16 %v233_v48, %v230_v47  ;;  %v236_v53 = vld [vmem:[%s1128_s23 + $0x90] sm:$0xff]  ;;  %v239_v54 = vld [vmem:[%s1128_s23 + $0xa8] sm:$0xff] }
  0x5f   : > { %755 = vmatprep.subr.bf16.mxu0 %v876_v9  ;;  %v252_v52 = vpack.c.bf16 %v240_v50, %v237_v49  ;;  %v251_v55 = vpack.c.bf16 %v239_v54, %v236_v53 }
  0x60   : > { %802 = vmatpush3.bf16.msra.mxu1 %v887_v15 }
  0x62   : > { %756 = vmatpush3.bf16.msra.mxu0 %v877_v11 }
  0x63   : > { %757 = vmatprep.subr.bf16.mxu0 %v879_v12  ;;  %804 = vmatmul.mubr.msk.bf16.vlgmr.msra.gmra.mrb[0].mxu1 %vm414_vm0, %v247_v27 }
  0x64   : > { %807 = vmatprep.mubr.msk.bf16.mxu1 %vm414_vm0, %v250_v30 }
  0x66   : > { %758 = vmatpush3.bf16.msra.mxu0 %v880_v14 }
  0x67   : > { %759 = vmatprep.subr.bf16.mxu0 %v882_v16 }
  0x6a   : > { %760 = vmatpush3.bf16.msra.mxu0 %v883_v25 }
  0x6b   : > { %761 = vmatprep.subr.bf16.mxu0 %v885_v26  ;;  %808 = vmatmul.mubr.msk.bf16.gmra.mrb[4].mxu1 %vm414_vm0, %v253_v40 }
  0x6e   : > { %762 = vmatpush3.bf16.msra.mxu0 %v886_v31 }
  0x71   : > { %460 = vmatmul.mubr.bf16.vlgmr.msra.gmra.mrb[0].mxu0 %v242_v38 }
  0x72   : > { %467 = vmatprep.mubr.bf16.mxu0 %v246_v39 }
  0x79   : > { %468 = vmatmul.mubr.bf16.gmra.mrb[4].mxu0 %v245_v45 }
  0x7a   : > { %475 = vmatprep.mubr.bf16.mxu0 %v249_v46 }
  0x81   : > { %476 = vmatmul.mubr.bf16.gmra.mrb[8].mxu0 %v248_v51 }
  0x82   : > { %483 = vmatprep.mubr.bf16.mxu0 %v252_v52 }
  0x89   : > { %484 = vmatmul.mubr.bf16.gmra.mrb[12].mxu0 %v251_v55 }
 0x136   : > { %v805_v56 = vpop.f32.mrb[0].mxu1 }
 0x137   : > { %v526_v57 = vpop.f32.mrb[1].mxu1 }
 0x138   : > { %v806_v58 = vpop.f32.mrb[2].mxu1 }
 0x139   : > { %v529_v59 = vpop.f32.mrb[3].mxu1 }
 0x13e   : > { %v809_v0 = vpop.f32.mrb[4].mxu1 }
 0x13f   : > { %v542_v2 = vpop.f32.mrb[5].mxu1 }
 0x140   : > { %v810_v5 = vpop.f32.mrb[6].mxu1 }
 0x141   : > { %v545_v6 = vpop.f32.mrb[7].mxu1 }
 0x144   : > { %v763_v60 = vpop.f32.mrb[0].mxu0 }
 0x145   : > { %v764_v61 = vpop.f32.mrb[1].mxu0 }
 0x146   : > { %v765_v62 = vadd.f32 %v764_v61, %v763_v60  ;;  %v766_v63 = vpop.f32.mrb[2].mxu0 }
 0x147   : > { %v767_v1 = vpop.f32.mrb[3].mxu0 }
 0x148   : > { %v768_v3 = vadd.f32 %v767_v1, %v766_v63  ;;  %v527_v4 = vadd.f32 %v765_v62, %v526_v57 }
 0x14a   : > { %557 = vst [vmem:[%s1174_s20] sm:$0xff] %v527_v4  ;;  %v530_v7 = vadd.f32 %v768_v3, %v529_v59  ;;  %v578_v8 = vmul.f32 %v527_v4, %v527_v4 }
 0x14c   : > { %558 = vst [vmem:[%s1174_s20 + $0x8] sm:$0xff] %v530_v7  ;;  %v565_v9 = vadd.f32 %v530_v7, %v527_v4  ;;  %v579_v10 = vmul.f32 %v530_v7, %v530_v7  ;;  %v769_v11 = vpop.f32.mrb[4].mxu0 }
 0x14d   : > { %v770_v12 = vpop.f32.mrb[5].mxu0 }
 0x14e   : > { %v586_v13 = vadd.f32 %v579_v10, %v578_v8  ;;  %v771_v14 = vadd.f32 %v770_v12, %v769_v11  ;;  %v772_v15 = vpop.f32.mrb[6].mxu0 }
 0x14f   : > { %v773_v16 = vpop.f32.mrb[7].mxu0 }
 0x150   : > { %v535_v17 = vadd.f32 %v805_v56, %v771_v14  ;;  %v774_v18 = vadd.f32 %v773_v16, %v772_v15 }
 0x152   : > { %559 = vst [vmem:[%s1174_s20 + $0x10] sm:$0xff] %v535_v17  ;;  %v566_v19 = vadd.f32 %v565_v9, %v535_v17  ;;  %v580_v20 = vmul.f32 %v535_v17, %v535_v17  ;;  %v538_v21 = vadd.f32 %v806_v58, %v774_v18 }
 0x154   : > { %v587_v22 = vadd.f32 %v586_v13, %v580_v20  ;;  %560 = vst [vmem:[%s1174_s20 + $0x18] sm:$0xff] %v538_v21  ;;  %v581_v23 = vmul.f32 %v538_v21, %v538_v21  ;;  %v775_v24 = vpop.f32.mrb[8].mxu0  ;;  %v567_v25 = vadd.f32 %v566_v19, %v538_v21 }
 0x155   : > { %v776_v26 = vpop.f32.mrb[9].mxu0 }
 0x156   : > { %v777_v27 = vadd.f32 %v776_v26, %v775_v24  ;;  %v778_v28 = vpop.f32.mrb[10].mxu0  ;;  %v588_v29 = vadd.f32 %v587_v22, %v581_v23 }
 0x157   : > { %v779_v30 = vpop.f32.mrb[11].mxu0 }
 0x158   : > { %v780_v31 = vadd.f32 %v779_v30, %v778_v28  ;;  %v543_v32 = vadd.f32 %v777_v27, %v542_v2 }
 0x15a   : > { %561 = vst [vmem:[%s1174_s20 + $0x20] sm:$0xff] %v543_v32  ;;  %v568_v33 = vadd.f32 %v567_v25, %v543_v32  ;;  %v582_v34 = vmul.f32 %v543_v32, %v543_v32  ;;  %v546_v35 = vadd.f32 %v780_v31, %v545_v6 }
 0x15c   : > { %v589_v36 = vadd.f32 %v588_v29, %v582_v34  ;;  %562 = vst [vmem:[%s1174_s20 + $0x28] sm:$0xff] %v546_v35  ;;  %v569_v37 = vadd.f32 %v568_v33, %v546_v35  ;;  %v583_v38 = vmul.f32 %v546_v35, %v546_v35  ;;  %v781_v39 = vpop.f32.mrb[12].mxu0 }
 0x15d   : > { %v782_v40 = vpop.f32.mrb[13].mxu0 }
 0x15e   : > { %v590_v41 = vadd.f32 %v589_v36, %v583_v38  ;;  %v783_v42 = vadd.f32 %v782_v40, %v781_v39  ;;  %v784_v43 = vpop.f32.mrb[14].mxu0 }
 0x15f   : > { %v785_v44 = vpop.f32.mrb[15].mxu0 }
 0x160   : > { %v551_v45 = vadd.f32 %v809_v0, %v783_v42  ;;  %v786_v46 = vadd.f32 %v785_v44, %v784_v43 }
 0x162   : > { %563 = vst [vmem:[%s1174_s20 + $0x30] sm:$0xff] %v551_v45  ;;  %v570_v47 = vadd.f32 %v569_v37, %v551_v45  ;;  %v584_v48 = vmul.f32 %v551_v45, %v551_v45  ;;  %v554_v49 = vadd.f32 %v810_v5, %v786_v46 }
 0x164   : > { %v591_v50 = vadd.f32 %v590_v41, %v584_v48  ;;  %564 = vst [vmem:[%s1174_s20 + $0x38] sm:$0xff] %v554_v49  ;;  %v571_v51 = vadd.f32 %v570_v47, %v554_v49  ;;  %v585_v52 = vmul.f32 %v554_v49, %v554_v49 }
 0x166   : > { %v572_v53 = vrot.slane %v571_v51, 4  ;;  %v592_v54 = vadd.f32 %v591_v50, %v585_v52 }
 0x168   : > { %v573_v55 = vadd.f32 %v572_v53, %v571_v51  ;;  %v593_v56 = vrot.slane %v592_v54, 4 }
 0x16a   : > { %v574_v57 = vrot.slane %v573_v55, 2  ;;  %v594_v58 = vadd.f32 %v593_v56, %v592_v54 }
 0x16c   : > { %v575_v59 = vadd.f32 %v574_v57, %v573_v55  ;;  %v595_v60 = vrot.slane %v594_v58, 2 }
 0x16e   : > { %v576_v61 = vrot.slane %v575_v59, 1  ;;  %v596_v62 = vadd.f32 %v595_v60, %v594_v58 }
 0x170   : > { %v597_v63 = vrot.slane %v596_v62, 1  ;;  %v577_v0 = vadd.f32 %v576_v61, %v575_v59 }
 0x172   : > { %v598_v1 = vadd.f32 %v597_v63, %v596_v62 }
 0x174   : > { %v600_v2 = vsel %vm599_vm1, %v577_v0, %v598_v1 }
 0x175   : > { %601 = vst [vmem:[%s216_s28] sm:$0x3] %v600_v2 }
 0x176 PF: > { %p15_p8 = scmp.ge.s32.totalorder %s1056_s22, 4   ;;  %s1216_s12 = smov %s976_s13 }
 0x177   : > { %s1217_s13 = smov %s980_s14  ;;  %s1218_s14 = smov %s1082_s10 }
 0x178   : > { %s1219_s15 = smov %s1056_s22  ;;  %17 = sbr.rel (!%p15_p8) target bundleno = 4 (0x4), region = 84 }
 0x17f   :  { %637 = vsyncpa [#allocation3], 1 }
 0x180   :  { %639 = vsyncpa [#allocation3 + $0x1], 1 }
 0x181   :  { %640 = vsyncpa [#allocation5], 1 }

// kernel: _lambda_.7
= control target key start
LH: loop header
LB: loop body
LE: loop exit
PB: predicated region body
PF: predicated region fallthrough
CT: control target
= control target key end

     0   :  { %19 = vsyncpa [#allocation3], 0  ;;  %s2590_s0 = inlined_call_operand.vmem [shape: f32[2,64,320], index: 0, kind: input, shape index: {}]   ;;  %s2591_s1 = inlined_call_operand.vmem [shape: f32[2,64,128], index: 1, kind: input, shape index: {}]   ;;  %s2592_s2 = inlined_call_operand.vmem [shape: f32[2,64,32], index: 2, kind: input, shape index: {}]   ;;  %s2593_s3 = inlined_call_operand.vmem [shape: f32[2,64,64], index: 3, kind: input, shape index: {}]   ;;  %s2594_s4 = inlined_call_operand.vmem [shape: f32[1,128], index: 4, kind: input, shape index: {}]   ;;  %s2595_s5 = inlined_call_operand.vmem [shape: f32[1,128], index: 5, kind: input, shape index: {}]   ;;  %s2596_s6 = inlined_call_operand.vmem [shape: f32[1,32], index: 6, kind: input, shape index: {}]   ;;  %s2597_s7 = inlined_call_operand.vmem [shape: f32[1,32], index: 7, kind: input, shape index: {}]   ;;  %s2598_s8 = inlined_call_operand.vmem [shape: f32[1,64], index: 8, kind: input, shape index: {}]   ;;  %s2599_s9 = inlined_call_operand.vmem [shape: f32[1,64], index: 9, kind: input, shape index: {}]   ;;  %s2600_s10 = inlined_call_operand.vmem [shape: bf16[128,320], index: 10, kind: input, shape index: {}]   ;;  %s2601_s11 = inlined_call_operand.vmem [shape: bf16[32,320], index: 11, kind: input, shape index: {}]   ;;  %s2602_s12 = inlined_call_operand.vmem [shape: bf16[64,320], index: 12, kind: input, shape index: {}]   ;;  %s2603_s13 = inlined_call_operand.vmem [shape: f32[1,320], index: 13, kind: input, shape index: {}]   ;;  %s2604_s14 = inlined_call_operand.hbm [shape: f32[2,64,320], index: 14, kind: output, shape index: {}]  }
   0x1   :  { %21 = vsyncpa [#allocation3 + $0x1], 0  ;;  %s2129_s29 = smov 0   ;;  %s2131_s30 = smov 0  }
   0x2   :  { %s2133_s15 = smov 0   ;;  %s2135_s16 = smov 0  }
   0x3 LB: > { %2609 = sst [smem:[#allocation5_spill]] %s2044_s15  ;;  %s2150_s17 = sadd.s32 4294967295, %s2048_s16   ;;  %s2048_s16 = sphi %s2135_s16, %s2616_s16   ;;  %s2044_s15 = sphi %s2133_s15, %s2618_s15   ;;  %s2040_s30 = sphi %s2131_s30, %s2620_s30   ;;  %s2036_s29 = sphi %s2129_s29, %s2619_s29  }
   0x4   : > { %s1670_s18 = sadd.s32 4294967294, %s2048_s16   ;;  %s2154_s19 = sadd.s32 1, %s2048_s16  }
   0x5   : > { %2610 = sst [smem:[#allocation6_spill]] %s2154_s19  ;;  %s348_s20 = sadd.s32 1, %s2044_s15 }
   0x6   : > { %s345_s21 = ssub.s32 %s2048_s16, %s2154_s19  ;;  %p358_p0 = scmp.ne.s32.totalorder %s2044_s15, %s2040_s30 }
   0x7   : > { %p346_p1 = scmp.eq.s32.totalorder %s345_s21, 0  ;;  %p359_p2 = scmp.eq.s32.totalorder %s2150_s17, 1 }
   0x8   : > { %p364_p3 = scmp.ne.s32.totalorder %s2040_s30, %s2036_s29  ;;  %p365_p4 = scmp.eq.s32.totalorder %s1670_s18, 1 }
   0x9   : > { %s2165_s22 = scalar_select %p346_p1, %s2044_s15, %s348_s20  }
   0xa   : > { %p2167_p5 = por %p359_p2, %p358_p0  ;;  %p2171_p6 = por %p365_p4, %p364_p3 }
   0xb   : > { %2611 = sst [smem:[#allocation7_spill]] %s2165_s22  ;;  %p1673_p7 = scmp.ge.s32.totalorder %s2048_s16, 1 }
   0xc   : > { %s2613_s24 = scalar_select %p2171_p6, 1, 0 }
   0xd   : > { %p445_p8 = scmp.lt.s32.totalorder %s2048_s16, 3 }
   0xe   : > { %2614 = sst [smem:[#allocation8_spill]] %s2613_s24 }
   0xf   : > { %p446_p9 = pnand %p1673_p7, %p445_p8 }
  0x10   : > { %v1930_v0 = vld [vmem:[%s2601_s11 + $0x4] ss:$12 sps:$4 sm:$0xff] (!%p446_p9)   ;;  %p506_p10 = scmp.lt.s32.totalorder (!%p446_p9), %s2150_s17, 1  ;;  %v1932_v1 = vld [vmem:[%s2601_s11 + $0x8] ss:$12 sps:$4 sm:$0xff] (!%p446_p9)   ;;  %v2050_v2 = vmov (!%p446_p9), 0  }
  0x11   : > { %449 = sbr.rel (%p446_p9) target bundleno = 347 (0x15b), region = 76  ;;  %794 = vmatprep.mubr.bf16.mxu0 (!%p446_p9), %v2050_v2  ;;  %762 = vmatprep.subr.bf16.mxu0 (!%p446_p9), %v1930_v0  ;;  %v1933_v3 = vld [vmem:[%s2601_s11] ss:$12 sps:$4 sm:$0xff] (!%p446_p9)   ;;  %v1934_v4 = vld [vmem:[%s2601_s11 + $0x1c] ss:$12 sps:$4 sm:$0xff] (!%p446_p9)   ;;  %vm749_vm0 = vcmask (!%p446_p9), 261120  }
  0x12   : > { %1777 = vmatprep.subr.bf16.mxu1 (!%p446_p9), %v1932_v1  ;;  %763 = vmatpush1.bf16.msra.mxu0 (!%p446_p9), %v1933_v3  ;;  %v1936_v5 = vld [vmem:[%s2601_s11 + $0x20] ss:$12 sps:$4 sm:$0xff] (!%p446_p9)   ;;  %v1937_v6 = vld [vmem:[%s2601_s11 + $0x18] ss:$12 sps:$4 sm:$0xff] (!%p446_p9)   ;;  %v1941_v14 = vld [vmem:[%s2600_s10 + $0x8] ss:$12 sps:$4 sm:$0xff] (!%p446_p9)  }
  0x13   : > { %1778 = vmatpush3.bf16.msra.mxu1 (!%p446_p9), %v1932_v1  ;;  %764 = vmatprep.subr.bf16.mxu0 (!%p446_p9), %v1934_v4  ;;  %v1683_v7 = vld [vmem:[%s2596_s6] ss:$0 sm:$0xff] (!%p446_p9)  ;;  %v1940_v13 = vld [vmem:[%s2600_s10 + $0x4] ss:$12 sps:$4 sm:$0xff] (!%p446_p9)   ;;  %v1944_v28 = vld [vmem:[%s2600_s10 + $0x1c] ss:$12 sps:$4 sm:$0xff] (!%p446_p9)  }
  0x14   : > { %v2215_v8 = vld [vmem:[%s2597_s7] ss:$0 sm:$0xff] (!%p446_p9)  ;;  %1779 = vmatprep.subr.bf16.mxu1 (!%p446_p9), %v1936_v5  ;;  %v1942_v30 = vld [vmem:[%s2600_s10 + $0x18] ss:$12 sps:$4 sm:$0xff] (!%p446_p9)   ;;  %v1946_v38 = vld [vmem:[%s2600_s10 + $0x30] ss:$12 sps:$4 sm:$0xff] (!%p446_p9)  }
  0x15   : > { %v1938_v24 = vld [vmem:[%s2600_s10] ss:$12 sps:$4 sm:$0xff] (!%p446_p9)   ;;  %v1949_v40 = vld [vmem:[%s2600_s10 + $0x38] ss:$12 sps:$4 sm:$0xff] (!%p446_p9)   ;;  %v1950_v48 = vld [vmem:[%s2600_s10 + $0x48] ss:$12 sps:$4 sm:$0xff] (!%p446_p9)  }
  0x16   : > { %765 = vmatpush1.bf16.msra.mxu0 (!%p446_p9), %v1937_v6  ;;  %v1945_v31 = vld [vmem:[%s2600_s10 + $0x20] ss:$12 sps:$4 sm:$0xff] (!%p446_p9)   ;;  %v1953_v50 = vld [vmem:[%s2600_s10 + $0x50] ss:$12 sps:$4 sm:$0xff] (!%p446_p9)   ;;  %v1957_v60 = vld [vmem:[%s2600_s10 + $0x68] ss:$12 sps:$4 sm:$0xff] (!%p446_p9)  }
  0x17   : > { %1780 = vmatpush3.bf16.msra.mxu1 (!%p446_p9), %v1936_v5  ;;  %1028 = vmatprep.subr.bf16.mxu0 (!%p446_p9), %v1940_v13  ;;  %v1948_v33 = vld [vmem:[%s2600_s10 + $0x34] ss:$12 sps:$4 sm:$0xff] (!%p446_p9)   ;;  %v1952_v41 = vld [vmem:[%s2600_s10 + $0x4c] ss:$12 sps:$4 sm:$0xff] (!%p446_p9)   ;;  %v1956_v53 = vld [vmem:[%s2600_s10 + $0x64] ss:$12 sps:$4 sm:$0xff] (!%p446_p9)  }
  0x18   : > { %s2189_s21 = scalar_select %p506_p10, %s2150_s17, 1  ;;  %1789 = vmatprep.subr.bf16.mxu1 %v1941_v14  ;;  %v1954_v57 = vld [vmem:[%s2600_s10 + $0x60] ss:$12 sps:$4 sm:$0xff]   ;;  %v1960_v63 = vld [vmem:[%s2600_s10 + $0x7c] ss:$12 sps:$4 sm:$0xff]   ;;  %vm1246_vm1 = vcmask 523264  }
  0x19   : > { %v1681_v61 = vld [vmem:[%s2594_s4] ss:$0 sm:$0xff]  ;;  %v1958_v3 = vld [vmem:[%s2600_s10 + $0x78] ss:$12 sps:$4 sm:$0xff]   ;;  %s1887_s27 = smul.u32 3072, %s2150_s17  ;;  %s2051_s25 = smov [#allocation2]  }
  0x1a   : > { %s2201_s18 = sshll.u32 %s2189_s21, 6  ;;  %v2299_v62 = vld [vmem:[%s2595_s5] ss:$0 sm:$0xff] }
  0x1b   : > { %s2207_s24 = scalar_lea.vmem %s2592_s2, %s2201_s18  ;;  %s2273_s19 = scalar_lea.vmem %s2591_s1, %s2201_s18 }
  0x1c   : > { %v577_v9 = vld [vmem:[%s2207_s24] sm:$0xff]  ;;  %v578_v10 = vld [vmem:[%s2207_s24 + $0x8] sm:$0xff]  ;;  %v579_v15 = vld [vmem:[%s2207_s24 + $0x10] sm:$0xff]  ;;  %s2537_s22 = scalar_lea.hbm %s2604_s14, %s1887_s27 }
  0x1d   : > { %v592_v11 = vmul.f32 %v1683_v7, %v577_v9  ;;  %v593_v12 = vmul.f32 %v1683_v7, %v578_v10  ;;  %v580_v18 = vld [vmem:[%s2207_s24 + $0x18] sm:$0xff]  ;;  %v594_v19 = vmul.f32 %v1683_v7, %v579_v15  ;;  %v581_v34 = vld [vmem:[%s2207_s24 + $0x20] sm:$0xff]  ;;  %v582_v35 = vld [vmem:[%s2207_s24 + $0x28] sm:$0xff] }
  0x1e   : > { %v595_v20 = vmul.f32 %v1683_v7, %v580_v18  ;;  %v596_v36 = vmul.f32 %v1683_v7, %v581_v34  ;;  %v597_v37 = vmul.f32 %v1683_v7, %v582_v35  ;;  %v583_v44 = vld [vmem:[%s2207_s24 + $0x30] sm:$0xff]  ;;  %v584_v46 = vld [vmem:[%s2207_s24 + $0x38] sm:$0xff]  ;;  %v527_v56 = vld [vmem:[%s2273_s19] sm:$0xff]  ;;  %s2352_s24 = scalar_lea.vmem %s2593_s3, %s2201_s18 }
  0x1f   : > { %v607_v16 = vadd.f32 %v2215_v8, %v592_v11  ;;  %v608_v17 = vadd.f32 %v2215_v8, %v593_v12  ;;  %v609_v23 = vadd.f32 %v2215_v8, %v594_v19  ;;  %v598_v47 = vmul.f32 %v1683_v7, %v583_v44  ;;  %v528_v59 = vld [vmem:[%s2273_s19 + $0x8] sm:$0xff]  ;;  %v531_v10 = vld [vmem:[%s2273_s19 + $0x20] sm:$0xff] }
  0x20   : > { %v610_v25 = vadd.f32 %v2215_v8, %v595_v20  ;;  %v611_v39 = vadd.f32 %v2215_v8, %v596_v36  ;;  %v612_v42 = vadd.f32 %v2215_v8, %v597_v37  ;;  %v599_v49 = vmul.f32 %v1683_v7, %v584_v46  ;;  %v529_v7 = vld [vmem:[%s2273_s19 + $0x10] sm:$0xff]  ;;  %v1961_v9 = vld [vmem:[%s2600_s10 + $0x80] ss:$12 sps:$4 sm:$0xff]  }
  0x21   : > { %v615_v21 = vmax.f32 %v607_v16, 0.0  ;;  %v616_v22 = vmax.f32 %v608_v17, 0.0  ;;  %v617_v27 = vmax.f32 %v609_v23, 0.0  ;;  %v613_v52 = vadd.f32 %v2215_v8, %v598_v47  ;;  %v532_v11 = vld [vmem:[%s2273_s19 + $0x28] sm:$0xff]  ;;  %v1964_v12 = vld [vmem:[%s2600_s10 + $0x94] ss:$12 sps:$4 sm:$0xff]  }
  0x22   : > { %v618_v29 = vmax.f32 %v610_v25, 0.0  ;;  %v619_v43 = vmax.f32 %v611_v39, 0.0  ;;  %v620_v45 = vmax.f32 %v612_v42, 0.0  ;;  %v614_v54 = vadd.f32 %v2215_v8, %v599_v49  ;;  %v530_v8 = vld [vmem:[%s2273_s19 + $0x18] sm:$0xff]  ;;  %v1966_v23 = vld [vmem:[%s2600_s10 + $0xa8] ss:$12 sps:$4 sm:$0xff]  }
  0x23   : > { %v623_v26 = vpack.c.bf16 %v616_v22, %v615_v21  ;;  %v621_v55 = vmax.f32 %v613_v52, 0.0  ;;  %v542_v0 = vmul.f32 %v1681_v61, %v527_v56  ;;  %v543_v1 = vmul.f32 %v1681_v61, %v528_v59  ;;  %v1962_v20 = vld [vmem:[%s2600_s10 + $0x90] ss:$12 sps:$4 sm:$0xff]   ;;  %v1965_v21 = vld [vmem:[%s2600_s10 + $0x98] ss:$12 sps:$4 sm:$0xff]  }
  0x24   : > { %v624_v32 = vpack.c.bf16 %v618_v29, %v617_v27  ;;  %v625_v51 = vpack.c.bf16 %v620_v45, %v619_v43  ;;  %v622_v58 = vmax.f32 %v614_v54, 0.0  ;;  %v544_v15 = vmul.f32 %v1681_v61, %v529_v7  ;;  %v1968_v22 = vld [vmem:[%s2600_s10 + $0xac] ss:$12 sps:$4 sm:$0xff]   ;;  %v1972_v35 = vld [vmem:[%s2602_s12 + $0x4] ss:$12 sps:$4 sm:$0xff]  }
  0x25   : > { %1693 = vmatmul.mubr.msk.bf16.vlgmr.msra.gmra.mrb[0].mxu0 %vm749_vm0, %v623_v26  ;;  %1781 = vmatprep.mubr.msk.bf16.mxu1 %vm749_vm0, %v623_v26  ;;  %v557_v5 = vadd.f32 %v2299_v62, %v542_v0  ;;  %v558_v6 = vadd.f32 %v2299_v62, %v543_v1  ;;  %v545_v16 = vmul.f32 %v1681_v61, %v530_v8  ;;  %v533_v26 = vld [vmem:[%s2273_s19 + $0x30] sm:$0xff]  ;;  %v534_v29 = vld [vmem:[%s2273_s19 + $0x38] sm:$0xff]  ;;  %v1970_v39 = vld [vmem:[%s2602_s12] ss:$12 sps:$4 sm:$0xff]   ;;  %s1886_s19 = smul.u32 192, %s2189_s21 }
  0x26   : > { %1029 = vmatpush1.bf16.msra.mxu0 %v1938_v24  ;;  %804 = vmatprep.mubr.bf16.mxu0 %v2050_v2  ;;  %v626_v4 = vpack.c.bf16 %v622_v58, %v621_v55  ;;  %v546_v18 = vmul.f32 %v1681_v61, %v531_v10  ;;  %v547_v19 = vmul.f32 %v1681_v61, %v532_v11  ;;  %v631_v44 = vld [vmem:[%s2352_s24 + $0x20] sm:$0xff]  ;;  %v632_v45 = vld [vmem:[%s2352_s24 + $0x28] sm:$0xff]  ;;  %v633_v58 = vld [vmem:[%s2352_s24 + $0x30] sm:$0xff] }
  0x27   : > { %1030 = vmatprep.subr.bf16.mxu0 %v1944_v28  ;;  %1782 = vmatmul.mubr.msk.bf16.vlgmr.msra.gmra.mrb[0].mxu1 %vm749_vm0, %v624_v32  ;;  %v565_v13 = vmax.f32 %v557_v5, 0.0  ;;  %v559_v24 = vadd.f32 %v2299_v62, %v544_v15  ;;  %v560_v25 = vadd.f32 %v2299_v62, %v545_v16  ;;  %v549_v34 = vmul.f32 %v1681_v61, %v534_v29  ;;  %v2367_v46 = vld [vmem:[%s2598_s8] ss:$0 sm:$0xff]  ;;  %v1973_v47 = vld [vmem:[%s2602_s12 + $0x18] ss:$12 sps:$4 sm:$0xff]   ;;  %s2441_s26 = scalar_lea.vmem %s2590_s0, %s1886_s19 }
  0x28   : > { %1790 = vmatpush3.bf16.msra.mxu1 %v1941_v14  ;;  %1785 = vmatprep.mubr.msk.bf16.mxu1 %vm749_vm0, %v625_v51  ;;  %v566_v14 = vmax.f32 %v558_v6, 0.0  ;;  %v561_v27 = vadd.f32 %v2299_v62, %v546_v18  ;;  %v562_v28 = vadd.f32 %v2299_v62, %v547_v19  ;;  %v1978_v52 = vld [vmem:[%s2602_s12 + $0x34] ss:$12 sps:$4 sm:$0xff]   ;;  %v634_v59 = vld [vmem:[%s2352_s24 + $0x38] sm:$0xff]  ;;  %v648_v1 = vmul.f32 %v2367_v46, %v633_v58 }
  0x29   : > { %1791 = vmatprep.subr.bf16.mxu1 %v1945_v31  ;;  %v564_v42 = vadd.f32 %v2299_v62, %v549_v34  ;;  %v1982_v7 = vld [vmem:[%s2602_s12 + $0x8] ss:$12 sps:$4 sm:$0xff]   ;;  %v1983_v15 = vld [vmem:[%s2602_s12 + $0x20] ss:$12 sps:$4 sm:$0xff]  }
  0x2a   : > { %1031 = vmatpush1.bf16.msra.mxu0 %v1942_v30  ;;  %v573_v17 = vpack.c.bf16 %v566_v14, %v565_v13  ;;  %v1969_v30 = vld [vmem:[%s2600_s10 + $0xb0] ss:$12 sps:$4 sm:$0xff]   ;;  %v569_v36 = vmax.f32 %v561_v27, 0.0  ;;  %v570_v37 = vmax.f32 %v562_v28, 0.0  ;;  %v2435_v34 = vld [vmem:[%s2603_s13] sm:$0x7] }
  0x2b   : > { %1032 = vmatprep.subr.bf16.mxu0 %v1948_v33  ;;  %v548_v33 = vmul.f32 %v1681_v61, %v533_v26  ;;  %v572_v49 = vmax.f32 %v564_v42, 0.0  ;;  %v627_v61 = vld [vmem:[%s2352_s24] sm:$0xff]  ;;  %v629_v13 = vld [vmem:[%s2352_s24 + $0x10] sm:$0xff]  ;;  %v630_v14 = vld [vmem:[%s2352_s24 + $0x18] sm:$0xff] }
  0x2c   : > { %1792 = vmatpush3.bf16.msra.mxu1 %v1945_v31  ;;  %v567_v31 = vmax.f32 %v559_v24, 0.0  ;;  %v575_v43 = vpack.c.bf16 %v570_v37, %v569_v36  ;;  %v642_v5 = vmul.f32 %v2367_v46, %v627_v61  ;;  %v644_v18 = vmul.f32 %v2367_v46, %v629_v13  ;;  %v1985_v27 = vld [vmem:[%s2602_s12 + $0x50] ss:$12 sps:$4 sm:$0xff]  }
  0x2d   : > { %1694 = vmatmul.mubr.msk.bf16.gmra.mrb[4].mxu0 %vm749_vm0, %v624_v32  ;;  %1793 = vmatprep.subr.bf16.mxu1 %v1949_v40  ;;  %v568_v32 = vmax.f32 %v560_v25, 0.0  ;;  %v645_v19 = vmul.f32 %v2367_v46, %v630_v14  ;;  %v1481_v14 = vld [vmem:[%s2441_s26 + $0x98] sm:$0xff] }
  0x2e   : > { %1033 = vmatpush1.bf16.msra.mxu0 %v1946_v38  ;;  %814 = vmatprep.mubr.bf16.mxu0 %v2050_v2 }
  0x2f   : > { %1034 = vmatprep.subr.bf16.mxu0 %v1952_v41  ;;  %1786 = vmatmul.mubr.msk.bf16.gmra.mrb[4].mxu1 %vm749_vm0, %v626_v4  ;;  %v574_v38 = vpack.c.bf16 %v568_v32, %v567_v31  ;;  %v563_v41 = vadd.f32 %v2299_v62, %v548_v33  ;;  %v628_v62 = vld [vmem:[%s2352_s24 + $0x8] sm:$0xff]  ;;  %v1423_v31 = vlaneseq  ;;  %s503_s24 = sand.u32 1, %s2040_s30  }
  0x30   : > { %1794 = vmatpush3.bf16.msra.mxu1 %v1949_v40  ;;  %1805 = vmatprep.mubr.bf16.mxu1 %v573_v17  ;;  %v1975_v40 = vld [vmem:[%s2602_s12 + $0x1c] ss:$12 sps:$4 sm:$0xff]   ;;  %v643_v6 = vmul.f32 %v2367_v46, %v628_v62  ;;  %s1885_s21 = smul.u32 192, %s503_s24  ;;  %s2549_s28 = scalar_lea.sflag [#allocation3], %s503_s24 }
  0x31   : > { %1795 = vmatprep.subr.bf16.mxu1 %v1953_v50  ;;  %v2428_v32 = vshrl.u32 %v1423_v31, 7 }
  0x32   : > { %1035 = vmatpush1.bf16.msra.mxu0 %v1950_v48  ;;  %v571_v48 = vmax.f32 %v563_v41, 0.0  ;;  %s2460_s18 = scalar_lea.vmem [#allocation2], %s1885_s21 }
  0x33   : > { %1036 = vmatprep.subr.bf16.mxu0 %v1956_v53  ;;  %v1686_v53 = vld [vmem:[%s2599_s9] ss:$0 sm:$0xff]  ;;  %v1425_v33 = vsub.s32 0, %v2428_v32  ;;  %s1572_s15 = sshll.u32 %s2460_s18, 4  ;;  %s2539_s15 = int_to_ptr.vmem [resolvable:$true] %s1572_s15 }
  0x34   : > { %1796 = vmatpush3.bf16.msra.mxu1 %v1953_v50  ;;  %v646_v50 = vmul.f32 %v2367_v46, %v631_v44  ;;  %v576_v54 = vpack.c.bf16 %v572_v49, %v571_v48  ;;  %v657_v11 = vadd.f32 %v1686_v53, %v642_v5  ;;  %v659_v24 = vadd.f32 %v1686_v53, %v644_v18  ;;  %v1474_v44 = vld [vmem:[%s2441_s26 + $0x60] sm:$0xff]  ;;  %v1475_v48 = vld [vmem:[%s2441_s26 + $0x68] sm:$0xff]  ;;  %s1986_s20 = scalar_lea.vmem %s2539_s15, 3072 }
  0x35   : > { %1695 = vmatmul.mubr.msk.bf16.gmra.mrb[8].mxu0 %vm749_vm0, %v625_v51  ;;  %1797 = vmatprep.subr.bf16.mxu1 %v1957_v60  ;;  %v647_v51 = vmul.f32 %v2367_v46, %v632_v45  ;;  %v660_v25 = vadd.f32 %v1686_v53, %v645_v19  ;;  %v2445_v37 = vrot.slane %v2435_v34, %v1425_v33  ;;  %v1483_v18 = vld [vmem:[%s2441_s26 + $0xa8] sm:$0xff]  ;;  %p1987_p11 = scmp.ne.s32.totalorder %s2539_s15, %s1986_s20 }
  0x36   : > { %1037 = vmatpush1.bf16.msra.mxu0 %v1954_v57  ;;  %824 = vmatprep.mubr.bf16.mxu0 %v2050_v2  ;;  %v661_v55 = vadd.f32 %v1686_v53, %v646_v50  ;;  %v1976_v57 = vld [vmem:[%s2602_s12 + $0x30] ss:$12 sps:$4 sm:$0xff]   ;;  %v667_v28 = vmax.f32 %v659_v24, 0.0  ;;  %v1462_v24 = vld [vmem:[%s2441_s26] sm:$0xff] }
  0x37   : > { %1038 = vmatprep.subr.bf16.mxu0 %v1960_v63  ;;  %v662_v56 = vadd.f32 %v1686_v53, %v647_v51  ;;  %v668_v29 = vmax.f32 %v660_v25, 0.0  ;;  %p1988_p12 = pnand %p1987_p11, %p2167_p5 }
  0x38   : > { %1798 = vmatpush3.bf16.msra.mxu1 %v1957_v60  ;;  %v1981_v60 = vld [vmem:[%s2602_s12 + $0x4c] ss:$12 sps:$4 sm:$0xff]   ;;  %v669_v63 = vmax.f32 %v661_v55, 0.0 }
  0x39   : > { %1799 = vmatprep.subr.bf16.mxu1 %v1961_v9  ;;  %v670_v0 = vmax.f32 %v662_v56, 0.0  ;;  %v1478_v56 = vld [vmem:[%s2441_s26 + $0x80] sm:$0xff]  ;;  %p1989_p13 = pneg %p1988_p12 }
  0x3a   : > { %1039 = vmatpush1.bf16.msra.mxu0 %v1958_v3  ;;  %v649_v3 = vmul.f32 %v2367_v46, %v634_v59 }
  0x3b   : > { %1040 = vmatprep.subr.bf16.mxu0 %v1964_v12  ;;  %v675_v8 = vpack.c.bf16 %v670_v0, %v669_v63  ;;  %v658_v12 = vadd.f32 %v1686_v53, %v643_v6 }
  0x3c   : > { %1800 = vmatpush3.bf16.msra.mxu1 %v1961_v9  ;;  %v663_v9 = vadd.f32 %v1686_v53, %v648_v1  ;;  %v664_v10 = vadd.f32 %v1686_v53, %v649_v3 }
  0x3d   : > { %1696 = vmatmul.mubr.msk.bf16.gmra.mrb[12].mxu0 %vm749_vm0, %v626_v4  ;;  %1801 = vmatprep.subr.bf16.mxu1 %v1965_v21  ;;  %v1979_v4 = vld [vmem:[%s2602_s12 + $0x48] ss:$12 sps:$4 sm:$0xff]  }
  0x3e   : > { %1041 = vmatpush1.bf16.msra.mxu0 %v1962_v20  ;;  %1060 = vmatprep.mubr.bf16.mxu0 %v2050_v2  ;;  %v671_v16 = vmax.f32 %v663_v9, 0.0  ;;  %v665_v20 = vmax.f32 %v657_v11, 0.0 }
  0x3f   : > { %1042 = vmatprep.subr.bf16.mxu0 %v1968_v22  ;;  %v1984_v22 = vld [vmem:[%s2602_s12 + $0x38] ss:$12 sps:$4 sm:$0xff]  }
  0x40   : > { %1802 = vmatpush3.bf16.msra.mxu1 %v1965_v21  ;;  %v666_v21 = vmax.f32 %v658_v12, 0.0 }
  0x41   : > { %1803 = vmatprep.subr.bf16.mxu1 %v1969_v30 }
  0x42   : > { %1043 = vmatpush1.bf16.msra.mxu0 %v1966_v23  ;;  %v673_v26 = vpack.c.bf16 %v666_v21, %v665_v20 }
  0x43   : > { %1259 = vmatprep.subr.bf16.mxu0 %v1972_v35 }
  0x44   : > { %1804 = vmatpush3.bf16.msra.mxu1 %v1969_v30  ;;  %v674_v30 = vpack.c.bf16 %v668_v29, %v667_v28 }
  0x45   : > { %1061 = vmatmul.mubr.bf16.vlgmr.msra.gmra.mrb[0].mxu0 %v573_v17  ;;  %1829 = vmatprep.subr.bf16.mxu1 %v1972_v35  ;;  %v672_v17 = vmax.f32 %v664_v10, 0.0  ;;  %v1480_v10 = vld [vmem:[%s2441_s26 + $0x90] sm:$0xff] }
  0x46   : > { %1260 = vmatpush1.bf16.msra.mxu0 %v1970_v39  ;;  %1070 = vmatprep.mubr.bf16.mxu0 %v2050_v2 }
  0x47   : > { %1261 = vmatprep.subr.bf16.mxu0 %v1975_v40  ;;  %1806 = vmatmul.mubr.bf16.vlgmr.msra.gmra.mrb[0].mxu1 %v574_v38  ;;  %v676_v23 = vpack.c.bf16 %v672_v17, %v671_v16 }
  0x48   : > { %1833 = vmatpush1.bf16.msra.mxu1 %v1970_v39  ;;  %1809 = vmatprep.mubr.bf16.mxu1 %v575_v43 }
  0x49   : > { %1830 = vmatprep.subr.bf16.mxu1 %v1975_v40 }
  0x4a   : > { %1262 = vmatpush1.bf16.msra.mxu0 %v1973_v47 }
  0x4b   : > { %1263 = vmatprep.subr.bf16.mxu0 %v1978_v52 }
  0x4c   : > { %1834 = vmatpush1.bf16.msra.mxu1 %v1973_v47 }
  0x4d   : > { %1071 = vmatmul.mubr.bf16.gmra.mrb[4].mxu0 %v574_v38  ;;  %1831 = vmatprep.subr.bf16.mxu1 %v1978_v52  ;;  %v1477_v52 = vld [vmem:[%s2441_s26 + $0x78] sm:$0xff] }
  0x4e   : > { %1080 = vmatprep.mubr.bf16.mxu0 %v2050_v2  ;;  %1264 = vmatpush1.bf16.msra.mxu0 %v1976_v57 }
  0x4f   : > { %1810 = vmatmul.mubr.bf16.gmra.mrb[4].mxu1 %v576_v54  ;;  %1265 = vmatprep.subr.bf16.mxu0 %v1981_v60 }
  0x50   : > { %1835 = vmatpush1.bf16.msra.mxu1 %v1976_v57  ;;  %1311 = vmatprep.mubr.bf16.mxu1 %v2050_v2 }
  0x51   : > { %1832 = vmatprep.subr.bf16.mxu1 %v1981_v60 }
  0x52   : > { %1266 = vmatpush1.bf16.msra.mxu0 %v1979_v4 }
  0x54   : > { %1836 = vmatpush1.bf16.msra.mxu1 %v1979_v4 }
  0x55   : > { %1081 = vmatmul.mubr.bf16.gmra.mrb[8].mxu0 %v575_v43  ;;  %1813 = vmatprep.subr.bf16.mxu1 %v1982_v7 }
  0x56   : > { %1090 = vmatprep.mubr.bf16.mxu0 %v2050_v2 }
  0x57   : > { %1739 = vmatmul.mubr.msk.bf16.vlgmr.msra.gmra.mrb[8].mxu1 %vm1246_vm1, %v675_v8 }
  0x58   : > { %1814 = vmatpush3.bf16.msra.mxu1 %v1982_v7  ;;  %1321 = vmatprep.mubr.bf16.mxu1 %v2050_v2 }
  0x59   : > { %1815 = vmatprep.subr.bf16.mxu1 %v1983_v15 }
  0x5c   : > { %1816 = vmatpush3.bf16.msra.mxu1 %v1983_v15 }
  0x5d   : > { %1091 = vmatmul.mubr.bf16.gmra.mrb[12].mxu0 %v576_v54  ;;  %1817 = vmatprep.subr.bf16.mxu1 %v1984_v22 }
  0x5e   : > { %1291 = vmatprep.mubr.bf16.mxu0 %v2050_v2 }
  0x5f   : > { %1740 = vmatmul.mubr.msk.bf16.gmra.mrb[12].mxu1 %vm1246_vm1, %v676_v23 }
  0x60   : > { %1818 = vmatpush3.bf16.msra.mxu1 %v1984_v22  ;;  %1821 = vmatprep.mubr.msk.bf16.mxu1 %vm1246_vm1, %v673_v26  ;;  %v1484_v22 = vld [vmem:[%s2441_s26 + $0xb0] sm:$0xff] }
  0x61   : > { %1819 = vmatprep.subr.bf16.mxu1 %v1985_v27 }
  0x64   : > { %1820 = vmatpush3.bf16.msra.mxu1 %v1985_v27 }
  0x65   : > { %1737 = vmatmul.mubr.msk.bf16.vlgmr.msra.gmra.mrb[0].mxu0 %vm1246_vm1, %v673_v26 }
  0x66   : > { %1301 = vmatprep.mubr.bf16.mxu0 %v2050_v2  ;;  %v1429_v2 = vsub.s32 1, %v2428_v32 }
  0x67   : > { %1822 = vmatmul.mubr.msk.bf16.vlgmr.msra.gmra.mrb[0].mxu1 %vm1246_vm1, %v674_v30 }
  0x68   : > { %1825 = vmatprep.mubr.msk.bf16.mxu1 %vm1246_vm1, %v675_v8  ;;  %v2448_v40 = vrot.slane %v2435_v34, %v1429_v2  ;;  %v1433_v8 = vsub.s32 2, %v2428_v32 }
  0x6a   : > { %v2476_v25 = vrot.slane %v2435_v34, %v1433_v8 }
  0x6d   : > { %1738 = vmatmul.mubr.msk.bf16.gmra.mrb[4].mxu0 %vm1246_vm1, %v674_v30  ;;  %v1463_v30 = vld [vmem:[%s2441_s26 + $0x8] sm:$0xff] }
  0x6f   : > { %1826 = vmatmul.mubr.msk.bf16.gmra.mrb[4].mxu1 %vm1246_vm1, %v676_v23 }
 0x128   : > { %v1082_v35 = vpop.f32.mrb[8].mxu0 }
 0x129   : > { %v1084_v36 = vpop.f32.mrb[9].mxu0 }
 0x12a   : > { %v1086_v38 = vpop.f32.mrb[10].mxu0  ;;  %v1313_v39 = vpop.f32.mrb[8].mxu1 }
 0x12b   : > { %v1088_v41 = vpop.f32.mrb[11].mxu0  ;;  %v1837_v42 = vadd.f32 %v1313_v39, %v1082_v35  ;;  %v1315_v43 = vpop.f32.mrb[9].mxu1  ;;  %v1465_v35 = vld [vmem:[%s2441_s26 + $0x18] sm:$0xff] }
 0x12c   : > { %v1838_v45 = vadd.f32 %v1315_v43, %v1084_v36  ;;  %v1317_v46 = vpop.f32.mrb[10].mxu1 }
 0x12d   : > { %v1450_v47 = vadd.f32 %v1837_v42, %v2445_v37  ;;  %v1839_v49 = vadd.f32 %v1317_v46, %v1086_v38  ;;  %v1319_v50 = vpop.f32.mrb[11].mxu1 }
 0x12e   : > { %v1451_v51 = vadd.f32 %v1838_v45, %v2448_v40  ;;  %v1840_v53 = vadd.f32 %v1319_v50, %v1088_v41  ;;  %v1470_v41 = vld [vmem:[%s2441_s26 + $0x40] sm:$0xff] }
 0x12f   : > { %v1498_v54 = vadd.f32 %v1474_v44, %v1450_v47  ;;  %v1453_v55 = vadd.f32 %v1839_v49, %v2445_v37  ;;  %v1466_v44 = vld [vmem:[%s2441_s26 + $0x20] sm:$0xff]  ;;  %v1464_v49 = vld [vmem:[%s2441_s26 + $0x10] sm:$0xff] }
 0x130   : > { %v1092_v57 = vpop.f32.mrb[12].mxu0  ;;  %v1499_v58 = vadd.f32 %v1475_v48, %v1451_v51  ;;  %v1454_v59 = vadd.f32 %v1840_v53, %v2448_v40 }
 0x131   : > { %v1094_v60 = vpop.f32.mrb[13].mxu0  ;;  %v1522_v61 = vmax.f32 %v1498_v54, 0.0  ;;  %v1501_v62 = vadd.f32 %v1477_v52, %v1453_v55 }
 0x132   : > { %v1096_v63 = vpop.f32.mrb[14].mxu0  ;;  %v1523_v0 = vmax.f32 %v1499_v58, 0.0  ;;  %v1502_v1 = vadd.f32 %v1478_v56, %v1454_v59  ;;  %v1323_v3 = vpop.f32.mrb[12].mxu1  ;;  %v1473_v56 = vld [vmem:[%s2441_s26 + $0x58] sm:$0xff] }
 0x133   : > { %v1098_v4 = vpop.f32.mrb[15].mxu0  ;;  %1546 = vst [vmem:[%s2460_s18 + $0x60] sm:$0xff] %v1522_v61  ;;  %v1525_v5 = vmax.f32 %v1501_v62, 0.0  ;;  %v1841_v6 = vadd.f32 %v1323_v3, %v1092_v57  ;;  %v1325_v7 = vpop.f32.mrb[13].mxu1  ;;  %v1467_v62 = vld [vmem:[%s2441_s26 + $0x28] sm:$0xff] }
 0x134   : > { %1547 = vst [vmem:[%s2460_s18 + $0x68] sm:$0xff] %v1523_v0  ;;  %v1526_v9 = vmax.f32 %v1502_v1, 0.0  ;;  %v1842_v11 = vadd.f32 %v1325_v7, %v1094_v60  ;;  %v1327_v12 = vpop.f32.mrb[14].mxu1  ;;  %v1468_v7 = vld [vmem:[%s2441_s26 + $0x30] sm:$0xff] }
 0x135   : > { %1549 = vst [vmem:[%s2460_s18 + $0x78] sm:$0xff] %v1525_v5  ;;  %v1456_v13 = vadd.f32 %v1841_v6, %v2445_v37  ;;  %v1843_v15 = vadd.f32 %v1327_v12, %v1096_v63  ;;  %v1329_v16 = vpop.f32.mrb[15].mxu1  ;;  %v1469_v12 = vld [vmem:[%s2441_s26 + $0x38] sm:$0xff] }
 0x136   : > { %1550 = vst [vmem:[%s2460_s18 + $0x80] sm:$0xff] %v1526_v9  ;;  %v1457_v17 = vadd.f32 %v1842_v11, %v2448_v40  ;;  %v1844_v19 = vadd.f32 %v1329_v16, %v1098_v4  ;;  %v1471_v16 = vld [vmem:[%s2441_s26 + $0x48] sm:$0xff] }
 0x137   : > { %v1504_v20 = vadd.f32 %v1480_v10, %v1456_v13  ;;  %v1459_v21 = vadd.f32 %v1843_v15, %v2445_v37 }
 0x138   : > { %v1293_v23 = vpop.f32.mrb[0].mxu0  ;;  %v1505_v26 = vadd.f32 %v1481_v14, %v1457_v17  ;;  %v1460_v27 = vadd.f32 %v1844_v19, %v2448_v40 }
 0x139   : > { %v1438_v28 = vadd.f32 %v2445_v37, %v1293_v23  ;;  %v1295_v29 = vpop.f32.mrb[1].mxu0  ;;  %v1528_v31 = vmax.f32 %v1504_v20, 0.0  ;;  %v1507_v32 = vadd.f32 %v1483_v18, %v1459_v21  ;;  %v1482_v20 = vld [vmem:[%s2441_s26 + $0xa0] sm:$0xff]  ;;  %v1472_v23 = vld [vmem:[%s2441_s26 + $0x50] sm:$0xff] }
 0x13a   : > { %v1439_v33 = vadd.f32 %v2448_v40, %v1295_v29  ;;  %v1297_v2 = vpop.f32.mrb[2].mxu0  ;;  %v1529_v36 = vmax.f32 %v1505_v26, 0.0  ;;  %v1508_v34 = vadd.f32 %v1484_v22, %v1460_v27  ;;  %v1823_v39 = vpop.f32.mrb[0].mxu1 }
 0x13b   : > { %v1486_v38 = vadd.f32 %v1462_v24, %v1438_v28  ;;  %v1441_v42 = vadd.f32 %v2445_v37, %v1297_v2  ;;  %v1299_v43 = vpop.f32.mrb[3].mxu0  ;;  %1552 = vst [vmem:[%s2460_s18 + $0x90] sm:$0xff] %v1528_v31  ;;  %v1531_v45 = vmax.f32 %v1507_v32, 0.0  ;;  %v1446_v46 = vadd.f32 %v1823_v39, %v2476_v25  ;;  %v1366_v48 = vpop.f32.mrb[1].mxu1  ;;  %v1476_v28 = vld [vmem:[%s2441_s26 + $0x70] sm:$0xff]  ;;  %v1479_v39 = vld [vmem:[%s2441_s26 + $0x88] sm:$0xff] }
 0x13c   : > { %v1487_v47 = vadd.f32 %v1463_v30, %v1439_v33  ;;  %v1442_v50 = vadd.f32 %v2448_v40, %v1299_v43  ;;  %1553 = vst [vmem:[%s2460_s18 + $0x98] sm:$0xff] %v1529_v36  ;;  %v1532_v51 = vmax.f32 %v1508_v34, 0.0  ;;  %v1440_v53 = vadd.f32 %v2476_v25, %v1366_v48  ;;  %v1824_v55 = vpop.f32.mrb[2].mxu1  ;;  %v1485_v33 = vld [vmem:[%s2441_s26 + $0xb8] sm:$0xff]  ;;  %s1990_s26 = sshll.u32 %s2051_s25, 4  ;;  %s1991_s26 = int_to_ptr.vmem [resolvable:$false] %s1990_s26 }
 0x13d   : > { %v1510_v52 = vmax.f32 %v1486_v38, 0.0  ;;  %v1489_v54 = vadd.f32 %v1465_v35, %v1441_v42  ;;  %1555 = vst [vmem:[%s2460_s18 + $0xa8] sm:$0xff] %v1531_v45  ;;  %v1494_v57 = vadd.f32 %v1470_v41, %v1446_v46  ;;  %v1449_v59 = vadd.f32 %v1824_v55, %v2476_v25  ;;  %v1369_v61 = vpop.f32.mrb[3].mxu1  ;;  %s1992_s21 = scalar_lea.vmem %s1991_s26, 6144  ;;  %p1993_p0 = scmp.lt.s32.totalorder %s2539_s15, %s1991_s26 }
 0x13e   : > { %v1511_v58 = vmax.f32 %v1487_v47, 0.0  ;;  %v1490_v60 = vadd.f32 %v1466_v44, %v1442_v50  ;;  %1556 = vst [vmem:[%s2460_s18 + $0xb0] sm:$0xff] %v1532_v51  ;;  %v1488_v63 = vadd.f32 %v1464_v49, %v1440_v53  ;;  %v1443_v1 = vadd.f32 %v2476_v25, %v1369_v61  ;;  %p1994_p1 = scmp.lt.s32.totalorder %s1992_s21, %s1986_s20 }
 0x13f   : > { %1534 = vst [vmem:[%s2460_s18] sm:$0xff] %v1510_v52  ;;  %v1513_v0 = vmax.f32 %v1489_v54, 0.0  ;;  %v1518_v3 = vmax.f32 %v1494_v57, 0.0  ;;  %v1497_v4 = vadd.f32 %v1473_v56, %v1449_v59 }
 0x140   : > { %1535 = vst [vmem:[%s2460_s18 + $0x8] sm:$0xff] %v1511_v58  ;;  %v1514_v5 = vmax.f32 %v1490_v60, 0.0  ;;  %v1303_v6 = vpop.f32.mrb[4].mxu0  ;;  %v1512_v8 = vmax.f32 %v1488_v63, 0.0  ;;  %v1491_v9 = vadd.f32 %v1467_v62, %v1443_v1  ;;  %p1995_p2 = por %p1994_p1, %p1993_p0 }
 0x141   : > { %1537 = vst [vmem:[%s2460_s18 + $0x18] sm:$0xff] %v1513_v0  ;;  %v1444_v10 = vadd.f32 %v2445_v37, %v1303_v6  ;;  %v1305_v11 = vpop.f32.mrb[5].mxu0  ;;  %1542 = vst.msk [vmem:[%s2460_s18 + $0x40] sm:$0xff] %vm1246_vm1, %v1518_v3  ;;  %v1521_v13 = vmax.f32 %v1497_v4, 0.0 }
 0x142   : > { %1538 = vst [vmem:[%s2460_s18 + $0x20] sm:$0xff] %v1514_v5  ;;  %v1445_v14 = vadd.f32 %v2448_v40, %v1305_v11  ;;  %v1307_v15 = vpop.f32.mrb[6].mxu0  ;;  %1536 = vst.msk [vmem:[%s2460_s18 + $0x10] sm:$0xff] %vm1246_vm1, %v1512_v8  ;;  %v1515_v17 = vmax.f32 %v1491_v9, 0.0  ;;  %v1827_v19 = vpop.f32.mrb[4].mxu1  ;;  %p1996_p3 = pnand %p1995_p2, %p1989_p13 }
 0x143   : > { %v1492_v18 = vadd.f32 %v1468_v7, %v1444_v10  ;;  %v1447_v21 = vadd.f32 %v2445_v37, %v1307_v15  ;;  %v1309_v22 = vpop.f32.mrb[7].mxu0  ;;  %1545 = vst.msk [vmem:[%s2460_s18 + $0x58] sm:$0xff] %vm1246_vm1, %v1521_v13  ;;  %v1458_v24 = vadd.f32 %v1827_v19, %v2476_v25  ;;  %v1382_v27 = vpop.f32.mrb[5].mxu1 }
 0x144   : > { %v1493_v26 = vadd.f32 %v1469_v12, %v1445_v14  ;;  %v1448_v29 = vadd.f32 %v2448_v40, %v1309_v22  ;;  %1539 = vst.msk [vmem:[%s2460_s18 + $0x28] sm:$0xff] %vm1246_vm1, %v1515_v17  ;;  %v1452_v37 = vadd.f32 %v2476_v25, %v1382_v27  ;;  %v1828_v32 = vpop.f32.mrb[6].mxu1 }
 0x145   : > { %v1516_v30 = vmax.f32 %v1492_v18, 0.0  ;;  %v1495_v31 = vadd.f32 %v1471_v16, %v1447_v21  ;;  %v1506_v2 = vadd.f32 %v1482_v20, %v1458_v24  ;;  %v1461_v36 = vadd.f32 %v1828_v32, %v2476_v25  ;;  %v1385_v38 = vpop.f32.mrb[7].mxu1 }
 0x146   : > { %v1517_v35 = vmax.f32 %v1493_v26, 0.0  ;;  %v1496_v34 = vadd.f32 %v1472_v23, %v1448_v29  ;;  %v1500_v40 = vadd.f32 %v1476_v28, %v1452_v37  ;;  %v1455_v42 = vadd.f32 %v2476_v25, %v1385_v38 }
 0x147   : > { %1540 = vst [vmem:[%s2460_s18 + $0x30] sm:$0xff] %v1516_v30  ;;  %v1519_v41 = vmax.f32 %v1495_v31, 0.0  ;;  %v1530_v43 = vmax.f32 %v1506_v2, 0.0  ;;  %v1509_v44 = vadd.f32 %v1485_v33, %v1461_v36 }
 0x148   : > { %1541 = vst [vmem:[%s2460_s18 + $0x38] sm:$0xff] %v1517_v35  ;;  %v1520_v45 = vmax.f32 %v1496_v34, 0.0  ;;  %v1524_v46 = vmax.f32 %v1500_v40, 0.0  ;;  %v1503_v47 = vadd.f32 %v1479_v39, %v1455_v42 }
 0x149   : > { %1543 = vst [vmem:[%s2460_s18 + $0x48] sm:$0xff] %v1519_v41  ;;  %1554 = vst.msk [vmem:[%s2460_s18 + $0xa0] sm:$0xff] %vm1246_vm1, %v1530_v43  ;;  %v1533_v48 = vmax.f32 %v1509_v44, 0.0 }
 0x14a   : > { %1544 = vst [vmem:[%s2460_s18 + $0x50] sm:$0xff] %v1520_v45  ;;  %1548 = vst.msk [vmem:[%s2460_s18 + $0x70] sm:$0xff] %vm1246_vm1, %v1524_v46  ;;  %v1527_v25 = vmax.f32 %v1503_v47, 0.0 }
 0x14b   : > { %1557 = vst.msk [vmem:[%s2460_s18 + $0xb8] sm:$0xff] %vm1246_vm1, %v1533_v48 }
 0x14c   : > { %1551 = vst.msk [vmem:[%s2460_s18 + $0x88] sm:$0xff] %vm1246_vm1, %v1527_v25 }
 0x14d   : > { %1999 = shalt.err (!%p1996_p3)
}
 0x14e   : > { %s2000_s24 = scalar_lea.hbm %s2537_s22, 3072  ;;  %s2004_s17 = scalar_lea.hbm %s2604_s14, 6144 }
 0x14f   : > { %p2001_p4 = scmp.ne.s32.totalorder %s2537_s22, %s2000_s24  ;;  %p2005_p9 = scmp.lt.u32.totalorder %s2537_s22, %s2604_s14 }
 0x150   : > { %p2006_p10 = scmp.lt.u32.totalorder %s2004_s17, %s2000_s24  ;;  %p2008_p12 = scmp.lt.u32.totalorder %s2000_s24, %s2537_s22 }
 0x151   : > { %p2002_p7 = pnand %p2001_p4, %p2167_p5 }
 0x152   : > { %p2007_p11 = por %p2006_p10, %p2005_p9 }
 0x153   : > { %p2003_p8 = pneg %p2002_p7 }
 0x154   : > { %p2009_p13 = por %p2008_p12, %p2007_p11 }
 0x156   : > { %p2010_p0 = pnand %p2009_p13, %p2003_p8 }
 0x158   : > { %2013 = shalt.err (!%p2010_p0)
}
 0x159   : > { %s2052_s20 = smov 384   ;;  %s2053_s26 = smov 24  }
 0x15a   : > { %1888 = dma.vmem_to_hbm [thread:$0]  (%p2167_p5), %s2539_s15, 3072, %s2537_s22, %s2549_s28, %s2052_s20, %s2052_s20, %s2053_s26  }
 0x15b PF: > { %p1894_p1 = scmp.ge.s32.totalorder %s2048_s16, 2  ;;  %s1587_s18 = sand.u32 1, %s2036_s29  }
 0x15c   : > { %s1588_s24 = scalar_lea.sflag [#allocation3], %s1587_s18 }
 0x15d   : > { %p1891_p2 = pnand %p1894_p1, %p2171_p6 }
 0x15f   : > { %2031 = dma.done.wait (!%p1891_p2), %s1588_s24, 3072  }
 0x160   : > { %2033 = vsyncadd (!%p1891_p2), %s1588_s24, 4294964224  ;;  %s2616_s16 = sld [smem:[#allocation6_spill]]  ;;  %s2617_s27 = sld [smem:[#allocation5_spill]] }
 0x161   : > { %s2618_s15 = sld [smem:[#allocation7_spill]]  ;;  %s2619_s29 = smov %s2040_s30 }
 0x166   : > { %p24_p3 = scmp.ge.s32.totalorder %s2616_s16, 4   ;;  %s2620_s30 = smov %s2617_s27 }
 0x168   :  { %26 = sbr.rel (!%p24_p3) target bundleno = 3 (0x3), region = 120 }
 0x16f   :  { %1593 = vsyncpa [#allocation3], 1 }
 0x170   :  { %1595 = vsyncpa [#allocation3 + $0x1], 1 }

// kernel: _lambda_.6
= control target key start
LH: loop header
LB: loop body
LE: loop exit
PB: predicated region body
PF: predicated region fallthrough
CT: control target
= control target key end

     0   :  { %s2888_s18 = smov 0   ;;  %s3489_s0 = inlined_call_operand.vmem [shape: f32[2,64,48], index: 0, kind: input, shape index: {}]   ;;  %s3490_s1 = inlined_call_operand.vmem [shape: f32[1,48], index: 1, kind: input, shape index: {}]   ;;  %s3491_s2 = inlined_call_operand.vmem [shape: f32[1,48], index: 2, kind: input, shape index: {}]   ;;  %s3492_s3 = inlined_call_operand.vmem [shape: bf16[9,48,64], index: 3, kind: input, shape index: {}]   ;;  %s3493_s4 = inlined_call_operand.vmem [shape: f32[2,64,64], index: 4, kind: output, shape index: {0}]   ;;  %s3494_s5 = inlined_call_operand.vmem [shape: f32[2,2,64], index: 5, kind: output, shape index: {1}]  }
   0x1 LB: > { %s2340_s19 = sadd.s32 4294967295, %s2855_s18   ;;  %p2344_p0 = scmp.ge.s32.totalorder %s2855_s18, 1  ;;  %s2855_s18 = sphi %s2888_s18, %s16_s18  }
   0x2   : > { %p190_p1 = scmp.lt.s32.totalorder %s2855_s18, 3 }
   0x4   : > { %p191_p2 = pnand %p2344_p0, %p190_p1 }
   0x5   : > { %v2811_v0 = vld [vmem:[%s3492_s3 + $0x60] sm:$0xff] (!%p191_p2)   ;;  %p222_p3 = scmp.lt.s32.totalorder (!%p191_p2), %s2340_s19, 1  ;;  %v2812_v1 = vld [vmem:[%s3492_s3 + $0x18] sm:$0xff] (!%p191_p2)   ;;  %vm283_vm0 = vcmask (!%p191_p2), 388096   ;;  %v2813_v2 = vld [vmem:[%s3492_s3 + $0x68] sm:$0xff] (!%p191_p2)   ;;  %v2857_v5 = vmov (!%p191_p2), 0  }
   0x6   : > { %194 = sbr.rel (%p191_p2) target bundleno = 407 (0x197), region = 36  ;;  %2662 = vmatprep.subr.bf16.mxu0 (!%p191_p2), %v2811_v0  ;;  %2606 = vmatprep.subr.bf16.mxu1 (!%p191_p2), %v2812_v1  ;;  %v2814_v3 = vld [vmem:[%s3492_s3 + $0x20] sm:$0xff] (!%p191_p2)   ;;  %v2815_v4 = vld [vmem:[%s3492_s3 + $0x70] sm:$0xff] (!%p191_p2)   ;;  %284 = vst.msk [vmem:[#allocation2] sm:$0xf] (!%p191_p2), %vm283_vm0, %v2857_v5  ;;  %v2816_v6 = vld [vmem:[%s3492_s3 + $0x28] sm:$0xff] (!%p191_p2)  }
   0x7   : > { %2663 = vmatpush3.bf16.msra.mxu0 (!%p191_p2), %v2811_v0  ;;  %2607 = vmatpush3.bf16.msra.mxu1 (!%p191_p2), %v2812_v1  ;;  %288 = vst.msk [vmem:[#allocation2 + $0x48] sm:$0xf] (!%p191_p2), %vm283_vm0, %v2857_v5  ;;  %vm285_vm1 = vcmask (!%p191_p2), 385024   ;;  %v2930_v8 = vld [vmem:[%s3490_s1] ss:$0 sm:$0xff] (!%p191_p2)  ;;  %v2968_v28 = vld [vmem:[%s3492_s3 + $0x78] sm:$0xff] (!%p191_p2)  }
   0x8   : > { %2664 = vmatprep.subr.bf16.mxu0 (!%p191_p2), %v2813_v2  ;;  %2608 = vmatprep.subr.bf16.mxu1 (!%p191_p2), %v2814_v3  ;;  %v2935_v9 = vld [vmem:[%s3491_s2] ss:$0 sm:$0xff] (!%p191_p2)  ;;  %286 = vst.msk [vmem:[#allocation2 + $0x4] sm:$0x1] (!%p191_p2), %vm285_vm1, %v2857_v5  ;;  %289 = vst.msk [vmem:[#allocation2 + $0x4c] sm:$0x1] (!%p191_p2), %vm285_vm1, %v2857_v5 }
   0x9   : > { %vm291_vm2 = vsmask.f32 (!%p191_p2), 256  ;;  %v296_v11 = vld [vmem:[#allocation2 + $0x8] sm:$0x1] (!%p191_p2)  ;;  %vm323_vm3 = vsmask.f32 (!%p191_p2), 7938 }
   0xa   : > { %vm2941_vm4 = vmand (!%p191_p2), %vm285_vm1, %vm291_vm2  ;;  %v328_v13 = vld [vmem:[#allocation2 + $0xc] sm:$0x1] (!%p191_p2)  ;;  %v299_v18 = vld [vmem:[#allocation2 + $0x10] sm:$0x1] (!%p191_p2)  ;;  %vm532_vm6 = vsmask.f32 (!%p191_p2), 3328 }
   0xb   : > { %2665 = vmatpush3.bf16.msra.mxu0 (!%p191_p2), %v2813_v2  ;;  %2609 = vmatpush3.bf16.msra.mxu1 (!%p191_p2), %v2814_v3  ;;  %v297_v15 = vsel (!%p191_p2), %vm2941_vm4, 0, %v296_v11  ;;  %vm2950_vm5 = vmand (!%p191_p2), %vm285_vm1, %vm323_vm3  ;;  %v300_v21 = vsel (!%p191_p2), %vm2941_vm4, 0, %v299_v18  ;;  %v331_v22 = vld [vmem:[#allocation2 + $0x14] sm:$0x1] (!%p191_p2)  ;;  %v302_v30 = vld [vmem:[#allocation2 + $0x18] sm:$0x1] (!%p191_p2) }
   0xc   : > { %2666 = vmatprep.subr.bf16.mxu0 (!%p191_p2), %v2815_v4  ;;  %2610 = vmatprep.subr.bf16.mxu1 (!%p191_p2), %v2816_v6  ;;  %298 = vst [vmem:[#allocation2 + $0x8] sm:$0x1] (!%p191_p2), %v297_v15  ;;  %v329_v19 = vsel (!%p191_p2), %vm2950_vm5, 0, %v328_v13  ;;  %301 = vst [vmem:[#allocation2 + $0x10] sm:$0x1] (!%p191_p2), %v300_v21  ;;  %v332_v25 = vsel (!%p191_p2), %vm2950_vm5, 0, %v331_v22 }
   0xd   : > { %s3506_s19 = smov (!%p222_p3, %s2340_s19), 1  ;;  %v293_v24 = vld [vmem:[#allocation2] sm:$0x1]  ;;  %330 = vst [vmem:[#allocation2 + $0xc] sm:$0x1] %v329_v19  ;;  %v303_v34 = vsel %vm2941_vm4, 0, %v302_v30  ;;  %vm2996_vm8 = vmand %vm283_vm0, %vm323_vm3 }
   0xe   : > { %s2533_s30 = sshll.u32 %s3506_s19, 6  ;;  %v294_v26 = vsel %vm2941_vm4, 0, %v293_v24  ;;  %333 = vst [vmem:[#allocation2 + $0x14] sm:$0x1] %v332_v25  ;;  %v334_v35 = vld [vmem:[#allocation2 + $0x1c] sm:$0x1] }
   0xf   : > { %s2924_s10 = scalar_lea.vmem %s3489_s0, %s2533_s30  ;;  %2667 = vmatpush3.bf16.msra.mxu0 %v2815_v4  ;;  %2611 = vmatpush3.bf16.msra.mxu1 %v2816_v6  ;;  %295 = vst [vmem:[#allocation2] sm:$0x1] %v294_v26  ;;  %v325_v31 = vld [vmem:[#allocation2 + $0x4] sm:$0x1]  ;;  %304 = vst [vmem:[#allocation2 + $0x18] sm:$0x1] %v303_v34  ;;  %s231_s15 = scalar_lea.vmem %s3493_s4, %s2533_s30 }
  0x10   : > { %v237_v7 = vld [vmem:[%s2924_s10] sm:$0xff]  ;;  %v238_v17 = vld [vmem:[%s2924_s10 + $0x8] sm:$0xff]  ;;  %v239_v29 = vld [vmem:[%s2924_s10 + $0x10] sm:$0xff]  ;;  %v326_v37 = vsel %vm2950_vm5, 0, %v325_v31  ;;  %2676 = vmatprep.subr.bf16.mxu0 %v2968_v28  ;;  %v335_v39 = vsel %vm2950_vm5, 0, %v334_v35  ;;  %vm684_vm10 = vcmask 392192  }
  0x11   : > { %v252_v10 = vmul.f32 %v2930_v8, %v237_v7  ;;  %v253_v20 = vmul.f32 %v2930_v8, %v238_v17  ;;  %v254_v33 = vmul.f32 %v2930_v8, %v239_v29  ;;  %v240_v36 = vld [vmem:[%s2924_s10 + $0x18] sm:$0xff]  ;;  %v305_v41 = vld [vmem:[#allocation2 + $0x20] sm:$0x1]  ;;  %327 = vst [vmem:[#allocation2 + $0x4] sm:$0x1] %v326_v37  ;;  %vm901_vm11 = vcmask 1042432  }
  0x12   : > { %v255_v40 = vmul.f32 %v2930_v8, %v240_v36  ;;  %v2984_v42 = vld [vmem:[%s3492_s3] sm:$0xff]   ;;  %336 = vst [vmem:[#allocation2 + $0x1c] sm:$0x1] %v335_v39  ;;  %v306_v46 = vsel %vm2941_vm4, 0, %v305_v41  ;;  %vm533_vm7 = vsmask.f32 7440 }
  0x13   : > { %v267_v14 = vadd.f32 %v2935_v9, %v252_v10  ;;  %v268_v27 = vadd.f32 %v2935_v9, %v253_v20  ;;  %v269_v45 = vadd.f32 %v2935_v9, %v254_v33  ;;  %v337_v47 = vld [vmem:[#allocation2 + $0x24] sm:$0x1]  ;;  %307 = vst [vmem:[#allocation2 + $0x20] sm:$0x1] %v306_v46  ;;  %2620 = vmatprep.subr.bf16.mxu1 %v2984_v42  ;;  %v462_v55 = vld [vmem:[#allocation2 + $0x8] sm:$0xf]  ;;  %vm3028_vm9 = vmor %vm532_vm6, %vm533_vm7 }
  0x14   : > { %v270_v49 = vadd.f32 %v2935_v9, %v255_v40  ;;  %v338_v50 = vsel %vm2950_vm5, 0, %v337_v47  ;;  %v241_v51 = vld [vmem:[%s2924_s10 + $0x20] sm:$0xff]  ;;  %v465_v56 = vld [vmem:[#allocation2 + $0xc] sm:$0x1]  ;;  %v468_v1 = vld [vmem:[#allocation2 + $0x10] sm:$0xf] }
  0x15   : > { %v275_v23 = vmax.f32 %v267_v14, 0.0  ;;  %v276_v38 = vmax.f32 %v268_v27, 0.0  ;;  %v277_v53 = vmax.f32 %v269_v45, 0.0  ;;  %339 = vst [vmem:[#allocation2 + $0x24] sm:$0x1] %v338_v50  ;;  %v256_v62 = vmul.f32 %v2930_v8, %v241_v51  ;;  %s2349_s30 = sshll.u32 %s3506_s19, 1 }
  0x16   : > { %v3001_v63 = vld [vmem:[#allocation2] sm:$0xf]  ;;  %v278_v2 = vmax.f32 %v270_v49, 0.0  ;;  %v471_v7 = vld [vmem:[#allocation2 + $0x14] sm:$0x1]  ;;  %vm902_vm12 = vcmask 1046532   ;;  %s235_s20 = scalar_lea.vmem %s3494_s5, %s2349_s30 }
  0x17   : > { %v2535_v32 = vpack.c.bf16 %v275_v23, %v275_v23  ;;  %v2536_v48 = vpack.c.bf16 %v276_v38, %v276_v38  ;;  %v2537_v61 = vpack.c.bf16 %v277_v53, %v277_v53  ;;  %v536_v5 = vshrl.u32 %v3001_v63, 16  ;;  %v308_v10 = vld [vmem:[#allocation2 + $0x28] sm:$0x1]  ;;  %v474_v25 = vld [vmem:[#allocation2 + $0x18] sm:$0xf]  ;;  %vm3239_vm13 = vmor %vm901_vm11, %vm902_vm12 }
  0x18   : > { %v539_v6 = vshll.u32 %v3001_v63, 16  ;;  %v3009_v11 = vld [vmem:[#allocation2 + $0x4] sm:$0x1]  ;;  %v271_v21 = vadd.f32 %v2935_v9, %v256_v62  ;;  %v2538_v26 = vpack.c.bf16 %v278_v2, %v278_v2  ;;  %v340_v27 = vld [vmem:[#allocation2 + $0x2c] sm:$0x1]  ;;  %v309_v31 = vsel %vm2941_vm4, 0, %v308_v10 }
  0x19   : > { %v380_v43 = vshrl.u32 %v2535_v32, 16  ;;  %v383_v44 = vshll.u32 %v2535_v32, 16  ;;  %v388_v57 = vshrl.u32 %v2536_v48, 16  ;;  %v391_v58 = vshll.u32 %v2536_v48, 16  ;;  %v477_v30 = vld [vmem:[#allocation2 + $0x1c] sm:$0x1] }
  0x1a   : > { %v396_v15 = vshrl.u32 %v2537_v61, 16  ;;  %v399_v17 = vshll.u32 %v2537_v61, 16  ;;  %v538_v18 = vrot.slane %v536_v5, 4  ;;  %v541_v19 = vrot.slane %v539_v6, 5  ;;  %v242_v32 = vld [vmem:[%s2924_s10 + $0x28] sm:$0xff] }
  0x1b   : > { %v382_v52 = vrot.slane %v380_v43, 7  ;;  %v390_v0 = vrot.slane %v388_v57, 7  ;;  %v545_v20 = vshll.u32 %v3009_v11, 16  ;;  %v311_v33 = vld [vmem:[#allocation2 + $0x30] sm:$0x1]  ;;  %v404_v37 = vshrl.u32 %v2538_v26, 16 }
  0x1c   : > { %v398_v24 = vrot.slane %v396_v15, 7  ;;  %v542_v29 = vor.u32 %v541_v19, %v538_v18  ;;  %310 = vst [vmem:[#allocation2 + $0x28] sm:$0x1] %v309_v31  ;;  %v407_v39 = vshll.u32 %v2538_v26, 16  ;;  %v279_v40 = vmax.f32 %v271_v21, 0.0 }
  0x1d   : > { %v385_v59 = vor.u32 %v383_v44, %v382_v52  ;;  %v386_v60 = vrot.slane %v382_v52, 4  ;;  %v393_v13 = vor.u32 %v391_v58, %v390_v0  ;;  %v394_v14 = vrot.slane %v390_v0, 4 }
  0x1e   : > { %v3020_v34 = vrot.slane %v545_v20, 5  ;;  %v401_v35 = vor.u32 %v399_v17, %v398_v24  ;;  %v402_v36 = vrot.slane %v398_v24, 4  ;;  %v3022_v38 = vrot.slane %v542_v29, 4 }
  0x1f   : > { %v463_v3 = vsel %vm2996_vm8, %v385_v59, %v462_v55  ;;  %v466_v4 = vsel %vm2941_vm4, %v386_v60, %v465_v56  ;;  %v469_v22 = vsel %vm2996_vm8, %v393_v13, %v468_v1  ;;  %v472_v23 = vsel %vm2941_vm4, %v394_v14, %v471_v7 }
  0x20   : > { %464 = vst [vmem:[#allocation2 + $0x8] sm:$0xf] %v463_v3  ;;  %467 = vst [vmem:[#allocation2 + $0xc] sm:$0x1] %v466_v4  ;;  %v341_v41 = vsel %vm2950_vm5, 0, %v340_v27  ;;  %v475_v44 = vsel %vm2996_vm8, %v401_v35, %v474_v25  ;;  %v478_v45 = vsel %vm2941_vm4, %v402_v36, %v477_v30  ;;  %v257_v46 = vmul.f32 %v2930_v8, %v242_v32 }
  0x21   : > { %470 = vst [vmem:[#allocation2 + $0x10] sm:$0xf] %v469_v22  ;;  %473 = vst [vmem:[#allocation2 + $0x14] sm:$0x1] %v472_v23  ;;  %v312_v47 = vsel %vm2941_vm4, 0, %v311_v33  ;;  %v3048_v56 = vrot.slane %v404_v37, 7  ;;  %v548_v57 = vsel %vm3028_vm9, %v3022_v38, %v3020_v34  ;;  %v3054_v60 = vpack.c.bf16 %v279_v40, %v279_v40 }
  0x22   : > { %342 = vst [vmem:[#allocation2 + $0x2c] sm:$0x1] %v341_v41  ;;  %476 = vst [vmem:[#allocation2 + $0x18] sm:$0xf] %v475_v44  ;;  %v3058_v2 = vadd.f32 %v2935_v9, %v257_v46  ;;  %v480_v38 = vld [vmem:[#allocation2 + $0x20] sm:$0xf] }
  0x23   : > { %479 = vst [vmem:[#allocation2 + $0x1c] sm:$0x1] %v478_v45  ;;  %313 = vst [vmem:[#allocation2 + $0x30] sm:$0x1] %v312_v47  ;;  %v409_v17 = vor.u32 %v407_v39, %v3048_v56  ;;  %v243_v39 = vld [vmem:[%s2924_s10 + $0x30] sm:$0xff]  ;;  %vm2191_vm14 = vcmask 523264  }
  0x24   : > { %vm2250_vm15 = vcmask 1040384   ;;  %vm2252_vm0 = vcmask 517120  }
  0x27   : > { %v3039_v48 = vld [vmem:[#allocation2 + $0x8] sm:$0xf]  ;;  %v3041_v49 = vld [vmem:[#allocation2 + $0xc] sm:$0x1] }
  0x28   : > { %v1196_v50 = vld [vmem:[#allocation2 + $0x8] sm:$0xf]  ;;  %v550_v51 = vshrl.u32 %v3039_v48, 16  ;;  %v553_v52 = vshll.u32 %v3039_v48, 16  ;;  %v559_v53 = vshll.u32 %v3041_v49, 16 }
  0x29   : > { %v3046_v55 = vld [vmem:[#allocation2 + $0xc] sm:$0x1]  ;;  %v1213_v58 = vshrl.u32 %v1196_v50, 16  ;;  %v1216_v59 = vshll.u32 %v1196_v50, 16  ;;  %v1198_v0 = vld [vmem:[#allocation2 + $0x10] sm:$0xf] }
  0x2a   : > { %v552_v61 = vrot.slane %v550_v51, 4  ;;  %v555_v62 = vrot.slane %v553_v52, 5  ;;  %v1222_v1 = vshll.u32 %v3046_v55, 16  ;;  %v561_v3 = vrot.slane %v559_v53, 5  ;;  %v3060_v4 = vld [vmem:[#allocation2 + $0x14] sm:$0x1] }
  0x2b   : > { %v1215_v5 = vrot.slane %v1213_v58, 4  ;;  %v1218_v6 = vrot.slane %v1216_v59, 5  ;;  %v1227_v7 = vshrl.u32 %v1198_v0, 16  ;;  %v1230_v13 = vshll.u32 %v1198_v0, 16  ;;  %v3063_v15 = vld [vmem:[#allocation2 + $0x10] sm:$0xf] }
  0x2c   : > { %v556_v10 = vor.u32 %v555_v62, %v552_v61  ;;  %v1236_v14 = vshll.u32 %v3060_v4, 16  ;;  %v3066_v20 = vld [vmem:[#allocation2 + $0x14] sm:$0x1]  ;;  %v564_v21 = vshrl.u32 %v3063_v15, 16  ;;  %v567_v22 = vshll.u32 %v3063_v15, 16  ;;  %v244_v58 = vld [vmem:[%s2924_s10 + $0x38] sm:$0xff] }
  0x2d   : > { %v1219_v18 = vor.u32 %v1218_v6, %v1215_v5  ;;  %v1229_v19 = vrot.slane %v1227_v7, 4  ;;  %v1224_v24 = vrot.slane %v1222_v1, 5  ;;  %v1232_v25 = vrot.slane %v1230_v13, 5  ;;  %v3070_v26 = vld [vmem:[#allocation2 + $0x18] sm:$0xf] }
  0x2e   : > { %v557_v23 = vrot.slane %v556_v10, 4  ;;  %v573_v27 = vshll.u32 %v3066_v20, 16  ;;  %v3073_v30 = vld [vmem:[#allocation2 + $0x1c] sm:$0x1]  ;;  %v566_v31 = vrot.slane %v564_v21, 4  ;;  %v569_v32 = vrot.slane %v567_v22, 5 }
  0x2f   : > { %v1220_v29 = vrot.slane %v1219_v18, 4  ;;  %v578_v33 = vshrl.u32 %v3070_v26, 16  ;;  %v1233_v35 = vor.u32 %v1232_v25, %v1229_v19  ;;  %v1238_v36 = vrot.slane %v1236_v14, 5  ;;  %v1200_v46 = vld [vmem:[#allocation2 + $0x18] sm:$0xf] }
  0x30   : > { %v562_v34 = vsel %vm3028_vm9, %v557_v23, %v561_v3  ;;  %v581_v37 = vshll.u32 %v3070_v26, 16  ;;  %v570_v41 = vor.u32 %v569_v32, %v566_v31  ;;  %v575_v44 = vrot.slane %v573_v27, 5  ;;  %v483_v53 = vld [vmem:[#allocation2 + $0x24] sm:$0x1]  ;;  %v3088_v62 = vld [vmem:[#allocation2 + $0x1c] sm:$0x1] }
  0x31   : > { %v2366_v40 = vcombine.low %v548_v57, %v562_v34  ;;  %v580_v45 = vrot.slane %v578_v33, 4  ;;  %v1225_v47 = vsel %vm3028_vm9, %v1220_v29, %v1224_v24  ;;  %v1234_v50 = vrot.slane %v1233_v35, 4  ;;  %v343_v0 = vld [vmem:[#allocation2 + $0x34] sm:$0x1]  ;;  %v314_v22 = vld [vmem:[#allocation2 + $0x38] sm:$0x1] }
  0x32   : > { %v583_v51 = vrot.slane %v581_v37, 5  ;;  %v587_v52 = vshll.u32 %v3073_v30, 16  ;;  %v571_v59 = vrot.slane %v570_v41, 4  ;;  %v410_v61 = vrot.slane %v3048_v56, 4  ;;  %v346_v29 = vld [vmem:[#allocation2 + $0x3c] sm:$0x1] }
  0x33   : > { %2612 = vmatprep.mubr.msk.bf16.mxu1 %vm684_vm10, %v2366_v40  ;;  %v481_v57 = vsel %vm2996_vm8, %v409_v17, %v480_v38  ;;  %v258_v1 = vmul.f32 %v2930_v8, %v243_v39  ;;  %v1239_v3 = vsel %vm3028_vm9, %v1234_v50, %v1238_v36  ;;  %v1241_v7 = vshrl.u32 %v1200_v46, 16  ;;  %v486_v31 = vld [vmem:[#allocation2 + $0x28] sm:$0xf]  ;;  %v489_v37 = vld [vmem:[#allocation2 + $0x2c] sm:$0x1] }
  0x34   : > { %v584_v5 = vor.u32 %v583_v51, %v580_v45  ;;  %v589_v6 = vrot.slane %v587_v52, 5  ;;  %482 = vst [vmem:[#allocation2 + $0x20] sm:$0xf] %v481_v57  ;;  %v2436_v10 = vcombine.low %v1225_v47, %v1239_v3  ;;  %v484_v13 = vsel %vm2941_vm4, %v410_v61, %v483_v53 }
  0x35   : > { %v1244_v56 = vshll.u32 %v1200_v46, 16  ;;  %v259_v14 = vmul.f32 %v2930_v8, %v244_v58  ;;  %v576_v17 = vsel %vm3028_vm9, %v571_v59, %v575_v44  ;;  %485 = vst [vmem:[#allocation2 + $0x24] sm:$0x1] %v484_v13  ;;  %v1243_v19 = vrot.slane %v1241_v7, 4  ;;  %v2822_v59 = vld [vmem:[%s3492_s3 + $0x10] sm:$0xff]  }
  0x36   : > { %v585_v18 = vrot.slane %v584_v5, 4  ;;  %v1250_v21 = vshll.u32 %v3088_v62, 16  ;;  %2668 = vmatprep.mubr.msk.bf16.mxu0 %vm684_vm10, %v2436_v10  ;;  %v412_v24 = vshrl.u32 %v3054_v60, 16  ;;  %v415_v25 = vshll.u32 %v3054_v60, 16  ;;  %v2820_v60 = vld [vmem:[%s3492_s3 + $0x8] sm:$0xff]  }
  0x37   : > { %v1246_v23 = vrot.slane %v1244_v56, 5  ;;  %v280_v27 = vmax.f32 %v3058_v2, 0.0  ;;  %v344_v32 = vsel %vm2950_vm5, 0, %v343_v0  ;;  %v273_v33 = vadd.f32 %v2935_v9, %v258_v1  ;;  %v317_v7 = vld [vmem:[#allocation2 + $0x40] sm:$0x1] }
  0x38   : > { %v590_v8 = vsel %vm3028_vm9, %v585_v18, %v589_v6  ;;  %v414_v36 = vrot.slane %v412_v24, 7  ;;  %345 = vst [vmem:[#allocation2 + $0x34] sm:$0x1] %v344_v32  ;;  %v3111_v2 = vrot.slane %v1250_v21, 5  ;;  %v315_v39 = vsel %vm2941_vm4, 0, %v314_v22  ;;  %v3140_v18 = vld [vmem:[%s3492_s3 + $0x30] sm:$0xff]  }
  0x39   : > { %v2367_v34 = vcombine.low %v576_v17, %v590_v8  ;;  %v1247_v35 = vor.u32 %v1246_v23, %v1243_v19  ;;  %v2540_v38 = vpack.c.bf16 %v280_v27, %v280_v27  ;;  %v347_v40 = vsel %vm2950_vm5, 0, %v346_v29  ;;  %316 = vst [vmem:[#allocation2 + $0x38] sm:$0x1] %v315_v39  ;;  %v349_v10 = vld [vmem:[#allocation2 + $0x44] sm:$0x1] }
  0x3a   : > { %v417_v44 = vor.u32 %v415_v25, %v414_v36  ;;  %v418_v45 = vrot.slane %v414_v36, 4  ;;  %v281_v47 = vmax.f32 %v273_v33, 0.0  ;;  %348 = vst [vmem:[#allocation2 + $0x3c] sm:$0x1] %v347_v40  ;;  %v274_v50 = vadd.f32 %v2935_v9, %v259_v14  ;;  %v492_v29 = vld [vmem:[#allocation2 + $0x30] sm:$0xf] }
  0x3b   : > { %2613 = vmatmul.mubr.msk.bf16.vlgmr.msra.gmra.mrb[0].mxu1 %vm684_vm10, %v2367_v34  ;;  %v1202_v41 = vld [vmem:[#allocation2 + $0x20] sm:$0xf]  ;;  %v1248_v57 = vrot.slane %v1247_v35, 4  ;;  %v423_v22 = vshll.u32 %v2540_v38, 16  ;;  %v918_v12 = vrot.slane %v3073_v30, 5  ;;  %v3291_v30 = vld [vmem:[%s3492_s3 + $0x48] sm:$0xff]  }
  0x3c   : > { %v3118_v46 = vld [vmem:[#allocation2 + $0x20] sm:$0xf]  ;;  %v1255_v51 = vshrl.u32 %v1202_v41, 16  ;;  %v1258_v52 = vshll.u32 %v1202_v41, 16  ;;  %2621 = vmatpush3.bf16.msra.mxu1 %v2984_v42  ;;  %v3127_v61 = vld [vmem:[#allocation2 + $0x24] sm:$0x1]  ;;  %v487_v0 = vsel %vm2996_vm8, %v417_v44, %v486_v31  ;;  %v490_v9 = vsel %vm2941_vm4, %v418_v45, %v489_v37 }
  0x3d   : > { %v592_v53 = vshrl.u32 %v3118_v46, 16  ;;  %v595_v58 = vshll.u32 %v3118_v46, 16  ;;  %v3133_v1 = vld [vmem:[#allocation2 + $0x24] sm:$0x1]  ;;  %v420_v42 = vshrl.u32 %v2540_v38, 16  ;;  %2622 = vmatprep.subr.bf16.mxu1 %v2820_v60  ;;  %v1264_v6 = vshll.u32 %v3127_v61, 16 }
  0x3e   : > { %v1257_v3 = vrot.slane %v1255_v51, 4  ;;  %v1260_v5 = vrot.slane %v1258_v52, 5  ;;  %488 = vst [vmem:[#allocation2 + $0x28] sm:$0xf] %v487_v0  ;;  %491 = vst [vmem:[#allocation2 + $0x2c] sm:$0x1] %v490_v9  ;;  %v2541_v24 = vpack.c.bf16 %v281_v47, %v281_v47  ;;  %v1253_v25 = vsel %vm3028_vm9, %v1248_v57, %v3111_v2 }
  0x3f   : > { %v594_v13 = vrot.slane %v592_v53, 4  ;;  %v597_v56 = vrot.slane %v595_v58, 5  ;;  %v601_v14 = vshll.u32 %v3133_v1, 16  ;;  %v422_v17 = vrot.slane %v420_v42, 7  ;;  %v495_v23 = vld [vmem:[#allocation2 + $0x34] sm:$0x1] }
  0x40   : > { %v1261_v19 = vor.u32 %v1260_v5, %v1257_v3  ;;  %v1266_v21 = vrot.slane %v1264_v6, 5  ;;  %2623 = vmatpush3.bf16.msra.mxu1 %v2820_v60  ;;  %v282_v8 = vmax.f32 %v274_v50, 0.0  ;;  %v428_v34 = vshrl.u32 %v2541_v24, 16  ;;  %v2819_v35 = vld [vmem:[%s3492_s3 + $0x80] sm:$0xff]   ;;  %v498_v44 = vld [vmem:[#allocation2 + $0x38] sm:$0xf] }
  0x41   : > { %v426_v27 = vrot.slane %v422_v17, 4  ;;  %2624 = vmatprep.subr.bf16.mxu1 %v2822_v59  ;;  %v598_v32 = vor.u32 %v597_v56, %v594_v13  ;;  %v425_v33 = vor.u32 %v423_v22, %v422_v17  ;;  %v431_v37 = vshll.u32 %v2541_v24, 16  ;;  %v501_v45 = vld [vmem:[#allocation2 + $0x3c] sm:$0x1] }
  0x42   : > { %v1262_v31 = vrot.slane %v1261_v19, 4  ;;  %v318_v38 = vsel %vm2941_vm4, 0, %v317_v7  ;;  %v350_v60 = vsel %vm2950_vm5, 0, %v349_v10  ;;  %v603_v39 = vrot.slane %v601_v14, 5 }
  0x43   : > { %v496_v36 = vsel %vm2941_vm4, %v426_v27, %v495_v23  ;;  %v493_v40 = vsel %vm2996_vm8, %v425_v33, %v492_v29  ;;  %v430_v41 = vrot.slane %v428_v34, 7  ;;  %319 = vst [vmem:[#allocation2 + $0x40] sm:$0x1] %v318_v38  ;;  %351 = vst [vmem:[#allocation2 + $0x44] sm:$0x1] %v350_v60  ;;  %v3162_v53 = vpack.c.bf16 %v282_v8, %v282_v8 }
  0x44   : > { %v1267_v2 = vsel %vm3028_vm9, %v1262_v31, %v1266_v21  ;;  %497 = vst [vmem:[#allocation2 + $0x34] sm:$0x1] %v496_v36  ;;  %2625 = vmatpush3.bf16.msra.mxu1 %v2822_v59  ;;  %494 = vst [vmem:[#allocation2 + $0x30] sm:$0xf] %v493_v40  ;;  %v599_v7 = vrot.slane %v598_v32, 4  ;;  %v2821_v21 = vld [vmem:[%s3492_s3 + $0x88] sm:$0xff]  }
  0x45   : > { %v2437_v47 = vcombine.low %v1253_v25, %v1267_v2  ;;  %v3158_v50 = vld [vmem:[#allocation2 + $0x28] sm:$0xf]  ;;  %v3160_v51 = vld [vmem:[#allocation2 + $0x2c] sm:$0x1]  ;;  %2634 = vmatprep.subr.bf16.mxu1 %v3140_v18  ;;  %v433_v5 = vor.u32 %v431_v37, %v430_v41  ;;  %v434_v6 = vrot.slane %v430_v41, 4  ;;  %v436_v29 = vshrl.u32 %v3162_v53, 16 }
  0x46   : > { %v1204_v52 = vld [vmem:[#allocation2 + $0x28] sm:$0xf]  ;;  %v606_v58 = vshrl.u32 %v3158_v50, 16  ;;  %v609_v57 = vshll.u32 %v3158_v50, 16  ;;  %v615_v0 = vshll.u32 %v3160_v51, 16  ;;  %v604_v8 = vsel %vm3028_vm9, %v599_v7, %v603_v39  ;;  %v3194_v2 = vld [vmem:[%s3492_s3 + $0x90] sm:$0xff]  }
  0x47   : > { %v3168_v9 = vld [vmem:[#allocation2 + $0x2c] sm:$0x1]  ;;  %v1269_v59 = vshrl.u32 %v1204_v52, 16  ;;  %2669 = vmatmul.mubr.msk.bf16.vlgmr.msra.gmra.mrb[0].mxu0 %vm684_vm10, %v2437_v47  ;;  %v1272_v42 = vshll.u32 %v1204_v52, 16  ;;  %v499_v17 = vsel %vm2996_vm8, %v433_v5, %v498_v44  ;;  %v502_v19 = vsel %vm2941_vm4, %v434_v6, %v501_v45 }
  0x48   : > { %v1278_v3 = vshll.u32 %v3168_v9, 16  ;;  %2677 = vmatpush3.bf16.msra.mxu0 %v2968_v28  ;;  %v608_v10 = vrot.slane %v606_v58, 4  ;;  %v611_v13 = vrot.slane %v609_v57, 5  ;;  %v617_v23 = vrot.slane %v615_v0, 5  ;;  %500 = vst [vmem:[#allocation2 + $0x38] sm:$0xf] %v499_v17 }
  0x49   : > { %v1271_v56 = vrot.slane %v1269_v59, 4  ;;  %2678 = vmatprep.subr.bf16.mxu0 %v2819_v35  ;;  %v1274_v14 = vrot.slane %v1272_v42, 5  ;;  %503 = vst [vmem:[#allocation2 + $0x3c] sm:$0x1] %v502_v19  ;;  %v439_v41 = vshll.u32 %v3162_v53, 16  ;;  %v438_v0 = vrot.slane %v436_v29, 7 }
  0x4a   : > { %v612_v22 = vor.u32 %v611_v13, %v608_v10  ;;  %v1280_v25 = vrot.slane %v1278_v3, 5  ;;  %v504_v59 = vld [vmem:[#allocation2 + $0x40] sm:$0xf] }
  0x4b   : > { %v3180_v28 = vld [vmem:[#allocation2 + $0x34] sm:$0x1]  ;;  %v1275_v24 = vor.u32 %v1274_v14, %v1271_v56  ;;  %v1206_v32 = vld [vmem:[#allocation2 + $0x30] sm:$0xf]  ;;  %v507_v14 = vld [vmem:[#allocation2 + $0x44] sm:$0x1] }
  0x4c   : > { %v3182_v27 = vld [vmem:[#allocation2 + $0x34] sm:$0x1]  ;;  %2679 = vmatpush3.bf16.msra.mxu0 %v2819_v35  ;;  %v613_v31 = vrot.slane %v612_v22, 4  ;;  %v1292_v33 = vshll.u32 %v3180_v28, 16  ;;  %v3188_v34 = vld [vmem:[#allocation2 + $0x30] sm:$0xf] }
  0x4d   : > { %v1276_v36 = vrot.slane %v1275_v24, 4  ;;  %v1283_v37 = vshrl.u32 %v1206_v32, 16  ;;  %v1286_v38 = vshll.u32 %v1206_v32, 16  ;;  %v620_v60 = vshrl.u32 %v3188_v34, 16  ;;  %2680 = vmatprep.subr.bf16.mxu0 %v2821_v21 }
  0x4e   : > { %v618_v35 = vsel %vm3028_vm9, %v613_v31, %v617_v23  ;;  %v623_v39 = vshll.u32 %v3188_v34, 16  ;;  %v629_v40 = vshll.u32 %v3182_v27, 16  ;;  %v1294_v52 = vrot.slane %v1292_v33, 5 }
  0x4f   : > { %v2368_v44 = vcombine.low %v604_v8, %v618_v35  ;;  %v1285_v45 = vrot.slane %v1283_v37, 4  ;;  %v1288_v47 = vrot.slane %v1286_v38, 5  ;;  %v622_v58 = vrot.slane %v620_v60, 4  ;;  %v3204_v5 = vld [vmem:[#allocation2 + $0x38] sm:$0xf] }
  0x50   : > { %v625_v57 = vrot.slane %v623_v39, 5  ;;  %2681 = vmatpush3.bf16.msra.mxu0 %v2821_v21  ;;  %v1281_v42 = vsel %vm3028_vm9, %v1276_v36, %v1280_v25  ;;  %v3206_v6 = vld [vmem:[#allocation2 + $0x3c] sm:$0x1]  ;;  %v1208_v53 = vld [vmem:[#allocation2 + $0x38] sm:$0xf]  ;;  %v634_v10 = vshrl.u32 %v3204_v5, 16  ;;  %v441_v21 = vor.u32 %v439_v41, %v438_v0 }
  0x51   : > { %2616 = vmatprep.mubr.msk.bf16.mxu1 %vm684_vm10, %v2368_v44  ;;  %v1289_v3 = vor.u32 %v1288_v47, %v1285_v45  ;;  %2690 = vmatprep.subr.bf16.mxu0 %v3194_v2  ;;  %v637_v13 = vshll.u32 %v3204_v5, 16  ;;  %v643_v56 = vshll.u32 %v3206_v6, 16  ;;  %v631_v19 = vrot.slane %v629_v40, 5  ;;  %v1446_v41 = vld [vmem:[#allocation2 + $0x8] sm:$0xe] }
  0x52   : > { %v626_v7 = vor.u32 %v625_v57, %v622_v58  ;;  %v442_v22 = vrot.slane %v438_v0, 4  ;;  %v636_v24 = vrot.slane %v634_v10, 4  ;;  %v1297_v29 = vshrl.u32 %v1208_v53, 16  ;;  %v3221_v54 = vld [vmem:[#allocation2 + $0x3c] sm:$0x1] }
  0x53   : > { %v1290_v17 = vrot.slane %v1289_v3, 4  ;;  %v639_v25 = vrot.slane %v637_v13, 5  ;;  %v505_v31 = vsel %vm2996_vm8, %v441_v21, %v504_v59  ;;  %v645_v37 = vrot.slane %v643_v56, 5  ;;  %v1447_v47 = vld [vmem:[#allocation2 + $0x10] sm:$0xe] }
  0x54   : > { %v627_v23 = vrot.slane %v626_v7, 4  ;;  %v508_v32 = vsel %vm2941_vm4, %v442_v22, %v507_v14  ;;  %506 = vst [vmem:[#allocation2 + $0x40] sm:$0xf] %v505_v31  ;;  %v1300_v38 = vshll.u32 %v1208_v53, 16  ;;  %v1299_v39 = vrot.slane %v1297_v29, 4 }
  0x55   : > { %v1295_v8 = vsel %vm3028_vm9, %v1290_v17, %v1294_v52  ;;  %v640_v36 = vor.u32 %v639_v25, %v636_v24  ;;  %509 = vst [vmem:[#allocation2 + $0x44] sm:$0x1] %v508_v32  ;;  %v2377_v45 = vcombine.low %v3001_v63, %v3039_v48  ;;  %v906_v52 = vrot.slane %v3009_v11, 5  ;;  %v1448_v14 = vld [vmem:[#allocation2 + $0x18] sm:$0xe] }
  0x56   : > { %v2438_v33 = vcombine.low %v1281_v42, %v1295_v8  ;;  %v632_v60 = vsel %vm3028_vm9, %v627_v23, %v631_v19  ;;  %v1302_v40 = vrot.slane %v1300_v38, 5  ;;  %v1472_v57 = vrot.slane %v3046_v55, 5  ;;  %v877_v17 = vld [vmem:[#allocation2] sm:$0xe]  ;;  %v878_v19 = vld [vmem:[#allocation2 + $0x8] sm:$0xe] }
  0x57   : > { %v641_v35 = vrot.slane %v640_v36, 4  ;;  %v1476_v0 = vrot.slane %v3060_v4, 5  ;;  %v1306_v42 = vshll.u32 %v3221_v54, 16  ;;  %v2447_v7 = vrot.slane %v1446_v41, 9  ;;  %v1449_v24 = vld [vmem:[#allocation2 + $0x20] sm:$0xe] }
  0x58   : > { %2672 = vmatprep.mubr.msk.bf16.mxu0 %vm684_vm10, %v2438_v33  ;;  %v1303_v59 = vor.u32 %v1302_v40, %v1299_v39  ;;  %v2448_v63 = vrot.slane %v1447_v47, 9  ;;  %v910_v48 = vrot.slane %v3041_v49, 5  ;;  %v1480_v4 = vrot.slane %v3088_v62, 5  ;;  %v1451_v31 = vld [vmem:[#allocation2 + $0x30] sm:$0xe]  ;;  %v2829_v36 = vld [vmem:[%s3492_s3 + $0x38] sm:$0xff]  }
  0x59   : > { %v646_v44 = vsel %vm3028_vm9, %v641_v35, %v645_v37  ;;  %v1484_v56 = vrot.slane %v3127_v61, 5  ;;  %v1308_v21 = vrot.slane %v1306_v42, 5  ;;  %v1473_v25 = vsel %vm3239_vm13, %v2447_v7, %v1472_v57  ;;  %v1450_v61 = vld [vmem:[#allocation2 + $0x28] sm:$0xe]  ;;  %v880_v42 = vld [vmem:[#allocation2 + $0x18] sm:$0xe] }
  0x5a   : > { %v2369_v58 = vcombine.low %v632_v60, %v646_v44  ;;  %v1304_v49 = vrot.slane %v1303_v59, 4  ;;  %v1477_v29 = vsel %vm3239_vm13, %v2448_v63, %v1476_v0  ;;  %v2378_v8 = vcombine.low %v3063_v15, %v3070_v26  ;;  %v320_v60 = vld [vmem:[#allocation2 + $0x48] sm:$0x1]  ;;  %v3258_v15 = vld [vmem:[#allocation2 + $0x38] sm:$0xe]  ;;  %v2831_v0 = vld [vmem:[%s3492_s3 + $0x40] sm:$0xff]  }
  0x5b   : > { %v1210_v3 = vld [vmem:[#allocation2 + $0x40] sm:$0xf]  ;;  %v2379_v62 = vcombine.low %v3118_v46, %v3158_v50  ;;  %v2388_v37 = vrot.slane %v877_v17, 9  ;;  %v2389_v38 = vrot.slane %v878_v19, 9  ;;  %v2449_v40 = vrot.slane %v1448_v14, 9 }
  0x5c   : > { %2617 = vmatmul.mubr.msk.bf16.gmra.mrb[4].mxu1 %vm684_vm10, %v2369_v58  ;;  %v3232_v53 = vld [vmem:[#allocation2 + $0x44] sm:$0x1]  ;;  %v1311_v11 = vshrl.u32 %v1210_v3, 16  ;;  %v1314_v10 = vshll.u32 %v1210_v3, 16  ;;  %v1309_v35 = vsel %vm3028_vm9, %v1304_v49, %v1308_v21  ;;  %v2461_v26 = vcombine.low %v1473_v25, %v1477_v29  ;;  %v879_v59 = vld [vmem:[#allocation2 + $0x10] sm:$0xe] }
  0x5d   : > { %v1320_v13 = vshll.u32 %v3232_v53, 16  ;;  %2626 = vmatprep.mubr.msk.bf16.mxu1 %vm684_vm10, %v2377_v45  ;;  %v2450_v46 = vrot.slane %v1449_v24, 9  ;;  %v2451_v50 = vrot.slane %v1450_v61, 9  ;;  %v1488_v41 = vrot.slane %v3168_v9, 5  ;;  %v881_v7 = vld [vmem:[#allocation2 + $0x20] sm:$0xe] }
  0x5e   : > { %v1313_v22 = vrot.slane %v1311_v11, 4  ;;  %v1316_v23 = vrot.slane %v1314_v10, 5  ;;  %v2452_v45 = vrot.slane %v1451_v31, 9  ;;  %v1492_v47 = vrot.slane %v3180_v28, 5  ;;  %v882_v63 = vld [vmem:[#allocation2 + $0x28] sm:$0xe] }
  0x5f   : > { %v1322_v33 = vrot.slane %v1320_v13, 5  ;;  %v321_v58 = vsel %vm2941_vm4, 0, %v320_v60  ;;  %v907_v9 = vsel %vm3239_vm13, %v2388_v37, %v906_v52  ;;  %v914_v28 = vrot.slane %v3066_v20, 5  ;;  %v1453_v10 = vld [vmem:[#allocation2 + $0x40] sm:$0xe] }
  0x60   : > { %v1317_v32 = vor.u32 %v1316_v23, %v1313_v22  ;;  %322 = vst [vmem:[#allocation2 + $0x48] sm:$0x1] %v321_v58  ;;  %v1481_v3 = vsel %vm3239_vm13, %v2449_v40, %v1480_v4  ;;  %v1485_v52 = vsel %vm3239_vm13, %v2450_v46, %v1484_v56  ;;  %v2380_v11 = vcombine.low %v3188_v34, %v3204_v5  ;;  %v883_v17 = vld [vmem:[#allocation2 + $0x30] sm:$0xe]  ;;  %v1765_v23 = vld [vmem:[#allocation2 + $0x18] sm:$0xf] }
  0x61   : > { %v2453_v20 = vrot.slane %v3258_v15, 9  ;;  %v1493_v13 = vsel %vm3239_vm13, %v2452_v45, %v1492_v47  ;;  %v2390_v56 = vrot.slane %v879_v59, 9  ;;  %v2391_v14 = vrot.slane %v880_v42, 9  ;;  %v1763_v19 = vld [vmem:[#allocation2 + $0x10] sm:$0xf] }
  0x62   : > { %v1318_v39 = vrot.slane %v1317_v32, 4  ;;  %v2392_v34 = vrot.slane %v881_v7, 9  ;;  %v922_v5 = vrot.slane %v3133_v1, 5  ;;  %v2462_v49 = vcombine.low %v1481_v3, %v1485_v52  ;;  %v2826_v32 = vld [vmem:[%s3492_s3 + $0x98] sm:$0xff]   ;;  %v3320_v15 = vld [vmem:[#allocation2 + $0x14] sm:$0x1] }
  0x63   : > { %v2393_v21 = vrot.slane %v882_v63, 9  ;;  %v926_v22 = vrot.slane %v3160_v51, 5  ;;  %v1496_v25 = vrot.slane %v3221_v54, 5  ;;  %v2454_v29 = vrot.slane %v1453_v10, 9  ;;  %v1767_v47 = vld [vmem:[#allocation2 + $0x20] sm:$0xf] }
  0x64   : > { %2627 = vmatmul.mubr.msk.bf16.vlgmr.msra.gmra.mrb[0].mxu1 %vm684_vm10, %v2378_v8  ;;  %v1323_v44 = vsel %vm3028_vm9, %v1318_v39, %v1322_v33  ;;  %v1500_v8 = vrot.slane %v3232_v53, 5  ;;  %v915_v1 = vsel %vm3239_vm13, %v2390_v56, %v914_v28  ;;  %v919_v61 = vsel %vm3239_vm13, %v2391_v14, %v918_v12  ;;  %v2830_v39 = vld [vmem:[%s3492_s3 + $0xa0] sm:$0xff]   ;;  %v1769_v58 = vld [vmem:[#allocation2 + $0x28] sm:$0xf]  ;;  %v1771_v28 = vld [vmem:[#allocation2 + $0x30] sm:$0xf] }
  0x65   : > { %2635 = vmatpush3.bf16.msra.mxu1 %v3140_v18  ;;  %2630 = vmatprep.mubr.msk.bf16.mxu1 %vm684_vm10, %v2379_v62  ;;  %v2439_v57 = vcombine.low %v1309_v35, %v1323_v44  ;;  %v911_v18 = vsel %vm3239_vm13, %v2389_v38, %v910_v48  ;;  %v1489_v48 = vsel %vm3239_vm13, %v2451_v50, %v1488_v41  ;;  %v884_v62 = vld [vmem:[#allocation2 + $0x38] sm:$0xe]  ;;  %v1780_v51 = vshrl.u32 %v1763_v19, 16 }
  0x66   : > { %2636 = vmatprep.subr.bf16.mxu1 %v2829_v36  ;;  %v2402_v4 = vcombine.low %v907_v9, %v911_v18  ;;  %v2463_v24 = vcombine.low %v1489_v48, %v1493_v13  ;;  %v1783_v31 = vshll.u32 %v1763_v19, 16  ;;  %v923_v54 = vsel %vm3239_vm13, %v2392_v34, %v922_v5  ;;  %v1773_v12 = vld [vmem:[#allocation2 + $0x38] sm:$0xf]  ;;  %v3344_v48 = vld [vmem:[%s3492_s3 + $0xa8] sm:$0xff]  }
  0x67   : > { %2673 = vmatmul.mubr.msk.bf16.gmra.mrb[4].mxu0 %vm684_vm10, %v2439_v57  ;;  %v2394_v53 = vrot.slane %v883_v17, 9  ;;  %v1794_v33 = vshrl.u32 %v1765_v23, 16  ;;  %v927_v37 = vsel %vm3239_vm13, %v2393_v21, %v926_v22  ;;  %v930_v38 = vrot.slane %v3182_v27, 5  ;;  %v2832_v57 = vld [vmem:[#allocation2 + $0x10] ss:$8 sps:$4 sm:$0xff]   ;;  %v3363_v22 = vld [vmem:[%s3492_s3 + $0xc0] sm:$0xff]  }
  0x68   : > { %2682 = vmatprep.mubr.msk.bf16.mxu0 %vm684_vm10, %v2461_v26  ;;  %v2395_v60 = vrot.slane %v884_v62, 9  ;;  %v934_v35 = vrot.slane %v3206_v6, 5  ;;  %v2403_v40 = vcombine.low %v915_v1, %v919_v61  ;;  %v3322_v26 = vld [vmem:[#allocation2 + $0x1c] sm:$0x1]  ;;  %v1497_v27 = vsel %vm3239_vm13, %v2453_v20, %v1496_v25  ;;  %v352_v17 = vld [vmem:[#allocation2 + $0x4c] sm:$0x1] }
  0x69   : > { %2637 = vmatpush3.bf16.msra.mxu1 %v2829_v36  ;;  %v1797_v36 = vshll.u32 %v1765_v23, 16  ;;  %v1501_v6 = vsel %vm3239_vm13, %v2454_v29, %v1500_v8  ;;  %v1782_v46 = vrot.slane %v1780_v51, 4  ;;  %v1785_v50 = vrot.slane %v1783_v31, 5  ;;  %v3370_v62 = vld [vmem:[#allocation2 + $0x2c] sm:$0x1] }
  0x6a   : > { %2638 = vmatprep.subr.bf16.mxu1 %v2831_v0  ;;  %v2404_v41 = vcombine.low %v923_v54, %v927_v37  ;;  %v1796_v44 = vrot.slane %v1794_v33, 4  ;;  %v1803_v9 = vshll.u32 %v3322_v26, 16  ;;  %v2464_v18 = vcombine.low %v1497_v27, %v1501_v6  ;;  %v2834_v1 = vld [vmem:[#allocation2 + $0x20] ss:$8 sps:$4 sm:$0xff]   ;;  %v2837_v54 = vld [vmem:[#allocation2 + $0x30] ss:$8 sps:$4 sm:$0xff]  }
  0x6b   : > { %v1799_v45 = vrot.slane %v1797_v36, 5  ;;  %v931_v59 = vsel %vm3239_vm13, %v2394_v53, %v930_v38  ;;  %v935_v42 = vsel %vm3239_vm13, %v2395_v60, %v934_v35  ;;  %v1808_v3 = vshrl.u32 %v1767_v47, 16  ;;  %v1772_v53 = vld [vmem:[#allocation2 + $0x34] sm:$0x1]  ;;  %v1774_v33 = vld [vmem:[#allocation2 + $0x3c] sm:$0x1] }
  0x6c   : > { %2631 = vmatmul.mubr.msk.bf16.gmra.mrb[4].mxu1 %vm684_vm10, %v2380_v11  ;;  %v1811_v7 = vshll.u32 %v1767_v47, 16  ;;  %v1822_v63 = vshrl.u32 %v1769_v58, 16  ;;  %v1825_v52 = vshll.u32 %v1769_v58, 16  ;;  %v2841_v11 = vld [vmem:[%s3492_s3 + $0x58] sm:$0xff]   ;;  %v1786_v10 = vor.u32 %v1785_v50, %v1782_v46  ;;  %v1775_v35 = vld [vmem:[#allocation2 + $0x40] sm:$0xf] }
  0x6d   : > { %2639 = vmatpush3.bf16.msra.mxu1 %v2831_v0  ;;  %2640 = vmatprep.mubr.msk.bf16.mxu1 %vm684_vm10, %v2402_v4  ;;  %v1789_v0 = vshll.u32 %v3320_v15, 16  ;;  %v1800_v20 = vor.u32 %v1799_v45, %v1796_v44  ;;  %v1836_v13 = vshrl.u32 %v1771_v28, 16  ;;  %v1839_v4 = vshll.u32 %v1771_v28, 16  ;;  %v2017_v45 = vld [vmem:[#allocation2 + $0x30] sm:$0xe] }
  0x6e   : > { %2648 = vmatprep.subr.bf16.mxu1 %v3291_v30  ;;  %v1850_v56 = vshrl.u32 %v1773_v12, 16  ;;  %v1853_v14 = vshll.u32 %v1773_v12, 16  ;;  %v2405_v34 = vcombine.low %v931_v59, %v935_v42  ;;  %v3353_v19 = vrot.slane %v1803_v9, 5  ;;  %v2018_v47 = vld [vmem:[#allocation2 + $0x38] sm:$0xe] }
  0x6f   : > { %2683 = vmatmul.mubr.msk.bf16.vlgmr.msra.gmra.mrb[0].mxu0 %vm684_vm10, %v2462_v49  ;;  %v3351_v5 = vrot.slane %v1789_v0, 5  ;;  %v3355_v49 = vld [vmem:[#allocation2 + $0x24] sm:$0x1]  ;;  %v353_v21 = vsel %vm2950_vm5, 0, %v352_v17  ;;  %v1810_v23 = vrot.slane %v1808_v3, 4  ;;  %v1824_v25 = vrot.slane %v1822_v63, 4 }
  0x70   : > { %2691 = vmatpush3.bf16.msra.mxu0 %v3194_v2  ;;  %2686 = vmatprep.mubr.msk.bf16.mxu0 %vm684_vm10, %v2463_v24  ;;  %v2838_v2 = vld [vmem:[%s3492_s3 + $0x50] sm:$0xff]   ;;  %v1813_v24 = vrot.slane %v1811_v7, 5  ;;  %v1827_v29 = vrot.slane %v1825_v52, 5  ;;  %354 = vst [vmem:[#allocation2 + $0x4c] sm:$0x1] %v353_v21  ;;  %v3366_v8 = vrot.slane %v1786_v10, 4 }
  0x71   : > { %2692 = vmatprep.subr.bf16.mxu0 %v2826_v32  ;;  %v3368_v16 = vrot.slane %v1800_v20, 4  ;;  %v1838_v61 = vrot.slane %v1836_v13, 4  ;;  %v1841_v51 = vrot.slane %v1839_v4, 5  ;;  %v1852_v31 = vrot.slane %v1850_v56, 4  ;;  %v2844_v58 = vld [vmem:[#allocation2 + $0x18] ss:$8 sps:$4 sm:$0xff]  }
  0x72   : > { %v1814_v36 = vor.u32 %v1813_v24, %v1810_v23  ;;  %v1817_v37 = vshll.u32 %v3355_v49, 16  ;;  %v1828_v38 = vor.u32 %v1827_v29, %v1824_v25  ;;  %v1831_v60 = vshll.u32 %v3370_v62, 16  ;;  %v3397_v3 = vld [vmem:[%s3492_s3 + $0xc8] sm:$0xff]   ;;  %v1776_v56 = vld [vmem:[#allocation2 + $0x44] sm:$0x1] }
  0x73   : > { %v1792_v27 = vsel %vm3028_vm9, %v3366_v8, %v3351_v5  ;;  %v1806_v6 = vsel %vm3028_vm9, %v3368_v16, %v3353_v19  ;;  %v1842_v46 = vor.u32 %v1841_v51, %v1838_v61  ;;  %v1845_v50 = vshll.u32 %v1772_v53, 16  ;;  %v2846_v7 = vld [vmem:[#allocation2 + $0x28] ss:$8 sps:$4 sm:$0xff]   ;;  %v2019_v29 = vld [vmem:[#allocation2 + $0x40] sm:$0xe] }
  0x74   : > { %2641 = vmatmul.mubr.msk.bf16.vlgmr.msra.gmra.mrb[0].mxu1 %vm684_vm10, %v2403_v40  ;;  %2693 = vmatpush3.bf16.msra.mxu0 %v2826_v32  ;;  %v1855_v32 = vrot.slane %v1853_v14, 5  ;;  %v2836_v40 = vld [vmem:[%s3492_s3 + $0xb0] sm:$0xff]   ;;  %v1859_v44 = vshll.u32 %v1774_v33, 16  ;;  %v1815_v59 = vrot.slane %v1814_v36, 4  ;;  %v1819_v42 = vrot.slane %v1817_v37, 5 }
  0x75   : > { %2649 = vmatpush3.bf16.msra.mxu1 %v3291_v30  ;;  %2694 = vmatprep.subr.bf16.mxu0 %v2830_v39  ;;  %v2842_v30 = vld [vmem:[#allocation2 + $0x8] ss:$8 sps:$4 sm:$0xff]   ;;  %v1829_v28 = vrot.slane %v1828_v38, 4  ;;  %v1833_v12 = vrot.slane %v1831_v60, 5  ;;  %v2510_v63 = vrot.slane %v2017_v45, 9  ;;  %v2055_v52 = vrot.slane %v1772_v53, 5 }
  0x76   : > { %2644 = vmatprep.mubr.msk.bf16.mxu1 %vm684_vm10, %v2404_v41  ;;  %2650 = vmatprep.subr.bf16.mxu1 %v2838_v2  ;;  %v1856_v41 = vor.u32 %v1855_v32, %v1852_v31  ;;  %v2839_v10 = vld [vmem:[#allocation2 + $0x40] ss:$8 sps:$4 sm:$0xff]   ;;  %v1843_v20 = vrot.slane %v1842_v46, 4  ;;  %v1861_v4 = vrot.slane %v1859_v44, 5  ;;  %v2495_v19 = vcombine.low %v1792_v27, %v1806_v6  ;;  %v2848_v31 = vld [vmem:[%s3492_s3 + $0xd0] sm:$0xff]  }
  0x77   : > { %2687 = vmatmul.mubr.msk.bf16.gmra.mrb[4].mxu0 %vm684_vm10, %v2464_v18  ;;  %v2840_v18 = vld [vmem:[%s3492_s3 + $0xb8] sm:$0xff]   ;;  %v1778_v21 = vld [vmem:[#allocation2 + $0x4c] sm:$0x1]  ;;  %v1820_v23 = vsel %vm3028_vm9, %v1815_v59, %v1819_v42  ;;  %v2056_v24 = vsel %vm3239_vm13, %v2510_v63, %v2055_v52  ;;  %v2020_v8 = vld [vmem:[#allocation2 + $0x48] sm:$0xe]  ;;  %v1834_v16 = vsel %vm3028_vm9, %v1829_v28, %v1833_v12  ;;  %v1873_v61 = vshll.u32 %v1776_v56, 16 }
  0x78   : > { %2695 = vmatpush3.bf16.msra.mxu0 %v2830_v39  ;;  %2696 = vmatprep.mubr.msk.bf16.mxu0 %vm684_vm10, %v2832_v57  ;;  %v1777_v39 = vld [vmem:[#allocation2 + $0x48] sm:$0xf]  ;;  %v1864_v57 = vshrl.u32 %v1775_v35, 16  ;;  %v1857_v13 = vrot.slane %v1856_v41, 4  ;;  %v2063_v51 = vrot.slane %v1776_v56, 5  ;;  %v1887_v36 = vshll.u32 %v1778_v21, 16 }
  0x79   : > { %2704 = vmatprep.subr.bf16.mxu0 %v3344_v48  ;;  %2651 = vmatpush3.bf16.msra.mxu1 %v2838_v2  ;;  %v1867_v2 = vshll.u32 %v1775_v35, 16  ;;  %v1878_v0 = vshrl.u32 %v1777_v39, 16  ;;  %v1881_v9 = vshll.u32 %v1777_v39, 16  ;;  %v2067_v37 = vrot.slane %v1778_v21, 5  ;;  %v2013_v39 = vld [vmem:[#allocation2 + $0x10] sm:$0xe] }
  0x7a   : > { %2652 = vmatprep.subr.bf16.mxu1 %v2841_v11  ;;  %v1866_v14 = vrot.slane %v1864_v57, 4  ;;  %v1862_v32 = vsel %vm3028_vm9, %v1857_v13, %v1861_v4  ;;  %v2512_v60 = vrot.slane %v2019_v29, 9  ;;  %v2513_v35 = vrot.slane %v2020_v8, 9  ;;  %v2015_v42 = vld [vmem:[#allocation2 + $0x20] sm:$0xe] }
  0x7b   : > { %v1869_v17 = vrot.slane %v1867_v2, 5  ;;  %v1883_v5 = vrot.slane %v1881_v9, 5  ;;  %v2496_v27 = vcombine.low %v1820_v23, %v1834_v16  ;;  %v1889_v44 = vrot.slane %v1887_v36, 5  ;;  %v2016_v28 = vld [vmem:[#allocation2 + $0x28] sm:$0xe] }
  0x7c   : > { %2645 = vmatmul.mubr.msk.bf16.gmra.mrb[4].mxu1 %vm684_vm10, %v2405_v34  ;;  %v1880_v34 = vrot.slane %v1878_v0, 4  ;;  %v2064_v45 = vsel %vm3239_vm13, %v2512_v60, %v2063_v51  ;;  %v2039_v57 = vrot.slane %v3320_v15, 5  ;;  %v2043_v0 = vrot.slane %v3322_v26, 5 }
  0x7d   : > { %2654 = vmatprep.mubr.msk.bf16.mxu1 %vm684_vm10, %v2842_v30  ;;  %2653 = vmatpush3.bf16.msra.mxu1 %v2841_v11  ;;  %v2059_v11 = vrot.slane %v1774_v33, 5  ;;  %v1847_v30 = vrot.slane %v1845_v50, 5  ;;  %v1870_v53 = vor.u32 %v1869_v17, %v1866_v14  ;;  %v1875_v50 = vrot.slane %v1873_v61, 5 }
  0x7e   : > { %2732 = vmatprep.subr.bf16.mxu1 %v3363_v22  ;;  %v1884_v33 = vor.u32 %v1883_v5, %v1880_v34  ;;  %v2047_v43 = vrot.slane %v3355_v49, 5  ;;  %v2509_v63 = vrot.slane %v2016_v28, 9  ;;  %v2051_v52 = vrot.slane %v3370_v62, 5 }
  0x7f   : > { %2697 = vmatmul.mubr.msk.bf16.vlgmr.msra.gmra.mrb[0].mxu0 %vm684_vm10, %v2834_v1  ;;  %v1848_v1 = vsel %vm3028_vm9, %v1843_v20, %v1847_v30  ;;  %v1871_v46 = vrot.slane %v1870_v53, 4 }
  0x80   : > { %2705 = vmatpush3.bf16.msra.mxu0 %v3344_v48  ;;  %2700 = vmatprep.mubr.msk.bf16.mxu0 %vm684_vm10, %v2837_v54  ;;  %v2511_v48 = vrot.slane %v2018_v47, 9  ;;  %v2847_v54 = vld [vmem:[#allocation2 + $0x38] ss:$8 sps:$4 sm:$0xff]   ;;  %v2497_v6 = vcombine.low %v1848_v1, %v1862_v32  ;;  %v1885_v41 = vrot.slane %v1884_v33, 4  ;;  %v2068_v47 = vsel %vm3239_vm13, %v2513_v35, %v2067_v37 }
  0x81   : > { %2706 = vmatprep.subr.bf16.mxu0 %v2836_v40  ;;  %v2523_v9 = vcombine.low %v2064_v45, %v2068_v47 }
  0x82   : > { %v2060_v25 = vsel %vm3239_vm13, %v2511_v48, %v2059_v11  ;;  %v1890_v59 = vsel %vm3028_vm9, %v1885_v41, %v1889_v44  ;;  %v2052_v11 = vsel %vm3239_vm13, %v2509_v63, %v2051_v52 }
  0x83   : > { %v2522_v38 = vcombine.low %v2056_v24, %v2060_v25 }
  0x84   : > { %2655 = vmatmul.mubr.msk.bf16.vlgmr.msra.gmra.mrb[0].mxu1 %vm684_vm10, %v2844_v58  ;;  %2707 = vmatpush3.bf16.msra.mxu0 %v2836_v40  ;;  %v2014_v40 = vld [vmem:[#allocation2 + $0x18] sm:$0xe]  ;;  %v2506_v58 = vrot.slane %v2013_v39, 9 }
  0x85   : > { %2735 = vmatpush3.bf16.msra.mxu1 %v3363_v22  ;;  %2708 = vmatprep.subr.bf16.mxu0 %v2840_v18  ;;  %v2507_v2 = vrot.slane %v2014_v40, 9 }
  0x86   : > { %2658 = vmatprep.mubr.msk.bf16.mxu1 %vm684_vm10, %v2846_v7  ;;  %2733 = vmatprep.subr.bf16.mxu1 %v3397_v3  ;;  %v2040_v15 = vsel %vm3239_vm13, %v2506_v58, %v2039_v57 }
  0x87   : > { %2701 = vmatmul.mubr.msk.bf16.gmra.mrb[4].mxu0 %vm684_vm10, %v2839_v10  ;;  %v2044_v26 = vsel %vm3239_vm13, %v2507_v2, %v2043_v0 }
  0x88   : > { %2709 = vmatpush3.bf16.msra.mxu0 %v2840_v18  ;;  %2710 = vmatprep.mubr.msk.bf16.mxu0 %vm684_vm10, %v2495_v19  ;;  %v1876_v18 = vsel %vm3028_vm9, %v1871_v46, %v1875_v50  ;;  %v2520_v7 = vcombine.low %v2040_v15, %v2044_v26 }
  0x89   : > { %2718 = vmatprep.subr.bf16.mxu0 %v3363_v22  ;;  %2736 = vmatpush3.bf16.msra.mxu1 %v3397_v3  ;;  %v2498_v12 = vcombine.low %v1876_v18, %v1890_v59 }
  0x8a   : > { %2734 = vmatprep.subr.bf16.mxu1 %v2848_v31 }
  0x8c   : > { %2659 = vmatmul.mubr.msk.bf16.gmra.mrb[4].mxu1 %vm684_vm10, %v2847_v54 }
  0x8d   : > { %2728 = vmatprep.mubr.msk.bf16.mxu1 %vm684_vm10, %v2522_v38  ;;  %2737 = vmatpush3.bf16.msra.mxu1 %v2848_v31 }
  0x8f   : > { %2711 = vmatmul.mubr.msk.bf16.vlgmr.msra.gmra.mrb[0].mxu0 %vm684_vm10, %v2496_v27 }
  0x90   : > { %2719 = vmatpush3.bf16.msra.mxu0 %v3363_v22  ;;  %2714 = vmatprep.mubr.msk.bf16.mxu0 %vm684_vm10, %v2497_v6  ;;  %v2508_v22 = vrot.slane %v2015_v42, 9 }
  0x91   : > { %2720 = vmatprep.subr.bf16.mxu0 %v3397_v3 }
  0x92   : > { %v2048_v48 = vsel %vm3239_vm13, %v2508_v22, %v2047_v43 }
  0x93   : > { %v2521_v10 = vcombine.low %v2048_v48, %v2052_v11 }
  0x94   : > { %2729 = vmatmul.mubr.msk.bf16.vlgmr.msra.gmra.mrb[8].mxu1 %vm684_vm10, %v2523_v9  ;;  %2721 = vmatpush3.bf16.msra.mxu0 %v3397_v3 }
  0x95   : > { %2722 = vmatprep.subr.bf16.mxu0 %v2848_v31 }
  0x97   : > { %2715 = vmatmul.mubr.msk.bf16.gmra.mrb[4].mxu0 %vm684_vm10, %v2498_v12 }
  0x98   : > { %2723 = vmatpush3.bf16.msra.mxu0 %v2848_v31  ;;  %2724 = vmatprep.mubr.msk.bf16.mxu0 %vm684_vm10, %v2520_v7 }
  0x9f   : > { %2725 = vmatmul.mubr.msk.bf16.vlgmr.msra.gmra.mrb[0].mxu0 %vm684_vm10, %v2521_v10 }
 0x157   : > { %v2656_v3 = vpop.f32.mrb[0].mxu1 }
 0x158   : > { %v1157_v49 = vpop.f32.mrb[1].mxu1 }
 0x159   : > { %v2657_v20 = vpop.f32.mrb[2].mxu1 }
 0x15a   : > { %v1160_v62 = vpop.f32.mrb[3].mxu1 }
 0x15f   : > { %v2660_v30 = vpop.f32.mrb[4].mxu1 }
 0x160   : > { %v1173_v13 = vpop.f32.mrb[5].mxu1 }
 0x161   : > { %v2661_v4 = vpop.f32.mrb[6].mxu1 }
 0x162   : > { %v1176_v56 = vpop.f32.mrb[7].mxu1 }
 0x167   : > { %v2730_v14 = vpop.f32.mrb[8].mxu1 }
 0x168   : > { %v2168_v17 = vpop.f32.mrb[9].mxu1 }
 0x169   : > { %v2731_v34 = vpop.f32.mrb[10].mxu1 }
 0x16a   : > { %v2171_v5 = vpop.f32.mrb[11].mxu1  ;;  %v2716_v19 = vpop.f32.mrb[4].mxu0 }
 0x16b   : > { %v2742_v21 = vadd.f32 %v2716_v19, %v2660_v30  ;;  %v1990_v55 = vpop.f32.mrb[5].mxu0 }
 0x16c   : > { %v2744_v23 = vadd.f32 %v1990_v55, %v1173_v13  ;;  %v2717_v24 = vpop.f32.mrb[6].mxu0 }
 0x16d   : > { %v2746_v25 = vadd.f32 %v2717_v24, %v2661_v4  ;;  %v1993_v29 = vpop.f32.mrb[7].mxu0  ;;  %v2743_v8 = vadd.f32 %v2742_v21, %v2730_v14 }
 0x16e   : > { %v2748_v16 = vadd.f32 %v1993_v29, %v1176_v56  ;;  %v2745_v1 = vadd.f32 %v2744_v23, %v2168_v17 }
 0x16f   : > { %2198 = vst.msk [vmem:[%s231_s15 + $0x30] sm:$0xff] %vm2191_vm14, %v2743_v8  ;;  %v2747_v61 = vadd.f32 %v2746_v25, %v2731_v34  ;;  %v2227_v28 = vmul.f32 %v2743_v8, %v2743_v8  ;;  %v2211_v63 = vsel %vm2191_vm14, %v2743_v8, 0.0 }
 0x170   : > { %2196 = vst.msk [vmem:[%s231_s15 + $0x20] sm:$0xff] %vm2191_vm14, %v2745_v1  ;;  %v2749_v51 = vadd.f32 %v2748_v16, %v2171_v5  ;;  %v2225_v57 = vmul.f32 %v2745_v1, %v2745_v1  ;;  %v2207_v18 = vsel %vm2191_vm14, %v2745_v1, 0.0 }
 0x171   : > { %2199 = vst.msk [vmem:[%s231_s15 + $0x38] sm:$0xff] %vm2191_vm14, %v2747_v61  ;;  %v2228_v52 = vmul.f32 %v2747_v61, %v2747_v61 }
 0x172   : > { %v2726_v31 = vpop.f32.mrb[0].mxu0  ;;  %2197 = vst.msk [vmem:[%s231_s15 + $0x28] sm:$0xff] %vm2191_vm14, %v2749_v51  ;;  %v2226_v42 = vmul.f32 %v2749_v51, %v2749_v51  ;;  %v2236_v12 = vsel %vm2191_vm14, %v2225_v57, 0.0  ;;  %v2209_v22 = vsel %vm2191_vm14, %v2749_v51, 0.0 }
 0x173   : > { %v2738_v32 = vadd.f32 %v2726_v31, %v2656_v3  ;;  %v2152_v54 = vpop.f32.mrb[1].mxu0  ;;  %v2240_v3 = vsel %vm2191_vm14, %v2227_v28, 0.0  ;;  %v2242_v30 = vsel %vm2191_vm14, %v2228_v52, 0.0 }
 0x174   : > { %v2739_v53 = vadd.f32 %v2152_v54, %v1157_v49  ;;  %v2727_v33 = vpop.f32.mrb[2].mxu0  ;;  %v2238_v48 = vsel %vm2191_vm14, %v2226_v42, 0.0  ;;  %v2213_v49 = vsel %vm2191_vm14, %v2747_v61, 0.0 }
 0x175   : > { %2194 = vst.msk [vmem:[%s231_s15 + $0x10] sm:$0xff] %vm2191_vm14, %v2738_v32  ;;  %v2740_v36 = vadd.f32 %v2727_v33, %v2657_v20  ;;  %v2155_v37 = vpop.f32.mrb[3].mxu0  ;;  %v2223_v35 = vmul.f32 %v2738_v32, %v2738_v32  ;;  %v2203_v46 = vsel %vm2191_vm14, %v2738_v32, 0.0 }
 0x176   : > { %2192 = vst.msk [vmem:[%s231_s15] sm:$0xff] %vm2191_vm14, %v2739_v53  ;;  %v2221_v38 = vmul.f32 %v2739_v53, %v2739_v53  ;;  %v2741_v60 = vadd.f32 %v2155_v37, %v1160_v62  ;;  %v2200_v39 = vsel %vm2191_vm14, %v2739_v53, 0.0 }
 0x177   : > { %2195 = vst.msk [vmem:[%s231_s15 + $0x18] sm:$0xff] %vm2191_vm14, %v2740_v36  ;;  %v2224_v41 = vmul.f32 %v2740_v36, %v2740_v36  ;;  %v2232_v58 = vsel %vm2191_vm14, %v2223_v35, 0.0  ;;  %v2205_v2 = vsel %vm2191_vm14, %v2740_v36, 0.0 }
 0x178   : > { %2193 = vst.msk [vmem:[%s231_s15 + $0x8] sm:$0xff] %vm2191_vm14, %v2741_v60  ;;  %v2201_v40 = vsel %vm2191_vm14, %v2741_v60, 0.0  ;;  %v2222_v27 = vmul.f32 %v2741_v60, %v2741_v60  ;;  %v2229_v50 = vsel %vm2191_vm14, %v2221_v38, 0.0 }
 0x179   : > { %v2202_v6 = vadd.f32 %v2201_v40, %v2200_v39  ;;  %v2234_v59 = vsel %vm2191_vm14, %v2224_v41, 0.0 }
 0x17a   : > { %v2230_v44 = vsel %vm2191_vm14, %v2222_v27, 0.0 }
 0x17b   : > { %v2204_v45 = vadd.f32 %v2203_v46, %v2202_v6  ;;  %v2231_v47 = vadd.f32 %v2230_v44, %v2229_v50 }
 0x17d   : > { %v2233_v0 = vadd.f32 %v2232_v58, %v2231_v47  ;;  %v2206_v9 = vadd.f32 %v2205_v2, %v2204_v45 }
 0x17f   : > { %v2208_v15 = vadd.f32 %v2207_v18, %v2206_v9  ;;  %v2235_v26 = vadd.f32 %v2234_v59, %v2233_v0 }
 0x181   : > { %v2210_v7 = vadd.f32 %v2209_v22, %v2208_v15  ;;  %v2237_v43 = vadd.f32 %v2236_v12, %v2235_v26 }
 0x183   : > { %v2212_v11 = vadd.f32 %v2211_v63, %v2210_v7  ;;  %v2239_v10 = vadd.f32 %v2238_v48, %v2237_v43 }
 0x185   : > { %v2214_v20 = vadd.f32 %v2213_v49, %v2212_v11  ;;  %v2241_v62 = vadd.f32 %v2240_v3, %v2239_v10 }
 0x187   : > { %v2215_v13 = vrot.slane %v2214_v20, 4  ;;  %v2243_v4 = vadd.f32 %v2242_v30, %v2241_v62 }
 0x189   : > { %v2216_v56 = vadd.f32 %v2215_v13, %v2214_v20  ;;  %v2244_v14 = vrot.slane %v2243_v4, 4 }
 0x18b   : > { %v2217_v17 = vrot.slane %v2216_v56, 2  ;;  %v2245_v34 = vadd.f32 %v2244_v14, %v2243_v4 }
 0x18d   : > { %v2218_v5 = vadd.f32 %v2217_v17, %v2216_v56  ;;  %v2246_v19 = vrot.slane %v2245_v34, 2 }
 0x18f   : > { %v2219_v21 = vrot.slane %v2218_v5, 1  ;;  %v2247_v55 = vadd.f32 %v2246_v19, %v2245_v34 }
 0x191   : > { %v2248_v23 = vrot.slane %v2247_v55, 1  ;;  %v2220_v24 = vadd.f32 %v2219_v21, %v2218_v5 }
 0x193   : > { %v2249_v25 = vadd.f32 %v2248_v23, %v2247_v55 }
 0x195   : > { %v2251_v29 = vsel %vm2250_vm15, %v2220_v24, %v2249_v25 }
 0x196   : > { %2253 = vst.msk [vmem:[%s235_s20] sm:$0x3] %vm2252_vm0, %v2251_v29 }
 0x197 PF: > { %s16_s18 = sadd.s32 1, %s2855_s18  }
 0x198   : > { %p13_p4 = scmp.ge.s32.totalorder %s16_s18, 4  }
 0x19a   :  { %15 = sbr.rel (!%p13_p4) target bundleno = 1 (0x1), region = 89 }

// kernel: _lambda_.5
= control target key start
LH: loop header
LB: loop body
LE: loop exit
PB: predicated region body
PF: predicated region fallthrough
CT: control target
= control target key end

     0   :  { %s5120_s27 = smov 0   ;;  %s6610_s0 = inlined_call_operand.vmem [shape: f32[2,64,128], index: 0, kind: input, shape index: {}]   ;;  %s6611_s1 = inlined_call_operand.vmem [shape: f32[1,128], index: 1, kind: input, shape index: {}]   ;;  %s6612_s2 = inlined_call_operand.vmem [shape: f32[1,128], index: 2, kind: input, shape index: {}]   ;;  %s6613_s3 = inlined_call_operand.vmem [shape: bf16[9,32,32], index: 3, kind: input, shape index: {}]   ;;  %s6614_s4 = inlined_call_operand.vmem [shape: bf16[9,32,48], index: 4, kind: input, shape index: {}]   ;;  %s6615_s5 = inlined_call_operand.vmem [shape: f32[2,64,32], index: 5, kind: output, shape index: {0}]   ;;  %s6616_s6 = inlined_call_operand.vmem [shape: f32[2,64,48], index: 6, kind: output, shape index: {1}]   ;;  %s6617_s7 = inlined_call_operand.vmem [shape: f32[2,2,32], index: 7, kind: output, shape index: {2}]   ;;  %s6618_s8 = inlined_call_operand.vmem [shape: f32[2,2,48], index: 8, kind: output, shape index: {3}]  }
   0x1 LB: > { %s4225_s28 = sadd.s32 4294967295, %s5070_s27   ;;  %p4229_p0 = scmp.ge.s32.totalorder %s5070_s27, 1  ;;  %s5070_s27 = sphi %s5120_s27, %s19_s27  }
   0x2   : > { %p269_p1 = scmp.lt.s32.totalorder %s5070_s27, 3 }
   0x4   : > { %p270_p2 = pnand %p4229_p0, %p269_p1 }
   0x6   : > { %273 = sbr.rel (%p270_p2) target bundleno = 608 (0x260), region = 40 }
   0xd   : > { %p316_p3 = scmp.lt.s32.totalorder %s4225_s28, 1  ;;  %vm386_vm0 = vcmask 257024   ;;  %vm388_vm1 = vcmask 253952   ;;  %vm394_vm2 = vsmask.f32 256  ;;  %v5072_v6 = vmov 0  }
   0xe   : > { %v5133_v0 = vld [vmem:[%s6611_s1] ss:$0 sm:$0xff]  ;;  %vm5136_vm3 = vmand %vm388_vm1, %vm394_vm2  ;;  %v405_v2 = vld [vmem:[#allocation2 + $0x18] sm:$0x1]  ;;  %vm426_vm4 = vsmask.f32 7938 }
   0xf   : > { %s6782_s28 = smov (!%p316_p3, %s4225_s28), 1  ;;  %v406_v3 = vsel %vm5136_vm3, 0, %v405_v2  ;;  %vm5143_vm5 = vmand %vm386_vm0, %vm426_vm4  ;;  %v399_v5 = vld [vmem:[#allocation2 + $0x8] sm:$0x1]  ;;  %392 = vst.msk [vmem:[#allocation2 + $0x4c] sm:$0x1] %vm388_vm1, %v5072_v6 }
  0x10   : > { %387 = vst.msk [vmem:[#allocation2] sm:$0xf] %vm386_vm0, %v5072_v6  ;;  %391 = vst.msk [vmem:[#allocation2 + $0x48] sm:$0xf] %vm386_vm0, %v5072_v6  ;;  %s5150_s9 = sshll.u32 %s6782_s28, 6  ;;  %v400_v8 = vsel %vm5136_vm3, 0, %v399_v5 }
  0x11   : > { %389 = vst.msk [vmem:[#allocation2 + $0x4] sm:$0x1] %vm388_vm1, %v5072_v6  ;;  %v5155_v7 = vld [vmem:[%s6612_s2] ss:$0 sm:$0xff]  ;;  %407 = vst [vmem:[#allocation2 + $0x18] sm:$0x1] %v406_v3  ;;  %s5163_s14 = scalar_lea.vmem %s6610_s0, %s5150_s9  ;;  %s6560_s18 = scalar_lea.vmem %s6616_s6, %s5150_s9 }
  0x12   : > { %401 = vst [vmem:[#allocation2 + $0x8] sm:$0x1] %v400_v8  ;;  %vm5167_vm6 = vmand %vm388_vm1, %vm426_vm4  ;;  %v431_v10 = vld [vmem:[#allocation2 + $0xc] sm:$0x1]  ;;  %v402_v11 = vld [vmem:[#allocation2 + $0x10] sm:$0x1] }
  0x13   : > { %v342_v12 = vld [vmem:[%s5163_s14 + $0x10] sm:$0xff]  ;;  %v340_v13 = vld [vmem:[%s5163_s14] sm:$0xff]  ;;  %v341_v14 = vld [vmem:[%s5163_s14 + $0x8] sm:$0xff]  ;;  %v432_v15 = vsel %vm5167_vm6, 0, %v431_v10  ;;  %v403_v16 = vsel %vm5136_vm3, 0, %v402_v11  ;;  %s5073_s15 = smov 96  }
  0x14   : > { %v357_v17 = vmul.f32 %v5133_v0, %v342_v12  ;;  %v355_v18 = vmul.f32 %v5133_v0, %v340_v13  ;;  %v356_v19 = vmul.f32 %v5133_v0, %v341_v14  ;;  %v344_v20 = vld [vmem:[%s5163_s14 + $0x20] sm:$0xff]  ;;  %v343_v21 = vld [vmem:[%s5163_s14 + $0x18] sm:$0xff]  ;;  %v346_v22 = vld [vmem:[%s5163_s14 + $0x30] sm:$0xff]  ;;  %433 = vst [vmem:[#allocation2 + $0xc] sm:$0x1] %v432_v15  ;;  %s5074_s20 = smov 64  }
  0x15   : > { %404 = vst [vmem:[#allocation2 + $0x10] sm:$0x1] %v403_v16  ;;  %v359_v23 = vmul.f32 %v5133_v0, %v344_v20  ;;  %v358_v24 = vmul.f32 %v5133_v0, %v343_v21  ;;  %v361_v25 = vmul.f32 %v5133_v0, %v346_v22  ;;  %v345_v26 = vld [vmem:[%s5163_s14 + $0x28] sm:$0xff]  ;;  %v437_v57 = vld [vmem:[#allocation2 + $0x1c] sm:$0x1]  ;;  %vm1020_vm10 = vcmask 1042432  }
  0x16   : > { %v372_v27 = vadd.f32 %v5155_v7, %v357_v17  ;;  %v370_v28 = vadd.f32 %v5155_v7, %v355_v18  ;;  %v371_v29 = vadd.f32 %v5155_v7, %v356_v19  ;;  %v360_v30 = vmul.f32 %v5133_v0, %v345_v26  ;;  %v455_v62 = vld [vmem:[#allocation2 + $0x4c] sm:$0x1]  ;;  %v434_v63 = vld [vmem:[#allocation2 + $0x14] sm:$0x1]  ;;  %v411_v2 = vld [vmem:[#allocation2 + $0x28] sm:$0x1] }
  0x17   : > { %v374_v31 = vadd.f32 %v5155_v7, %v359_v23  ;;  %v373_v32 = vadd.f32 %v5155_v7, %v358_v24  ;;  %v376_v33 = vadd.f32 %v5155_v7, %v361_v25  ;;  %v408_v3 = vld [vmem:[#allocation2 + $0x20] sm:$0x1]  ;;  %v417_v5 = vld [vmem:[#allocation2 + $0x38] sm:$0x1]  ;;  %v456_v14 = vsel %vm5167_vm6, 0, %v455_v62 }
  0x18   : > { %v380_v34 = vmax.f32 %v372_v27, 0.0  ;;  %v378_v35 = vmax.f32 %v370_v28, 0.0  ;;  %v379_v36 = vmax.f32 %v371_v29, 0.0  ;;  %v375_v42 = vadd.f32 %v5155_v7, %v360_v30  ;;  %v396_v12 = vld [vmem:[#allocation2] sm:$0x1] }
  0x19   : > { %v382_v37 = vmax.f32 %v374_v31, 0.0  ;;  %v381_v38 = vmax.f32 %v373_v32, 0.0  ;;  %v384_v45 = vmax.f32 %v376_v33, 0.0  ;;  %v428_v13 = vld [vmem:[#allocation2 + $0x4] sm:$0x1]  ;;  %v438_v15 = vsel %vm5167_vm6, 0, %v437_v57 }
  0x1a   : > { %v4547_v39 = vpack.c.bf16 %v380_v34, %v380_v34  ;;  %v4545_v40 = vpack.c.bf16 %v378_v35, %v378_v35  ;;  %v4546_v41 = vpack.c.bf16 %v379_v36, %v379_v36  ;;  %v383_v54 = vmax.f32 %v375_v42, 0.0  ;;  %v414_v16 = vld [vmem:[#allocation2 + $0x30] sm:$0x1]  ;;  %457 = vst [vmem:[#allocation2 + $0x4c] sm:$0x1] %v456_v14 }
  0x1b   : > { %v5196_v43 = vpack.c.bf16 %v382_v37, %v382_v37  ;;  %v5198_v44 = vpack.c.bf16 %v381_v38, %v381_v38  ;;  %v5206_v56 = vpack.c.bf16 %v384_v45, %v384_v45  ;;  %439 = vst [vmem:[#allocation2 + $0x1c] sm:$0x1] %v438_v15  ;;  %v435_v23 = vsel %vm5167_vm6, 0, %v434_v63  ;;  %v5016_v31 = vld [vmem:[%s6613_s3 + $0x10] sm:$0xff]   ;;  %v5017_v38 = vld [vmem:[%s6613_s3 + $0x18] sm:$0xff]  }
  0x1c   : > { %v499_v46 = vshrl.u32 %v4547_v39, 16  ;;  %v502_v47 = vshll.u32 %v4547_v39, 16  ;;  %v483_v48 = vshrl.u32 %v4545_v40, 16  ;;  %v486_v49 = vshll.u32 %v4545_v40, 16  ;;  %436 = vst [vmem:[#allocation2 + $0x14] sm:$0x1] %v435_v23  ;;  %4661 = vmatprep.subr.bf16.mxu0 %v5016_v31 }
  0x1d   : > { %v491_v50 = vshrl.u32 %v4546_v41, 16  ;;  %v494_v53 = vshll.u32 %v4546_v41, 16  ;;  %v515_v60 = vshrl.u32 %v5196_v43, 16  ;;  %v507_v61 = vshrl.u32 %v5198_v44, 16  ;;  %4662 = vmatpush3.bf16.msra.mxu0 %v5016_v31  ;;  %v440_v41 = vld [vmem:[#allocation2 + $0x24] sm:$0x1] }
  0x1e   : > { %v5200_v51 = vrot.slane %v499_v46, 7  ;;  %v5202_v52 = vrot.slane %v483_v48, 7  ;;  %v518_v10 = vshll.u32 %v5196_v43, 16  ;;  %v4550_v11 = vpack.c.bf16 %v383_v54, %v383_v54  ;;  %4663 = vmatprep.subr.bf16.mxu0 %v5017_v38  ;;  %v446_v46 = vld [vmem:[#allocation2 + $0x34] sm:$0x1]  ;;  %v347_v48 = vld [vmem:[%s5163_s14 + $0x38] sm:$0xff] }
  0x1f   : > { %v5204_v55 = vrot.slane %v491_v50, 7  ;;  %v5228_v18 = vrot.slane %v515_v60, 7  ;;  %v510_v19 = vshll.u32 %v5198_v44, 16  ;;  %v531_v20 = vshrl.u32 %v5206_v56, 16  ;;  %v420_v63 = vld [vmem:[#allocation2 + $0x40] sm:$0x1] }
  0x20   : > { %v5209_v58 = vor.u32 %v502_v47, %v5200_v51  ;;  %v5212_v59 = vor.u32 %v486_v49, %v5202_v52  ;;  %v489_v6 = vrot.slane %v5202_v52, 4  ;;  %v505_v17 = vrot.slane %v5200_v51, 4  ;;  %v443_v47 = vld [vmem:[#allocation2 + $0x2c] sm:$0x1]  ;;  %v5319_v51 = vld [vmem:[%s6613_s3] sm:$0xff]   ;;  %v5020_v52 = vld [vmem:[%s6614_s4 + $0x18] sm:$0xff]  }
  0x21   : > { %v496_v8 = vor.u32 %v494_v53, %v5204_v55  ;;  %v497_v21 = vrot.slane %v5204_v55, 4  ;;  %v5233_v22 = vrot.slane %v507_v61, 7  ;;  %v412_v24 = vsel %vm5136_vm3, 0, %v411_v2  ;;  %4664 = vmatpush3.bf16.msra.mxu0 %v5017_v38  ;;  %v449_v53 = vld [vmem:[#allocation2 + $0x3c] sm:$0x1] }
  0x22   : > { %554 = vrot.lane.b32.xlu1 %v5209_v58, %s5073_s15  ;;  %546 = vrot.lane.b32.xlu0 %v5212_v59, %s5073_s15  ;;  %v523_v25 = vshrl.u32 %v4550_v11, 16  ;;  %413 = vst [vmem:[#allocation2 + $0x28] sm:$0x1] %v412_v24  ;;  %v409_v26 = vsel %vm5136_vm3, 0, %v408_v3  ;;  %v418_v27 = vsel %vm5136_vm3, 0, %v417_v5  ;;  %v415_v28 = vsel %vm5136_vm3, 0, %v414_v16 }
  0x23   : > { %410 = vst [vmem:[#allocation2 + $0x20] sm:$0x1] %v409_v26  ;;  %419 = vst [vmem:[#allocation2 + $0x38] sm:$0x1] %v418_v27  ;;  %v397_v29 = vsel %vm5136_vm3, 0, %v396_v12  ;;  %v429_v30 = vsel %vm5167_vm6, 0, %v428_v13  ;;  %v520_v32 = vor.u32 %v518_v10, %v5228_v18  ;;  %v512_v34 = vor.u32 %v510_v19, %v5233_v22  ;;  %4673 = vmatprep.subr.bf16.mxu0 %v5319_v51 }
  0x24   : > { %416 = vst [vmem:[#allocation2 + $0x30] sm:$0x1] %v415_v28  ;;  %398 = vst [vmem:[#allocation2] sm:$0x1] %v397_v29  ;;  %v534_v33 = vshll.u32 %v5206_v56, 16  ;;  %v5265_v35 = vrot.slane %v531_v20, 7  ;;  %v362_v57 = vmul.f32 %v5133_v0, %v347_v48 }
  0x25   : > { %430 = vst [vmem:[#allocation2 + $0x4] sm:$0x1] %v429_v30  ;;  %v5267_v36 = vrot.slane %v523_v25, 7  ;;  %v526_v37 = vshll.u32 %v4550_v11, 16  ;;  %v441_v42 = vsel %vm5167_vm6, 0, %v440_v41  ;;  %v513_v43 = vrot.slane %v5233_v22, 4 }
  0x26   : > { %548 = vrot.lane.b32.xlu1 %v489_v6, %s5073_s15  ;;  %550 = vrot.lane.b32.xlu0 %v496_v8, %s5073_s15  ;;  %v536_v39 = vor.u32 %v534_v33, %v5265_v35  ;;  %442 = vst [vmem:[#allocation2 + $0x24] sm:$0x1] %v441_v42  ;;  %v521_v45 = vrot.slane %v5228_v18, 4  ;;  %v447_v49 = vsel %vm5167_vm6, 0, %v446_v46  ;;  %v444_v50 = vsel %vm5167_vm6, 0, %v443_v47  ;;  %v5018_v0 = vld [vmem:[%s6614_s4 + $0x10] sm:$0xff]  }
  0x27   : > { %v528_v40 = vor.u32 %v526_v37, %v5267_v36  ;;  %v529_v44 = vrot.slane %v5267_v36, 4  ;;  %448 = vst [vmem:[#allocation2 + $0x34] sm:$0x1] %v447_v49  ;;  %445 = vst [vmem:[#allocation2 + $0x2c] sm:$0x1] %v444_v50  ;;  %v450_v54 = vsel %vm5167_vm6, 0, %v449_v53  ;;  %4769 = vmatprep.subr.bf16.mxu1 %v5018_v0 }
  0x28   : > { %v537_v56 = vrot.slane %v5265_v35, 4  ;;  %451 = vst [vmem:[#allocation2 + $0x3c] sm:$0x1] %v450_v54  ;;  %4770 = vmatpush3.bf16.msra.mxu1 %v5018_v0  ;;  %v421_v2 = vsel %vm5136_vm3, 0, %v420_v63  ;;  %v5336_v3 = vld [vmem:[%s6614_s4] sm:$0xff]   ;;  %vm809_vm11 = vcmask 261120  }
  0x29   : > { %4771 = vmatprep.subr.bf16.mxu1 %v5020_v52  ;;  %v452_v5 = vld [vmem:[#allocation2 + $0x44] sm:$0x1]  ;;  %422 = vst [vmem:[#allocation2 + $0x40] sm:$0x1] %v421_v2  ;;  %v609_v10 = vld [vmem:[#allocation2 + $0x18] sm:$0xf] }
  0x2a   : > { %556 = vrot.lane.b32.xlu1 %v505_v17, %s5073_s15  ;;  %552 = vrot.lane.b32.xlu0 %v497_v21, %s5073_s15  ;;  %v597_v11 = vld [vmem:[#allocation2 + $0x8] sm:$0xf]  ;;  %v600_v15 = vld [vmem:[#allocation2 + $0xc] sm:$0x1]  ;;  %v603_v16 = vld [vmem:[#allocation2 + $0x10] sm:$0xf] }
  0x2b   : > { %v612_v22 = vld [vmem:[#allocation2 + $0x1c] sm:$0x1]  ;;  %v606_v23 = vld [vmem:[#allocation2 + $0x14] sm:$0x1]  ;;  %v621_v31 = vld [vmem:[#allocation2 + $0x28] sm:$0xf] }
  0x2c   : > { %4772 = vmatpush3.bf16.msra.mxu1 %v5020_v52  ;;  %v5361_v30 = vld [vmem:[#allocation2 + $0x4] sm:$0x1]  ;;  %v633_v35 = vld [vmem:[#allocation2 + $0x38] sm:$0xf]  ;;  %v627_v36 = vld [vmem:[#allocation2 + $0x30] sm:$0xf] }
  0x2d   : > { %4781 = vmatprep.subr.bf16.mxu1 %v5336_v3  ;;  %vm665_vm7 = vsmask.f32 3328  ;;  %vm666_vm8 = vsmask.f32 7440  ;;  %vm1021_vm12 = vcmask 1046532   ;;  %vm4013_vm14 = vcmask 392192  }
  0x2e   : > { %562 = vrot.lane.b32.xlu1 %v520_v32, %s5073_s15  ;;  %558 = vrot.lane.b32.xlu0 %v512_v34, %s5073_s15  ;;  %vm5429_vm9 = vmor %vm665_vm7, %vm666_vm8  ;;  %vm2312_vm15 = vcmask 1040384   ;;  %vm2314_vm0 = vcmask 254976   ;;  %vm4073_vm1 = vcmask 386048  }
  0x2f   : > { %vm5504_vm13 = vmor %vm1020_vm10, %vm1021_vm12 }
  0x32   : > { %570 = vrot.lane.b32.xlu1 %v536_v39, %s5073_s15  ;;  %566 = vrot.lane.b32.xlu0 %v528_v40, %s5073_s15 }
  0x36   : > { %2320 = vrot.lane.b32.xlu1 %v496_v8, %s5074_s20  ;;  %2316 = vrot.lane.b32.xlu0 %v5212_v59, %s5074_s20 }
  0x3a   : > { %560 = vrot.lane.b32.xlu1 %v513_v43, %s5073_s15  ;;  %2324 = vrot.lane.b32.xlu0 %v5209_v58, %s5074_s20  ;;  %v377_v58 = vadd.f32 %v5155_v7, %v362_v57 }
  0x3c   : > { %v385_v59 = vmax.f32 %v377_v58, 0.0 }
  0x3e   : > { %568 = vrot.lane.b32.xlu1 %v529_v44, %s5073_s15  ;;  %564 = vrot.lane.b32.xlu0 %v521_v45, %s5073_s15  ;;  %v4552_v7 = vpack.c.bf16 %v385_v59, %v385_v59 }
  0x40   : > { %v539_v55 = vshrl.u32 %v4552_v7, 16  ;;  %v542_v61 = vshll.u32 %v4552_v7, 16 }
  0x42   : > { %2318 = vrot.lane.b32.xlu1 %v489_v6, %s5074_s20  ;;  %572 = vrot.lane.b32.xlu0 %v537_v56, %s5073_s15  ;;  %v541_v60 = vrot.slane %v539_v55, 7  ;;  %v453_v6 = vsel %vm5167_vm6, 0, %v452_v5 }
  0x43   : > { %454 = vst [vmem:[#allocation2 + $0x44] sm:$0x1] %v453_v6 }
  0x44   : > { %v544_v62 = vor.u32 %v542_v61, %v541_v60  ;;  %v545_v8 = vrot.slane %v541_v60, 4 }
  0x46   : > { %2326 = vrot.lane.b32.xlu1 %v505_v17, %s5074_s20  ;;  %2322 = vrot.lane.b32.xlu0 %v497_v21, %s5074_s20  ;;  %v5353_v21 = vld [vmem:[#allocation2] sm:$0xf] }
  0x47   : > { %v669_v26 = vshrl.u32 %v5353_v21, 16  ;;  %v672_v27 = vshll.u32 %v5353_v21, 16 }
  0x49   : > { %v671_v37 = vrot.slane %v669_v26, 4  ;;  %v674_v38 = vrot.slane %v672_v27, 5  ;;  %v5435_v27 = vld [vmem:[#allocation2] sm:$0xe] }
  0x4a   : > { %2332 = vrot.lane.b32.xlu1 %v520_v32, %s5074_s20  ;;  %2328 = vrot.lane.b32.xlu0 %v512_v34, %s5074_s20  ;;  %v615_v32 = vld [vmem:[#allocation2 + $0x20] sm:$0xf] }
  0x4b   : > { %v675_v0 = vor.u32 %v674_v38, %v671_v37 }
  0x4e   : > { %2340 = vrot.lane.b32.xlu1 %v536_v39, %s5074_s20  ;;  %2336 = vrot.lane.b32.xlu0 %v528_v40, %s5074_s20  ;;  %v678_v39 = vshll.u32 %v5361_v30, 16 }
  0x50   : > { %v5391_v7 = vrot.slane %v678_v39, 5 }
  0x52   : > { %2334 = vrot.lane.b32.xlu1 %v521_v45, %s5074_s20  ;;  %2330 = vrot.lane.b32.xlu0 %v513_v43, %s5074_s20 }
  0x56   : > { %2342 = vrot.lane.b32.xlu1 %v537_v56, %s5074_s20  ;;  %2338 = vrot.lane.b32.xlu0 %v529_v44, %s5074_s20  ;;  %v5372_v44 = vld [vmem:[#allocation2] sm:$0xf] }
  0x57   : > { %v2433_v47 = vshrl.u32 %v5372_v44, 16  ;;  %v2436_v48 = vshll.u32 %v5372_v44, 16 }
  0x59   : > { %v5395_v60 = vrot.slane %v2433_v47, 4  ;;  %v5397_v61 = vrot.slane %v2436_v48, 5 }
  0x5a   : > { %574 = vrot.lane.b32.xlu0 %v544_v62, %s5073_s15  ;;  %2344 = vrot.lane.b32.xlu1 %v544_v62, %s5074_s20 }
  0x5e   : > { %576 = vrot.lane.b32.xlu0 %v545_v8, %s5073_s15  ;;  %2346 = vrot.lane.b32.xlu1 %v545_v8, %s5074_s20  ;;  %s6522_s15 = scalar_lea.vmem %s6615_s5, %s5150_s9  ;;  %s4236_s9 = sshll.u32 %s6782_s28, 1 }
  0x5f   : > { %s334_s21 = scalar_lea.vmem %s6617_s7, %s4236_s9  ;;  %s338_s24 = scalar_lea.vmem %s6618_s8, %s4236_s9 }
  0x94   : > { %v555_v12 = vpop.permute.xlu1 %554  ;;  %v547_v13 = vpop.permute.xlu0 %546 }
  0x95   : > { %v610_v9 = vsel %vm5143_vm5, %v555_v12, %v609_v10  ;;  %v598_v14 = vsel %vm5143_vm5, %v547_v13, %v597_v11  ;;  %v5409_v10 = vld [vmem:[#allocation2 + $0x4] sm:$0x1] }
  0x96   : > { %611 = vst [vmem:[#allocation2 + $0x18] sm:$0xf] %v610_v9  ;;  %599 = vst [vmem:[#allocation2 + $0x8] sm:$0xf] %v598_v14 }
  0x98   : > { %v549_v17 = vpop.permute.xlu1 %548  ;;  %v551_v18 = vpop.permute.xlu0 %550 }
  0x99   : > { %v601_v19 = vsel %vm5136_vm3, %v549_v17, %v600_v15  ;;  %v604_v20 = vsel %vm5143_vm5, %v551_v18, %v603_v16  ;;  %v618_v15 = vld [vmem:[#allocation2 + $0x24] sm:$0x1] }
  0x9a   : > { %602 = vst [vmem:[#allocation2 + $0xc] sm:$0x1] %v601_v19  ;;  %605 = vst [vmem:[#allocation2 + $0x10] sm:$0xf] %v604_v20 }
  0x9c   : > { %v557_v24 = vpop.permute.xlu1 %556  ;;  %v553_v25 = vpop.permute.xlu0 %552 }
  0x9d   : > { %v613_v28 = vsel %vm5136_vm3, %v557_v24, %v612_v22  ;;  %v607_v29 = vsel %vm5136_vm3, %v553_v25, %v606_v23  ;;  %v5364_v40 = vld [vmem:[#allocation2 + $0x8] sm:$0xf]  ;;  %v5374_v45 = vld [vmem:[#allocation2 + $0x18] sm:$0xf]  ;;  %v5433_v24 = vrot.slane %v675_v0, 4 }
  0x9e   : > { %614 = vst [vmem:[#allocation2 + $0x1c] sm:$0x1] %v613_v28  ;;  %608 = vst [vmem:[#allocation2 + $0x14] sm:$0x1] %v607_v29  ;;  %v5382_v50 = vld [vmem:[#allocation2 + $0x8] sm:$0xf] }
  0x9f   : > { %6661 = vst [vmem:[#allocation3_spill] sm:$0xff] %v5364_v40  ;;  %6663 = vst [vmem:[#allocation5_spill] sm:$0xff] %v5374_v45  ;;  %v683_v52 = vshrl.u32 %v5382_v50, 16  ;;  %v686_v55 = vshll.u32 %v5382_v50, 16  ;;  %v5399_v62 = vld [vmem:[#allocation2 + $0x8] sm:$0xe]  ;;  %v681_v0 = vsel %vm5429_vm9, %v5433_v24, %v5391_v7 }
  0xa0   : > { %v563_v33 = vpop.permute.xlu1 %562  ;;  %v559_v34 = vpop.permute.xlu0 %558  ;;  %v5401_v63 = vld [vmem:[#allocation2 + $0x8] sm:$0xf]  ;;  %v5437_v28 = vld [vmem:[#allocation2 + $0x18] sm:$0xe] }
  0xa1   : > { %v5366_v41 = vld [vmem:[#allocation2 + $0x10] sm:$0xf]  ;;  %v622_v42 = vsel %vm5143_vm5, %v563_v33, %v621_v31  ;;  %v616_v43 = vsel %vm5143_vm5, %v559_v34, %v615_v32  ;;  %6665 = vst [vmem:[#allocation7_spill] sm:$0xff] %v5401_v63  ;;  %v5403_v2 = vld [vmem:[#allocation2 + $0x8] sm:$0xe]  ;;  %v685_v25 = vrot.slane %v683_v52, 4 }
  0xa2   : > { %6662 = vst [vmem:[#allocation4_spill] sm:$0xff] %v5366_v41  ;;  %v5376_v46 = vld [vmem:[#allocation2 + $0x10] sm:$0xf]  ;;  %623 = vst [vmem:[#allocation2 + $0x28] sm:$0xf] %v622_v42  ;;  %v688_v26 = vrot.slane %v686_v55, 5 }
  0xa3   : > { %6664 = vst [vmem:[#allocation6_spill] sm:$0xff] %v5376_v46  ;;  %617 = vst [vmem:[#allocation2 + $0x20] sm:$0xf] %v616_v43  ;;  %v5405_v5 = vld [vmem:[#allocation2 + $0x10] sm:$0xe]  ;;  %v2442_v42 = vshll.u32 %v5409_v10, 16 }
  0xa4   : > { %v571_v54 = vpop.permute.xlu1 %570  ;;  %v567_v56 = vpop.permute.xlu0 %566  ;;  %6666 = vst [vmem:[#allocation8_spill] sm:$0xff] %v5403_v2  ;;  %v5407_v6 = vld [vmem:[#allocation2 + $0x10] sm:$0xf]  ;;  %v2364_v8 = vld [vmem:[#allocation2 + $0x8] sm:$0xf]  ;;  %v689_v52 = vor.u32 %v688_v26, %v685_v25 }
  0xa5   : > { %v634_v58 = vsel %vm5143_vm5, %v571_v54, %v633_v35  ;;  %v628_v59 = vsel %vm5143_vm5, %v567_v56, %v627_v36  ;;  %6667 = vst [vmem:[#allocation9_spill] sm:$0xff] %v5407_v6  ;;  %v5411_v11 = vld [vmem:[#allocation2 + $0x10] sm:$0xe]  ;;  %v5421_v19 = vld [vmem:[#allocation2 + $0xc] sm:$0x1]  ;;  %v5480_v26 = vrot.slane %v2442_v42, 5 }
  0xa6   : > { %635 = vst [vmem:[#allocation2 + $0x38] sm:$0xf] %v634_v58  ;;  %629 = vst [vmem:[#allocation2 + $0x30] sm:$0xf] %v628_v59  ;;  %v5413_v12 = vld [vmem:[#allocation2 + $0x10] sm:$0xf]  ;;  %v2439_v58 = vor.u32 %v5397_v61, %v5395_v60 }
  0xa7   : > { %6668 = vst [vmem:[#allocation10_spill] sm:$0xff] %v5411_v11  ;;  %6669 = vst [vmem:[#allocation11_spill] sm:$0xff] %v5413_v12  ;;  %v2370_v9 = vld [vmem:[#allocation2 + $0x10] sm:$0xf]  ;;  %v5439_v29 = vld [vmem:[#allocation2 + $0x18] sm:$0xf] }
  0xa8   : > { %v2321_v13 = vpop.permute.xlu1 %2320  ;;  %v2317_v14 = vpop.permute.xlu0 %2316  ;;  %v5415_v16 = vld [vmem:[#allocation2 + $0x10] sm:$0xe]  ;;  %v5441_v31 = vld [vmem:[#allocation2 + $0x18] sm:$0xf]  ;;  %v692_v36 = vshll.u32 %v5421_v19, 16  ;;  %v4272_v61 = vrot.slane %v5435_v27, 9 }
  0xa9   : > { %6670 = vst [vmem:[#allocation12_spill] sm:$0xff] %v5415_v16  ;;  %v2371_v17 = vsel %vm5143_vm5, %v2321_v13, %v2370_v9  ;;  %v2365_v18 = vsel %vm5143_vm5, %v2317_v14, %v2364_v8  ;;  %v5423_v20 = vld [vmem:[#allocation2 + $0x10] sm:$0xf]  ;;  %v5425_v22 = vld [vmem:[#allocation2 + $0x28] sm:$0xf]  ;;  %6674 = vst [vmem:[#allocation14_spill] sm:$0xff] %v5441_v31 }
  0xaa   : > { %6671 = vst [vmem:[#allocation13_spill] sm:$0xff] %v5425_v22  ;;  %2366 = vst [vmem:[#allocation2 + $0x8] sm:$0xf] %v2365_v18  ;;  %v5443_v32 = vld [vmem:[#allocation2 + $0x18] sm:$0xe]  ;;  %v697_v55 = vshrl.u32 %v5423_v20, 16 }
  0xab   : > { %2372 = vst [vmem:[#allocation2 + $0x10] sm:$0xf] %v2371_v17  ;;  %6675 = vst [vmem:[#allocation15_spill] sm:$0xff] %v5443_v32  ;;  %v5445_v33 = vld [vmem:[#allocation2 + $0x18] sm:$0xf]  ;;  %v700_v8 = vshll.u32 %v5423_v20, 16 }
  0xac   : > { %6676 = vst [vmem:[#allocation16_spill] sm:$0xff] %v5445_v33  ;;  %v2376_v34 = vld [vmem:[#allocation2 + $0x18] sm:$0xf]  ;;  %v5447_v35 = vld [vmem:[#allocation2 + $0x20] sm:$0xf]  ;;  %v561_v37 = vpop.permute.xlu1 %560  ;;  %v2325_v38 = vpop.permute.xlu0 %2324  ;;  %v694_v17 = vrot.slane %v692_v36, 5 }
  0xad   : > { %6677 = vst [vmem:[#allocation17_spill] sm:$0xff] %v5447_v35  ;;  %v5450_v39 = vld [vmem:[#allocation2 + $0x18] sm:$0xf]  ;;  %v619_v47 = vsel %vm5136_vm3, %v561_v37, %v618_v15  ;;  %v2377_v48 = vsel %vm5143_vm5, %v2325_v38, %v2376_v34  ;;  %v5459_v54 = vld [vmem:[#allocation2 + $0x14] sm:$0x1]  ;;  %v5486_v38 = vrot.slane %v2439_v58, 4 }
  0xae   : > { %v5453_v43 = vld [vmem:[#allocation2 + $0x18] sm:$0xe]  ;;  %v5461_v56 = vld [vmem:[#allocation2 + $0x1c] sm:$0x1]  ;;  %620 = vst [vmem:[#allocation2 + $0x24] sm:$0x1] %v619_v47 }
  0xaf   : > { %6678 = vst [vmem:[#allocation18_spill] sm:$0xff] %v5453_v43  ;;  %2378 = vst [vmem:[#allocation2 + $0x18] sm:$0xf] %v2377_v48  ;;  %v630_v13 = vld [vmem:[#allocation2 + $0x34] sm:$0x1]  ;;  %v711_v14 = vshrl.u32 %v5450_v39, 16 }
  0xb0   : > { %v624_v9 = vld [vmem:[#allocation2 + $0x2c] sm:$0x1]  ;;  %v714_v60 = vshll.u32 %v5450_v39, 16  ;;  %v5476_v15 = vld [vmem:[#allocation2] sm:$0xe]  ;;  %v706_v7 = vshll.u32 %v5459_v54, 16  ;;  %v569_v24 = vpop.permute.xlu1 %568  ;;  %v565_v25 = vpop.permute.xlu0 %564 }
  0xb1   : > { %v720_v18 = vshll.u32 %v5461_v56, 16  ;;  %v631_v34 = vsel %vm5136_vm3, %v569_v24, %v630_v13  ;;  %v625_v37 = vsel %vm5136_vm3, %v565_v25, %v624_v9  ;;  %v690_v47 = vrot.slane %v689_v52, 4  ;;  %v636_v59 = vld [vmem:[#allocation2 + $0x3c] sm:$0x1]  ;;  %v5490_v42 = vld [vmem:[#allocation2 + $0x38] sm:$0xf] }
  0xb2   : > { %v699_v36 = vrot.slane %v697_v55, 4  ;;  %v702_v48 = vrot.slane %v700_v8, 5  ;;  %632 = vst [vmem:[#allocation2 + $0x34] sm:$0x1] %v631_v34  ;;  %626 = vst [vmem:[#allocation2 + $0x2c] sm:$0x1] %v625_v37 }
  0xb3   : > { %6679 = vst [vmem:[#allocation19_spill] sm:$0xff] %v5490_v42  ;;  %v5492_v49 = vld [vmem:[#allocation2 + $0x30] sm:$0xf]  ;;  %v713_v13 = vrot.slane %v711_v14, 4  ;;  %v716_v24 = vrot.slane %v714_v60, 5  ;;  %v695_v58 = vsel %vm5429_vm9, %v690_v47, %v694_v17  ;;  %v708_v25 = vrot.slane %v706_v7, 5 }
  0xb4   : > { %6680 = vst [vmem:[#allocation20_spill] sm:$0xff] %v5492_v49  ;;  %v703_v9 = vor.u32 %v702_v48, %v699_v36  ;;  %v722_v27 = vrot.slane %v720_v18, 5  ;;  %v2367_v52 = vld [vmem:[#allocation2 + $0xc] sm:$0x1]  ;;  %v2319_v55 = vpop.permute.xlu1 %2318  ;;  %v573_v8 = vpop.permute.xlu0 %572  ;;  %v4252_v34 = vcombine.low %v681_v0, %v695_v58  ;;  %v2379_v18 = vld [vmem:[#allocation2 + $0x1c] sm:$0x1] }
  0xb5   : > { %v717_v37 = vor.u32 %v716_v24, %v713_v13  ;;  %v5496_v57 = vld [vmem:[#allocation2 + $0xc] sm:$0x1]  ;;  %v2368_v53 = vsel %vm5136_vm3, %v2319_v55, %v2367_v52  ;;  %v637_v14 = vsel %vm5136_vm3, %v573_v8, %v636_v59  ;;  %v5514_v48 = vld [vmem:[#allocation2 + $0x1c] sm:$0x1]  ;;  %v5518_v24 = vld [vmem:[#allocation2 + $0x14] sm:$0x1] }
  0xb6   : > { %6681 = vst [vmem:[#allocation21_spill] sm:$0xff] %v5496_v57  ;;  %v704_v7 = vrot.slane %v703_v9, 4  ;;  %2369 = vst [vmem:[#allocation2 + $0xc] sm:$0x1] %v2368_v53  ;;  %4665 = vmatprep.mubr.msk.bf16.mxu0 %vm809_vm11, %v4252_v34  ;;  %v5516_v13 = vld [vmem:[#allocation2 + $0x1c] sm:$0x1] }
  0xb7   : > { %638 = vst [vmem:[#allocation2 + $0x3c] sm:$0x1] %v637_v14  ;;  %v718_v59 = vrot.slane %v717_v37, 4  ;;  %6684 = vst [vmem:[#allocation22_spill] sm:$0xff] %v5514_v48  ;;  %v2373_v58 = vld [vmem:[#allocation2 + $0x14] sm:$0x1] }
  0xb8   : > { %6685 = vst [vmem:[#allocation23_spill] sm:$0xff] %v5516_v13  ;;  %6686 = vst [vmem:[#allocation24_spill] sm:$0xff] %v5518_v24  ;;  %v709_v53 = vsel %vm5429_vm9, %v704_v7, %v708_v25  ;;  %v2327_v9 = vpop.permute.xlu1 %2326  ;;  %v2323_v52 = vpop.permute.xlu0 %2322  ;;  %v5522_v55 = vld [vmem:[#allocation2 + $0x20] sm:$0xf]  ;;  %v5524_v8 = vld [vmem:[#allocation2 + $0x28] sm:$0xf] }
  0xb9   : > { %v5526_v34 = vld [vmem:[#allocation2 + $0x24] sm:$0x1]  ;;  %v6687_v37 = vrot.slane %v5361_v30, 5  ;;  %v723_v47 = vsel %vm5429_vm9, %v718_v59, %v722_v27  ;;  %v2380_v25 = vsel %vm5136_vm3, %v2327_v9, %v2379_v18  ;;  %v5538_v7 = vld [vmem:[#allocation2 + $0x14] sm:$0x1]  ;;  %v2374_v36 = vsel %vm5136_vm3, %v2323_v52, %v2373_v58  ;;  %v5551_v18 = vld [vmem:[%s6613_s3 + $0x8] sm:$0xff]  }
  0xba   : > { %6688 = vst [vmem:[#allocation25_spill] sm:$0xff] %v5538_v7  ;;  %v5542_v0 = vld [vmem:[#allocation2 + $0x2c] sm:$0x1]  ;;  %v725_v17 = vshrl.u32 %v5522_v55, 16  ;;  %v4253_v30 = vcombine.low %v709_v53, %v723_v47  ;;  %2381 = vst [vmem:[#allocation2 + $0x1c] sm:$0x1] %v2380_v25 }
  0xbb   : > { %v5532_v14 = vsel %vm5504_vm13, %v4272_v61, %v6687_v37  ;;  %2375 = vst [vmem:[#allocation2 + $0x14] sm:$0x1] %v2374_v36  ;;  %v728_v61 = vshll.u32 %v5522_v55, 16  ;;  %v734_v37 = vshll.u32 %v5526_v34, 16  ;;  %v739_v27 = vshrl.u32 %v5524_v8, 16  ;;  %v5582_v12 = vld [vmem:[%s6613_s3 + $0x20] sm:$0xff]  }
  0xbc   : > { %v5553_v59 = vld [vmem:[#allocation2 + $0x28] sm:$0xe]  ;;  %v5565_v52 = vld [vmem:[#allocation2 + $0x20] sm:$0xe]  ;;  %v727_v49 = vrot.slane %v725_v17, 4  ;;  %v742_v22 = vshll.u32 %v5524_v8, 16  ;;  %4666 = vmatmul.mubr.msk.bf16.vlgmr.msra.gmra.mrb[0].mxu0 %vm809_vm11, %v4253_v30  ;;  %v2333_v46 = vpop.permute.xlu1 %2332 }
  0xbd   : > { %v5555_v58 = vld [vmem:[#allocation2 + $0x28] sm:$0xf]  ;;  %v5567_v25 = vld [vmem:[#allocation2 + $0x20] sm:$0xf]  ;;  %v748_v35 = vshll.u32 %v5542_v0, 16  ;;  %v730_v13 = vrot.slane %v728_v61, 5  ;;  %4674 = vmatpush3.bf16.msra.mxu0 %v5319_v51 }
  0xbe   : > { %v5557_v9 = vld [vmem:[#allocation2 + $0x28] sm:$0xf]  ;;  %v5569_v43 = vld [vmem:[#allocation2 + $0x20] sm:$0xf]  ;;  %v5577_v7 = vrot.slane %v734_v37, 5  ;;  %v741_v33 = vrot.slane %v739_v27, 4  ;;  %4675 = vmatprep.subr.bf16.mxu0 %v5551_v18 }
  0xbf   : > { %6689 = vst [vmem:[#allocation26_spill] sm:$0xff] %v5557_v9  ;;  %v5559_v47 = vld [vmem:[#allocation2 + $0x28] sm:$0xe]  ;;  %6693 = vst [vmem:[#allocation30_spill] sm:$0xff] %v5569_v43  ;;  %v5571_v16 = vld [vmem:[#allocation2 + $0x20] sm:$0xe]  ;;  %v731_v11 = vor.u32 %v730_v13, %v727_v49 }
  0xc0   : > { %6690 = vst [vmem:[#allocation27_spill] sm:$0xff] %v5559_v47  ;;  %v5561_v36 = vld [vmem:[#allocation2 + $0x28] sm:$0xf]  ;;  %6694 = vst [vmem:[#allocation31_spill] sm:$0xff] %v5571_v16  ;;  %v5585_v32 = vld [vmem:[#allocation2 + $0x20] sm:$0xf] }
  0xc1   : > { %6691 = vst [vmem:[#allocation28_spill] sm:$0xff] %v5561_v36  ;;  %v5563_v53 = vld [vmem:[#allocation2 + $0x28] sm:$0xe]  ;;  %v2329_v36 = vpop.permute.xlu0 %2328  ;;  %6695 = vst [vmem:[#allocation32_spill] sm:$0xff] %v5585_v32  ;;  %v5587_v47 = vld [vmem:[#allocation2 + $0x20] sm:$0xe]  ;;  %4676 = vmatpush3.bf16.msra.mxu0 %v5551_v18 }
  0xc2   : > { %6692 = vst [vmem:[#allocation29_spill] sm:$0xff] %v5563_v53  ;;  %v2388_v42 = vld [vmem:[#allocation2 + $0x28] sm:$0xf]  ;;  %v2382_v53 = vld [vmem:[#allocation2 + $0x20] sm:$0xf]  ;;  %6696 = vst [vmem:[#allocation33_spill] sm:$0xff] %v5587_v47  ;;  %4685 = vmatprep.subr.bf16.mxu0 %v5582_v12 }
  0xc3   : > { %v2389_v30 = vsel %vm5143_vm5, %v2333_v46, %v2388_v42  ;;  %v2383_v61 = vsel %vm5143_vm5, %v2329_v36, %v2382_v53  ;;  %v744_v37 = vrot.slane %v742_v22, 5  ;;  %v750_v45 = vrot.slane %v748_v35, 5  ;;  %v2400_v27 = vld [vmem:[#allocation2 + $0x38] sm:$0xf]  ;;  %v2394_v16 = vld [vmem:[#allocation2 + $0x30] sm:$0xf] }
  0xc4   : > { %2384 = vst [vmem:[#allocation2 + $0x20] sm:$0xf] %v2383_v61  ;;  %2390 = vst [vmem:[#allocation2 + $0x28] sm:$0xf] %v2389_v30  ;;  %v5594_v17 = vld [vmem:[#allocation2 + $0x30] sm:$0xf] }
  0xc5   : > { %v5596_v32 = vld [vmem:[#allocation2 + $0x38] sm:$0xf]  ;;  %v5598_v47 = vld [vmem:[#allocation2 + $0x34] sm:$0x1]  ;;  %v6697_v51 = vrot.slane %v5409_v10, 5  ;;  %v6698_v49 = vrot.slane %v5476_v15, 9  ;;  %v745_v46 = vor.u32 %v744_v37, %v741_v33  ;;  %v2337_v41 = vpop.permute.xlu0 %2336 }
  0xc6   : > { %v5615_v42 = vld [vmem:[#allocation2 + $0x38] sm:$0xe]  ;;  %v5627_v22 = vld [vmem:[#allocation2 + $0x30] sm:$0xe]  ;;  %v5637_v2 = vld [vmem:[#allocation2 + $0x3c] sm:$0x1] }
  0xc7   : > { %v5613_v35 = vsel %vm5504_vm13, %v6698_v49, %v6697_v51  ;;  %v5617_v13 = vld [vmem:[#allocation2 + $0x38] sm:$0xf]  ;;  %v5629_v10 = vld [vmem:[#allocation2 + $0x30] sm:$0xf]  ;;  %v732_v40 = vrot.slane %v731_v11, 4  ;;  %v767_v48 = vshrl.u32 %v5596_v32, 16 }
  0xc8   : > { %6699 = vst [vmem:[#allocation34_spill] sm:$0xff] %v5613_v35  ;;  %v5619_v36 = vld [vmem:[#allocation2 + $0x38] sm:$0xf]  ;;  %v5631_v15 = vld [vmem:[#allocation2 + $0x30] sm:$0xf]  ;;  %v746_v43 = vrot.slane %v745_v46, 4 }
  0xc9   : > { %6700 = vst [vmem:[#allocation35_spill] sm:$0xff] %v5619_v36  ;;  %v5621_v53 = vld [vmem:[#allocation2 + $0x38] sm:$0xe]  ;;  %6704 = vst [vmem:[#allocation39_spill] sm:$0xff] %v5631_v15  ;;  %v5633_v51 = vld [vmem:[#allocation2 + $0x30] sm:$0xe]  ;;  %v737_v11 = vsel %vm5429_vm9, %v732_v40, %v5577_v7 }
  0xca   : > { %6701 = vst [vmem:[#allocation36_spill] sm:$0xff] %v5621_v53  ;;  %v5623_v30 = vld [vmem:[#allocation2 + $0x38] sm:$0xf]  ;;  %6705 = vst [vmem:[#allocation40_spill] sm:$0xff] %v5633_v51  ;;  %v5635_v49 = vld [vmem:[#allocation2 + $0x30] sm:$0xf] }
  0xcb   : > { %6702 = vst [vmem:[#allocation37_spill] sm:$0xff] %v5623_v30  ;;  %v5625_v61 = vld [vmem:[#allocation2 + $0x38] sm:$0xe]  ;;  %6706 = vst [vmem:[#allocation41_spill] sm:$0xff] %v5635_v49  ;;  %v753_v36 = vshrl.u32 %v5594_v17, 16  ;;  %v756_v53 = vshll.u32 %v5594_v17, 16  ;;  %v2395_v49 = vsel %vm5143_vm5, %v2337_v41, %v2394_v16  ;;  %v751_v41 = vsel %vm5429_vm9, %v746_v43, %v750_v45 }
  0xcc   : > { %6703 = vst [vmem:[#allocation38_spill] sm:$0xff] %v5625_v61  ;;  %v762_v30 = vshll.u32 %v5598_v47, 16  ;;  %v2341_v61 = vpop.permute.xlu1 %2340  ;;  %v770_v15 = vshll.u32 %v5596_v32, 16  ;;  %v776_v51 = vshll.u32 %v5637_v2, 16  ;;  %v5645_v9 = vld [vmem:[#allocation2 + $0x8] sm:$0xf]  ;;  %v4254_v40 = vcombine.low %v737_v11, %v751_v41 }
  0xcd   : > { %v5647_v33 = vld [vmem:[#allocation2 + $0x30] sm:$0xe]  ;;  %v2401_v37 = vsel %vm5143_vm5, %v2341_v61, %v2400_v27  ;;  %v755_v35 = vrot.slane %v753_v36, 4  ;;  %v5653_v31 = vld [vmem:[#allocation2 + $0xc] sm:$0x1]  ;;  %v758_v24 = vrot.slane %v756_v53, 5 }
  0xce   : > { %6707 = vst [vmem:[#allocation42_spill] sm:$0xff] %v5647_v33  ;;  %v764_v6 = vrot.slane %v762_v30, 5  ;;  %v769_v57 = vrot.slane %v767_v48, 4  ;;  %2396 = vst [vmem:[#allocation2 + $0x30] sm:$0xf] %v2395_v49  ;;  %v772_v18 = vrot.slane %v770_v15, 5  ;;  %v2331_v30 = vpop.permute.xlu0 %2330  ;;  %4669 = vmatprep.mubr.msk.bf16.mxu0 %vm809_vm11, %v4254_v40 }
  0xcf   : > { %2402 = vst [vmem:[#allocation2 + $0x38] sm:$0xf] %v2401_v37  ;;  %v5662_v16 = vld [vmem:[#allocation2 + $0x2c] sm:$0x1]  ;;  %v778_v36 = vrot.slane %v776_v51, 5  ;;  %v2447_v61 = vshrl.u32 %v5645_v9, 16  ;;  %v759_v49 = vor.u32 %v758_v24, %v755_v35 }
  0xd0   : > { %6708 = vst [vmem:[#allocation43_spill] sm:$0xff] %v5662_v16  ;;  %v5664_v27 = vld [vmem:[#allocation2 + $0x2c] sm:$0x1]  ;;  %v2335_v7 = vpop.permute.xlu1 %2334  ;;  %v5667_v53 = vld [vmem:[#allocation2 + $0x24] sm:$0x1]  ;;  %v2450_v37 = vshll.u32 %v5645_v9, 16  ;;  %v773_v51 = vor.u32 %v772_v18, %v769_v57 }
  0xd1   : > { %6709 = vst [vmem:[#allocation44_spill] sm:$0xff] %v5664_v27  ;;  %v2391_v46 = vld [vmem:[#allocation2 + $0x2c] sm:$0x1]  ;;  %6710 = vst [vmem:[#allocation45_spill] sm:$0xff] %v5667_v53  ;;  %v2385_v48 = vld [vmem:[#allocation2 + $0x24] sm:$0x1] }
  0xd2   : > { %v2456_v45 = vshll.u32 %v5653_v31, 16  ;;  %v2392_v43 = vsel %vm5136_vm3, %v2335_v7, %v2391_v46  ;;  %v5673_v33 = vld [vmem:[#allocation2 + $0x24] sm:$0x1]  ;;  %v2386_v15 = vsel %vm5136_vm3, %v2331_v30, %v2385_v48  ;;  %v2449_v11 = vrot.slane %v2447_v61, 4  ;;  %v5677_v41 = vld [vmem:[#allocation2 + $0x10] sm:$0xf] }
  0xd3   : > { %6711 = vst [vmem:[#allocation46_spill] sm:$0xff] %v5673_v33  ;;  %2393 = vst [vmem:[#allocation2 + $0x2c] sm:$0x1] %v2392_v43  ;;  %v760_v24 = vrot.slane %v759_v49, 4  ;;  %v2452_v35 = vrot.slane %v2450_v37, 5  ;;  %v6712_v7 = vrot.slane %v5421_v19, 5 }
  0xd4   : > { %2387 = vst [vmem:[#allocation2 + $0x24] sm:$0x1] %v2386_v15  ;;  %v2403_v27 = vld [vmem:[#allocation2 + $0x3c] sm:$0x1]  ;;  %v2397_v16 = vld [vmem:[#allocation2 + $0x34] sm:$0x1]  ;;  %v2339_v15 = vpop.permute.xlu0 %2338 }
  0xd5   : > { %v6713_v33 = vrot.slane %v5399_v62, 9  ;;  %v774_v18 = vrot.slane %v773_v51, 4  ;;  %v2458_v61 = vrot.slane %v2456_v45, 5  ;;  %v5690_v40 = vld [vmem:[#allocation2 + $0x3c] sm:$0x1]  ;;  %v2461_v37 = vshrl.u32 %v5677_v41, 16 }
  0xd6   : > { %6714 = vst [vmem:[#allocation47_spill] sm:$0xff] %v5690_v40  ;;  %v5692_v48 = vld [vmem:[#allocation2 + $0x3c] sm:$0x1]  ;;  %v5694_v30 = vld [vmem:[#allocation2 + $0x34] sm:$0x1]  ;;  %v4275_v19 = vrot.slane %v5437_v28, 9  ;;  %v765_v62 = vsel %vm5429_vm9, %v760_v24, %v764_v6  ;;  %v2453_v43 = vor.u32 %v2452_v35, %v2449_v11  ;;  %v2398_v6 = vsel %vm5136_vm3, %v2339_v15, %v2397_v16 }
  0xd7   : > { %v5688_v57 = vsel %vm5504_vm13, %v6713_v33, %v6712_v7  ;;  %6715 = vst [vmem:[#allocation48_spill] sm:$0xff] %v5692_v48  ;;  %6716 = vst [vmem:[#allocation49_spill] sm:$0xff] %v5694_v30  ;;  %v5696_v49 = vld [vmem:[#allocation2 + $0x14] sm:$0x1]  ;;  %v2343_v33 = vpop.permute.xlu1 %2342  ;;  %v5702_v51 = vld [vmem:[#allocation2 + $0x18] sm:$0xf]  ;;  %v779_v48 = vsel %vm5429_vm9, %v774_v18, %v778_v36 }
  0xd8   : > { %v5704_v45 = vld [vmem:[#allocation2 + $0x1c] sm:$0x1]  ;;  %v2464_v7 = vshll.u32 %v5677_v41, 16  ;;  %v2470_v46 = vshll.u32 %v5696_v49, 16  ;;  %v2404_v28 = vsel %vm5136_vm3, %v2343_v33, %v2403_v27  ;;  %v5712_v40 = vld [vmem:[#allocation2 + $0x34] sm:$0x1]  ;;  %v4255_v35 = vcombine.low %v765_v62, %v779_v48 }
  0xd9   : > { %6717 = vst [vmem:[#allocation50_spill] sm:$0xff] %v5712_v40  ;;  %v2463_v11 = vrot.slane %v2461_v37, 4  ;;  %v5716_v24 = vld [vmem:[#allocation2 + $0x20] sm:$0xf]  ;;  %v2454_v30 = vrot.slane %v2453_v43, 4  ;;  %v6718_v63 = vrot.slane %v5459_v54, 5  ;;  %v4264_v48 = vcombine.low %v5522_v55, %v5524_v8  ;;  %v575_v43 = vpop.permute.xlu0 %574 }
  0xda   : > { %2405 = vst [vmem:[#allocation2 + $0x3c] sm:$0x1] %v2404_v28  ;;  %2399 = vst [vmem:[#allocation2 + $0x34] sm:$0x1] %v2398_v6  ;;  %v2466_v53 = vrot.slane %v2464_v7, 5  ;;  %v6719_v36 = vrot.slane %v5405_v5, 9  ;;  %4670 = vmatmul.mubr.msk.bf16.gmra.mrb[4].mxu0 %vm809_vm11, %v4255_v35  ;;  %v6720_v55 = vsel %vm5429_vm9, %v5486_v38, %v5480_v26  ;;  %v6721_v6 = vcombine.low %v5353_v21, %v5382_v50 }
  0xdb   : > { %v2475_v18 = vshrl.u32 %v5702_v51, 16  ;;  %v2478_v16 = vshll.u32 %v5702_v51, 16  ;;  %v2484_v37 = vshll.u32 %v5704_v45, 16  ;;  %v639_v33 = vld [vmem:[#allocation2 + $0x40] sm:$0xf]  ;;  %v2459_v54 = vsel %vm5429_vm9, %v2454_v30, %v2458_v61 }
  0xdc   : > { %v5724_v27 = vsel %vm5504_vm13, %v6719_v36, %v6718_v63  ;;  %v2467_v5 = vor.u32 %v2466_v53, %v2463_v11  ;;  %v2472_v62 = vrot.slane %v2470_v46, 5  ;;  %v642_v63 = vld [vmem:[#allocation2 + $0x44] sm:$0x1]  ;;  %v5734_v15 = vld [vmem:[#allocation2 + $0x28] sm:$0xf]  ;;  %v2489_v7 = vshrl.u32 %v5716_v24, 16  ;;  %4677 = vmatprep.mubr.msk.bf16.mxu0 %vm809_vm11, %v6721_v6 }
  0xdd   : > { %v5737_v28 = vld [vmem:[#allocation2 + $0x30] sm:$0xf]  ;;  %v4398_v8 = vcombine.low %v6720_v55, %v2459_v54  ;;  %v2477_v53 = vrot.slane %v2475_v18, 4  ;;  %v2480_v46 = vrot.slane %v2478_v16, 5  ;;  %v2486_v61 = vrot.slane %v2484_v37, 5  ;;  %v577_v16 = vpop.permute.xlu0 %576 }
  0xde   : > { %v5748_v30 = vld [vmem:[#allocation2 + $0x24] sm:$0x1]  ;;  %v2468_v11 = vrot.slane %v2467_v5, 4  ;;  %v640_v35 = vsel %vm5143_vm5, %v575_v43, %v639_v33  ;;  %v5752_v36 = vld [vmem:[#allocation2 + $0x2c] sm:$0x1]  ;;  %v2491_v40 = vrot.slane %v2489_v7, 4  ;;  %v643_v6 = vsel %vm5136_vm3, %v577_v16, %v642_v63 }
  0xdf   : > { %6722 = vst [vmem:[#allocation51_spill] sm:$0xff] %v5748_v30  ;;  %6723 = vst [vmem:[#allocation52_spill] sm:$0xff] %v5752_v36  ;;  %v2492_v26 = vshll.u32 %v5716_v24, 16  ;;  %4773 = vmatprep.mubr.msk.bf16.mxu1 %vm809_vm11, %v4398_v8  ;;  %v2481_v38 = vor.u32 %v2480_v46, %v2477_v53  ;;  %v2498_v21 = vshll.u32 %v5748_v30, 16  ;;  %v2503_v50 = vshrl.u32 %v5734_v15, 16  ;;  %v5773_v53 = vpop.permute.xlu1 %2344  ;;  %v5024_v63 = vld [vmem:[%s6614_s4 + $0x8] sm:$0xff]  }
  0xe0   : > { %641 = vst [vmem:[#allocation2 + $0x40] sm:$0xf] %v640_v35  ;;  %v2506_v18 = vshll.u32 %v5734_v15, 16  ;;  %v2512_v54 = vshll.u32 %v5752_v36, 16  ;;  %v5760_v33 = vld [vmem:[#allocation2 + $0x38] sm:$0xf]  ;;  %v2473_v55 = vsel %vm5429_vm9, %v2468_v11, %v2472_v62 }
  0xe1   : > { %v2494_v37 = vrot.slane %v2492_v26, 5  ;;  %v2517_v5 = vshrl.u32 %v5737_v28, 16  ;;  %v6724_v43 = vrot.slane %v5461_v56, 5  ;;  %v2482_v8 = vrot.slane %v2481_v38, 4  ;;  %v5775_v35 = vld [vmem:[#allocation2 + $0x34] sm:$0x1] }
  0xe2   : > { %v2505_v46 = vrot.slane %v2503_v50, 4  ;;  %644 = vst [vmem:[#allocation2 + $0x44] sm:$0x1] %v643_v6  ;;  %v2500_v36 = vrot.slane %v2498_v21, 5  ;;  %v2508_v56 = vrot.slane %v2506_v18, 5  ;;  %v2514_v30 = vrot.slane %v2512_v54, 5 }
  0xe3   : > { %v5767_v7 = vsel %vm5504_vm13, %v4275_v19, %v6724_v43  ;;  %v2495_v26 = vor.u32 %v2494_v37, %v2491_v40  ;;  %v5025_v19 = vld [vmem:[%s6613_s3 + $0x28] sm:$0xff]   ;;  %v5780_v43 = vld [vmem:[#allocation2 + $0x3c] sm:$0x1]  ;;  %v2487_v62 = vsel %vm5429_vm9, %v2482_v8, %v2486_v61  ;;  %v2519_v11 = vrot.slane %v2517_v5, 4  ;;  %v3848_v23 = vld [vmem:[#allocation2 + $0x38] sm:$0xe] }
  0xe4   : > { %v2520_v38 = vshll.u32 %v5737_v28, 16  ;;  %v2531_v40 = vshrl.u32 %v5760_v33, 16  ;;  %v4399_v21 = vcombine.low %v2473_v55, %v2487_v62  ;;  %v6725_v50 = vcombine.low %v5423_v20, %v5450_v39  ;;  %v5804_v39 = vld [vmem:[%s6613_s3 + $0x30] sm:$0xff]  }
  0xe5   : > { %v2509_v18 = vor.u32 %v2508_v56, %v2505_v46  ;;  %v2526_v16 = vshll.u32 %v5775_v35, 16  ;;  %v2534_v61 = vshll.u32 %v5760_v33, 16  ;;  %v2496_v37 = vrot.slane %v2495_v26, 4  ;;  %v2347_v46 = vpop.permute.xlu1 %2346 }
  0xe6   : > { %4678 = vmatmul.mubr.msk.bf16.vlgmr.msra.gmra.mrb[0].mxu0 %vm809_vm11, %v6725_v50  ;;  %v2522_v54 = vrot.slane %v2520_v38, 5  ;;  %v2533_v5 = vrot.slane %v2531_v40, 4  ;;  %v2540_v8 = vshll.u32 %v5780_v43, 16  ;;  %4774 = vmatmul.mubr.msk.bf16.vlgmr.msra.gmra.mrb[0].mxu1 %vm809_vm11, %v4399_v21  ;;  %v4284_v20 = vcombine.low %v5532_v14, %v5688_v57 }
  0xe7   : > { %4681 = vmatprep.mubr.msk.bf16.mxu0 %vm809_vm11, %v4264_v48  ;;  %4686 = vmatpush3.bf16.msra.mxu0 %v5582_v12  ;;  %v4299_v48 = vcombine.low %v5439_v29, %v5567_v25  ;;  %v2501_v55 = vsel %vm5429_vm9, %v2496_v37, %v2500_v36  ;;  %v2510_v6 = vrot.slane %v2509_v18, 4  ;;  %v2536_v57 = vrot.slane %v2534_v61, 5  ;;  %v2406_v56 = vld [vmem:[#allocation2 + $0x40] sm:$0xf] }
  0xe8   : > { %4687 = vmatprep.subr.bf16.mxu0 %v5025_v19  ;;  %4782 = vmatpush3.bf16.msra.mxu1 %v5336_v3  ;;  %v2523_v14 = vor.u32 %v2522_v54, %v2519_v11  ;;  %v2789_v26 = vrot.slane %v5653_v31, 5  ;;  %v2528_v62 = vrot.slane %v2526_v16, 5  ;;  %v2542_v38 = vrot.slane %v2540_v8, 5  ;;  %v5819_v3 = vld [vmem:[%s6614_s4 + $0x20] sm:$0xff]  }
  0xe9   : > { %4783 = vmatprep.subr.bf16.mxu1 %v5024_v63  ;;  %v4285_v40 = vcombine.low %v5724_v27, %v5767_v7  ;;  %v4265_v36 = vcombine.low %v5594_v17, %v5596_v32  ;;  %v2515_v11 = vsel %vm5429_vm9, %v2510_v6, %v2514_v30  ;;  %v5825_v21 = vld [vmem:[#allocation2 + $0x44] sm:$0x1]  ;;  %v2537_v16 = vor.u32 %v2536_v57, %v2533_v5  ;;  %v5832_v54 = vld [vmem:[#allocation2 + $0x40] sm:$0xe]  ;;  %v2760_v5 = vld [vmem:[#allocation2 + $0x8] sm:$0xe] }
  0xea   : > { %v5827_v50 = vld [vmem:[#allocation2 + $0x44] sm:$0x1]  ;;  %v4408_v61 = vcombine.low %v5372_v44, %v5645_v9  ;;  %v2793_v37 = vrot.slane %v5696_v49, 5  ;;  %v5834_v8 = vld [vmem:[#allocation2 + $0x40] sm:$0xf]  ;;  %v4400_v17 = vcombine.low %v2501_v55, %v2515_v11  ;;  %v2524_v6 = vrot.slane %v2523_v14, 4 }
  0xeb   : > { %v2409_v18 = vld [vmem:[#allocation2 + $0x44] sm:$0x1]  ;;  %4688 = vmatpush3.bf16.msra.mxu0 %v5025_v19  ;;  %v5836_v32 = vld [vmem:[#allocation2 + $0x40] sm:$0xf]  ;;  %v2761_v19 = vld [vmem:[#allocation2 + $0x10] sm:$0xe] }
  0xec   : > { %v2410_v30 = vsel %vm5136_vm3, %v2347_v46, %v2409_v18  ;;  %4697 = vmatprep.subr.bf16.mxu0 %v5804_v39  ;;  %v5841_v57 = vld [vmem:[#allocation2 + $0x40] sm:$0xe]  ;;  %v2538_v44 = vrot.slane %v2537_v16, 4  ;;  %4784 = vmatpush3.bf16.msra.mxu1 %v5024_v63  ;;  %v1041_v9 = vrot.slane %v5526_v34, 5  ;;  %v4277_v49 = vrot.slane %v5553_v59, 9  ;;  %v5031_v7 = vld [vmem:[%s6614_s4 + $0x28] sm:$0xff]  }
  0xed   : > { %2411 = vst [vmem:[#allocation2 + $0x44] sm:$0x1] %v2410_v30  ;;  %v1045_v12 = vrot.slane %v5542_v0, 5  ;;  %v2797_v55 = vrot.slane %v5704_v45, 5  ;;  %v2407_v46 = vsel %vm5143_vm5, %v5773_v53, %v2406_v56  ;;  %4777 = vmatprep.mubr.msk.bf16.mxu1 %vm809_vm11, %v4400_v17  ;;  %v2529_v14 = vsel %vm5429_vm9, %v2524_v6, %v2528_v62  ;;  %v5855_v34 = vld [vmem:[#allocation2 + $0x40] sm:$0xf]  ;;  %4793 = vmatprep.subr.bf16.mxu1 %v5819_v3 }
  0xee   : > { %4682 = vmatmul.mubr.msk.bf16.gmra.mrb[4].mxu0 %vm809_vm11, %v4265_v36  ;;  %v1053_v63 = vrot.slane %v5637_v2, 5  ;;  %v2543_v0 = vsel %vm5429_vm9, %v2538_v44, %v2542_v38  ;;  %v4276_v59 = vrot.slane %v5565_v52, 9  ;;  %v4409_v45 = vcombine.low %v5677_v41, %v5702_v51  ;;  %v5871_v62 = vld [vmem:[#allocation2 + $0x40] sm:$0xf]  ;;  %v2764_v16 = vld [vmem:[#allocation2 + $0x28] sm:$0xe] }
  0xef   : > { %4689 = vmatprep.mubr.msk.bf16.mxu0 %vm809_vm11, %v4284_v20  ;;  %v1046_v4 = vsel %vm5504_vm13, %v4277_v49, %v1045_v12  ;;  %v4401_v53 = vcombine.low %v2529_v14, %v2543_v0  ;;  %v4410_v2 = vcombine.low %v5716_v24, %v5734_v15  ;;  %v4279_v56 = vrot.slane %v5615_v42, 9  ;;  %2408 = vst [vmem:[#allocation2 + $0x40] sm:$0xf] %v2407_v46  ;;  %v2762_v15 = vld [vmem:[#allocation2 + $0x18] sm:$0xe]  ;;  %v6727_v6 = vld [vmem:[#allocation51_spill] sm:$0xff] }
  0xf0   : > { %v4411_v20 = vcombine.low %v5737_v28, %v5760_v33  ;;  %v1042_v52 = vsel %vm5504_vm13, %v4276_v59, %v1041_v9  ;;  %v4419_v12 = vrot.slane %v2760_v5, 9  ;;  %v4420_v38 = vrot.slane %v2761_v19, 9  ;;  %v6728_v5 = vld [vmem:[#allocation52_spill] sm:$0xff]  ;;  %v6730_v9 = vld [vmem:[#allocation9_spill] sm:$0xff]  ;;  %v5037_v28 = vld [vmem:[%s6613_s3 + $0x48] sm:$0xff]  }
  0xf1   : > { %v4301_v36 = vcombine.low %v5617_v13, %v5855_v34  ;;  %4778 = vmatmul.mubr.msk.bf16.gmra.mrb[4].mxu1 %vm809_vm11, %v4401_v53  ;;  %v4286_v41 = vcombine.low %v1042_v52, %v1046_v4  ;;  %v4278_v51 = vrot.slane %v5627_v22, 9  ;;  %v1049_v42 = vrot.slane %v5598_v47, 5  ;;  %v2763_v22 = vld [vmem:[#allocation2 + $0x20] sm:$0xe]  ;;  %v6726_v47 = vld [vmem:[#allocation7_spill] sm:$0xff]  ;;  %v6731_v53 = vld [vmem:[#allocation24_spill] sm:$0xff] }
  0xf2   : > { %v5882_v24 = vsel %vm5504_vm13, %v4279_v56, %v1053_v63  ;;  %4785 = vmatprep.mubr.msk.bf16.mxu1 %vm809_vm11, %v4408_v61  ;;  %v5889_v11 = vsel %vm5504_vm13, %v4419_v12, %v2789_v26  ;;  %v5893_v18 = vsel %vm5504_vm13, %v4420_v38, %v2793_v37  ;;  %v1316_v17 = vshrl.u32 %v6726_v47, 16  ;;  %v5032_v61 = vld [vmem:[%s6613_s3 + $0x38] sm:$0xff]   ;;  %v6729_v26 = vld [vmem:[#allocation21_spill] sm:$0xff] }
  0xf3   : > { %v1319_v30 = vshll.u32 %v6726_v47, 16  ;;  %v2801_v31 = vrot.slane %v6727_v6, 5  ;;  %v2805_v19 = vrot.slane %v6728_v5, 5  ;;  %v1325_v44 = vshll.u32 %v6729_v26, 16  ;;  %v6733_v6 = vld [vmem:[#allocation34_spill] sm:$0xff] }
  0xf4   : > { %v1330_v49 = vshrl.u32 %v6730_v9, 16  ;;  %v4421_v37 = vrot.slane %v2762_v15, 9  ;;  %v1318_v46 = vrot.slane %v1316_v17, 4  ;;  %v1333_v63 = vshll.u32 %v6730_v9, 16 }
  0xf5   : > { %v1321_v14 = vrot.slane %v1319_v30, 5  ;;  %v4422_v0 = vrot.slane %v2763_v22, 9  ;;  %v4423_v59 = vrot.slane %v2764_v16, 9  ;;  %v1339_v56 = vshll.u32 %v6731_v53, 16 }
  0xf6   : > { %4690 = vmatmul.mubr.msk.bf16.vlgmr.msra.gmra.mrb[0].mxu0 %vm809_vm11, %v4285_v40  ;;  %v1332_v4 = vrot.slane %v1330_v49, 4  ;;  %v5914_v52 = vsel %vm5504_vm13, %v4421_v37, %v2797_v55  ;;  %v1327_v38 = vrot.slane %v1325_v44, 5  ;;  %v1335_v15 = vrot.slane %v1333_v63, 5  ;;  %v2765_v55 = vld [vmem:[#allocation2 + $0x30] sm:$0xe] }
  0xf7   : > { %4693 = vmatprep.mubr.msk.bf16.mxu0 %vm809_vm11, %v4286_v41  ;;  %4698 = vmatpush3.bf16.msra.mxu0 %v5804_v39  ;;  %v1322_v12 = vor.u32 %v1321_v14, %v1318_v46  ;;  %v1050_v27 = vsel %vm5504_vm13, %v4278_v51, %v1049_v42  ;;  %v5923_v40 = vsel %vm5504_vm13, %v4422_v0, %v2801_v31  ;;  %v6732_v41 = vld [vmem:[#allocation14_spill] sm:$0xff]  ;;  %v5933_v51 = vld [vmem:[%s6613_s3 + $0x40] sm:$0xff]   ;;  %v1341_v47 = vrot.slane %v1339_v56, 5  ;;  %v2766_v63 = vld [vmem:[#allocation2 + $0x38] sm:$0xe] }
  0xf8   : > { %4699 = vmatprep.subr.bf16.mxu0 %v5032_v61  ;;  %v5927_v39 = vsel %vm5504_vm13, %v4423_v59, %v2805_v19  ;;  %v1344_v22 = vshrl.u32 %v6732_v41, 16  ;;  %v1336_v16 = vor.u32 %v1335_v15, %v1332_v4  ;;  %v1347_v17 = vshll.u32 %v6732_v41, 16  ;;  %v6734_v19 = vld [vmem:[#allocation30_spill] sm:$0xff] }
  0xf9   : > { %v1323_v42 = vrot.slane %v1322_v12, 4  ;;  %4786 = vmatmul.mubr.msk.bf16.vlgmr.msra.gmra.mrb[0].mxu1 %vm809_vm11, %v4409_v45  ;;  %v4287_v30 = vcombine.low %v1050_v27, %v5882_v24  ;;  %v4430_v31 = vcombine.low %v6733_v6, %v5889_v11  ;;  %v4431_v5 = vcombine.low %v5893_v18, %v5914_v52  ;;  %v5952_v11 = vld [vmem:[%s6614_s4 + $0x30] sm:$0xff]   ;;  %v6735_v59 = vld [vmem:[#allocation26_spill] sm:$0xff] }
  0xfa   : > { %v1358_v44 = vshrl.u32 %v6734_v19, 16  ;;  %4794 = vmatpush3.bf16.msra.mxu1 %v5819_v3  ;;  %4789 = vmatprep.mubr.msk.bf16.mxu1 %vm809_vm11, %v4410_v2  ;;  %v4432_v9 = vcombine.low %v5923_v40, %v5927_v39  ;;  %v1337_v49 = vrot.slane %v1336_v16, 4  ;;  %v4424_v24 = vrot.slane %v2765_v55, 9  ;;  %v6736_v12 = vld [vmem:[#allocation22_spill] sm:$0xff]  ;;  %v6737_v27 = vld [vmem:[#allocation3_spill] sm:$0xff]  ;;  %v6738_v55 = vld [vmem:[#allocation4_spill] sm:$0xff] }
  0xfb   : > { %v1328_v45 = vsel %vm5429_vm9, %v1323_v42, %v1327_v38  ;;  %4795 = vmatprep.subr.bf16.mxu1 %v5031_v7  ;;  %4700 = vmatpush3.bf16.msra.mxu0 %v5032_v61  ;;  %v2809_v37 = vrot.slane %v5775_v35, 5  ;;  %v1346_v3 = vrot.slane %v1344_v22, 4  ;;  %v1349_v46 = vrot.slane %v1347_v17, 5  ;;  %v6740_v22 = vld [vmem:[#allocation45_spill] sm:$0xff]  ;;  %v6741_v17 = vld [vmem:[#allocation39_spill] sm:$0xff] }
  0xfc   : > { %v1361_v2 = vshll.u32 %v6734_v19, 16  ;;  %4709 = vmatprep.subr.bf16.mxu0 %v5933_v51  ;;  %v1342_v14 = vsel %vm5429_vm9, %v1337_v49, %v1341_v47  ;;  %v1360_v0 = vrot.slane %v1358_v44, 4  ;;  %v1372_v61 = vshrl.u32 %v6735_v59, 16  ;;  %v6055_v40 = vld [vmem:[%s6614_s4 + $0x40] sm:$0xff]  }
  0xfd   : > { %v1375_v4 = vshll.u32 %v6735_v59, 16  ;;  %v5962_v56 = vcombine.low %v1328_v45, %v1342_v14  ;;  %v2813_v35 = vrot.slane %v5780_v43, 5  ;;  %v1353_v38 = vshll.u32 %v6736_v12, 16  ;;  %v6742_v43 = vld [vmem:[#allocation43_spill] sm:$0xff] }
  0xfe   : > { %4694 = vmatmul.mubr.msk.bf16.gmra.mrb[4].mxu0 %vm809_vm11, %v4287_v30  ;;  %v1363_v15 = vrot.slane %v1361_v2, 5  ;;  %v6739_v41 = vcombine.low %v6737_v27, %v6738_v55  ;;  %4796 = vmatpush3.bf16.msra.mxu1 %v5031_v7  ;;  %v1367_v42 = vshll.u32 %v6740_v22, 16  ;;  %v1374_v16 = vrot.slane %v1372_v61, 4  ;;  %v6743_v14 = vld [vmem:[#allocation35_spill] sm:$0xff] }
  0xff   : > { %v1377_v47 = vrot.slane %v1375_v4, 5  ;;  %v1386_v6 = vshrl.u32 %v6741_v17, 16  ;;  %4805 = vmatprep.subr.bf16.mxu1 %v5952_v11  ;;  %v4425_v30 = vrot.slane %v2766_v63, 9  ;;  %v1350_v19 = vor.u32 %v1349_v46, %v1346_v3  ;;  %v6744_v3 = vld [vmem:[#allocation49_spill] sm:$0xff] }
 0x100   : > { %4701 = vmatprep.mubr.msk.bf16.mxu0 %vm809_vm11, %v6739_v41  ;;  %v1381_v44 = vshll.u32 %v6742_v43, 16  ;;  %v1389_v45 = vshll.u32 %v6741_v17, 16  ;;  %v5977_v49 = vsel %vm5504_vm13, %v4424_v24, %v2809_v37  ;;  %v1364_v2 = vor.u32 %v1363_v15, %v1360_v0  ;;  %v3059_v41 = vld [vmem:[#allocation2 + $0x8] sm:$0xf] }
 0x101   : > { %v1388_v7 = vrot.slane %v1386_v6, 4  ;;  %v1400_v59 = vshrl.u32 %v6743_v14, 16  ;;  %4790 = vmatmul.mubr.msk.bf16.gmra.mrb[4].mxu1 %vm809_vm11, %v4411_v20  ;;  %v1378_v61 = vor.u32 %v1377_v47, %v1374_v16  ;;  %v1395_v46 = vshll.u32 %v6744_v3, 16  ;;  %v6745_v6 = vld [vmem:[#allocation47_spill] sm:$0xff] }
 0x102   : > { %v1391_v63 = vrot.slane %v1389_v45, 5  ;;  %v1403_v4 = vshll.u32 %v6743_v14, 16  ;;  %4797 = vmatprep.mubr.msk.bf16.mxu1 %vm809_vm11, %v4430_v31  ;;  %v5989_v24 = vsel %vm5504_vm13, %v4425_v30, %v2813_v35  ;;  %v1355_v37 = vrot.slane %v1353_v38, 5  ;;  %v5036_v35 = vld [vmem:[%s6614_s4 + $0x38] sm:$0xff]  }
 0x103   : > { %v1369_v0 = vrot.slane %v1367_v42, 5  ;;  %v1414_v15 = vshrl.u32 %v5871_v62, 16  ;;  %v1351_v33 = vrot.slane %v1350_v19, 4  ;;  %v1383_v20 = vrot.slane %v1381_v44, 5  ;;  %v6747_v44 = vld [vmem:[#allocation8_spill] sm:$0xff] }
 0x104   : > { %v1392_v27 = vor.u32 %v1391_v63, %v1388_v7  ;;  %v1417_v55 = vshll.u32 %v5871_v62, 16  ;;  %v1365_v16 = vrot.slane %v1364_v2, 4  ;;  %v1402_v31 = vrot.slane %v1400_v59, 4 }
 0x105   : > { %v1405_v47 = vrot.slane %v1403_v4, 5  ;;  %v1416_v17 = vrot.slane %v1414_v15, 4  ;;  %v1379_v38 = vrot.slane %v1378_v61, 4  ;;  %v1397_v42 = vrot.slane %v1395_v46, 5 }
 0x106   : > { %4702 = vmatmul.mubr.msk.bf16.vlgmr.msra.gmra.mrb[0].mxu0 %vm809_vm11, %v4299_v48  ;;  %v1409_v30 = vshll.u32 %v6745_v6, 16  ;;  %v1419_v19 = vrot.slane %v1417_v55, 5  ;;  %v6746_v62 = vcombine.low %v5555_v58, %v5629_v10  ;;  %v4322_v29 = vrot.slane %v6747_v44, 9  ;;  %v6748_v48 = vld [vmem:[#allocation10_spill] sm:$0xff]  ;;  %v3061_v10 = vld [vmem:[#allocation2 + $0x10] sm:$0xf] }
 0x107   : > { %4710 = vmatpush3.bf16.msra.mxu0 %v5933_v51  ;;  %v1567_v25 = vrot.slane %v6729_v26, 5  ;;  %v4323_v45 = vrot.slane %v6748_v48, 9  ;;  %v1571_v2 = vrot.slane %v6731_v53, 5  ;;  %v1370_v7 = vsel %vm5429_vm9, %v1365_v16, %v1369_v0  ;;  %v6019_v51 = vld [vmem:[%s6613_s3 + $0x50] sm:$0xff]   ;;  %v3065_v48 = vld [vmem:[#allocation2 + $0x20] sm:$0xf] }
 0x108   : > { %4705 = vmatprep.mubr.msk.bf16.mxu0 %vm809_vm11, %v6746_v62  ;;  %4711 = vmatprep.subr.bf16.mxu0 %v5037_v28  ;;  %v1393_v14 = vrot.slane %v1392_v27, 4  ;;  %v1420_v59 = vor.u32 %v1419_v19, %v1416_v17  ;;  %v1423_v58 = vshll.u32 %v5825_v21, 16  ;;  %v1406_v61 = vor.u32 %v1405_v47, %v1402_v31  ;;  %v3063_v17 = vld [vmem:[#allocation2 + $0x18] sm:$0xf]  ;;  %v6750_v19 = vld [vmem:[#allocation27_spill] sm:$0xff] }
 0x109   : > { %v6023_v26 = vsel %vm5504_vm13, %v4322_v29, %v1567_v25  ;;  %v6027_v53 = vsel %vm5504_vm13, %v4323_v45, %v1571_v2  ;;  %v3076_v63 = vshrl.u32 %v3059_v41, 16  ;;  %4798 = vmatmul.mubr.msk.bf16.vlgmr.msra.gmra.mrb[0].mxu1 %vm809_vm11, %v4431_v5  ;;  %v1384_v46 = vsel %vm5429_vm9, %v1379_v38, %v1383_v20  ;;  %v6048_v5 = vld [vmem:[#allocation2 + $0xc] sm:$0x1]  ;;  %v6050_v20 = vld [vmem:[#allocation2 + $0x14] sm:$0x1] }
 0x10a   : > { %v1398_v4 = vsel %vm5429_vm9, %v1393_v14, %v1397_v42  ;;  %v4334_v0 = vcombine.low %v6023_v26, %v6027_v53  ;;  %v3079_v15 = vshll.u32 %v3059_v41, 16  ;;  %4806 = vmatpush3.bf16.msra.mxu1 %v5952_v11  ;;  %4801 = vmatprep.mubr.msk.bf16.mxu1 %vm809_vm11, %v4432_v9  ;;  %v4433_v18 = vcombine.low %v5977_v49, %v5989_v24  ;;  %v6749_v38 = vld [vmem:[#allocation31_spill] sm:$0xff]  ;;  %v3301_v53 = vld [vmem:[#allocation2 + $0x8] sm:$0xe] }
 0x10b   : > { %v1356_v52 = vsel %vm5429_vm9, %v1351_v33, %v1355_v37  ;;  %v3090_v27 = vshrl.u32 %v3061_v10, 16  ;;  %v3093_v55 = vshll.u32 %v3061_v10, 16  ;;  %4807 = vmatprep.subr.bf16.mxu1 %v5036_v35  ;;  %4712 = vmatpush3.bf16.msra.mxu0 %v5037_v28  ;;  %v6057_v39 = vrot.slane %v1409_v30, 5  ;;  %v5038_v44 = vld [vmem:[#allocation2 + $0x8] ss:$8 sps:$4 sm:$0xff]  }
 0x10c   : > { %v4313_v11 = vcombine.low %v1356_v52, %v1370_v7  ;;  %v6059_v9 = vrot.slane %v1420_v59, 4  ;;  %v6061_v49 = vrot.slane %v1423_v58, 5  ;;  %v4314_v24 = vcombine.low %v1384_v46, %v1398_v4  ;;  %4721 = vmatprep.subr.bf16.mxu0 %v6019_v51  ;;  %v6752_v7 = vld [vmem:[#allocation15_spill] sm:$0xff]  ;;  %v6103_v59 = vld [vmem:[#allocation2 + $0x1c] sm:$0x1] }
 0x10d   : > { %v6063_v37 = vrot.slane %v1406_v61, 4  ;;  %v3078_v33 = vrot.slane %v3076_v63, 4  ;;  %v3081_v41 = vrot.slane %v3079_v15, 5  ;;  %v3085_v28 = vshll.u32 %v6048_v5, 16  ;;  %v3067_v10 = vld [vmem:[#allocation2 + $0x28] sm:$0xf] }
 0x10e   : > { %4706 = vmatmul.mubr.msk.bf16.gmra.mrb[4].mxu0 %vm809_vm11, %v4301_v36  ;;  %v3092_v16 = vrot.slane %v3090_v27, 4  ;;  %v3095_v31 = vrot.slane %v3093_v55, 5  ;;  %v3099_v47 = vshll.u32 %v6050_v20, 16  ;;  %4808 = vmatpush3.bf16.msra.mxu1 %v5036_v35  ;;  %v4325_v42 = vrot.slane %v6749_v38, 9  ;;  %v5044_v61 = vld [vmem:[%s6613_s3 + $0x58] sm:$0xff]  }
 0x10f   : > { %4713 = vmatprep.mubr.msk.bf16.mxu0 %vm809_vm11, %v5962_v56  ;;  %v1579_v30 = vrot.slane %v6740_v22, 5  ;;  %v4326_v62 = vrot.slane %v6750_v19, 9  ;;  %v1583_v13 = vrot.slane %v6742_v43, 5  ;;  %4817 = vmatprep.subr.bf16.mxu1 %v6055_v40  ;;  %v1412_v34 = vsel %vm5429_vm9, %v6063_v37, %v6057_v39  ;;  %v6751_v56 = vld [vmem:[#allocation40_spill] sm:$0xff]  ;;  %v6111_v15 = vld [vmem:[#allocation2 + $0x24] sm:$0x1] }
 0x110   : > { %v1426_v36 = vsel %vm5429_vm9, %v6059_v9, %v6061_v49  ;;  %v4327_v35 = vrot.slane %v6751_v56, 9  ;;  %v1587_v22 = vrot.slane %v6744_v3, 5  ;;  %v3082_v29 = vor.u32 %v3081_v41, %v3078_v33  ;;  %v3069_v9 = vld [vmem:[#allocation2 + $0x30] sm:$0xf]  ;;  %v6121_v38 = vld [vmem:[#allocation2 + $0x34] sm:$0x1] }
 0x111   : > { %v6091_v43 = vsel %vm5504_vm13, %v4325_v42, %v1579_v30  ;;  %v6095_v25 = vsel %vm5504_vm13, %v4326_v62, %v1583_v13  ;;  %v3104_v45 = vshrl.u32 %v3063_v17, 16  ;;  %4802 = vmatmul.mubr.msk.bf16.gmra.mrb[4].mxu1 %vm809_vm11, %v4433_v18  ;;  %v3096_v2 = vor.u32 %v3095_v31, %v3092_v16  ;;  %v5040_v62 = vld [vmem:[#allocation2 + $0x18] ss:$8 sps:$4 sm:$0xff]   ;;  %v5041_v13 = vld [vmem:[#allocation2 + $0x28] ss:$8 sps:$4 sm:$0xff]  }
 0x112   : > { %v4324_v14 = vrot.slane %v6752_v7, 9  ;;  %v6101_v3 = vsel %vm5504_vm13, %v4327_v35, %v1587_v22  ;;  %v3107_v58 = vshll.u32 %v3063_v17, 16  ;;  %4809 = vmatprep.mubr.msk.bf16.mxu1 %vm809_vm11, %v5038_v44  ;;  %v3087_v63 = vrot.slane %v3085_v28, 5  ;;  %v6117_v17 = vld [vmem:[#allocation2 + $0x2c] sm:$0x1] }
 0x113   : > { %v3101_v46 = vrot.slane %v3099_v47, 5  ;;  %v4336_v4 = vcombine.low %v6095_v25, %v6101_v3  ;;  %v3106_v18 = vrot.slane %v3104_v45, 4  ;;  %v1575_v52 = vrot.slane %v6736_v12, 5  ;;  %v5043_v56 = vld [vmem:[%s6614_s4 + $0x48] sm:$0xff]  }
 0x114   : > { %v3109_v27 = vrot.slane %v3107_v58, 5  ;;  %v3118_v55 = vshrl.u32 %v3065_v48, 16  ;;  %v3121_v39 = vshll.u32 %v3065_v48, 16  ;;  %v3083_v49 = vrot.slane %v3082_v29, 4  ;;  %v3071_v48 = vld [vmem:[#allocation2 + $0x38] sm:$0xf] }
 0x115   : > { %v3113_v37 = vshll.u32 %v6103_v59, 16  ;;  %v3132_v33 = vshrl.u32 %v3067_v10, 16  ;;  %v3135_v41 = vshll.u32 %v3067_v10, 16  ;;  %v3097_v28 = vrot.slane %v3096_v2, 4 }
 0x116   : > { %4714 = vmatmul.mubr.msk.bf16.vlgmr.msra.gmra.mrb[0].mxu0 %vm809_vm11, %v4313_v11  ;;  %v3120_v16 = vrot.slane %v3118_v55, 4  ;;  %v3123_v31 = vrot.slane %v3121_v39, 5  ;;  %v3127_v47 = vshll.u32 %v6111_v15, 16  ;;  %v3110_v12 = vor.u32 %v3109_v27, %v3106_v18  ;;  %v6149_v18 = vld [vmem:[%s6614_s4 + $0x50] sm:$0xff]   ;;  %v3073_v39 = vld [vmem:[#allocation2 + $0x40] sm:$0xf] }
 0x117   : > { %4717 = vmatprep.mubr.msk.bf16.mxu0 %vm809_vm11, %v4314_v24  ;;  %4722 = vmatpush3.bf16.msra.mxu0 %v6019_v51  ;;  %v3134_v42 = vrot.slane %v3132_v33, 4  ;;  %v3137_v30 = vrot.slane %v3135_v41, 5  ;;  %v3146_v19 = vshrl.u32 %v3069_v9, 16  ;;  %v4315_v11 = vcombine.low %v1412_v34, %v1426_v36  ;;  %v6138_v36 = vld [vmem:[%s6613_s3 + $0x60] sm:$0xff]  }
 0x118   : > { %4723 = vmatprep.subr.bf16.mxu0 %v5044_v61  ;;  %v3102_v35 = vsel %vm5429_vm9, %v3097_v28, %v3101_v46  ;;  %v6130_v51 = vsel %vm5504_vm13, %v4324_v14, %v1575_v52  ;;  %v3149_v24 = vshll.u32 %v3069_v9, 16  ;;  %v3088_v22 = vsel %vm5429_vm9, %v3083_v49, %v3087_v63 }
 0x119   : > { %v3115_v44 = vrot.slane %v3113_v37, 5  ;;  %v3141_v29 = vshll.u32 %v6117_v17, 16  ;;  %v3148_v34 = vrot.slane %v3146_v19, 4  ;;  %4810 = vmatmul.mubr.msk.bf16.vlgmr.msra.gmra.mrb[0].mxu1 %vm809_vm11, %v5040_v62  ;;  %v4335_v45 = vcombine.low %v6130_v51, %v6091_v43  ;;  %v6753_v37 = vld [vmem:[#allocation36_spill] sm:$0xff] }
 0x11a   : > { %v3124_v2 = vor.u32 %v3123_v31, %v3120_v16  ;;  %v3151_v7 = vrot.slane %v3149_v24, 5  ;;  %v3155_v14 = vshll.u32 %v6121_v38, 16  ;;  %4818 = vmatpush3.bf16.msra.mxu1 %v6055_v40  ;;  %4813 = vmatprep.mubr.msk.bf16.mxu1 %vm809_vm11, %v5041_v13  ;;  %v4458_v58 = vcombine.low %v3088_v22, %v3102_v35  ;;  %v5045_v19 = vld [vmem:[#allocation2 + $0x38] ss:$8 sps:$4 sm:$0xff]   ;;  %v3302_v35 = vld [vmem:[#allocation2 + $0x10] sm:$0xe] }
 0x11b   : > { %v3111_v10 = vrot.slane %v3110_v12, 4  ;;  %v3129_v63 = vrot.slane %v3127_v47, 5  ;;  %v3138_v46 = vor.u32 %v3137_v30, %v3134_v42  ;;  %4819 = vmatprep.subr.bf16.mxu1 %v5043_v56  ;;  %4724 = vmatpush3.bf16.msra.mxu0 %v5044_v61  ;;  %v4329_v27 = vrot.slane %v5832_v54, 9  ;;  %v6157_v61 = vld [vmem:[#allocation2 + $0x3c] sm:$0x1] }
 0x11c   : > { %v3152_v52 = vor.u32 %v3151_v7, %v3148_v34  ;;  %v1595_v55 = vrot.slane %v5825_v21, 5  ;;  %v3160_v40 = vshrl.u32 %v3071_v48, 16  ;;  %v3143_v49 = vrot.slane %v3141_v29, 5  ;;  %4733 = vmatprep.subr.bf16.mxu0 %v6138_v36  ;;  %v6161_v21 = vld [vmem:[#allocation2 + $0x44] sm:$0x1] }
 0x11d   : > { %v3116_v9 = vsel %vm5429_vm9, %v3111_v10, %v3115_v44  ;;  %v4328_v33 = vrot.slane %v6753_v37, 9  ;;  %v3163_v41 = vshll.u32 %v3071_v48, 16  ;;  %v3125_v28 = vrot.slane %v3124_v2, 4  ;;  %v3304_v10 = vld [vmem:[#allocation2 + $0x20] sm:$0xe] }
 0x11e   : > { %4718 = vmatmul.mubr.msk.bf16.gmra.mrb[4].mxu0 %vm809_vm11, %v4315_v11  ;;  %v3157_v16 = vrot.slane %v3155_v14, 5  ;;  %v1591_v54 = vrot.slane %v6745_v6, 5  ;;  %v3162_v31 = vrot.slane %v3160_v40, 4  ;;  %4820 = vmatpush3.bf16.msra.mxu1 %v5043_v56  ;;  %v3139_v47 = vrot.slane %v3138_v46, 4  ;;  %v3303_v14 = vld [vmem:[#allocation2 + $0x18] sm:$0xe] }
 0x11f   : > { %4725 = vmatprep.mubr.msk.bf16.mxu0 %vm809_vm11, %v4334_v0  ;;  %v3165_v12 = vrot.slane %v3163_v41, 5  ;;  %v3174_v42 = vshrl.u32 %v3073_v39, 16  ;;  %v3177_v30 = vshll.u32 %v3073_v39, 16  ;;  %4829 = vmatprep.subr.bf16.mxu1 %v6149_v18  ;;  %v3130_v62 = vsel %vm5429_vm9, %v3125_v28, %v3129_v63  ;;  %v5049_v46 = vld [vmem:[%s6613_s3 + $0x68] sm:$0xff]   ;;  %v3306_v28 = vld [vmem:[#allocation2 + $0x30] sm:$0xe] }
 0x120   : > { %v3153_v6 = vrot.slane %v3152_v52, 4  ;;  %v6172_v13 = vsel %vm5504_vm13, %v4329_v27, %v1595_v55  ;;  %v3169_v26 = vshll.u32 %v6157_v61, 16  ;;  %v3183_v56 = vshll.u32 %v6161_v21, 16 }
 0x121   : > { %v3176_v0 = vrot.slane %v3174_v42, 4  ;;  %v3179_v11 = vrot.slane %v3177_v30, 5  ;;  %v3327_v24 = vrot.slane %v6048_v5, 5  ;;  %4814 = vmatmul.mubr.msk.bf16.gmra.mrb[4].mxu1 %vm809_vm11, %v5045_v19  ;;  %v6182_v44 = vsel %vm5504_vm13, %v4328_v33, %v1591_v54  ;;  %v5048_v54 = vld [vmem:[%s6614_s4 + $0x58] sm:$0xff]   ;;  %v3308_v30 = vld [vmem:[#allocation2 + $0x40] sm:$0xe] }
 0x122   : > { %v3158_v22 = vsel %vm5429_vm9, %v3153_v6, %v3157_v16  ;;  %v3166_v29 = vor.u32 %v3165_v12, %v3162_v31  ;;  %v3331_v34 = vrot.slane %v6050_v20, 5  ;;  %4821 = vmatprep.mubr.msk.bf16.mxu1 %vm809_vm11, %v4458_v58  ;;  %v4459_v48 = vcombine.low %v3116_v9, %v3130_v62  ;;  %v423_v58 = vld [vmem:[#allocation2 + $0x48] sm:$0x1]  ;;  %v6233_v31 = vld [vmem:[%s6613_s3 + $0x70] sm:$0xff]   ;;  %v6755_v12 = vld [vmem:[#allocation16_spill] sm:$0xff] }
 0x123   : > { %v3144_v2 = vsel %vm5429_vm9, %v3139_v47, %v3143_v49  ;;  %v3180_v7 = vor.u32 %v3179_v11, %v3176_v0  ;;  %v4468_v5 = vrot.slane %v3301_v53, 9  ;;  %v4337_v63 = vcombine.low %v6182_v44, %v6172_v13  ;;  %v3305_v49 = vld [vmem:[#allocation2 + $0x28] sm:$0xe]  ;;  %v6756_v53 = vld [vmem:[#allocation25_spill] sm:$0xff] }
 0x124   : > { %v3171_v52 = vrot.slane %v3169_v26, 5  ;;  %v4469_v27 = vrot.slane %v3302_v35, 9  ;;  %v3335_v20 = vrot.slane %v6103_v59, 5  ;;  %v4460_v55 = vcombine.low %v3144_v2, %v3158_v22  ;;  %v3307_v22 = vld [vmem:[#allocation2 + $0x38] sm:$0xe] }
 0x125   : > { %v3185_v39 = vrot.slane %v3183_v56, 5  ;;  %v6196_v40 = vsel %vm5504_vm13, %v4468_v5, %v3327_v24  ;;  %v3339_v9 = vrot.slane %v6111_v15, 5  ;;  %v3167_v37 = vrot.slane %v3166_v29, 4  ;;  %v6757_v56 = vld [vmem:[#allocation23_spill] sm:$0xff]  ;;  %v6758_v2 = vld [vmem:[#allocation32_spill] sm:$0xff] }
 0x126   : > { %4726 = vmatmul.mubr.msk.bf16.vlgmr.msra.gmra.mrb[0].mxu0 %vm809_vm11, %v4335_v45  ;;  %v3181_v33 = vrot.slane %v3180_v7, 4  ;;  %v6205_v59 = vsel %vm5504_vm13, %v4469_v27, %v3331_v34  ;;  %v4470_v41 = vrot.slane %v3303_v14, 9  ;;  %v4471_v15 = vrot.slane %v3304_v10, 9  ;;  %v6754_v45 = vld [vmem:[#allocation11_spill] sm:$0xff]  ;;  %v6760_v27 = vld [vmem:[#allocation6_spill] sm:$0xff] }
 0x127   : > { %4729 = vmatprep.mubr.msk.bf16.mxu0 %vm809_vm11, %v4336_v4  ;;  %4734 = vmatpush3.bf16.msra.mxu0 %v6138_v36  ;;  %v3347_v43 = vrot.slane %v6121_v38, 5  ;;  %v424_v51 = vsel %vm5136_vm3, 0, %v423_v58  ;;  %v1859_v16 = vshrl.u32 %v6754_v45, 16  ;;  %v3172_v25 = vsel %vm5429_vm9, %v3167_v37, %v3171_v52  ;;  %v6763_v37 = vld [vmem:[#allocation46_spill] sm:$0xff] }
 0x128   : > { %4735 = vmatprep.subr.bf16.mxu0 %v5049_v46  ;;  %v6223_v3 = vsel %vm5504_vm13, %v4470_v41, %v3335_v20  ;;  %v4472_v4 = vrot.slane %v3305_v49, 9  ;;  %425 = vst [vmem:[#allocation2 + $0x48] sm:$0x1] %v424_v51  ;;  %v1862_v38 = vshll.u32 %v6754_v45, 16  ;;  %v6228_v1 = vsel %vm5504_vm13, %v4471_v15, %v3339_v9  ;;  %v6761_v20 = vld [vmem:[#allocation5_spill] sm:$0xff] }
 0x129   : > { %v4473_v36 = vrot.slane %v3306_v28, 9  ;;  %v1861_v47 = vrot.slane %v1859_v16, 4  ;;  %v1873_v42 = vshrl.u32 %v6755_v12, 16  ;;  %4822 = vmatmul.mubr.msk.bf16.vlgmr.msra.gmra.mrb[0].mxu1 %vm809_vm11, %v4459_v48  ;;  %v3186_v19 = vsel %vm5429_vm9, %v3181_v33, %v3185_v39  ;;  %v6764_v15 = vld [vmem:[#allocation41_spill] sm:$0xff] }
 0x12a   : > { %v3343_v62 = vrot.slane %v6117_v17, 5  ;;  %v1864_v6 = vrot.slane %v1862_v38, 5  ;;  %v1876_v13 = vshll.u32 %v6755_v12, 16  ;;  %4830 = vmatpush3.bf16.msra.mxu1 %v6149_v18  ;;  %4825 = vmatprep.mubr.msk.bf16.mxu1 %vm809_vm11, %v4460_v55  ;;  %v1868_v0 = vshll.u32 %v6756_v53, 16  ;;  %v6252_v17 = vld [vmem:[%s6614_s4 + $0x60] sm:$0xff]  }
 0x12b   : > { %v6245_v26 = vsel %vm5504_vm13, %v4473_v36, %v3347_v43  ;;  %v1875_v11 = vrot.slane %v1873_v42, 4  ;;  %v1882_v35 = vshll.u32 %v6757_v56, 16  ;;  %4831 = vmatprep.subr.bf16.mxu1 %v5048_v54  ;;  %4736 = vmatpush3.bf16.msra.mxu0 %v5049_v46  ;;  %v4475_v44 = vrot.slane %v3308_v30, 9  ;;  %v6759_v46 = vld [vmem:[#allocation28_spill] sm:$0xff] }
 0x12c   : > { %v1865_v24 = vor.u32 %v1864_v6, %v1861_v47  ;;  %v1878_v18 = vrot.slane %v1876_v13, 5  ;;  %v3355_v29 = vrot.slane %v6161_v21, 5  ;;  %v4480_v34 = vcombine.low %v6196_v40, %v6205_v59  ;;  %4745 = vmatprep.subr.bf16.mxu0 %v6233_v31  ;;  %v6766_v47 = vld [vmem:[#allocation44_spill] sm:$0xff] }
 0x12d   : > { %v4481_v48 = vcombine.low %v6223_v3, %v6228_v1  ;;  %v1887_v7 = vshrl.u32 %v6758_v2, 16  ;;  %v1890_v5 = vshll.u32 %v6758_v2, 16  ;;  %v4461_v14 = vcombine.low %v3172_v25, %v3186_v19  ;;  %v5053_v30 = vld [vmem:[%s6613_s3 + $0x78] sm:$0xff]  }
 0x12e   : > { %4730 = vmatmul.mubr.msk.bf16.gmra.mrb[4].mxu0 %vm809_vm11, %v4337_v63  ;;  %v6265_v10 = vsel %vm5504_vm13, %v4472_v4, %v3343_v62  ;;  %v3351_v21 = vrot.slane %v6157_v61, 5  ;;  %v1901_v52 = vshrl.u32 %v6759_v46, 16  ;;  %v6762_v58 = vcombine.low %v6760_v27, %v6761_v20  ;;  %4832 = vmatpush3.bf16.msra.mxu1 %v5048_v54  ;;  %v6765_v54 = vld [vmem:[#allocation37_spill] sm:$0xff]  ;;  %v6774_v20 = vld [vmem:[#allocation48_spill] sm:$0xff] }
 0x12f   : > { %v4482_v55 = vcombine.low %v6265_v10, %v6245_v26  ;;  %v6275_v39 = vrot.slane %v1868_v0, 5  ;;  %v1879_v63 = vor.u32 %v1878_v18, %v1875_v11  ;;  %v4474_v40 = vrot.slane %v3307_v22, 9  ;;  %4841 = vmatprep.subr.bf16.mxu1 %v6252_v17  ;;  %v1856_v13 = vld [vmem:[#allocation2 + $0x48] sm:$0xf]  ;;  %v6767_v18 = vld [vmem:[#allocation17_spill] sm:$0xff]  ;;  %v6353_v26 = vld [vmem:[%s6614_s4 + $0x70] sm:$0xff]  }
 0x130   : > { %4737 = vmatprep.mubr.msk.bf16.mxu0 %vm809_vm11, %v6762_v58  ;;  %v1866_v9 = vrot.slane %v1865_v24, 4  ;;  %v1884_v49 = vrot.slane %v1882_v35, 5  ;;  %v6280_v61 = vsel %vm5504_vm13, %v4475_v44, %v3355_v29  ;;  %v1896_v33 = vshll.u32 %v6763_v37, 16  ;;  %v6768_v22 = vld [vmem:[#allocation13_spill] sm:$0xff]  ;;  %v6355_v10 = vld [vmem:[#allocation2 + $0x14] sm:$0x1] }
 0x131   : > { %v1889_v59 = vrot.slane %v1887_v7, 4  ;;  %v1892_v41 = vrot.slane %v1890_v5, 5  ;;  %v1904_v28 = vshll.u32 %v6759_v46, 16  ;;  %v1915_v43 = vshrl.u32 %v6764_v15, 16  ;;  %4826 = vmatmul.mubr.msk.bf16.gmra.mrb[4].mxu1 %vm809_vm11, %v4461_v14  ;;  %v6771_v14 = vld [vmem:[#allocation20_spill] sm:$0xff] }
 0x132   : > { %v6288_v51 = vsel %vm5504_vm13, %v4474_v40, %v3351_v21  ;;  %v1903_v45 = vrot.slane %v1901_v52, 4  ;;  %v1918_v16 = vshll.u32 %v6764_v15, 16  ;;  %v1929_v25 = vshrl.u32 %v6765_v54, 16  ;;  %4833 = vmatprep.mubr.msk.bf16.mxu1 %vm809_vm11, %v4480_v34  ;;  %v6770_v34 = vld [vmem:[#allocation50_spill] sm:$0xff]  ;;  %v6772_v21 = vld [vmem:[#allocation19_spill] sm:$0xff] }
 0x133   : > { %v1880_v4 = vrot.slane %v1879_v63, 4  ;;  %v4483_v38 = vcombine.low %v6288_v51, %v6280_v61  ;;  %v1906_v36 = vrot.slane %v1904_v28, 5  ;;  %v1910_v12 = vshll.u32 %v6766_v47, 16  ;;  %v1719_v63 = vld [vmem:[#allocation2 + $0x48] sm:$0xf] }
 0x134   : > { %v1871_v42 = vsel %vm5429_vm9, %v1866_v9, %v6275_v39  ;;  %v6302_v19 = vrot.slane %v1896_v33, 5  ;;  %v1917_v62 = vrot.slane %v1915_v43, 4  ;;  %v1920_v6 = vrot.slane %v1918_v16, 5  ;;  %v5052_v40 = vld [vmem:[%s6614_s4 + $0x68] sm:$0xff]   ;;  %v6331_v43 = vld [vmem:[%s6613_s3 + $0x80] sm:$0xff]  }
 0x135   : > { %v1885_v0 = vsel %vm5429_vm9, %v1880_v4, %v1884_v49  ;;  %v1893_v11 = vor.u32 %v1892_v41, %v1889_v59  ;;  %v1931_v35 = vrot.slane %v1929_v25, 4  ;;  %v1932_v24 = vshll.u32 %v6765_v54, 16  ;;  %v3601_v4 = vld [vmem:[#allocation2 + $0x10] sm:$0xf]  ;;  %v5060_v51 = vld [vmem:[%s6613_s3 + $0x88] sm:$0xff]  }
 0x136   : > { %v6769_v44 = vcombine.low %v6767_v18, %v6768_v22  ;;  %v1907_v29 = vor.u32 %v1906_v36, %v1903_v45  ;;  %v1924_v2 = vshll.u32 %v6770_v34, 16  ;;  %v1943_v7 = vshrl.u32 %v5836_v32, 16 }
 0x137   : > { %v1946_v5 = vshll.u32 %v5836_v32, 16  ;;  %v6773_v46 = vcombine.low %v6771_v14, %v6772_v21  ;;  %v6319_v52 = vrot.slane %v1910_v12, 5  ;;  %v1934_v27 = vrot.slane %v1932_v24, 5  ;;  %v5054_v14 = vld [vmem:[#allocation2 + $0x10] ss:$8 sps:$4 sm:$0xff]  }
 0x138   : > { %4738 = vmatmul.mubr.msk.bf16.vlgmr.msra.gmra.mrb[0].mxu0 %vm809_vm11, %v6769_v44  ;;  %v1938_v58 = vshll.u32 %v6774_v20, 16  ;;  %v1957_v39 = vshrl.u32 %v1856_v13, 16  ;;  %v1921_v32 = vor.u32 %v1920_v6, %v1917_v62  ;;  %v1945_v9 = vrot.slane %v1943_v7, 4  ;;  %v3603_v6 = vld [vmem:[#allocation2 + $0x18] sm:$0xf] }
 0x139   : > { %4741 = vmatprep.mubr.msk.bf16.mxu0 %vm809_vm11, %v6773_v46  ;;  %4746 = vmatpush3.bf16.msra.mxu0 %v6233_v31  ;;  %v1948_v49 = vrot.slane %v1946_v5, 5  ;;  %v1952_v33 = vshll.u32 %v5827_v50, 16  ;;  %v1894_v59 = vrot.slane %v1893_v11, 4  ;;  %v1935_v41 = vor.u32 %v1934_v27, %v1931_v35  ;;  %v6326_v31 = vld [vmem:[#allocation2 + $0x4c] sm:$0x1]  ;;  %v6775_v46 = vld [vmem:[#allocation12_spill] sm:$0xff] }
 0x13a   : > { %4747 = vmatprep.subr.bf16.mxu0 %v5053_v30  ;;  %v1959_v28 = vrot.slane %v1957_v39, 4  ;;  %v1960_v15 = vshll.u32 %v1856_v13, 16  ;;  %4834 = vmatmul.mubr.msk.bf16.vlgmr.msra.gmra.mrb[0].mxu1 %vm809_vm11, %v4481_v48  ;;  %v1908_v45 = vrot.slane %v1907_v29, 4  ;;  %v1926_v16 = vrot.slane %v1924_v2, 5  ;;  %v6362_v35 = vld [vmem:[#allocation2 + $0x1c] sm:$0x1] }
 0x13b   : > { %v1949_v54 = vor.u32 %v1948_v49, %v1945_v9  ;;  %v1966_v25 = vshll.u32 %v6326_v31, 16  ;;  %4842 = vmatpush3.bf16.msra.mxu1 %v6252_v17  ;;  %4837 = vmatprep.mubr.msk.bf16.mxu1 %vm809_vm11, %v4482_v55  ;;  %v4351_v36 = vcombine.low %v5834_v8, %v1719_v63  ;;  %v4362_v12 = vcombine.low %v1871_v42, %v1885_v0  ;;  %v6776_v27 = vld [vmem:[#allocation18_spill] sm:$0xff]  ;;  %v3605_v9 = vld [vmem:[#allocation2 + $0x20] sm:$0xf] }
 0x13c   : > { %v1940_v62 = vrot.slane %v1938_v58, 5  ;;  %v1962_v3 = vrot.slane %v1960_v15, 5  ;;  %4843 = vmatprep.subr.bf16.mxu1 %v5052_v40  ;;  %v1899_v1 = vsel %vm5429_vm9, %v1894_v59, %v6302_v19  ;;  %v1913_v17 = vsel %vm5429_vm9, %v1908_v45, %v6319_v52 }
 0x13d   : > { %4748 = vmatpush3.bf16.msra.mxu0 %v5053_v30  ;;  %v1922_v48 = vrot.slane %v1921_v32, 4  ;;  %v1954_v8 = vrot.slane %v1952_v33, 5  ;;  %v1936_v55 = vrot.slane %v1935_v41, 4  ;;  %v1950_v42 = vrot.slane %v1949_v54, 4  ;;  %v6777_v41 = vld [vmem:[#allocation33_spill] sm:$0xff] }
 0x13e   : > { %v1963_v30 = vor.u32 %v1962_v3, %v1959_v28  ;;  %4757 = vmatprep.subr.bf16.mxu0 %v6331_v43  ;;  %v3618_v19 = vshrl.u32 %v3601_v4, 16  ;;  %v1968_v0 = vrot.slane %v1966_v25, 5  ;;  %v2110_v11 = vrot.slane %v6756_v53, 5 }
 0x13f   : > { %v1927_v13 = vsel %vm5429_vm9, %v1922_v48, %v1926_v16  ;;  %v3621_v24 = vshll.u32 %v3601_v4, 16  ;;  %4844 = vmatpush3.bf16.msra.mxu1 %v5052_v40  ;;  %v1941_v18 = vsel %vm5429_vm9, %v1936_v55, %v1940_v62  ;;  %v2114_v44 = vrot.slane %v6757_v56, 5  ;;  %v3607_v4 = vld [vmem:[#allocation2 + $0x28] sm:$0xf]  ;;  %v5059_v62 = vld [vmem:[%s6614_s4 + $0x78] sm:$0xff]  }
 0x140   : > { %4742 = vmatmul.mubr.msk.bf16.gmra.mrb[4].mxu0 %vm809_vm11, %v4351_v36  ;;  %v1964_v22 = vrot.slane %v1963_v30, 4  ;;  %v3620_v29 = vrot.slane %v3618_v19, 4  ;;  %4853 = vmatprep.subr.bf16.mxu1 %v6353_v26  ;;  %v3627_v7 = vshll.u32 %v6355_v10, 16  ;;  %v3632_v5 = vshrl.u32 %v3603_v6, 16 }
 0x141   : > { %4749 = vmatprep.mubr.msk.bf16.mxu0 %vm809_vm11, %v4362_v12  ;;  %v3623_v2 = vrot.slane %v3621_v24, 5  ;;  %v3635_v53 = vshll.u32 %v3603_v6, 16  ;;  %v1955_v21 = vsel %vm5429_vm9, %v1950_v42, %v1954_v8  ;;  %v4372_v52 = vrot.slane %v6775_v46, 9  ;;  %v5056_v12 = vld [vmem:[#allocation2 + $0x20] ss:$8 sps:$4 sm:$0xff]  }
 0x142   : > { %v4373_v58 = vrot.slane %v6776_v27, 9  ;;  %v3641_v39 = vshll.u32 %v6362_v35, 16  ;;  %4838 = vmatmul.mubr.msk.bf16.gmra.mrb[4].mxu1 %vm809_vm11, %v4483_v38  ;;  %v1969_v56 = vsel %vm5429_vm9, %v1964_v22, %v1968_v0  ;;  %v3634_v40 = vrot.slane %v3632_v5, 4  ;;  %v6780_v42 = vld [vmem:[#allocation38_spill] sm:$0xff]  ;;  %v3611_v22 = vld [vmem:[#allocation2 + $0x38] sm:$0xf] }
 0x143   : > { %v3624_v63 = vor.u32 %v3623_v2, %v3620_v29  ;;  %v3637_v32 = vrot.slane %v3635_v53, 5  ;;  %4845 = vmatprep.mubr.msk.bf16.mxu1 %vm809_vm11, %v5054_v14  ;;  %v4363_v49 = vcombine.low %v1899_v1, %v1913_v17  ;;  %v4364_v33 = vcombine.low %v1927_v13, %v1941_v18  ;;  %v6778_v17 = vld [vmem:[#allocation29_spill] sm:$0xff]  ;;  %v3609_v13 = vld [vmem:[#allocation2 + $0x30] sm:$0xf]  ;;  %v6418_v24 = vld [vmem:[#allocation2 + $0x2c] sm:$0x1] }
 0x144   : > { %v6384_v59 = vsel %vm5504_vm13, %v4372_v52, %v2110_v11  ;;  %v6388_v61 = vsel %vm5504_vm13, %v4373_v58, %v2114_v44  ;;  %v6393_v38 = vrot.slane %v3627_v7, 5  ;;  %v4374_v28 = vrot.slane %v6777_v41, 9  ;;  %v6425_v7 = vld [vmem:[#allocation2 + $0x34] sm:$0x1]  ;;  %v6433_v58 = vld [vmem:[#allocation2 + $0x3c] sm:$0x1] }
 0x145   : > { %v2118_v15 = vrot.slane %v6763_v37, 5  ;;  %v2122_v45 = vrot.slane %v6766_v47, 5  ;;  %v4365_v16 = vcombine.low %v1955_v21, %v1969_v56  ;;  %v3638_v54 = vor.u32 %v3637_v32, %v3634_v40  ;;  %v6779_v37 = vld [vmem:[#allocation42_spill] sm:$0xff]  ;;  %v6405_v47 = vld [vmem:[#allocation2 + $0x24] sm:$0x1] }
 0x146   : > { %v2130_v25 = vrot.slane %v6774_v20, 5  ;;  %v3646_v36 = vshrl.u32 %v3605_v9, 16  ;;  %v3625_v3 = vrot.slane %v3624_v63, 4  ;;  %v3643_v1 = vrot.slane %v3641_v39, 5  ;;  %v5057_v20 = vld [vmem:[#allocation2 + $0x30] ss:$8 sps:$4 sm:$0xff]  }
 0x147   : > { %v4375_v48 = vrot.slane %v6778_v17, 9  ;;  %v4376_v8 = vrot.slane %v6779_v37, 9  ;;  %v2126_v55 = vrot.slane %v6770_v34, 5  ;;  %v4377_v30 = vrot.slane %v6780_v42, 9  ;;  %v6438_v56 = vld [vmem:[%s6614_s4 + $0x80] sm:$0xff]  }
 0x148   : > { %4750 = vmatmul.mubr.msk.bf16.vlgmr.msra.gmra.mrb[0].mxu0 %vm809_vm11, %v4363_v49  ;;  %v3648_v6 = vrot.slane %v3646_v36, 4  ;;  %v3649_v19 = vshll.u32 %v3605_v9, 16  ;;  %v3630_v0 = vsel %vm5429_vm9, %v3625_v3, %v6393_v38  ;;  %v3660_v18 = vshrl.u32 %v3607_v4, 16  ;;  %v5061_v36 = vld [vmem:[#allocation2 + $0x40] ss:$8 sps:$4 sm:$0xff]  }
 0x149   : > { %4753 = vmatprep.mubr.msk.bf16.mxu0 %vm809_vm11, %v4364_v33  ;;  %4758 = vmatpush3.bf16.msra.mxu0 %v6331_v43  ;;  %v6416_v11 = vsel %vm5504_vm13, %v4375_v48, %v2122_v45  ;;  %v3663_v43 = vshll.u32 %v3607_v4, 16  ;;  %v3639_v34 = vrot.slane %v3638_v54, 4  ;;  %v6422_v44 = vsel %vm5504_vm13, %v4377_v30, %v2130_v25  ;;  %v3613_v25 = vld [vmem:[#allocation2 + $0x40] sm:$0xf]  ;;  %v3615_v17 = vld [vmem:[#allocation2 + $0x48] sm:$0xf] }
 0x14a   : > { %4759 = vmatprep.subr.bf16.mxu0 %v5060_v51  ;;  %v3651_v29 = vrot.slane %v3649_v19, 5  ;;  %v3655_v2 = vshll.u32 %v6405_v47, 16  ;;  %4846 = vmatmul.mubr.msk.bf16.vlgmr.msra.gmra.mrb[0].mxu1 %vm809_vm11, %v5056_v12  ;;  %v3662_v5 = vrot.slane %v3660_v18, 4  ;;  %v3674_v14 = vshrl.u32 %v3609_v13, 16  ;;  %v6461_v19 = vld [vmem:[#allocation2 + $0x44] sm:$0x1] }
 0x14b   : > { %v3665_v53 = vrot.slane %v3663_v43, 5  ;;  %v3677_v21 = vshll.u32 %v3609_v13, 16  ;;  %4854 = vmatpush3.bf16.msra.mxu1 %v6353_v26  ;;  %4849 = vmatprep.mubr.msk.bf16.mxu1 %vm809_vm11, %v5057_v20  ;;  %v3644_v46 = vsel %vm5429_vm9, %v3639_v34, %v3643_v1  ;;  %v3669_v27 = vshll.u32 %v6418_v24, 16 }
 0x14c   : > { %v3652_v52 = vor.u32 %v3651_v29, %v3648_v6  ;;  %v3688_v39 = vshrl.u32 %v3611_v22, 16  ;;  %4855 = vmatprep.subr.bf16.mxu1 %v5059_v62  ;;  %v3676_v63 = vrot.slane %v3674_v14, 4  ;;  %v3683_v40 = vshll.u32 %v6425_v7, 16 }
 0x14d   : > { %4760 = vmatpush3.bf16.msra.mxu0 %v5060_v51  ;;  %v3679_v26 = vrot.slane %v3677_v21, 5  ;;  %v3691_v32 = vshll.u32 %v3611_v22, 16  ;;  %v4384_v9 = vcombine.low %v6384_v59, %v6388_v61  ;;  %v2119_v49 = vsel %vm5504_vm13, %v4374_v28, %v2118_v15  ;;  %v2091_v15 = vld [vmem:[#allocation2 + $0x48] sm:$0xe]  ;;  %v6464_v22 = vld [vmem:[#allocation2 + $0x4c] sm:$0x1] }
 0x14e   : > { %v3666_v33 = vor.u32 %v3665_v53, %v3662_v5  ;;  %v3690_v38 = vrot.slane %v3688_v39, 4  ;;  %v2127_v51 = vsel %vm5504_vm13, %v4376_v8, %v2126_v55  ;;  %v3657_v41 = vrot.slane %v3655_v2, 5  ;;  %v3843_v39 = vld [vmem:[#allocation2 + $0x10] sm:$0xe] }
 0x14f   : > { %v3693_v45 = vrot.slane %v3691_v32, 5  ;;  %v3697_v54 = vshll.u32 %v6433_v58, 16  ;;  %4856 = vmatpush3.bf16.msra.mxu1 %v5059_v62  ;;  %v4508_v4 = vcombine.low %v3630_v0, %v3644_v46  ;;  %v4385_v59 = vcombine.low %v2119_v49, %v6416_v11 }
 0x150   : > { %4754 = vmatmul.mubr.msk.bf16.gmra.mrb[4].mxu0 %vm809_vm11, %v4365_v16  ;;  %v4386_v61 = vcombine.low %v2127_v51, %v6422_v44  ;;  %v3671_v28 = vrot.slane %v3669_v27, 5  ;;  %4865 = vmatprep.subr.bf16.mxu1 %v6438_v56  ;;  %v3653_v16 = vrot.slane %v3652_v52, 4  ;;  %v3680_v12 = vor.u32 %v3679_v26, %v3676_v63  ;;  %v5063_v52 = vld [vmem:[%s6614_s4 + $0x88] sm:$0xff]  }
 0x151   : > { %4761 = vmatprep.mubr.msk.bf16.mxu0 %vm809_vm11, %v4384_v9  ;;  %v3685_v3 = vrot.slane %v3683_v40, 5  ;;  %v3694_v1 = vor.u32 %v3693_v45, %v3690_v38  ;;  %v3667_v48 = vrot.slane %v3666_v33, 4  ;;  %v4378_v37 = vrot.slane %v5841_v57, 9  ;;  %v3844_v9 = vld [vmem:[#allocation2 + $0x18] sm:$0xe] }
 0x152   : > { %v3702_v8 = vshrl.u32 %v3613_v25, 16  ;;  %v3705_v62 = vshll.u32 %v3613_v25, 16  ;;  %4850 = vmatmul.mubr.msk.bf16.gmra.mrb[4].mxu1 %vm809_vm11, %v5061_v36  ;;  %v3658_v20 = vsel %vm5429_vm9, %v3653_v16, %v3657_v41  ;;  %v3699_v55 = vrot.slane %v3697_v54, 5  ;;  %v3847_v36 = vld [vmem:[#allocation2 + $0x30] sm:$0xe] }
 0x153   : > { %v2134_v42 = vrot.slane %v5827_v50, 5  ;;  %v4379_v30 = vrot.slane %v2091_v15, 9  ;;  %4857 = vmatprep.mubr.msk.bf16.mxu1 %vm809_vm11, %v4508_v4  ;;  %v3672_v6 = vsel %vm5429_vm9, %v3667_v48, %v3671_v28  ;;  %v3716_v0 = vshrl.u32 %v3615_v17, 16  ;;  %v3845_v4 = vld [vmem:[#allocation2 + $0x20] sm:$0xe] }
 0x154   : > { %v3704_v13 = vrot.slane %v3702_v8, 4  ;;  %v3707_v57 = vrot.slane %v3705_v62, 5  ;;  %v3681_v11 = vrot.slane %v3680_v12, 4  ;;  %v3695_v18 = vrot.slane %v3694_v1, 4 }
 0x155   : > { %v2138_v43 = vrot.slane %v6326_v31, 5  ;;  %v3719_v34 = vshll.u32 %v3615_v17, 16  ;;  %v3711_v50 = vshll.u32 %v6461_v19, 16  ;;  %v3718_v29 = vrot.slane %v3716_v0, 4 }
 0x156   : > { %v3708_v44 = vor.u32 %v3707_v57, %v3704_v13  ;;  %v3725_v2 = vshll.u32 %v6464_v22, 16  ;;  %v3686_v5 = vsel %vm5429_vm9, %v3681_v11, %v3685_v3  ;;  %v3700_v53 = vsel %vm5429_vm9, %v3695_v18, %v3699_v55 }
 0x157   : > { %v3721_v14 = vrot.slane %v3719_v34, 5  ;;  %v4509_v31 = vcombine.low %v3658_v20, %v3672_v6  ;;  %v2135_v21 = vsel %vm5504_vm13, %v4378_v37, %v2134_v42  ;;  %v2139_v46 = vsel %vm5504_vm13, %v4379_v30, %v2138_v43 }
 0x158   : > { %4762 = vmatmul.mubr.msk.bf16.vlgmr.msra.gmra.mrb[0].mxu0 %vm809_vm11, %v4385_v59  ;;  %v4510_v63 = vcombine.low %v3686_v5, %v3700_v53  ;;  %v3709_v26 = vrot.slane %v3708_v44, 4  ;;  %v3713_v40 = vrot.slane %v3711_v50, 5  ;;  %v3727_v32 = vrot.slane %v3725_v2, 5  ;;  %v3846_v59 = vld [vmem:[#allocation2 + $0x28] sm:$0xe] }
 0x159   : > { %4765 = vmatprep.mubr.msk.bf16.mxu0 %vm809_vm11, %v4386_v61  ;;  %v3722_v27 = vor.u32 %v3721_v14, %v3718_v29  ;;  %v3869_v33 = vrot.slane %v6355_v10, 5  ;;  %v3873_v38 = vrot.slane %v6362_v35, 5  ;;  %v4387_v51 = vcombine.low %v2135_v21, %v2139_v46 }
 0x15a   : > { %4858 = vmatmul.mubr.msk.bf16.vlgmr.msra.gmra.mrb[0].mxu1 %vm809_vm11, %v4509_v31  ;;  %v4518_v41 = vrot.slane %v3843_v39, 9  ;;  %v4519_v45 = vrot.slane %v3844_v9, 9  ;;  %v3714_v54 = vsel %vm5429_vm9, %v3709_v26, %v3713_v40  ;;  %v3877_v28 = vrot.slane %v6405_v47, 5 }
 0x15b   : > { %v3723_v49 = vrot.slane %v3722_v27, 4  ;;  %4866 = vmatpush3.bf16.msra.mxu1 %v6438_v56  ;;  %4861 = vmatprep.mubr.msk.bf16.mxu1 %vm809_vm11, %v4510_v63  ;;  %v3881_v15 = vrot.slane %v6418_v24, 5  ;;  %v3885_v16 = vrot.slane %v6425_v7, 5  ;;  %v3889_v12 = vrot.slane %v6433_v58, 5  ;;  %v3849_v24 = vld [vmem:[#allocation2 + $0x40] sm:$0xe] }
 0x15c   : > { %4867 = vmatprep.subr.bf16.mxu1 %v5063_v52  ;;  %v3870_v10 = vsel %vm5504_vm13, %v4518_v41, %v3869_v33  ;;  %v3874_v35 = vsel %vm5504_vm13, %v4519_v45, %v3873_v38  ;;  %v4520_v3 = vrot.slane %v3845_v4, 9  ;;  %v4521_v1 = vrot.slane %v3846_v59, 9  ;;  %v3850_v58 = vld [vmem:[#allocation2 + $0x48] sm:$0xe] }
 0x15d   : > { %v3728_v25 = vsel %vm5429_vm9, %v3723_v49, %v3727_v32  ;;  %v4530_v61 = vcombine.low %v3870_v10, %v3874_v35  ;;  %v4522_v17 = vrot.slane %v3847_v36, 9  ;;  %v4523_v48 = vrot.slane %v3848_v23, 9 }
 0x15e   : > { %v4511_v56 = vcombine.low %v3714_v54, %v3728_v25  ;;  %v3878_v37 = vsel %vm5504_vm13, %v4520_v3, %v3877_v28  ;;  %v3882_v47 = vsel %vm5504_vm13, %v4521_v1, %v3881_v15  ;;  %v4524_v20 = vrot.slane %v3849_v24, 9 }
 0x15f   : > { %4868 = vmatpush3.bf16.msra.mxu1 %v5063_v52  ;;  %v3886_v8 = vsel %vm5504_vm13, %v4522_v17, %v3885_v16  ;;  %v3890_v7 = vsel %vm5504_vm13, %v4523_v48, %v3889_v12  ;;  %v4531_v62 = vcombine.low %v3878_v37, %v3882_v47  ;;  %v3893_v42 = vrot.slane %v6461_v19, 5 }
 0x160   : > { %4766 = vmatmul.mubr.msk.bf16.gmra.mrb[4].mxu0 %vm809_vm11, %v4387_v51  ;;  %v4532_v55 = vcombine.low %v3886_v8, %v3890_v7  ;;  %v4525_v30 = vrot.slane %v3850_v58, 9  ;;  %v3897_v6 = vrot.slane %v6464_v22, 5 }
 0x161   : > { %v3894_v13 = vsel %vm5504_vm13, %v4524_v20, %v3893_v42 }
 0x162   : > { %4862 = vmatmul.mubr.msk.bf16.gmra.mrb[4].mxu1 %vm809_vm11, %v4511_v56  ;;  %v3898_v57 = vsel %vm5504_vm13, %v4525_v30, %v3897_v6 }
 0x163   : > { %4869 = vmatprep.mubr.msk.bf16.mxu1 %vm809_vm11, %v4530_v61  ;;  %v4533_v0 = vcombine.low %v3894_v13, %v3898_v57 }
 0x16a   : > { %4870 = vmatmul.mubr.msk.bf16.vlgmr.msra.gmra.mrb[0].mxu1 %vm809_vm11, %v4531_v62 }
 0x16b   : > { %4873 = vmatprep.mubr.msk.bf16.mxu1 %vm809_vm11, %v4532_v55 }
 0x172   : > { %4874 = vmatmul.mubr.msk.bf16.gmra.mrb[4].mxu1 %vm809_vm11, %v4533_v0 }
 0x22b   : > { %v4763_v19 = vpop.f32.mrb[0].mxu0 }
 0x22c   : > { %2256 = vst.msk [vmem:[%s6522_s15 + $0x10] sm:$0xff] %vm809_vm11, %v4763_v19  ;;  %v2215_v11 = vpop.f32.mrb[1].mxu0  ;;  %v2285_v22 = vmul.f32 %v4763_v19, %v4763_v19  ;;  %v2265_v2 = vsel %vm809_vm11, %v4763_v19, 0.0 }
 0x22d   : > { %2254 = vst.msk [vmem:[%s6522_s15] sm:$0xff] %vm809_vm11, %v2215_v11  ;;  %v2283_v60 = vmul.f32 %v2215_v11, %v2215_v11  ;;  %v4764_v18 = vpop.f32.mrb[2].mxu0  ;;  %v2262_v34 = vsel %vm809_vm11, %v2215_v11, 0.0 }
 0x22e   : > { %2257 = vst.msk [vmem:[%s6522_s15 + $0x18] sm:$0xff] %vm809_vm11, %v4764_v18  ;;  %v2218_v43 = vpop.f32.mrb[3].mxu0  ;;  %v2286_v53 = vmul.f32 %v4764_v18, %v4764_v18  ;;  %v2294_v46 = vsel %vm809_vm11, %v2285_v22, 0.0  ;;  %v2267_v52 = vsel %vm809_vm11, %v4764_v18, 0.0 }
 0x22f   : > { %2255 = vst.msk [vmem:[%s6522_s15 + $0x8] sm:$0xff] %vm809_vm11, %v2218_v43  ;;  %v2263_v44 = vsel %vm809_vm11, %v2218_v43, 0.0  ;;  %v2284_v50 = vmul.f32 %v2218_v43, %v2218_v43  ;;  %v2291_v5 = vsel %vm809_vm11, %v2283_v60, 0.0 }
 0x230   : > { %v2264_v29 = vadd.f32 %v2263_v44, %v2262_v34  ;;  %v2296_v40 = vsel %vm809_vm11, %v2286_v53, 0.0 }
 0x231   : > { %v2292_v14 = vsel %vm809_vm11, %v2284_v50, 0.0 }
 0x232   : > { %v2266_v31 = vadd.f32 %v2265_v2, %v2264_v29  ;;  %v2293_v21 = vadd.f32 %v2292_v14, %v2291_v5 }
 0x233   : > { %v4767_v27 = vpop.f32.mrb[4].mxu0 }
 0x234   : > { %v2295_v39 = vadd.f32 %v2294_v46, %v2293_v21  ;;  %2260 = vst.msk [vmem:[%s6522_s15 + $0x30] sm:$0xff] %vm809_vm11, %v4767_v27  ;;  %v2231_v63 = vpop.f32.mrb[5].mxu0  ;;  %v2268_v26 = vadd.f32 %v2267_v52, %v2266_v31  ;;  %v2289_v41 = vmul.f32 %v4767_v27, %v4767_v27  ;;  %v2273_v56 = vsel %vm809_vm11, %v4767_v27, 0.0 }
 0x235   : > { %2258 = vst.msk [vmem:[%s6522_s15 + $0x20] sm:$0xff] %vm809_vm11, %v2231_v63  ;;  %v2269_v32 = vsel %vm809_vm11, %v2231_v63, 0.0  ;;  %v2287_v9 = vmul.f32 %v2231_v63, %v2231_v63  ;;  %v4768_v49 = vpop.f32.mrb[6].mxu0 }
 0x236   : > { %v2270_v33 = vadd.f32 %v2269_v32, %v2268_v26  ;;  %v2297_v38 = vadd.f32 %v2296_v40, %v2295_v39  ;;  %2261 = vst.msk [vmem:[%s6522_s15 + $0x38] sm:$0xff] %vm809_vm11, %v4768_v49  ;;  %v2234_v51 = vpop.f32.mrb[7].mxu0  ;;  %v2290_v4 = vmul.f32 %v4768_v49, %v4768_v49  ;;  %v2302_v15 = vsel %vm809_vm11, %v2289_v41, 0.0 }
 0x237   : > { %v2298_v45 = vsel %vm809_vm11, %v2287_v9, 0.0  ;;  %2259 = vst.msk [vmem:[%s6522_s15 + $0x28] sm:$0xff] %vm809_vm11, %v2234_v51  ;;  %v2271_v54 = vsel %vm809_vm11, %v2234_v51, 0.0  ;;  %v2288_v25 = vmul.f32 %v2234_v51, %v2234_v51  ;;  %v2275_v36 = vsel %vm809_vm11, %v4768_v49, 0.0 }
 0x238   : > { %v2299_v10 = vadd.f32 %v2298_v45, %v2297_v38  ;;  %v2272_v35 = vadd.f32 %v2271_v54, %v2270_v33  ;;  %v2304_v12 = vsel %vm809_vm11, %v2290_v4, 0.0 }
 0x239   : > { %v2300_v59 = vsel %vm809_vm11, %v2288_v25, 0.0 }
 0x23a   : > { %v2274_v61 = vadd.f32 %v2273_v56, %v2272_v35  ;;  %v2301_v28 = vadd.f32 %v2300_v59, %v2299_v10 }
 0x23c   : > { %v2276_v23 = vadd.f32 %v2275_v36, %v2274_v61  ;;  %v2303_v16 = vadd.f32 %v2302_v15, %v2301_v28 }
 0x23d   : > { %v4871_v17 = vpop.f32.mrb[0].mxu1 }
 0x23e   : > { %v2277_v3 = vrot.slane %v2276_v23, 4  ;;  %v2305_v1 = vadd.f32 %v2304_v12, %v2303_v16  ;;  %4016 = vst.msk [vmem:[%s6560_s18 + $0x10] sm:$0xff] %vm4013_vm14, %v4871_v17  ;;  %v3974_v47 = vpop.f32.mrb[1].mxu1  ;;  %v4045_v20 = vmul.f32 %v4871_v17, %v4871_v17  ;;  %v4025_v0 = vsel %vm4013_vm14, %v4871_v17, 0.0 }
 0x23f   : > { %4014 = vst.msk [vmem:[%s6560_s18] sm:$0xff] %vm4013_vm14, %v3974_v47  ;;  %v4043_v24 = vmul.f32 %v3974_v47, %v3974_v47  ;;  %v4872_v8 = vpop.f32.mrb[2].mxu1  ;;  %v4022_v55 = vsel %vm4013_vm14, %v3974_v47, 0.0 }
 0x240   : > { %v2278_v48 = vadd.f32 %v2277_v3, %v2276_v23  ;;  %v2306_v37 = vrot.slane %v2305_v1, 4  ;;  %4017 = vst.msk [vmem:[%s6560_s18 + $0x18] sm:$0xff] %vm4013_vm14, %v4872_v8  ;;  %v3977_v62 = vpop.f32.mrb[3].mxu1  ;;  %v4046_v11 = vmul.f32 %v4872_v8, %v4872_v8  ;;  %v4054_v44 = vsel %vm4013_vm14, %v4045_v20, 0.0 }
 0x241   : > { %4015 = vst.msk [vmem:[%s6560_s18 + $0x8] sm:$0xff] %vm4013_vm14, %v3977_v62  ;;  %v4023_v42 = vsel %vm4013_vm14, %v3977_v62, 0.0  ;;  %v4044_v30 = vmul.f32 %v3977_v62, %v3977_v62  ;;  %v4051_v19 = vsel %vm4013_vm14, %v4043_v24, 0.0  ;;  %v4027_v2 = vsel %vm4013_vm14, %v4872_v8, 0.0 }
 0x242   : > { %v2279_v7 = vrot.slane %v2278_v48, 2  ;;  %v2307_v58 = vadd.f32 %v2306_v37, %v2305_v1  ;;  %v4024_v57 = vadd.f32 %v4023_v42, %v4022_v55  ;;  %v4056_v14 = vsel %vm4013_vm14, %v4046_v11, 0.0 }
 0x243   : > { %v4052_v60 = vsel %vm4013_vm14, %v4044_v30, 0.0 }
 0x244   : > { %v2280_v6 = vadd.f32 %v2279_v7, %v2278_v48  ;;  %v2308_v13 = vrot.slane %v2307_v58, 2  ;;  %v4026_v22 = vadd.f32 %v4025_v0, %v4024_v57  ;;  %v4053_v34 = vadd.f32 %v4052_v60, %v4051_v19 }
 0x245   : > { %v4875_v50 = vpop.f32.mrb[4].mxu1 }
 0x246   : > { %v2281_v18 = vrot.slane %v2280_v6, 1  ;;  %v2309_v43 = vadd.f32 %v2308_v13, %v2307_v58  ;;  %v4055_v5 = vadd.f32 %v4054_v44, %v4053_v34  ;;  %4020 = vst.msk [vmem:[%s6560_s18 + $0x30] sm:$0xff] %vm4013_vm14, %v4875_v50  ;;  %v3990_v53 = vpop.f32.mrb[5].mxu1  ;;  %v4028_v31 = vadd.f32 %v4027_v2, %v4026_v22 }
 0x247   : > { %4018 = vst.msk [vmem:[%s6560_s18 + $0x20] sm:$0xff] %vm4013_vm14, %v3990_v53  ;;  %v4029_v21 = vsel %vm4013_vm14, %v3990_v53, 0.0  ;;  %v4047_v46 = vmul.f32 %v3990_v53, %v3990_v53  ;;  %v4876_v52 = vpop.f32.mrb[6].mxu1  ;;  %v4049_v33 = vmul.f32 %v4875_v50, %v4875_v50  ;;  %v4033_v45 = vsel %vm4013_vm14, %v4875_v50, 0.0 }
 0x248   : > { %v2310_v29 = vrot.slane %v2309_v43, 1  ;;  %v2282_v27 = vadd.f32 %v2281_v18, %v2280_v6  ;;  %v4057_v63 = vadd.f32 %v4056_v14, %v4055_v5  ;;  %4021 = vst.msk [vmem:[%s6560_s18 + $0x38] sm:$0xff] %vm4013_vm14, %v4876_v52  ;;  %v3993_v26 = vpop.f32.mrb[7].mxu1  ;;  %v4030_v40 = vadd.f32 %v4029_v21, %v4028_v31 }
 0x249   : > { %v4058_v32 = vsel %vm4013_vm14, %v4047_v46, 0.0  ;;  %4019 = vst.msk [vmem:[%s6560_s18 + $0x28] sm:$0xff] %vm4013_vm14, %v3993_v26  ;;  %v4031_v9 = vsel %vm4013_vm14, %v3993_v26, 0.0  ;;  %v4048_v51 = vmul.f32 %v3993_v26, %v3993_v26  ;;  %v4050_v54 = vmul.f32 %v4876_v52, %v4876_v52 }
 0x24a   : > { %v2311_v39 = vadd.f32 %v2310_v29, %v2309_v43  ;;  %v4059_v38 = vadd.f32 %v4058_v32, %v4057_v63  ;;  %v4032_v41 = vadd.f32 %v4031_v9, %v4030_v40  ;;  %v4062_v56 = vsel %vm4013_vm14, %v4049_v33, 0.0 }
 0x24b   : > { %v4060_v25 = vsel %vm4013_vm14, %v4048_v51, 0.0  ;;  %v4035_v4 = vsel %vm4013_vm14, %v4876_v52, 0.0  ;;  %v4064_v28 = vsel %vm4013_vm14, %v4050_v54, 0.0 }
 0x24c   : > { %v2313_v49 = vsel %vm2312_vm15, %v2282_v27, %v2311_v39  ;;  %v4034_v10 = vadd.f32 %v4033_v45, %v4032_v41  ;;  %v4061_v35 = vadd.f32 %v4060_v25, %v4059_v38 }
 0x24d   : > { %2315 = vst.msk [vmem:[%s334_s21] sm:$0x3] %vm2314_vm0, %v2313_v49 }
 0x24e   : > { %v4036_v59 = vadd.f32 %v4035_v4, %v4034_v10  ;;  %v4063_v61 = vadd.f32 %v4062_v56, %v4061_v35 }
 0x250   : > { %v4037_v15 = vrot.slane %v4036_v59, 4  ;;  %v4065_v36 = vadd.f32 %v4064_v28, %v4063_v61 }
 0x252   : > { %v4038_v23 = vadd.f32 %v4037_v15, %v4036_v59  ;;  %v4066_v16 = vrot.slane %v4065_v36, 4 }
 0x254   : > { %v4039_v12 = vrot.slane %v4038_v23, 2  ;;  %v4067_v3 = vadd.f32 %v4066_v16, %v4065_v36 }
 0x256   : > { %v4040_v1 = vadd.f32 %v4039_v12, %v4038_v23  ;;  %v4068_v17 = vrot.slane %v4067_v3, 2 }
 0x258   : > { %v4041_v48 = vrot.slane %v4040_v1, 1  ;;  %v4069_v37 = vadd.f32 %v4068_v17, %v4067_v3 }
 0x25a   : > { %v4070_v47 = vrot.slane %v4069_v37, 1  ;;  %v4042_v24 = vadd.f32 %v4041_v48, %v4040_v1 }
 0x25c   : > { %v4071_v8 = vadd.f32 %v4070_v47, %v4069_v37 }
 0x25e   : > { %v4072_v7 = vsel %vm2312_vm15, %v4042_v24, %v4071_v8 }
 0x25f   : > { %4074 = vst.msk [vmem:[%s338_s24] sm:$0x3] %vm4073_vm1, %v4072_v7 }
 0x260 PF: > { %s19_s27 = sadd.s32 1, %s5070_s27  }
 0x261   : > { %p16_p4 = scmp.ge.s32.totalorder %s19_s27, 4  }
 0x263   :  { %18 = sbr.rel (!%p16_p4) target bundleno = 1 (0x1), region = 125 }

</bundles_post_ra>
